<compile_context>
chip_gen: v7x
topology: tpu7x:2x2x1
jax: 0.10.0
libtpu: 0.0.40
codegen_flags: <defaults>
</compile_context>

<pallas_src>
import math

import jax
import jax.numpy as jnp
import numpy as np
from jax.experimental import pallas as pl
from jax.experimental.pallas import tpu as pltpu

# ---- configuration (module defaults, small synthetic input_size / batch / seq) ----
INPUT_SIZE = 16
D_MODEL = 128
NHEAD = 8
HEAD_DIM = D_MODEL // NHEAD
DIM_FF = 512
NUM_LAYERS = 3
SEQ = 8
BATCH = 2
LN_EPS = 1e-5
NEG_INF = -1e30


def _layernorm(x, g, b):
    mu = jnp.mean(x, axis=-1, keepdims=True)
    xc = x - mu
    var = jnp.mean(xc * xc, axis=-1, keepdims=True)
    return xc * jax.lax.rsqrt(var + LN_EPS) * g + b


def _make_kernel(num_layers, nhead):
    def kernel(x_ref, bias_ref, w0_ref, b0_ref,
               inw_ref, inb_ref, outw_ref, outb_ref,
               w1_ref, b1_ref, w2_ref, b2_ref,
               ln1g_ref, ln1b_ref, ln2g_ref, ln2b_ref,
               decw_ref, decb_ref, o_ref):
        x = x_ref[...]                                   # (B*S, input_size)
        # pos_encoder: Linear + ReLU; batch*seq rows go through the MXU together.
        h = jnp.dot(x, w0_ref[...], preferred_element_type=jnp.float32) + b0_ref[...]
        h = jnp.maximum(h, 0.0)                          # (BS, D)
        bs = h.shape[0]
        d_model = h.shape[-1]
        hd = d_model // nhead
        scale = 1.0 / math.sqrt(hd)
        bias = bias_ref[...]                             # (BS, BS) block-diagonal mask (0 / -1e30)

        for l in range(num_layers):                      # static, unrolled
            # ---- multi-head self attention (all heads + all batch rows at once) ----
            qkv = jnp.dot(h, inw_ref[l], preferred_element_type=jnp.float32) + inb_ref[l]
            qh = jnp.stack([qkv[:, hh * hd:(hh + 1) * hd]
                            for hh in range(nhead)], axis=0)                    # (H, BS, hd)
            kh = jnp.stack([qkv[:, d_model + hh * hd: d_model + (hh + 1) * hd]
                            for hh in range(nhead)], axis=0)                    # (H, BS, hd)
            vh = jnp.stack([qkv[:, 2 * d_model + hh * hd: 2 * d_model + (hh + 1) * hd]
                            for hh in range(nhead)], axis=0)                    # (H, BS, hd)

            s = jnp.einsum('hqd,hkd->hqk', qh, kh,
                           preferred_element_type=jnp.float32) * scale + bias   # (H, BS, BS)
            m = jnp.max(s, axis=-1, keepdims=True)
            e = jnp.exp(s - m)
            p = e / jnp.sum(e, axis=-1, keepdims=True)                          # masked rows -> 0
            ctx = jnp.einsum('hqk,hkd->hqd', p, vh,
                             preferred_element_type=jnp.float32)                # (H, BS, hd)
            ctx2 = jnp.concatenate([ctx[hh] for hh in range(nhead)], axis=-1)   # (BS, D)

            attn = jnp.dot(ctx2, outw_ref[l],
                           preferred_element_type=jnp.float32) + outb_ref[l]
            # post-norm residual (TransformerEncoderLayer default norm_first=False)
            h = _layernorm(h + attn, ln1g_ref[l], ln1b_ref[l])

            # ---- feed forward (Linear -> ReLU -> Linear) ----
            ff = jnp.dot(h, w1_ref[l], preferred_element_type=jnp.float32) + b1_ref[l]
            ff = jnp.maximum(ff, 0.0)
            ff = jnp.dot(ff, w2_ref[l], preferred_element_type=jnp.float32) + b2_ref[l]
            h = _layernorm(h + ff, ln2g_ref[l], ln2b_ref[l])

        # decoder Linear(d_model, 1) on the VPU: broadcast-multiply + lane reduce
        dec = jnp.sum(h * decw_ref[...], axis=-1)        # (BS,)
        o_ref[...] = dec.reshape(1, bs) + decb_ref[...]  # lane-dense (1, BS) output

    return kernel


def init_params(key):
    ks = jax.random.split(key, 10)

    def w(kk, shape, scale=0.05):
        return scale * jax.random.normal(kk, shape, dtype=jnp.float32)

    # weights stored pre-transposed as (in_features, out_features)
    w0 = w(ks[0], (INPUT_SIZE, D_MODEL))
    b0 = jnp.zeros((1, D_MODEL), jnp.float32)
    inw = w(ks[1], (NUM_LAYERS, D_MODEL, 3 * D_MODEL))
    inb = w(ks[2], (NUM_LAYERS, 1, 3 * D_MODEL), 0.01)
    outw = w(ks[3], (NUM_LAYERS, D_MODEL, D_MODEL))
    outb = w(ks[4], (NUM_LAYERS, 1, D_MODEL), 0.01)
    w1 = w(ks[5], (NUM_LAYERS, D_MODEL, DIM_FF))
    b1 = w(ks[6], (NUM_LAYERS, 1, DIM_FF), 0.01)
    w2 = w(ks[7], (NUM_LAYERS, DIM_FF, D_MODEL))
    b2 = w(ks[8], (NUM_LAYERS, 1, D_MODEL), 0.01)
    ln1g = jnp.ones((NUM_LAYERS, 1, D_MODEL), jnp.float32)
    ln1b = jnp.zeros((NUM_LAYERS, 1, D_MODEL), jnp.float32)
    ln2g = jnp.ones((NUM_LAYERS, 1, D_MODEL), jnp.float32)
    ln2b = jnp.zeros((NUM_LAYERS, 1, D_MODEL), jnp.float32)
    decw = w(ks[9], (D_MODEL, 1))
    decb = jnp.zeros((1, 1), jnp.float32)
    return (w0, b0, inw, inb, outw, outb, w1, b1, w2, b2,
            ln1g, ln1b, ln2g, ln2b, decw, decb)


def transformer_forward(src, params):
    """src: (seq, batch, input_size) like PyTorch. Returns (seq, batch, 1)."""
    S, B, F = src.shape
    BS = B * S
    # fold (batch, seq) into the matmul M dimension; rows are batch-major
    x = jnp.transpose(src, (1, 0, 2)).reshape(BS, F).astype(jnp.float32)   # (BS, F)

    # block-diagonal additive attention bias keeping batch elements independent
    blk = np.arange(BS) // S
    bias = jnp.asarray(np.where(blk[:, None] == blk[None, :], 0.0, NEG_INF),
                       dtype=jnp.float32)                                  # (BS, BS)

    (w0, b0, inw, inb, outw, outb, w1, b1, w2, b2,
     ln1g, ln1b, ln2g, ln2b, decw, decb) = params
    decw_row = jnp.reshape(decw, (1, D_MODEL))           # (1, D) row for VPU reduce
    weight_args = [w0, b0, inw, inb, outw, outb, w1, b1, w2, b2,
                   ln1g, ln1b, ln2g, ln2b, decw_row, decb]

    kernel = _make_kernel(NUM_LAYERS, NHEAD)

    def full_spec(a):
        nd = a.ndim
        return pl.BlockSpec(a.shape, lambda i, nd=nd: (0,) * nd)

    in_specs = [full_spec(x), full_spec(bias)] + [full_spec(a) for a in weight_args]
    out_spec = pl.BlockSpec((1, BS), lambda i: (0, 0))

    out = pl.pallas_call(
        kernel,
        out_shape=jax.ShapeDtypeStruct((1, BS), jnp.float32),
        grid_spec=pltpu.PrefetchScalarGridSpec(
            num_scalar_prefetch=0,
            grid=(1,),                       # single fused invocation (batch folded into M)
            in_specs=in_specs,
            out_specs=out_spec,
        ),
        compiler_params=pltpu.CompilerParams(
            dimension_semantics=("arbitrary",)),
    )(x, bias, *weight_args)

    out = out.reshape(B, S)                               # (B, S)
    return jnp.transpose(out, (1, 0))[:, :, None]         # (S, B, 1)


def reference_forward(src, params):
    """Pure-JAX reference matching PyTorch eval-mode semantics."""
    (w0, b0, inw, inb, outw, outb, w1, b1, w2, b2,
     ln1g, ln1b, ln2g, ln2b, decw, decb) = params
    x = jnp.transpose(src, (1, 0, 2)).astype(jnp.float32)       # (B, S, F)
    h = jax.nn.relu(x @ w0 + b0)
    hd = D_MODEL // NHEAD
    scale = 1.0 / math.sqrt(hd)
    Bsz, S, _ = h.shape
    for l in range(NUM_LAYERS):
        qkv = h @ inw[l] + inb[l]
        q, k, v = jnp.split(qkv, 3, axis=-1)
        qh = q.reshape(Bsz, S, NHEAD, hd).transpose(0, 2, 1, 3)
        kh = k.reshape(Bsz, S, NHEAD, hd).transpose(0, 2, 1, 3)
        vh = v.reshape(Bsz, S, NHEAD, hd).transpose(0, 2, 1, 3)
        s = jnp.einsum('bhqd,bhkd->bhqk', qh, kh) * scale
        p = jax.nn.softmax(s, axis=-1)
        ctx = jnp.einsum('bhqk,bhkd->bhqd', p, vh).transpose(0, 2, 1, 3)
        ctx = ctx.reshape(Bsz, S, D_MODEL)
        attn = ctx @ outw[l] + outb[l]
        h = _layernorm(h + attn, ln1g[l], ln1b[l])
        ff = jax.nn.relu(h @ w1[l] + b1[l]) @ w2[l] + b2[l]
        h = _layernorm(h + ff, ln2g[l], ln2b[l])
    out = h @ decw + decb
    return jnp.transpose(out, (1, 0, 2))


if __name__ == "__main__":
    key = jax.random.PRNGKey(0)
    pkey, xkey = jax.random.split(key)
    params = init_params(pkey)
    src = jax.random.normal(xkey, (SEQ, BATCH, INPUT_SIZE), dtype=jnp.float32)

    out = transformer_forward(src, params)
    out = jax.block_until_ready(out)
    assert out.shape == (SEQ, BATCH, 1)

    ref = reference_forward(src, params)
    np.testing.assert_allclose(np.asarray(out), np.asarray(ref),
                               rtol=2e-4, atol=2e-4)
    print("KERNEL_OK")
</pallas_src>

<mosaic_0001>
module attributes {stable_mosaic.version = 11 : i64} {
  func.func @kernel(%arg0: i32, %arg1: memref<16x16xf32, #tpu.memory_space<vmem>>, %arg2: memref<16x16xf32, #tpu.memory_space<vmem>>, %arg3: memref<16x128xf32, #tpu.memory_space<vmem>>, %arg4: memref<1x128xf32, #tpu.memory_space<vmem>>, %arg5: memref<3x128x384xf32, #tpu.memory_space<vmem>>, %arg6: memref<3x1x384xf32, #tpu.memory_space<vmem>>, %arg7: memref<3x128x128xf32, #tpu.memory_space<vmem>>, %arg8: memref<3x1x128xf32, #tpu.memory_space<vmem>>, %arg9: memref<3x128x512xf32, #tpu.memory_space<vmem>>, %arg10: memref<3x1x512xf32, #tpu.memory_space<vmem>>, %arg11: memref<3x512x128xf32, #tpu.memory_space<vmem>>, %arg12: memref<3x1x128xf32, #tpu.memory_space<vmem>>, %arg13: memref<3x1x128xf32, #tpu.memory_space<vmem>>, %arg14: memref<3x1x128xf32, #tpu.memory_space<vmem>>, %arg15: memref<3x1x128xf32, #tpu.memory_space<vmem>>, %arg16: memref<3x1x128xf32, #tpu.memory_space<vmem>>, %arg17: memref<1x128xf32, #tpu.memory_space<vmem>>, %arg18: memref<1x1xf32, #tpu.memory_space<vmem>>, %arg19: memref<1x16xf32, #tpu.memory_space<vmem>>) attributes {dimension_semantics = [#tpu.dimension_semantics<arbitrary>], iteration_bounds = array<i64: 1>, scalar_prefetch = 0 : i64, scratch_operands = 0 : i64, tpu.core_type = #tpu.core_type<tc>, window_params = [{pipeline_mode = #tpu.pipeline_mode<synchronous>, transform_indices = @transform_0, window_bounds = array<i64: 16, 16>}, {pipeline_mode = #tpu.pipeline_mode<synchronous>, transform_indices = @transform_1, window_bounds = array<i64: 16, 16>}, {pipeline_mode = #tpu.pipeline_mode<synchronous>, transform_indices = @transform_2, window_bounds = array<i64: 16, 128>}, {pipeline_mode = #tpu.pipeline_mode<synchronous>, transform_indices = @transform_3, window_bounds = array<i64: 1, 128>}, {pipeline_mode = #tpu.pipeline_mode<synchronous>, transform_indices = @transform_4, window_bounds = array<i64: 3, 128, 384>}, {pipeline_mode = #tpu.pipeline_mode<synchronous>, transform_indices = @transform_5, window_bounds = array<i64: 3, 1, 384>}, {pipeline_mode = #tpu.pipeline_mode<synchronous>, transform_indices = @transform_6, window_bounds = array<i64: 3, 128, 128>}, {pipeline_mode = #tpu.pipeline_mode<synchronous>, transform_indices = @transform_7, window_bounds = array<i64: 3, 1, 128>}, {pipeline_mode = #tpu.pipeline_mode<synchronous>, transform_indices = @transform_8, window_bounds = array<i64: 3, 128, 512>}, {pipeline_mode = #tpu.pipeline_mode<synchronous>, transform_indices = @transform_9, window_bounds = array<i64: 3, 1, 512>}, {pipeline_mode = #tpu.pipeline_mode<synchronous>, transform_indices = @transform_10, window_bounds = array<i64: 3, 512, 128>}, {pipeline_mode = #tpu.pipeline_mode<synchronous>, transform_indices = @transform_11, window_bounds = array<i64: 3, 1, 128>}, {pipeline_mode = #tpu.pipeline_mode<synchronous>, transform_indices = @transform_12, window_bounds = array<i64: 3, 1, 128>}, {pipeline_mode = #tpu.pipeline_mode<synchronous>, transform_indices = @transform_13, window_bounds = array<i64: 3, 1, 128>}, {pipeline_mode = #tpu.pipeline_mode<synchronous>, transform_indices = @transform_14, window_bounds = array<i64: 3, 1, 128>}, {pipeline_mode = #tpu.pipeline_mode<synchronous>, transform_indices = @transform_15, window_bounds = array<i64: 3, 1, 128>}, {pipeline_mode = #tpu.pipeline_mode<synchronous>, transform_indices = @transform_16, window_bounds = array<i64: 1, 128>}, {pipeline_mode = #tpu.pipeline_mode<synchronous>, transform_indices = @transform_17, window_bounds = array<i64: 1, 1>}, {pipeline_mode = #tpu.pipeline_mode<synchronous>, transform_indices = @transform_18, window_bounds = array<i64: 1, 16>}]} {
    %c0 = arith.constant 0 : index
    %c0_0 = arith.constant 0 : index
    %0 = vector.load %arg1[%c0, %c0_0] : memref<16x16xf32, #tpu.memory_space<vmem>>, vector<16x16xf32>
    %c0_1 = arith.constant 0 : index
    %c0_2 = arith.constant 0 : index
    %1 = vector.load %arg3[%c0_1, %c0_2] : memref<16x128xf32, #tpu.memory_space<vmem>>, vector<16x128xf32>
    %cst = arith.constant dense<0.000000e+00> : vector<16x128xf32>
    %2 = tpu.matmul %0, %1, %cst {dimension_numbers = #tpu.dot_dimension_numbers<[1], [0], [0], [1], [0, 0, 1, 1], [], []>} : vector<16x16xf32>, vector<16x128xf32>, vector<16x128xf32> -> vector<16x128xf32>
    %c0_3 = arith.constant 0 : index
    %c0_4 = arith.constant 0 : index
    %3 = vector.load %arg4[%c0_3, %c0_4] : memref<1x128xf32, #tpu.memory_space<vmem>>, vector<1x128xf32>
    %4 = vector.broadcast %3 : vector<1x128xf32> to vector<16x128xf32>
    %5 = arith.addf %2, %4 : vector<16x128xf32>
    %cst_5 = arith.constant 0.000000e+00 : f32
    %6 = vector.broadcast %cst_5 : f32 to vector<16x128xf32>
    %7 = arith.maximumf %5, %6 : vector<16x128xf32>
    %c0_6 = arith.constant 0 : index
    %c0_7 = arith.constant 0 : index
    %8 = vector.load %arg2[%c0_6, %c0_7] : memref<16x16xf32, #tpu.memory_space<vmem>>, vector<16x16xf32>
    %c0_8 = arith.constant 0 : index
    %c0_9 = arith.constant 0 : index
    %c0_10 = arith.constant 0 : index
    %9 = vector.load %arg5[%c0_8, %c0_9, %c0_10] : memref<3x128x384xf32, #tpu.memory_space<vmem>>, vector<1x128x384xf32>
    %10 = vector.shape_cast %9 : vector<1x128x384xf32> to vector<128x384xf32>
    %cst_11 = arith.constant dense<0.000000e+00> : vector<16x384xf32>
    %11 = tpu.matmul %7, %10, %cst_11 {dimension_numbers = #tpu.dot_dimension_numbers<[1], [0], [0], [1], [0, 0, 1, 1], [], []>} : vector<16x128xf32>, vector<128x384xf32>, vector<16x384xf32> -> vector<16x384xf32>
    %c0_12 = arith.constant 0 : index
    %c0_13 = arith.constant 0 : index
    %c0_14 = arith.constant 0 : index
    %12 = vector.load %arg6[%c0_12, %c0_13, %c0_14] : memref<3x1x384xf32, #tpu.memory_space<vmem>>, vector<1x1x384xf32>
    %13 = vector.shape_cast %12 : vector<1x1x384xf32> to vector<1x384xf32>
    %14 = vector.broadcast %13 : vector<1x384xf32> to vector<16x384xf32>
    %15 = arith.addf %11, %14 : vector<16x384xf32>
    %16 = vector.extract_strided_slice %15 {offsets = [0, 0], sizes = [16, 16], strides = [1, 1]} : vector<16x384xf32> to vector<16x16xf32>
    %17 = vector.extract_strided_slice %15 {offsets = [0, 16], sizes = [16, 16], strides = [1, 1]} : vector<16x384xf32> to vector<16x16xf32>
    %18 = vector.extract_strided_slice %15 {offsets = [0, 32], sizes = [16, 16], strides = [1, 1]} : vector<16x384xf32> to vector<16x16xf32>
    %19 = vector.extract_strided_slice %15 {offsets = [0, 48], sizes = [16, 16], strides = [1, 1]} : vector<16x384xf32> to vector<16x16xf32>
    %20 = vector.extract_strided_slice %15 {offsets = [0, 64], sizes = [16, 16], strides = [1, 1]} : vector<16x384xf32> to vector<16x16xf32>
    %21 = vector.extract_strided_slice %15 {offsets = [0, 80], sizes = [16, 16], strides = [1, 1]} : vector<16x384xf32> to vector<16x16xf32>
    %22 = vector.extract_strided_slice %15 {offsets = [0, 96], sizes = [16, 16], strides = [1, 1]} : vector<16x384xf32> to vector<16x16xf32>
    %23 = vector.extract_strided_slice %15 {offsets = [0, 112], sizes = [16, 16], strides = [1, 1]} : vector<16x384xf32> to vector<16x16xf32>
    %24 = vector.shape_cast %16 : vector<16x16xf32> to vector<1x16x16xf32>
    %25 = vector.shape_cast %17 : vector<16x16xf32> to vector<1x16x16xf32>
    %26 = vector.shape_cast %18 : vector<16x16xf32> to vector<1x16x16xf32>
    %27 = vector.shape_cast %19 : vector<16x16xf32> to vector<1x16x16xf32>
    %28 = vector.shape_cast %20 : vector<16x16xf32> to vector<1x16x16xf32>
    %29 = vector.shape_cast %21 : vector<16x16xf32> to vector<1x16x16xf32>
    %30 = vector.shape_cast %22 : vector<16x16xf32> to vector<1x16x16xf32>
    %31 = vector.shape_cast %23 : vector<16x16xf32> to vector<1x16x16xf32>
    %32 = tpu.concatenate %24, %25, %26, %27, %28, %29, %30, %31 in 0 : vector<1x16x16xf32>, vector<1x16x16xf32>, vector<1x16x16xf32>, vector<1x16x16xf32>, vector<1x16x16xf32>, vector<1x16x16xf32>, vector<1x16x16xf32>, vector<1x16x16xf32> -> vector<8x16x16xf32>
    %33 = vector.extract_strided_slice %15 {offsets = [0, 128], sizes = [16, 16], strides = [1, 1]} : vector<16x384xf32> to vector<16x16xf32>
    %34 = vector.extract_strided_slice %15 {offsets = [0, 144], sizes = [16, 16], strides = [1, 1]} : vector<16x384xf32> to vector<16x16xf32>
    %35 = vector.extract_strided_slice %15 {offsets = [0, 160], sizes = [16, 16], strides = [1, 1]} : vector<16x384xf32> to vector<16x16xf32>
    %36 = vector.extract_strided_slice %15 {offsets = [0, 176], sizes = [16, 16], strides = [1, 1]} : vector<16x384xf32> to vector<16x16xf32>
    %37 = vector.extract_strided_slice %15 {offsets = [0, 192], sizes = [16, 16], strides = [1, 1]} : vector<16x384xf32> to vector<16x16xf32>
    %38 = vector.extract_strided_slice %15 {offsets = [0, 208], sizes = [16, 16], strides = [1, 1]} : vector<16x384xf32> to vector<16x16xf32>
    %39 = vector.extract_strided_slice %15 {offsets = [0, 224], sizes = [16, 16], strides = [1, 1]} : vector<16x384xf32> to vector<16x16xf32>
    %40 = vector.extract_strided_slice %15 {offsets = [0, 240], sizes = [16, 16], strides = [1, 1]} : vector<16x384xf32> to vector<16x16xf32>
    %41 = vector.shape_cast %33 : vector<16x16xf32> to vector<1x16x16xf32>
    %42 = vector.shape_cast %34 : vector<16x16xf32> to vector<1x16x16xf32>
    %43 = vector.shape_cast %35 : vector<16x16xf32> to vector<1x16x16xf32>
    %44 = vector.shape_cast %36 : vector<16x16xf32> to vector<1x16x16xf32>
    %45 = vector.shape_cast %37 : vector<16x16xf32> to vector<1x16x16xf32>
    %46 = vector.shape_cast %38 : vector<16x16xf32> to vector<1x16x16xf32>
    %47 = vector.shape_cast %39 : vector<16x16xf32> to vector<1x16x16xf32>
    %48 = vector.shape_cast %40 : vector<16x16xf32> to vector<1x16x16xf32>
    %49 = tpu.concatenate %41, %42, %43, %44, %45, %46, %47, %48 in 0 : vector<1x16x16xf32>, vector<1x16x16xf32>, vector<1x16x16xf32>, vector<1x16x16xf32>, vector<1x16x16xf32>, vector<1x16x16xf32>, vector<1x16x16xf32>, vector<1x16x16xf32> -> vector<8x16x16xf32>
    %50 = vector.extract_strided_slice %15 {offsets = [0, 256], sizes = [16, 16], strides = [1, 1]} : vector<16x384xf32> to vector<16x16xf32>
    %51 = vector.extract_strided_slice %15 {offsets = [0, 272], sizes = [16, 16], strides = [1, 1]} : vector<16x384xf32> to vector<16x16xf32>
    %52 = vector.extract_strided_slice %15 {offsets = [0, 288], sizes = [16, 16], strides = [1, 1]} : vector<16x384xf32> to vector<16x16xf32>
    %53 = vector.extract_strided_slice %15 {offsets = [0, 304], sizes = [16, 16], strides = [1, 1]} : vector<16x384xf32> to vector<16x16xf32>
    %54 = vector.extract_strided_slice %15 {offsets = [0, 320], sizes = [16, 16], strides = [1, 1]} : vector<16x384xf32> to vector<16x16xf32>
    %55 = vector.extract_strided_slice %15 {offsets = [0, 336], sizes = [16, 16], strides = [1, 1]} : vector<16x384xf32> to vector<16x16xf32>
    %56 = vector.extract_strided_slice %15 {offsets = [0, 352], sizes = [16, 16], strides = [1, 1]} : vector<16x384xf32> to vector<16x16xf32>
    %57 = vector.extract_strided_slice %15 {offsets = [0, 368], sizes = [16, 16], strides = [1, 1]} : vector<16x384xf32> to vector<16x16xf32>
    %58 = vector.shape_cast %50 : vector<16x16xf32> to vector<1x16x16xf32>
    %59 = vector.shape_cast %51 : vector<16x16xf32> to vector<1x16x16xf32>
    %60 = vector.shape_cast %52 : vector<16x16xf32> to vector<1x16x16xf32>
    %61 = vector.shape_cast %53 : vector<16x16xf32> to vector<1x16x16xf32>
    %62 = vector.shape_cast %54 : vector<16x16xf32> to vector<1x16x16xf32>
    %63 = vector.shape_cast %55 : vector<16x16xf32> to vector<1x16x16xf32>
    %64 = vector.shape_cast %56 : vector<16x16xf32> to vector<1x16x16xf32>
    %65 = vector.shape_cast %57 : vector<16x16xf32> to vector<1x16x16xf32>
    %66 = tpu.concatenate %58, %59, %60, %61, %62, %63, %64, %65 in 0 : vector<1x16x16xf32>, vector<1x16x16xf32>, vector<1x16x16xf32>, vector<1x16x16xf32>, vector<1x16x16xf32>, vector<1x16x16xf32>, vector<1x16x16xf32>, vector<1x16x16xf32> -> vector<8x16x16xf32>
    "tpu.trace_start"() <{level = 10 : i32, message = "hqd,hkd->hqk"}> : () -> ()
    %cst_15 = arith.constant dense<0.000000e+00> : vector<8x16x16xf32>
    %67 = tpu.matmul %32, %49, %cst_15 {dimension_numbers = #tpu.dot_dimension_numbers<[2], [2], [1], [1], [0, 0, 0, 1, 1, 1], [0], [0]>} : vector<8x16x16xf32>, vector<8x16x16xf32>, vector<8x16x16xf32> -> vector<8x16x16xf32>
    "tpu.trace_stop"() : () -> ()
    %cst_16 = arith.constant 2.500000e-01 : f32
    %68 = vector.broadcast %cst_16 : f32 to vector<8x16x16xf32>
    %69 = arith.mulf %67, %68 : vector<8x16x16xf32>
    %70 = vector.shape_cast %8 : vector<16x16xf32> to vector<1x16x16xf32>
    %71 = vector.broadcast %70 : vector<1x16x16xf32> to vector<8x16x16xf32>
    %72 = arith.addf %69, %71 : vector<8x16x16xf32>
    %cst_17 = arith.constant dense<0xFF800000> : vector<8x16xf32>
    %73 = vector.multi_reduction <maximumf>, %72, %cst_17 [2] : vector<8x16x16xf32> to vector<8x16xf32>
    %74 = vector.shape_cast %73 : vector<8x16xf32> to vector<8x16x1xf32>
    %75 = vector.broadcast %74 : vector<8x16x1xf32> to vector<8x16x16xf32>
    %76 = arith.subf %72, %75 : vector<8x16x16xf32>
    %77 = math.exp %76 : vector<8x16x16xf32>
    %cst_18 = arith.constant dense<0.000000e+00> : vector<8x16xf32>
    %78 = vector.multi_reduction <add>, %77, %cst_18 [2] : vector<8x16x16xf32> to vector<8x16xf32>
    %79 = vector.shape_cast %78 : vector<8x16xf32> to vector<8x16x1xf32>
    %80 = vector.broadcast %79 : vector<8x16x1xf32> to vector<8x16x16xf32>
    %81 = arith.divf %77, %80 : vector<8x16x16xf32>
    "tpu.trace_start"() <{level = 10 : i32, message = "hqk,hkd->hqd"}> : () -> ()
    %cst_19 = arith.constant dense<0.000000e+00> : vector<8x16x16xf32>
    %82 = tpu.matmul %81, %66, %cst_19 {dimension_numbers = #tpu.dot_dimension_numbers<[2], [1], [1], [2], [0, 0, 0, 1, 1, 2], [0], [0]>} : vector<8x16x16xf32>, vector<8x16x16xf32>, vector<8x16x16xf32> -> vector<8x16x16xf32>
    "tpu.trace_stop"() : () -> ()
    %83 = vector.extract_strided_slice %82 {offsets = [0, 0, 0], sizes = [1, 16, 16], strides = [1, 1, 1]} : vector<8x16x16xf32> to vector<1x16x16xf32>
    %84 = vector.shape_cast %83 : vector<1x16x16xf32> to vector<16x16xf32>
    %85 = vector.extract_strided_slice %82 {offsets = [1, 0, 0], sizes = [1, 16, 16], strides = [1, 1, 1]} : vector<8x16x16xf32> to vector<1x16x16xf32>
    %86 = vector.shape_cast %85 : vector<1x16x16xf32> to vector<16x16xf32>
    %87 = vector.extract_strided_slice %82 {offsets = [2, 0, 0], sizes = [1, 16, 16], strides = [1, 1, 1]} : vector<8x16x16xf32> to vector<1x16x16xf32>
    %88 = vector.shape_cast %87 : vector<1x16x16xf32> to vector<16x16xf32>
    %89 = vector.extract_strided_slice %82 {offsets = [3, 0, 0], sizes = [1, 16, 16], strides = [1, 1, 1]} : vector<8x16x16xf32> to vector<1x16x16xf32>
    %90 = vector.shape_cast %89 : vector<1x16x16xf32> to vector<16x16xf32>
    %91 = vector.extract_strided_slice %82 {offsets = [4, 0, 0], sizes = [1, 16, 16], strides = [1, 1, 1]} : vector<8x16x16xf32> to vector<1x16x16xf32>
    %92 = vector.shape_cast %91 : vector<1x16x16xf32> to vector<16x16xf32>
    %93 = vector.extract_strided_slice %82 {offsets = [5, 0, 0], sizes = [1, 16, 16], strides = [1, 1, 1]} : vector<8x16x16xf32> to vector<1x16x16xf32>
    %94 = vector.shape_cast %93 : vector<1x16x16xf32> to vector<16x16xf32>
    %95 = vector.extract_strided_slice %82 {offsets = [6, 0, 0], sizes = [1, 16, 16], strides = [1, 1, 1]} : vector<8x16x16xf32> to vector<1x16x16xf32>
    %96 = vector.shape_cast %95 : vector<1x16x16xf32> to vector<16x16xf32>
    %97 = vector.extract_strided_slice %82 {offsets = [7, 0, 0], sizes = [1, 16, 16], strides = [1, 1, 1]} : vector<8x16x16xf32> to vector<1x16x16xf32>
    %98 = vector.shape_cast %97 : vector<1x16x16xf32> to vector<16x16xf32>
    %99 = tpu.concatenate %84, %86, %88, %90, %92, %94, %96, %98 in 1 : vector<16x16xf32>, vector<16x16xf32>, vector<16x16xf32>, vector<16x16xf32>, vector<16x16xf32>, vector<16x16xf32>, vector<16x16xf32>, vector<16x16xf32> -> vector<16x128xf32>
    %c0_20 = arith.constant 0 : index
    %c0_21 = arith.constant 0 : index
    %c0_22 = arith.constant 0 : index
    %100 = vector.load %arg7[%c0_20, %c0_21, %c0_22] : memref<3x128x128xf32, #tpu.memory_space<vmem>>, vector<1x128x128xf32>
    %101 = vector.shape_cast %100 : vector<1x128x128xf32> to vector<128x128xf32>
    %cst_23 = arith.constant dense<0.000000e+00> : vector<16x128xf32>
    %102 = tpu.matmul %99, %101, %cst_23 {dimension_numbers = #tpu.dot_dimension_numbers<[1], [0], [0], [1], [0, 0, 1, 1], [], []>} : vector<16x128xf32>, vector<128x128xf32>, vector<16x128xf32> -> vector<16x128xf32>
    %c0_24 = arith.constant 0 : index
    %c0_25 = arith.constant 0 : index
    %c0_26 = arith.constant 0 : index
    %103 = vector.load %arg8[%c0_24, %c0_25, %c0_26] : memref<3x1x128xf32, #tpu.memory_space<vmem>>, vector<1x1x128xf32>
    %104 = vector.shape_cast %103 : vector<1x1x128xf32> to vector<1x128xf32>
    %105 = vector.broadcast %104 : vector<1x128xf32> to vector<16x128xf32>
    %106 = arith.addf %102, %105 : vector<16x128xf32>
    %107 = arith.addf %7, %106 : vector<16x128xf32>
    %c0_27 = arith.constant 0 : index
    %c0_28 = arith.constant 0 : index
    %c0_29 = arith.constant 0 : index
    %108 = vector.load %arg13[%c0_27, %c0_28, %c0_29] : memref<3x1x128xf32, #tpu.memory_space<vmem>>, vector<1x1x128xf32>
    %109 = vector.shape_cast %108 : vector<1x1x128xf32> to vector<1x128xf32>
    %c0_30 = arith.constant 0 : index
    %c0_31 = arith.constant 0 : index
    %c0_32 = arith.constant 0 : index
    %110 = vector.load %arg14[%c0_30, %c0_31, %c0_32] : memref<3x1x128xf32, #tpu.memory_space<vmem>>, vector<1x1x128xf32>
    %111 = vector.shape_cast %110 : vector<1x1x128xf32> to vector<1x128xf32>
    %cst_33 = arith.constant dense<0.000000e+00> : vector<16xf32>
    %112 = vector.multi_reduction <add>, %107, %cst_33 [1] : vector<16x128xf32> to vector<16xf32>
    %113 = vector.shape_cast %112 : vector<16xf32> to vector<16x1xf32>
    %cst_34 = arith.constant 1.280000e+02 : f32
    %114 = vector.broadcast %cst_34 : f32 to vector<16x1xf32>
    %115 = arith.divf %113, %114 : vector<16x1xf32>
    %116 = vector.broadcast %115 : vector<16x1xf32> to vector<16x128xf32>
    %117 = arith.subf %107, %116 : vector<16x128xf32>
    %118 = arith.mulf %117, %117 : vector<16x128xf32>
    %cst_35 = arith.constant dense<0.000000e+00> : vector<16xf32>
    %119 = vector.multi_reduction <add>, %118, %cst_35 [1] : vector<16x128xf32> to vector<16xf32>
    %120 = vector.shape_cast %119 : vector<16xf32> to vector<16x1xf32>
    %cst_36 = arith.constant 1.280000e+02 : f32
    %121 = vector.broadcast %cst_36 : f32 to vector<16x1xf32>
    %122 = arith.divf %120, %121 : vector<16x1xf32>
    %cst_37 = arith.constant 9.99999974E-6 : f32
    %123 = vector.broadcast %cst_37 : f32 to vector<16x1xf32>
    %124 = arith.addf %122, %123 : vector<16x1xf32>
    %125 = math.rsqrt %124 : vector<16x1xf32>
    %126 = vector.broadcast %125 : vector<16x1xf32> to vector<16x128xf32>
    %127 = arith.mulf %117, %126 : vector<16x128xf32>
    %128 = vector.broadcast %109 : vector<1x128xf32> to vector<16x128xf32>
    %129 = arith.mulf %127, %128 : vector<16x128xf32>
    %130 = vector.broadcast %111 : vector<1x128xf32> to vector<16x128xf32>
    %131 = arith.addf %129, %130 : vector<16x128xf32>
    %c0_38 = arith.constant 0 : index
    %c0_39 = arith.constant 0 : index
    %c0_40 = arith.constant 0 : index
    %132 = vector.load %arg9[%c0_38, %c0_39, %c0_40] : memref<3x128x512xf32, #tpu.memory_space<vmem>>, vector<1x128x512xf32>
    %133 = vector.shape_cast %132 : vector<1x128x512xf32> to vector<128x512xf32>
    %cst_41 = arith.constant dense<0.000000e+00> : vector<16x512xf32>
    %134 = tpu.matmul %131, %133, %cst_41 {dimension_numbers = #tpu.dot_dimension_numbers<[1], [0], [0], [1], [0, 0, 1, 1], [], []>} : vector<16x128xf32>, vector<128x512xf32>, vector<16x512xf32> -> vector<16x512xf32>
    %c0_42 = arith.constant 0 : index
    %c0_43 = arith.constant 0 : index
    %c0_44 = arith.constant 0 : index
    %135 = vector.load %arg10[%c0_42, %c0_43, %c0_44] : memref<3x1x512xf32, #tpu.memory_space<vmem>>, vector<1x1x512xf32>
    %136 = vector.shape_cast %135 : vector<1x1x512xf32> to vector<1x512xf32>
    %137 = vector.broadcast %136 : vector<1x512xf32> to vector<16x512xf32>
    %138 = arith.addf %134, %137 : vector<16x512xf32>
    %cst_45 = arith.constant 0.000000e+00 : f32
    %139 = vector.broadcast %cst_45 : f32 to vector<16x512xf32>
    %140 = arith.maximumf %138, %139 : vector<16x512xf32>
    %c0_46 = arith.constant 0 : index
    %c0_47 = arith.constant 0 : index
    %c0_48 = arith.constant 0 : index
    %141 = vector.load %arg11[%c0_46, %c0_47, %c0_48] : memref<3x512x128xf32, #tpu.memory_space<vmem>>, vector<1x512x128xf32>
    %142 = vector.shape_cast %141 : vector<1x512x128xf32> to vector<512x128xf32>
    %cst_49 = arith.constant dense<0.000000e+00> : vector<16x128xf32>
    %143 = tpu.matmul %140, %142, %cst_49 {dimension_numbers = #tpu.dot_dimension_numbers<[1], [0], [0], [1], [0, 0, 1, 1], [], []>} : vector<16x512xf32>, vector<512x128xf32>, vector<16x128xf32> -> vector<16x128xf32>
    %c0_50 = arith.constant 0 : index
    %c0_51 = arith.constant 0 : index
    %c0_52 = arith.constant 0 : index
    %144 = vector.load %arg12[%c0_50, %c0_51, %c0_52] : memref<3x1x128xf32, #tpu.memory_space<vmem>>, vector<1x1x128xf32>
    %145 = vector.shape_cast %144 : vector<1x1x128xf32> to vector<1x128xf32>
    %146 = vector.broadcast %145 : vector<1x128xf32> to vector<16x128xf32>
    %147 = arith.addf %143, %146 : vector<16x128xf32>
    %148 = arith.addf %131, %147 : vector<16x128xf32>
    %c0_53 = arith.constant 0 : index
    %c0_54 = arith.constant 0 : index
    %c0_55 = arith.constant 0 : index
    %149 = vector.load %arg15[%c0_53, %c0_54, %c0_55] : memref<3x1x128xf32, #tpu.memory_space<vmem>>, vector<1x1x128xf32>
    %150 = vector.shape_cast %149 : vector<1x1x128xf32> to vector<1x128xf32>
    %c0_56 = arith.constant 0 : index
    %c0_57 = arith.constant 0 : index
    %c0_58 = arith.constant 0 : index
    %151 = vector.load %arg16[%c0_56, %c0_57, %c0_58] : memref<3x1x128xf32, #tpu.memory_space<vmem>>, vector<1x1x128xf32>
    %152 = vector.shape_cast %151 : vector<1x1x128xf32> to vector<1x128xf32>
    %cst_59 = arith.constant dense<0.000000e+00> : vector<16xf32>
    %153 = vector.multi_reduction <add>, %148, %cst_59 [1] : vector<16x128xf32> to vector<16xf32>
    %154 = vector.shape_cast %153 : vector<16xf32> to vector<16x1xf32>
    %cst_60 = arith.constant 1.280000e+02 : f32
    %155 = vector.broadcast %cst_60 : f32 to vector<16x1xf32>
    %156 = arith.divf %154, %155 : vector<16x1xf32>
    %157 = vector.broadcast %156 : vector<16x1xf32> to vector<16x128xf32>
    %158 = arith.subf %148, %157 : vector<16x128xf32>
    %159 = arith.mulf %158, %158 : vector<16x128xf32>
    %cst_61 = arith.constant dense<0.000000e+00> : vector<16xf32>
    %160 = vector.multi_reduction <add>, %159, %cst_61 [1] : vector<16x128xf32> to vector<16xf32>
    %161 = vector.shape_cast %160 : vector<16xf32> to vector<16x1xf32>
    %cst_62 = arith.constant 1.280000e+02 : f32
    %162 = vector.broadcast %cst_62 : f32 to vector<16x1xf32>
    %163 = arith.divf %161, %162 : vector<16x1xf32>
    %cst_63 = arith.constant 9.99999974E-6 : f32
    %164 = vector.broadcast %cst_63 : f32 to vector<16x1xf32>
    %165 = arith.addf %163, %164 : vector<16x1xf32>
    %166 = math.rsqrt %165 : vector<16x1xf32>
    %167 = vector.broadcast %166 : vector<16x1xf32> to vector<16x128xf32>
    %168 = arith.mulf %158, %167 : vector<16x128xf32>
    %169 = vector.broadcast %150 : vector<1x128xf32> to vector<16x128xf32>
    %170 = arith.mulf %168, %169 : vector<16x128xf32>
    %171 = vector.broadcast %152 : vector<1x128xf32> to vector<16x128xf32>
    %172 = arith.addf %170, %171 : vector<16x128xf32>
    %c1 = arith.constant 1 : index
    %c0_64 = arith.constant 0 : index
    %c0_65 = arith.constant 0 : index
    %173 = vector.load %arg5[%c1, %c0_64, %c0_65] : memref<3x128x384xf32, #tpu.memory_space<vmem>>, vector<1x128x384xf32>
    %174 = vector.shape_cast %173 : vector<1x128x384xf32> to vector<128x384xf32>
    %cst_66 = arith.constant dense<0.000000e+00> : vector<16x384xf32>
    %175 = tpu.matmul %172, %174, %cst_66 {dimension_numbers = #tpu.dot_dimension_numbers<[1], [0], [0], [1], [0, 0, 1, 1], [], []>} : vector<16x128xf32>, vector<128x384xf32>, vector<16x384xf32> -> vector<16x384xf32>
    %c1_67 = arith.constant 1 : index
    %c0_68 = arith.constant 0 : index
    %c0_69 = arith.constant 0 : index
    %176 = vector.load %arg6[%c1_67, %c0_68, %c0_69] : memref<3x1x384xf32, #tpu.memory_space<vmem>>, vector<1x1x384xf32>
    %177 = vector.shape_cast %176 : vector<1x1x384xf32> to vector<1x384xf32>
    %178 = vector.broadcast %177 : vector<1x384xf32> to vector<16x384xf32>
    %179 = arith.addf %175, %178 : vector<16x384xf32>
    %180 = vector.extract_strided_slice %179 {offsets = [0, 0], sizes = [16, 16], strides = [1, 1]} : vector<16x384xf32> to vector<16x16xf32>
    %181 = vector.extract_strided_slice %179 {offsets = [0, 16], sizes = [16, 16], strides = [1, 1]} : vector<16x384xf32> to vector<16x16xf32>
    %182 = vector.extract_strided_slice %179 {offsets = [0, 32], sizes = [16, 16], strides = [1, 1]} : vector<16x384xf32> to vector<16x16xf32>
    %183 = vector.extract_strided_slice %179 {offsets = [0, 48], sizes = [16, 16], strides = [1, 1]} : vector<16x384xf32> to vector<16x16xf32>
    %184 = vector.extract_strided_slice %179 {offsets = [0, 64], sizes = [16, 16], strides = [1, 1]} : vector<16x384xf32> to vector<16x16xf32>
    %185 = vector.extract_strided_slice %179 {offsets = [0, 80], sizes = [16, 16], strides = [1, 1]} : vector<16x384xf32> to vector<16x16xf32>
    %186 = vector.extract_strided_slice %179 {offsets = [0, 96], sizes = [16, 16], strides = [1, 1]} : vector<16x384xf32> to vector<16x16xf32>
    %187 = vector.extract_strided_slice %179 {offsets = [0, 112], sizes = [16, 16], strides = [1, 1]} : vector<16x384xf32> to vector<16x16xf32>
    %188 = vector.shape_cast %180 : vector<16x16xf32> to vector<1x16x16xf32>
    %189 = vector.shape_cast %181 : vector<16x16xf32> to vector<1x16x16xf32>
    %190 = vector.shape_cast %182 : vector<16x16xf32> to vector<1x16x16xf32>
    %191 = vector.shape_cast %183 : vector<16x16xf32> to vector<1x16x16xf32>
    %192 = vector.shape_cast %184 : vector<16x16xf32> to vector<1x16x16xf32>
    %193 = vector.shape_cast %185 : vector<16x16xf32> to vector<1x16x16xf32>
    %194 = vector.shape_cast %186 : vector<16x16xf32> to vector<1x16x16xf32>
    %195 = vector.shape_cast %187 : vector<16x16xf32> to vector<1x16x16xf32>
    %196 = tpu.concatenate %188, %189, %190, %191, %192, %193, %194, %195 in 0 : vector<1x16x16xf32>, vector<1x16x16xf32>, vector<1x16x16xf32>, vector<1x16x16xf32>, vector<1x16x16xf32>, vector<1x16x16xf32>, vector<1x16x16xf32>, vector<1x16x16xf32> -> vector<8x16x16xf32>
    %197 = vector.extract_strided_slice %179 {offsets = [0, 128], sizes = [16, 16], strides = [1, 1]} : vector<16x384xf32> to vector<16x16xf32>
    %198 = vector.extract_strided_slice %179 {offsets = [0, 144], sizes = [16, 16], strides = [1, 1]} : vector<16x384xf32> to vector<16x16xf32>
    %199 = vector.extract_strided_slice %179 {offsets = [0, 160], sizes = [16, 16], strides = [1, 1]} : vector<16x384xf32> to vector<16x16xf32>
    %200 = vector.extract_strided_slice %179 {offsets = [0, 176], sizes = [16, 16], strides = [1, 1]} : vector<16x384xf32> to vector<16x16xf32>
    %201 = vector.extract_strided_slice %179 {offsets = [0, 192], sizes = [16, 16], strides = [1, 1]} : vector<16x384xf32> to vector<16x16xf32>
    %202 = vector.extract_strided_slice %179 {offsets = [0, 208], sizes = [16, 16], strides = [1, 1]} : vector<16x384xf32> to vector<16x16xf32>
    %203 = vector.extract_strided_slice %179 {offsets = [0, 224], sizes = [16, 16], strides = [1, 1]} : vector<16x384xf32> to vector<16x16xf32>
    %204 = vector.extract_strided_slice %179 {offsets = [0, 240], sizes = [16, 16], strides = [1, 1]} : vector<16x384xf32> to vector<16x16xf32>
    %205 = vector.shape_cast %197 : vector<16x16xf32> to vector<1x16x16xf32>
    %206 = vector.shape_cast %198 : vector<16x16xf32> to vector<1x16x16xf32>
    %207 = vector.shape_cast %199 : vector<16x16xf32> to vector<1x16x16xf32>
    %208 = vector.shape_cast %200 : vector<16x16xf32> to vector<1x16x16xf32>
    %209 = vector.shape_cast %201 : vector<16x16xf32> to vector<1x16x16xf32>
    %210 = vector.shape_cast %202 : vector<16x16xf32> to vector<1x16x16xf32>
    %211 = vector.shape_cast %203 : vector<16x16xf32> to vector<1x16x16xf32>
    %212 = vector.shape_cast %204 : vector<16x16xf32> to vector<1x16x16xf32>
    %213 = tpu.concatenate %205, %206, %207, %208, %209, %210, %211, %212 in 0 : vector<1x16x16xf32>, vector<1x16x16xf32>, vector<1x16x16xf32>, vector<1x16x16xf32>, vector<1x16x16xf32>, vector<1x16x16xf32>, vector<1x16x16xf32>, vector<1x16x16xf32> -> vector<8x16x16xf32>
    %214 = vector.extract_strided_slice %179 {offsets = [0, 256], sizes = [16, 16], strides = [1, 1]} : vector<16x384xf32> to vector<16x16xf32>
    %215 = vector.extract_strided_slice %179 {offsets = [0, 272], sizes = [16, 16], strides = [1, 1]} : vector<16x384xf32> to vector<16x16xf32>
    %216 = vector.extract_strided_slice %179 {offsets = [0, 288], sizes = [16, 16], strides = [1, 1]} : vector<16x384xf32> to vector<16x16xf32>
    %217 = vector.extract_strided_slice %179 {offsets = [0, 304], sizes = [16, 16], strides = [1, 1]} : vector<16x384xf32> to vector<16x16xf32>
    %218 = vector.extract_strided_slice %179 {offsets = [0, 320], sizes = [16, 16], strides = [1, 1]} : vector<16x384xf32> to vector<16x16xf32>
    %219 = vector.extract_strided_slice %179 {offsets = [0, 336], sizes = [16, 16], strides = [1, 1]} : vector<16x384xf32> to vector<16x16xf32>
    %220 = vector.extract_strided_slice %179 {offsets = [0, 352], sizes = [16, 16], strides = [1, 1]} : vector<16x384xf32> to vector<16x16xf32>
    %221 = vector.extract_strided_slice %179 {offsets = [0, 368], sizes = [16, 16], strides = [1, 1]} : vector<16x384xf32> to vector<16x16xf32>
    %222 = vector.shape_cast %214 : vector<16x16xf32> to vector<1x16x16xf32>
    %223 = vector.shape_cast %215 : vector<16x16xf32> to vector<1x16x16xf32>
    %224 = vector.shape_cast %216 : vector<16x16xf32> to vector<1x16x16xf32>
    %225 = vector.shape_cast %217 : vector<16x16xf32> to vector<1x16x16xf32>
    %226 = vector.shape_cast %218 : vector<16x16xf32> to vector<1x16x16xf32>
    %227 = vector.shape_cast %219 : vector<16x16xf32> to vector<1x16x16xf32>
    %228 = vector.shape_cast %220 : vector<16x16xf32> to vector<1x16x16xf32>
    %229 = vector.shape_cast %221 : vector<16x16xf32> to vector<1x16x16xf32>
    %230 = tpu.concatenate %222, %223, %224, %225, %226, %227, %228, %229 in 0 : vector<1x16x16xf32>, vector<1x16x16xf32>, vector<1x16x16xf32>, vector<1x16x16xf32>, vector<1x16x16xf32>, vector<1x16x16xf32>, vector<1x16x16xf32>, vector<1x16x16xf32> -> vector<8x16x16xf32>
    "tpu.trace_start"() <{level = 10 : i32, message = "hqd,hkd->hqk"}> : () -> ()
    %cst_70 = arith.constant dense<0.000000e+00> : vector<8x16x16xf32>
    %231 = tpu.matmul %196, %213, %cst_70 {dimension_numbers = #tpu.dot_dimension_numbers<[2], [2], [1], [1], [0, 0, 0, 1, 1, 1], [0], [0]>} : vector<8x16x16xf32>, vector<8x16x16xf32>, vector<8x16x16xf32> -> vector<8x16x16xf32>
    "tpu.trace_stop"() : () -> ()
    %cst_71 = arith.constant 2.500000e-01 : f32
    %232 = vector.broadcast %cst_71 : f32 to vector<8x16x16xf32>
    %233 = arith.mulf %231, %232 : vector<8x16x16xf32>
    %234 = vector.shape_cast %8 : vector<16x16xf32> to vector<1x16x16xf32>
    %235 = vector.broadcast %234 : vector<1x16x16xf32> to vector<8x16x16xf32>
    %236 = arith.addf %233, %235 : vector<8x16x16xf32>
    %cst_72 = arith.constant dense<0xFF800000> : vector<8x16xf32>
    %237 = vector.multi_reduction <maximumf>, %236, %cst_72 [2] : vector<8x16x16xf32> to vector<8x16xf32>
    %238 = vector.shape_cast %237 : vector<8x16xf32> to vector<8x16x1xf32>
    %239 = vector.broadcast %238 : vector<8x16x1xf32> to vector<8x16x16xf32>
    %240 = arith.subf %236, %239 : vector<8x16x16xf32>
    %241 = math.exp %240 : vector<8x16x16xf32>
    %cst_73 = arith.constant dense<0.000000e+00> : vector<8x16xf32>
    %242 = vector.multi_reduction <add>, %241, %cst_73 [2] : vector<8x16x16xf32> to vector<8x16xf32>
    %243 = vector.shape_cast %242 : vector<8x16xf32> to vector<8x16x1xf32>
    %244 = vector.broadcast %243 : vector<8x16x1xf32> to vector<8x16x16xf32>
    %245 = arith.divf %241, %244 : vector<8x16x16xf32>
    "tpu.trace_start"() <{level = 10 : i32, message = "hqk,hkd->hqd"}> : () -> ()
    %cst_74 = arith.constant dense<0.000000e+00> : vector<8x16x16xf32>
    %246 = tpu.matmul %245, %230, %cst_74 {dimension_numbers = #tpu.dot_dimension_numbers<[2], [1], [1], [2], [0, 0, 0, 1, 1, 2], [0], [0]>} : vector<8x16x16xf32>, vector<8x16x16xf32>, vector<8x16x16xf32> -> vector<8x16x16xf32>
    "tpu.trace_stop"() : () -> ()
    %247 = vector.extract_strided_slice %246 {offsets = [0, 0, 0], sizes = [1, 16, 16], strides = [1, 1, 1]} : vector<8x16x16xf32> to vector<1x16x16xf32>
    %248 = vector.shape_cast %247 : vector<1x16x16xf32> to vector<16x16xf32>
    %249 = vector.extract_strided_slice %246 {offsets = [1, 0, 0], sizes = [1, 16, 16], strides = [1, 1, 1]} : vector<8x16x16xf32> to vector<1x16x16xf32>
    %250 = vector.shape_cast %249 : vector<1x16x16xf32> to vector<16x16xf32>
    %251 = vector.extract_strided_slice %246 {offsets = [2, 0, 0], sizes = [1, 16, 16], strides = [1, 1, 1]} : vector<8x16x16xf32> to vector<1x16x16xf32>
    %252 = vector.shape_cast %251 : vector<1x16x16xf32> to vector<16x16xf32>
    %253 = vector.extract_strided_slice %246 {offsets = [3, 0, 0], sizes = [1, 16, 16], strides = [1, 1, 1]} : vector<8x16x16xf32> to vector<1x16x16xf32>
    %254 = vector.shape_cast %253 : vector<1x16x16xf32> to vector<16x16xf32>
    %255 = vector.extract_strided_slice %246 {offsets = [4, 0, 0], sizes = [1, 16, 16], strides = [1, 1, 1]} : vector<8x16x16xf32> to vector<1x16x16xf32>
    %256 = vector.shape_cast %255 : vector<1x16x16xf32> to vector<16x16xf32>
    %257 = vector.extract_strided_slice %246 {offsets = [5, 0, 0], sizes = [1, 16, 16], strides = [1, 1, 1]} : vector<8x16x16xf32> to vector<1x16x16xf32>
    %258 = vector.shape_cast %257 : vector<1x16x16xf32> to vector<16x16xf32>
    %259 = vector.extract_strided_slice %246 {offsets = [6, 0, 0], sizes = [1, 16, 16], strides = [1, 1, 1]} : vector<8x16x16xf32> to vector<1x16x16xf32>
    %260 = vector.shape_cast %259 : vector<1x16x16xf32> to vector<16x16xf32>
    %261 = vector.extract_strided_slice %246 {offsets = [7, 0, 0], sizes = [1, 16, 16], strides = [1, 1, 1]} : vector<8x16x16xf32> to vector<1x16x16xf32>
    %262 = vector.shape_cast %261 : vector<1x16x16xf32> to vector<16x16xf32>
    %263 = tpu.concatenate %248, %250, %252, %254, %256, %258, %260, %262 in 1 : vector<16x16xf32>, vector<16x16xf32>, vector<16x16xf32>, vector<16x16xf32>, vector<16x16xf32>, vector<16x16xf32>, vector<16x16xf32>, vector<16x16xf32> -> vector<16x128xf32>
    %c1_75 = arith.constant 1 : index
    %c0_76 = arith.constant 0 : index
    %c0_77 = arith.constant 0 : index
    %264 = vector.load %arg7[%c1_75, %c0_76, %c0_77] : memref<3x128x128xf32, #tpu.memory_space<vmem>>, vector<1x128x128xf32>
    %265 = vector.shape_cast %264 : vector<1x128x128xf32> to vector<128x128xf32>
    %cst_78 = arith.constant dense<0.000000e+00> : vector<16x128xf32>
    %266 = tpu.matmul %263, %265, %cst_78 {dimension_numbers = #tpu.dot_dimension_numbers<[1], [0], [0], [1], [0, 0, 1, 1], [], []>} : vector<16x128xf32>, vector<128x128xf32>, vector<16x128xf32> -> vector<16x128xf32>
    %c1_79 = arith.constant 1 : index
    %c0_80 = arith.constant 0 : index
    %c0_81 = arith.constant 0 : index
    %267 = vector.load %arg8[%c1_79, %c0_80, %c0_81] : memref<3x1x128xf32, #tpu.memory_space<vmem>>, vector<1x1x128xf32>
    %268 = vector.shape_cast %267 : vector<1x1x128xf32> to vector<1x128xf32>
    %269 = vector.broadcast %268 : vector<1x128xf32> to vector<16x128xf32>
    %270 = arith.addf %266, %269 : vector<16x128xf32>
    %271 = arith.addf %172, %270 : vector<16x128xf32>
    %c1_82 = arith.constant 1 : index
    %c0_83 = arith.constant 0 : index
    %c0_84 = arith.constant 0 : index
    %272 = vector.load %arg13[%c1_82, %c0_83, %c0_84] : memref<3x1x128xf32, #tpu.memory_space<vmem>>, vector<1x1x128xf32>
    %273 = vector.shape_cast %272 : vector<1x1x128xf32> to vector<1x128xf32>
    %c1_85 = arith.constant 1 : index
    %c0_86 = arith.constant 0 : index
    %c0_87 = arith.constant 0 : index
    %274 = vector.load %arg14[%c1_85, %c0_86, %c0_87] : memref<3x1x128xf32, #tpu.memory_space<vmem>>, vector<1x1x128xf32>
    %275 = vector.shape_cast %274 : vector<1x1x128xf32> to vector<1x128xf32>
    %cst_88 = arith.constant dense<0.000000e+00> : vector<16xf32>
    %276 = vector.multi_reduction <add>, %271, %cst_88 [1] : vector<16x128xf32> to vector<16xf32>
    %277 = vector.shape_cast %276 : vector<16xf32> to vector<16x1xf32>
    %cst_89 = arith.constant 1.280000e+02 : f32
    %278 = vector.broadcast %cst_89 : f32 to vector<16x1xf32>
    %279 = arith.divf %277, %278 : vector<16x1xf32>
    %280 = vector.broadcast %279 : vector<16x1xf32> to vector<16x128xf32>
    %281 = arith.subf %271, %280 : vector<16x128xf32>
    %282 = arith.mulf %281, %281 : vector<16x128xf32>
    %cst_90 = arith.constant dense<0.000000e+00> : vector<16xf32>
    %283 = vector.multi_reduction <add>, %282, %cst_90 [1] : vector<16x128xf32> to vector<16xf32>
    %284 = vector.shape_cast %283 : vector<16xf32> to vector<16x1xf32>
    %cst_91 = arith.constant 1.280000e+02 : f32
    %285 = vector.broadcast %cst_91 : f32 to vector<16x1xf32>
    %286 = arith.divf %284, %285 : vector<16x1xf32>
    %cst_92 = arith.constant 9.99999974E-6 : f32
    %287 = vector.broadcast %cst_92 : f32 to vector<16x1xf32>
    %288 = arith.addf %286, %287 : vector<16x1xf32>
    %289 = math.rsqrt %288 : vector<16x1xf32>
    %290 = vector.broadcast %289 : vector<16x1xf32> to vector<16x128xf32>
    %291 = arith.mulf %281, %290 : vector<16x128xf32>
    %292 = vector.broadcast %273 : vector<1x128xf32> to vector<16x128xf32>
    %293 = arith.mulf %291, %292 : vector<16x128xf32>
    %294 = vector.broadcast %275 : vector<1x128xf32> to vector<16x128xf32>
    %295 = arith.addf %293, %294 : vector<16x128xf32>
    %c1_93 = arith.constant 1 : index
    %c0_94 = arith.constant 0 : index
    %c0_95 = arith.constant 0 : index
    %296 = vector.load %arg9[%c1_93, %c0_94, %c0_95] : memref<3x128x512xf32, #tpu.memory_space<vmem>>, vector<1x128x512xf32>
    %297 = vector.shape_cast %296 : vector<1x128x512xf32> to vector<128x512xf32>
    %cst_96 = arith.constant dense<0.000000e+00> : vector<16x512xf32>
    %298 = tpu.matmul %295, %297, %cst_96 {dimension_numbers = #tpu.dot_dimension_numbers<[1], [0], [0], [1], [0, 0, 1, 1], [], []>} : vector<16x128xf32>, vector<128x512xf32>, vector<16x512xf32> -> vector<16x512xf32>
    %c1_97 = arith.constant 1 : index
    %c0_98 = arith.constant 0 : index
    %c0_99 = arith.constant 0 : index
    %299 = vector.load %arg10[%c1_97, %c0_98, %c0_99] : memref<3x1x512xf32, #tpu.memory_space<vmem>>, vector<1x1x512xf32>
    %300 = vector.shape_cast %299 : vector<1x1x512xf32> to vector<1x512xf32>
    %301 = vector.broadcast %300 : vector<1x512xf32> to vector<16x512xf32>
    %302 = arith.addf %298, %301 : vector<16x512xf32>
    %cst_100 = arith.constant 0.000000e+00 : f32
    %303 = vector.broadcast %cst_100 : f32 to vector<16x512xf32>
    %304 = arith.maximumf %302, %303 : vector<16x512xf32>
    %c1_101 = arith.constant 1 : index
    %c0_102 = arith.constant 0 : index
    %c0_103 = arith.constant 0 : index
    %305 = vector.load %arg11[%c1_101, %c0_102, %c0_103] : memref<3x512x128xf32, #tpu.memory_space<vmem>>, vector<1x512x128xf32>
    %306 = vector.shape_cast %305 : vector<1x512x128xf32> to vector<512x128xf32>
    %cst_104 = arith.constant dense<0.000000e+00> : vector<16x128xf32>
    %307 = tpu.matmul %304, %306, %cst_104 {dimension_numbers = #tpu.dot_dimension_numbers<[1], [0], [0], [1], [0, 0, 1, 1], [], []>} : vector<16x512xf32>, vector<512x128xf32>, vector<16x128xf32> -> vector<16x128xf32>
    %c1_105 = arith.constant 1 : index
    %c0_106 = arith.constant 0 : index
    %c0_107 = arith.constant 0 : index
    %308 = vector.load %arg12[%c1_105, %c0_106, %c0_107] : memref<3x1x128xf32, #tpu.memory_space<vmem>>, vector<1x1x128xf32>
    %309 = vector.shape_cast %308 : vector<1x1x128xf32> to vector<1x128xf32>
    %310 = vector.broadcast %309 : vector<1x128xf32> to vector<16x128xf32>
    %311 = arith.addf %307, %310 : vector<16x128xf32>
    %312 = arith.addf %295, %311 : vector<16x128xf32>
    %c1_108 = arith.constant 1 : index
    %c0_109 = arith.constant 0 : index
    %c0_110 = arith.constant 0 : index
    %313 = vector.load %arg15[%c1_108, %c0_109, %c0_110] : memref<3x1x128xf32, #tpu.memory_space<vmem>>, vector<1x1x128xf32>
    %314 = vector.shape_cast %313 : vector<1x1x128xf32> to vector<1x128xf32>
    %c1_111 = arith.constant 1 : index
    %c0_112 = arith.constant 0 : index
    %c0_113 = arith.constant 0 : index
    %315 = vector.load %arg16[%c1_111, %c0_112, %c0_113] : memref<3x1x128xf32, #tpu.memory_space<vmem>>, vector<1x1x128xf32>
    %316 = vector.shape_cast %315 : vector<1x1x128xf32> to vector<1x128xf32>
    %cst_114 = arith.constant dense<0.000000e+00> : vector<16xf32>
    %317 = vector.multi_reduction <add>, %312, %cst_114 [1] : vector<16x128xf32> to vector<16xf32>
    %318 = vector.shape_cast %317 : vector<16xf32> to vector<16x1xf32>
    %cst_115 = arith.constant 1.280000e+02 : f32
    %319 = vector.broadcast %cst_115 : f32 to vector<16x1xf32>
    %320 = arith.divf %318, %319 : vector<16x1xf32>
    %321 = vector.broadcast %320 : vector<16x1xf32> to vector<16x128xf32>
    %322 = arith.subf %312, %321 : vector<16x128xf32>
    %323 = arith.mulf %322, %322 : vector<16x128xf32>
    %cst_116 = arith.constant dense<0.000000e+00> : vector<16xf32>
    %324 = vector.multi_reduction <add>, %323, %cst_116 [1] : vector<16x128xf32> to vector<16xf32>
    %325 = vector.shape_cast %324 : vector<16xf32> to vector<16x1xf32>
    %cst_117 = arith.constant 1.280000e+02 : f32
    %326 = vector.broadcast %cst_117 : f32 to vector<16x1xf32>
    %327 = arith.divf %325, %326 : vector<16x1xf32>
    %cst_118 = arith.constant 9.99999974E-6 : f32
    %328 = vector.broadcast %cst_118 : f32 to vector<16x1xf32>
    %329 = arith.addf %327, %328 : vector<16x1xf32>
    %330 = math.rsqrt %329 : vector<16x1xf32>
    %331 = vector.broadcast %330 : vector<16x1xf32> to vector<16x128xf32>
    %332 = arith.mulf %322, %331 : vector<16x128xf32>
    %333 = vector.broadcast %314 : vector<1x128xf32> to vector<16x128xf32>
    %334 = arith.mulf %332, %333 : vector<16x128xf32>
    %335 = vector.broadcast %316 : vector<1x128xf32> to vector<16x128xf32>
    %336 = arith.addf %334, %335 : vector<16x128xf32>
    %c2 = arith.constant 2 : index
    %c0_119 = arith.constant 0 : index
    %c0_120 = arith.constant 0 : index
    %337 = vector.load %arg5[%c2, %c0_119, %c0_120] : memref<3x128x384xf32, #tpu.memory_space<vmem>>, vector<1x128x384xf32>
    %338 = vector.shape_cast %337 : vector<1x128x384xf32> to vector<128x384xf32>
    %cst_121 = arith.constant dense<0.000000e+00> : vector<16x384xf32>
    %339 = tpu.matmul %336, %338, %cst_121 {dimension_numbers = #tpu.dot_dimension_numbers<[1], [0], [0], [1], [0, 0, 1, 1], [], []>} : vector<16x128xf32>, vector<128x384xf32>, vector<16x384xf32> -> vector<16x384xf32>
    %c2_122 = arith.constant 2 : index
    %c0_123 = arith.constant 0 : index
    %c0_124 = arith.constant 0 : index
    %340 = vector.load %arg6[%c2_122, %c0_123, %c0_124] : memref<3x1x384xf32, #tpu.memory_space<vmem>>, vector<1x1x384xf32>
    %341 = vector.shape_cast %340 : vector<1x1x384xf32> to vector<1x384xf32>
    %342 = vector.broadcast %341 : vector<1x384xf32> to vector<16x384xf32>
    %343 = arith.addf %339, %342 : vector<16x384xf32>
    %344 = vector.extract_strided_slice %343 {offsets = [0, 0], sizes = [16, 16], strides = [1, 1]} : vector<16x384xf32> to vector<16x16xf32>
    %345 = vector.extract_strided_slice %343 {offsets = [0, 16], sizes = [16, 16], strides = [1, 1]} : vector<16x384xf32> to vector<16x16xf32>
    %346 = vector.extract_strided_slice %343 {offsets = [0, 32], sizes = [16, 16], strides = [1, 1]} : vector<16x384xf32> to vector<16x16xf32>
    %347 = vector.extract_strided_slice %343 {offsets = [0, 48], sizes = [16, 16], strides = [1, 1]} : vector<16x384xf32> to vector<16x16xf32>
    %348 = vector.extract_strided_slice %343 {offsets = [0, 64], sizes = [16, 16], strides = [1, 1]} : vector<16x384xf32> to vector<16x16xf32>
    %349 = vector.extract_strided_slice %343 {offsets = [0, 80], sizes = [16, 16], strides = [1, 1]} : vector<16x384xf32> to vector<16x16xf32>
    %350 = vector.extract_strided_slice %343 {offsets = [0, 96], sizes = [16, 16], strides = [1, 1]} : vector<16x384xf32> to vector<16x16xf32>
    %351 = vector.extract_strided_slice %343 {offsets = [0, 112], sizes = [16, 16], strides = [1, 1]} : vector<16x384xf32> to vector<16x16xf32>
    %352 = vector.shape_cast %344 : vector<16x16xf32> to vector<1x16x16xf32>
    %353 = vector.shape_cast %345 : vector<16x16xf32> to vector<1x16x16xf32>
    %354 = vector.shape_cast %346 : vector<16x16xf32> to vector<1x16x16xf32>
    %355 = vector.shape_cast %347 : vector<16x16xf32> to vector<1x16x16xf32>
    %356 = vector.shape_cast %348 : vector<16x16xf32> to vector<1x16x16xf32>
    %357 = vector.shape_cast %349 : vector<16x16xf32> to vector<1x16x16xf32>
    %358 = vector.shape_cast %350 : vector<16x16xf32> to vector<1x16x16xf32>
    %359 = vector.shape_cast %351 : vector<16x16xf32> to vector<1x16x16xf32>
    %360 = tpu.concatenate %352, %353, %354, %355, %356, %357, %358, %359 in 0 : vector<1x16x16xf32>, vector<1x16x16xf32>, vector<1x16x16xf32>, vector<1x16x16xf32>, vector<1x16x16xf32>, vector<1x16x16xf32>, vector<1x16x16xf32>, vector<1x16x16xf32> -> vector<8x16x16xf32>
    %361 = vector.extract_strided_slice %343 {offsets = [0, 128], sizes = [16, 16], strides = [1, 1]} : vector<16x384xf32> to vector<16x16xf32>
    %362 = vector.extract_strided_slice %343 {offsets = [0, 144], sizes = [16, 16], strides = [1, 1]} : vector<16x384xf32> to vector<16x16xf32>
    %363 = vector.extract_strided_slice %343 {offsets = [0, 160], sizes = [16, 16], strides = [1, 1]} : vector<16x384xf32> to vector<16x16xf32>
    %364 = vector.extract_strided_slice %343 {offsets = [0, 176], sizes = [16, 16], strides = [1, 1]} : vector<16x384xf32> to vector<16x16xf32>
    %365 = vector.extract_strided_slice %343 {offsets = [0, 192], sizes = [16, 16], strides = [1, 1]} : vector<16x384xf32> to vector<16x16xf32>
    %366 = vector.extract_strided_slice %343 {offsets = [0, 208], sizes = [16, 16], strides = [1, 1]} : vector<16x384xf32> to vector<16x16xf32>
    %367 = vector.extract_strided_slice %343 {offsets = [0, 224], sizes = [16, 16], strides = [1, 1]} : vector<16x384xf32> to vector<16x16xf32>
    %368 = vector.extract_strided_slice %343 {offsets = [0, 240], sizes = [16, 16], strides = [1, 1]} : vector<16x384xf32> to vector<16x16xf32>
    %369 = vector.shape_cast %361 : vector<16x16xf32> to vector<1x16x16xf32>
    %370 = vector.shape_cast %362 : vector<16x16xf32> to vector<1x16x16xf32>
    %371 = vector.shape_cast %363 : vector<16x16xf32> to vector<1x16x16xf32>
    %372 = vector.shape_cast %364 : vector<16x16xf32> to vector<1x16x16xf32>
    %373 = vector.shape_cast %365 : vector<16x16xf32> to vector<1x16x16xf32>
    %374 = vector.shape_cast %366 : vector<16x16xf32> to vector<1x16x16xf32>
    %375 = vector.shape_cast %367 : vector<16x16xf32> to vector<1x16x16xf32>
    %376 = vector.shape_cast %368 : vector<16x16xf32> to vector<1x16x16xf32>
    %377 = tpu.concatenate %369, %370, %371, %372, %373, %374, %375, %376 in 0 : vector<1x16x16xf32>, vector<1x16x16xf32>, vector<1x16x16xf32>, vector<1x16x16xf32>, vector<1x16x16xf32>, vector<1x16x16xf32>, vector<1x16x16xf32>, vector<1x16x16xf32> -> vector<8x16x16xf32>
    %378 = vector.extract_strided_slice %343 {offsets = [0, 256], sizes = [16, 16], strides = [1, 1]} : vector<16x384xf32> to vector<16x16xf32>
    %379 = vector.extract_strided_slice %343 {offsets = [0, 272], sizes = [16, 16], strides = [1, 1]} : vector<16x384xf32> to vector<16x16xf32>
    %380 = vector.extract_strided_slice %343 {offsets = [0, 288], sizes = [16, 16], strides = [1, 1]} : vector<16x384xf32> to vector<16x16xf32>
    %381 = vector.extract_strided_slice %343 {offsets = [0, 304], sizes = [16, 16], strides = [1, 1]} : vector<16x384xf32> to vector<16x16xf32>
    %382 = vector.extract_strided_slice %343 {offsets = [0, 320], sizes = [16, 16], strides = [1, 1]} : vector<16x384xf32> to vector<16x16xf32>
    %383 = vector.extract_strided_slice %343 {offsets = [0, 336], sizes = [16, 16], strides = [1, 1]} : vector<16x384xf32> to vector<16x16xf32>
    %384 = vector.extract_strided_slice %343 {offsets = [0, 352], sizes = [16, 16], strides = [1, 1]} : vector<16x384xf32> to vector<16x16xf32>
    %385 = vector.extract_strided_slice %343 {offsets = [0, 368], sizes = [16, 16], strides = [1, 1]} : vector<16x384xf32> to vector<16x16xf32>
    %386 = vector.shape_cast %378 : vector<16x16xf32> to vector<1x16x16xf32>
    %387 = vector.shape_cast %379 : vector<16x16xf32> to vector<1x16x16xf32>
    %388 = vector.shape_cast %380 : vector<16x16xf32> to vector<1x16x16xf32>
    %389 = vector.shape_cast %381 : vector<16x16xf32> to vector<1x16x16xf32>
    %390 = vector.shape_cast %382 : vector<16x16xf32> to vector<1x16x16xf32>
    %391 = vector.shape_cast %383 : vector<16x16xf32> to vector<1x16x16xf32>
    %392 = vector.shape_cast %384 : vector<16x16xf32> to vector<1x16x16xf32>
    %393 = vector.shape_cast %385 : vector<16x16xf32> to vector<1x16x16xf32>
    %394 = tpu.concatenate %386, %387, %388, %389, %390, %391, %392, %393 in 0 : vector<1x16x16xf32>, vector<1x16x16xf32>, vector<1x16x16xf32>, vector<1x16x16xf32>, vector<1x16x16xf32>, vector<1x16x16xf32>, vector<1x16x16xf32>, vector<1x16x16xf32> -> vector<8x16x16xf32>
    "tpu.trace_start"() <{level = 10 : i32, message = "hqd,hkd->hqk"}> : () -> ()
    %cst_125 = arith.constant dense<0.000000e+00> : vector<8x16x16xf32>
    %395 = tpu.matmul %360, %377, %cst_125 {dimension_numbers = #tpu.dot_dimension_numbers<[2], [2], [1], [1], [0, 0, 0, 1, 1, 1], [0], [0]>} : vector<8x16x16xf32>, vector<8x16x16xf32>, vector<8x16x16xf32> -> vector<8x16x16xf32>
    "tpu.trace_stop"() : () -> ()
    %cst_126 = arith.constant 2.500000e-01 : f32
    %396 = vector.broadcast %cst_126 : f32 to vector<8x16x16xf32>
    %397 = arith.mulf %395, %396 : vector<8x16x16xf32>
    %398 = vector.shape_cast %8 : vector<16x16xf32> to vector<1x16x16xf32>
    %399 = vector.broadcast %398 : vector<1x16x16xf32> to vector<8x16x16xf32>
    %400 = arith.addf %397, %399 : vector<8x16x16xf32>
    %cst_127 = arith.constant dense<0xFF800000> : vector<8x16xf32>
    %401 = vector.multi_reduction <maximumf>, %400, %cst_127 [2] : vector<8x16x16xf32> to vector<8x16xf32>
    %402 = vector.shape_cast %401 : vector<8x16xf32> to vector<8x16x1xf32>
    %403 = vector.broadcast %402 : vector<8x16x1xf32> to vector<8x16x16xf32>
    %404 = arith.subf %400, %403 : vector<8x16x16xf32>
    %405 = math.exp %404 : vector<8x16x16xf32>
    %cst_128 = arith.constant dense<0.000000e+00> : vector<8x16xf32>
    %406 = vector.multi_reduction <add>, %405, %cst_128 [2] : vector<8x16x16xf32> to vector<8x16xf32>
    %407 = vector.shape_cast %406 : vector<8x16xf32> to vector<8x16x1xf32>
    %408 = vector.broadcast %407 : vector<8x16x1xf32> to vector<8x16x16xf32>
    %409 = arith.divf %405, %408 : vector<8x16x16xf32>
    "tpu.trace_start"() <{level = 10 : i32, message = "hqk,hkd->hqd"}> : () -> ()
    %cst_129 = arith.constant dense<0.000000e+00> : vector<8x16x16xf32>
    %410 = tpu.matmul %409, %394, %cst_129 {dimension_numbers = #tpu.dot_dimension_numbers<[2], [1], [1], [2], [0, 0, 0, 1, 1, 2], [0], [0]>} : vector<8x16x16xf32>, vector<8x16x16xf32>, vector<8x16x16xf32> -> vector<8x16x16xf32>
    "tpu.trace_stop"() : () -> ()
    %411 = vector.extract_strided_slice %410 {offsets = [0, 0, 0], sizes = [1, 16, 16], strides = [1, 1, 1]} : vector<8x16x16xf32> to vector<1x16x16xf32>
    %412 = vector.shape_cast %411 : vector<1x16x16xf32> to vector<16x16xf32>
    %413 = vector.extract_strided_slice %410 {offsets = [1, 0, 0], sizes = [1, 16, 16], strides = [1, 1, 1]} : vector<8x16x16xf32> to vector<1x16x16xf32>
    %414 = vector.shape_cast %413 : vector<1x16x16xf32> to vector<16x16xf32>
    %415 = vector.extract_strided_slice %410 {offsets = [2, 0, 0], sizes = [1, 16, 16], strides = [1, 1, 1]} : vector<8x16x16xf32> to vector<1x16x16xf32>
    %416 = vector.shape_cast %415 : vector<1x16x16xf32> to vector<16x16xf32>
    %417 = vector.extract_strided_slice %410 {offsets = [3, 0, 0], sizes = [1, 16, 16], strides = [1, 1, 1]} : vector<8x16x16xf32> to vector<1x16x16xf32>
    %418 = vector.shape_cast %417 : vector<1x16x16xf32> to vector<16x16xf32>
    %419 = vector.extract_strided_slice %410 {offsets = [4, 0, 0], sizes = [1, 16, 16], strides = [1, 1, 1]} : vector<8x16x16xf32> to vector<1x16x16xf32>
    %420 = vector.shape_cast %419 : vector<1x16x16xf32> to vector<16x16xf32>
    %421 = vector.extract_strided_slice %410 {offsets = [5, 0, 0], sizes = [1, 16, 16], strides = [1, 1, 1]} : vector<8x16x16xf32> to vector<1x16x16xf32>
    %422 = vector.shape_cast %421 : vector<1x16x16xf32> to vector<16x16xf32>
    %423 = vector.extract_strided_slice %410 {offsets = [6, 0, 0], sizes = [1, 16, 16], strides = [1, 1, 1]} : vector<8x16x16xf32> to vector<1x16x16xf32>
    %424 = vector.shape_cast %423 : vector<1x16x16xf32> to vector<16x16xf32>
    %425 = vector.extract_strided_slice %410 {offsets = [7, 0, 0], sizes = [1, 16, 16], strides = [1, 1, 1]} : vector<8x16x16xf32> to vector<1x16x16xf32>
    %426 = vector.shape_cast %425 : vector<1x16x16xf32> to vector<16x16xf32>
    %427 = tpu.concatenate %412, %414, %416, %418, %420, %422, %424, %426 in 1 : vector<16x16xf32>, vector<16x16xf32>, vector<16x16xf32>, vector<16x16xf32>, vector<16x16xf32>, vector<16x16xf32>, vector<16x16xf32>, vector<16x16xf32> -> vector<16x128xf32>
    %c2_130 = arith.constant 2 : index
    %c0_131 = arith.constant 0 : index
    %c0_132 = arith.constant 0 : index
    %428 = vector.load %arg7[%c2_130, %c0_131, %c0_132] : memref<3x128x128xf32, #tpu.memory_space<vmem>>, vector<1x128x128xf32>
    %429 = vector.shape_cast %428 : vector<1x128x128xf32> to vector<128x128xf32>
    %cst_133 = arith.constant dense<0.000000e+00> : vector<16x128xf32>
    %430 = tpu.matmul %427, %429, %cst_133 {dimension_numbers = #tpu.dot_dimension_numbers<[1], [0], [0], [1], [0, 0, 1, 1], [], []>} : vector<16x128xf32>, vector<128x128xf32>, vector<16x128xf32> -> vector<16x128xf32>
    %c2_134 = arith.constant 2 : index
    %c0_135 = arith.constant 0 : index
    %c0_136 = arith.constant 0 : index
    %431 = vector.load %arg8[%c2_134, %c0_135, %c0_136] : memref<3x1x128xf32, #tpu.memory_space<vmem>>, vector<1x1x128xf32>
    %432 = vector.shape_cast %431 : vector<1x1x128xf32> to vector<1x128xf32>
    %433 = vector.broadcast %432 : vector<1x128xf32> to vector<16x128xf32>
    %434 = arith.addf %430, %433 : vector<16x128xf32>
    %435 = arith.addf %336, %434 : vector<16x128xf32>
    %c2_137 = arith.constant 2 : index
    %c0_138 = arith.constant 0 : index
    %c0_139 = arith.constant 0 : index
    %436 = vector.load %arg13[%c2_137, %c0_138, %c0_139] : memref<3x1x128xf32, #tpu.memory_space<vmem>>, vector<1x1x128xf32>
    %437 = vector.shape_cast %436 : vector<1x1x128xf32> to vector<1x128xf32>
    %c2_140 = arith.constant 2 : index
    %c0_141 = arith.constant 0 : index
    %c0_142 = arith.constant 0 : index
    %438 = vector.load %arg14[%c2_140, %c0_141, %c0_142] : memref<3x1x128xf32, #tpu.memory_space<vmem>>, vector<1x1x128xf32>
    %439 = vector.shape_cast %438 : vector<1x1x128xf32> to vector<1x128xf32>
    %cst_143 = arith.constant dense<0.000000e+00> : vector<16xf32>
    %440 = vector.multi_reduction <add>, %435, %cst_143 [1] : vector<16x128xf32> to vector<16xf32>
    %441 = vector.shape_cast %440 : vector<16xf32> to vector<16x1xf32>
    %cst_144 = arith.constant 1.280000e+02 : f32
    %442 = vector.broadcast %cst_144 : f32 to vector<16x1xf32>
    %443 = arith.divf %441, %442 : vector<16x1xf32>
    %444 = vector.broadcast %443 : vector<16x1xf32> to vector<16x128xf32>
    %445 = arith.subf %435, %444 : vector<16x128xf32>
    %446 = arith.mulf %445, %445 : vector<16x128xf32>
    %cst_145 = arith.constant dense<0.000000e+00> : vector<16xf32>
    %447 = vector.multi_reduction <add>, %446, %cst_145 [1] : vector<16x128xf32> to vector<16xf32>
    %448 = vector.shape_cast %447 : vector<16xf32> to vector<16x1xf32>
    %cst_146 = arith.constant 1.280000e+02 : f32
    %449 = vector.broadcast %cst_146 : f32 to vector<16x1xf32>
    %450 = arith.divf %448, %449 : vector<16x1xf32>
    %cst_147 = arith.constant 9.99999974E-6 : f32
    %451 = vector.broadcast %cst_147 : f32 to vector<16x1xf32>
    %452 = arith.addf %450, %451 : vector<16x1xf32>
    %453 = math.rsqrt %452 : vector<16x1xf32>
    %454 = vector.broadcast %453 : vector<16x1xf32> to vector<16x128xf32>
    %455 = arith.mulf %445, %454 : vector<16x128xf32>
    %456 = vector.broadcast %437 : vector<1x128xf32> to vector<16x128xf32>
    %457 = arith.mulf %455, %456 : vector<16x128xf32>
    %458 = vector.broadcast %439 : vector<1x128xf32> to vector<16x128xf32>
    %459 = arith.addf %457, %458 : vector<16x128xf32>
    %c2_148 = arith.constant 2 : index
    %c0_149 = arith.constant 0 : index
    %c0_150 = arith.constant 0 : index
    %460 = vector.load %arg9[%c2_148, %c0_149, %c0_150] : memref<3x128x512xf32, #tpu.memory_space<vmem>>, vector<1x128x512xf32>
    %461 = vector.shape_cast %460 : vector<1x128x512xf32> to vector<128x512xf32>
    %cst_151 = arith.constant dense<0.000000e+00> : vector<16x512xf32>
    %462 = tpu.matmul %459, %461, %cst_151 {dimension_numbers = #tpu.dot_dimension_numbers<[1], [0], [0], [1], [0, 0, 1, 1], [], []>} : vector<16x128xf32>, vector<128x512xf32>, vector<16x512xf32> -> vector<16x512xf32>
    %c2_152 = arith.constant 2 : index
    %c0_153 = arith.constant 0 : index
    %c0_154 = arith.constant 0 : index
    %463 = vector.load %arg10[%c2_152, %c0_153, %c0_154] : memref<3x1x512xf32, #tpu.memory_space<vmem>>, vector<1x1x512xf32>
    %464 = vector.shape_cast %463 : vector<1x1x512xf32> to vector<1x512xf32>
    %465 = vector.broadcast %464 : vector<1x512xf32> to vector<16x512xf32>
    %466 = arith.addf %462, %465 : vector<16x512xf32>
    %cst_155 = arith.constant 0.000000e+00 : f32
    %467 = vector.broadcast %cst_155 : f32 to vector<16x512xf32>
    %468 = arith.maximumf %466, %467 : vector<16x512xf32>
    %c2_156 = arith.constant 2 : index
    %c0_157 = arith.constant 0 : index
    %c0_158 = arith.constant 0 : index
    %469 = vector.load %arg11[%c2_156, %c0_157, %c0_158] : memref<3x512x128xf32, #tpu.memory_space<vmem>>, vector<1x512x128xf32>
    %470 = vector.shape_cast %469 : vector<1x512x128xf32> to vector<512x128xf32>
    %cst_159 = arith.constant dense<0.000000e+00> : vector<16x128xf32>
    %471 = tpu.matmul %468, %470, %cst_159 {dimension_numbers = #tpu.dot_dimension_numbers<[1], [0], [0], [1], [0, 0, 1, 1], [], []>} : vector<16x512xf32>, vector<512x128xf32>, vector<16x128xf32> -> vector<16x128xf32>
    %c2_160 = arith.constant 2 : index
    %c0_161 = arith.constant 0 : index
    %c0_162 = arith.constant 0 : index
    %472 = vector.load %arg12[%c2_160, %c0_161, %c0_162] : memref<3x1x128xf32, #tpu.memory_space<vmem>>, vector<1x1x128xf32>
    %473 = vector.shape_cast %472 : vector<1x1x128xf32> to vector<1x128xf32>
    %474 = vector.broadcast %473 : vector<1x128xf32> to vector<16x128xf32>
    %475 = arith.addf %471, %474 : vector<16x128xf32>
    %476 = arith.addf %459, %475 : vector<16x128xf32>
    %c2_163 = arith.constant 2 : index
    %c0_164 = arith.constant 0 : index
    %c0_165 = arith.constant 0 : index
    %477 = vector.load %arg15[%c2_163, %c0_164, %c0_165] : memref<3x1x128xf32, #tpu.memory_space<vmem>>, vector<1x1x128xf32>
    %478 = vector.shape_cast %477 : vector<1x1x128xf32> to vector<1x128xf32>
    %c2_166 = arith.constant 2 : index
    %c0_167 = arith.constant 0 : index
    %c0_168 = arith.constant 0 : index
    %479 = vector.load %arg16[%c2_166, %c0_167, %c0_168] : memref<3x1x128xf32, #tpu.memory_space<vmem>>, vector<1x1x128xf32>
    %480 = vector.shape_cast %479 : vector<1x1x128xf32> to vector<1x128xf32>
    %cst_169 = arith.constant dense<0.000000e+00> : vector<16xf32>
    %481 = vector.multi_reduction <add>, %476, %cst_169 [1] : vector<16x128xf32> to vector<16xf32>
    %482 = vector.shape_cast %481 : vector<16xf32> to vector<16x1xf32>
    %cst_170 = arith.constant 1.280000e+02 : f32
    %483 = vector.broadcast %cst_170 : f32 to vector<16x1xf32>
    %484 = arith.divf %482, %483 : vector<16x1xf32>
    %485 = vector.broadcast %484 : vector<16x1xf32> to vector<16x128xf32>
    %486 = arith.subf %476, %485 : vector<16x128xf32>
    %487 = arith.mulf %486, %486 : vector<16x128xf32>
    %cst_171 = arith.constant dense<0.000000e+00> : vector<16xf32>
    %488 = vector.multi_reduction <add>, %487, %cst_171 [1] : vector<16x128xf32> to vector<16xf32>
    %489 = vector.shape_cast %488 : vector<16xf32> to vector<16x1xf32>
    %cst_172 = arith.constant 1.280000e+02 : f32
    %490 = vector.broadcast %cst_172 : f32 to vector<16x1xf32>
    %491 = arith.divf %489, %490 : vector<16x1xf32>
    %cst_173 = arith.constant 9.99999974E-6 : f32
    %492 = vector.broadcast %cst_173 : f32 to vector<16x1xf32>
    %493 = arith.addf %491, %492 : vector<16x1xf32>
    %494 = math.rsqrt %493 : vector<16x1xf32>
    %495 = vector.broadcast %494 : vector<16x1xf32> to vector<16x128xf32>
    %496 = arith.mulf %486, %495 : vector<16x128xf32>
    %497 = vector.broadcast %478 : vector<1x128xf32> to vector<16x128xf32>
    %498 = arith.mulf %496, %497 : vector<16x128xf32>
    %499 = vector.broadcast %480 : vector<1x128xf32> to vector<16x128xf32>
    %500 = arith.addf %498, %499 : vector<16x128xf32>
    %c0_174 = arith.constant 0 : index
    %c0_175 = arith.constant 0 : index
    %501 = vector.load %arg17[%c0_174, %c0_175] : memref<1x128xf32, #tpu.memory_space<vmem>>, vector<1x128xf32>
    %502 = vector.broadcast %501 : vector<1x128xf32> to vector<16x128xf32>
    %503 = arith.mulf %500, %502 : vector<16x128xf32>
    %cst_176 = arith.constant dense<0.000000e+00> : vector<16xf32>
    %504 = vector.multi_reduction <add>, %503, %cst_176 [1] : vector<16x128xf32> to vector<16xf32>
    %505 = vector.shape_cast %504 : vector<16xf32> to vector<1x16xf32>
    %c0_177 = arith.constant 0 : index
    %c0_178 = arith.constant 0 : index
    %506 = vector.load %arg18[%c0_177, %c0_178] : memref<1x1xf32, #tpu.memory_space<vmem>>, vector<1x1xf32>
    %507 = vector.broadcast %506 : vector<1x1xf32> to vector<1x16xf32>
    %508 = arith.addf %505, %507 : vector<1x16xf32>
    %c0_179 = arith.constant 0 : index
    %c0_180 = arith.constant 0 : index
    %509 = vector.load %arg19[%c0_179, %c0_180] : memref<1x16xf32, #tpu.memory_space<vmem>>, vector<1x16xf32>
    tpu.vector_store %arg19[%c0_179, %c0_180], %508 {strides = array<i32>} : memref<1x16xf32, #tpu.memory_space<vmem>>, vector<1x16xf32>,
    return
  }
  func.func @transform_0(%arg0: i32) -> (i32, i32) {
    %c0_i32 = arith.constant 0 : i32
    %c0_i32_0 = arith.constant 0 : i32
    %c0_i32_1 = arith.constant 0 : i32
    return %c0_i32, %c0_i32_0 : i32, i32
  }
  func.func @transform_1(%arg0: i32) -> (i32, i32) {
    %c0_i32 = arith.constant 0 : i32
    %c0_i32_0 = arith.constant 0 : i32
    %c0_i32_1 = arith.constant 0 : i32
    return %c0_i32, %c0_i32_0 : i32, i32
  }
  func.func @transform_2(%arg0: i32) -> (i32, i32) {
    %c0_i32 = arith.constant 0 : i32
    %c0_i32_0 = arith.constant 0 : i32
    %c0_i32_1 = arith.constant 0 : i32
    return %c0_i32, %c0_i32_0 : i32, i32
  }
  func.func @transform_3(%arg0: i32) -> (i32, i32) {
    %c0_i32 = arith.constant 0 : i32
    %c0_i32_0 = arith.constant 0 : i32
    %c0_i32_1 = arith.constant 0 : i32
    return %c0_i32, %c0_i32_0 : i32, i32
  }
  func.func @transform_4(%arg0: i32) -> (i32, i32, i32) {
    %c0_i32 = arith.constant 0 : i32
    %c0_i32_0 = arith.constant 0 : i32
    %c0_i32_1 = arith.constant 0 : i32
    %c0_i32_2 = arith.constant 0 : i32
    return %c0_i32, %c0_i32_0, %c0_i32_1 : i32, i32, i32
  }
  func.func @transform_5(%arg0: i32) -> (i32, i32, i32) {
    %c0_i32 = arith.constant 0 : i32
    %c0_i32_0 = arith.constant 0 : i32
    %c0_i32_1 = arith.constant 0 : i32
    %c0_i32_2 = arith.constant 0 : i32
    return %c0_i32, %c0_i32_0, %c0_i32_1 : i32, i32, i32
  }
  func.func @transform_6(%arg0: i32) -> (i32, i32, i32) {
    %c0_i32 = arith.constant 0 : i32
    %c0_i32_0 = arith.constant 0 : i32
    %c0_i32_1 = arith.constant 0 : i32
    %c0_i32_2 = arith.constant 0 : i32
    return %c0_i32, %c0_i32_0, %c0_i32_1 : i32, i32, i32
  }
  func.func @transform_7(%arg0: i32) -> (i32, i32, i32) {
    %c0_i32 = arith.constant 0 : i32
    %c0_i32_0 = arith.constant 0 : i32
    %c0_i32_1 = arith.constant 0 : i32
    %c0_i32_2 = arith.constant 0 : i32
    return %c0_i32, %c0_i32_0, %c0_i32_1 : i32, i32, i32
  }
  func.func @transform_8(%arg0: i32) -> (i32, i32, i32) {
    %c0_i32 = arith.constant 0 : i32
    %c0_i32_0 = arith.constant 0 : i32
    %c0_i32_1 = arith.constant 0 : i32
    %c0_i32_2 = arith.constant 0 : i32
    return %c0_i32, %c0_i32_0, %c0_i32_1 : i32, i32, i32
  }
  func.func @transform_9(%arg0: i32) -> (i32, i32, i32) {
    %c0_i32 = arith.constant 0 : i32
    %c0_i32_0 = arith.constant 0 : i32
    %c0_i32_1 = arith.constant 0 : i32
    %c0_i32_2 = arith.constant 0 : i32
    return %c0_i32, %c0_i32_0, %c0_i32_1 : i32, i32, i32
  }
  func.func @transform_10(%arg0: i32) -> (i32, i32, i32) {
    %c0_i32 = arith.constant 0 : i32
    %c0_i32_0 = arith.constant 0 : i32
    %c0_i32_1 = arith.constant 0 : i32
    %c0_i32_2 = arith.constant 0 : i32
    return %c0_i32, %c0_i32_0, %c0_i32_1 : i32, i32, i32
  }
  func.func @transform_11(%arg0: i32) -> (i32, i32, i32) {
    %c0_i32 = arith.constant 0 : i32
    %c0_i32_0 = arith.constant 0 : i32
    %c0_i32_1 = arith.constant 0 : i32
    %c0_i32_2 = arith.constant 0 : i32
    return %c0_i32, %c0_i32_0, %c0_i32_1 : i32, i32, i32
  }
  func.func @transform_12(%arg0: i32) -> (i32, i32, i32) {
    %c0_i32 = arith.constant 0 : i32
    %c0_i32_0 = arith.constant 0 : i32
    %c0_i32_1 = arith.constant 0 : i32
    %c0_i32_2 = arith.constant 0 : i32
    return %c0_i32, %c0_i32_0, %c0_i32_1 : i32, i32, i32
  }
  func.func @transform_13(%arg0: i32) -> (i32, i32, i32) {
    %c0_i32 = arith.constant 0 : i32
    %c0_i32_0 = arith.constant 0 : i32
    %c0_i32_1 = arith.constant 0 : i32
    %c0_i32_2 = arith.constant 0 : i32
    return %c0_i32, %c0_i32_0, %c0_i32_1 : i32, i32, i32
  }
  func.func @transform_14(%arg0: i32) -> (i32, i32, i32) {
    %c0_i32 = arith.constant 0 : i32
    %c0_i32_0 = arith.constant 0 : i32
    %c0_i32_1 = arith.constant 0 : i32
    %c0_i32_2 = arith.constant 0 : i32
    return %c0_i32, %c0_i32_0, %c0_i32_1 : i32, i32, i32
  }
  func.func @transform_15(%arg0: i32) -> (i32, i32, i32) {
    %c0_i32 = arith.constant 0 : i32
    %c0_i32_0 = arith.constant 0 : i32
    %c0_i32_1 = arith.constant 0 : i32
    %c0_i32_2 = arith.constant 0 : i32
    return %c0_i32, %c0_i32_0, %c0_i32_1 : i32, i32, i32
  }
  func.func @transform_16(%arg0: i32) -> (i32, i32) {
    %c0_i32 = arith.constant 0 : i32
    %c0_i32_0 = arith.constant 0 : i32
    %c0_i32_1 = arith.constant 0 : i32
    return %c0_i32, %c0_i32_0 : i32, i32
  }
  func.func @transform_17(%arg0: i32) -> (i32, i32) {
    %c0_i32 = arith.constant 0 : i32
    %c0_i32_0 = arith.constant 0 : i32
    %c0_i32_1 = arith.constant 0 : i32
    return %c0_i32, %c0_i32_0 : i32, i32
  }
  func.func @transform_18(%arg0: i32) -> (i32, i32) {
    %c0_i32 = arith.constant 0 : i32
    %c0_i32_0 = arith.constant 0 : i32
    %c0_i32_1 = arith.constant 0 : i32
    return %c0_i32, %c0_i32_0 : i32, i32
  }
}

</mosaic_0001>

<bundles_post_ra>
// kernel: tpu_custom_call.1
= control target key start
LH: loop header
LB: loop body
LE: loop exit
PB: predicated region body
PF: predicated region fallthrough
CT: control target
= control target key end

     0   :  { %s12475_s0 = inlined_call_operand.hbm [shape: f32[16,16], index: 0, kind: input, shape index: {}]   ;;  %s12476_s1 = inlined_call_operand.hbm [shape: f32[16,16], index: 1, kind: input, shape index: {}]   ;;  %s12477_s2 = inlined_call_operand.hbm [shape: f32[16,128], index: 2, kind: input, shape index: {}]   ;;  %s12478_s3 = inlined_call_operand.hbm [shape: f32[1,128], index: 3, kind: input, shape index: {}]   ;;  %s12479_s4 = inlined_call_operand.hbm [shape: f32[3,128,384], index: 4, kind: input, shape index: {}]   ;;  %s12480_s5 = inlined_call_operand.vmem [shape: f32[3,1,384], index: 5, kind: input, shape index: {}]   ;;  %s12481_s6 = inlined_call_operand.hbm [shape: f32[3,128,128], index: 6, kind: input, shape index: {}]   ;;  %s12482_s7 = inlined_call_operand.vmem [shape: f32[3,1,128], index: 7, kind: input, shape index: {}]   ;;  %s12483_s8 = inlined_call_operand.hbm [shape: f32[3,128,512], index: 8, kind: input, shape index: {}]   ;;  %s12484_s9 = inlined_call_operand.vmem [shape: f32[3,1,512], index: 9, kind: input, shape index: {}]   ;;  %s12485_s10 = inlined_call_operand.hbm [shape: f32[3,512,128], index: 10, kind: input, shape index: {}]   ;;  %s12486_s11 = inlined_call_operand.vmem [shape: f32[3,1,128], index: 11, kind: input, shape index: {}]   ;;  %s12487_s12 = inlined_call_operand.vmem [shape: f32[3,1,128], index: 12, kind: input, shape index: {}]   ;;  %s12488_s13 = inlined_call_operand.vmem [shape: f32[3,1,128], index: 13, kind: input, shape index: {}]   ;;  %s12489_s14 = inlined_call_operand.vmem [shape: f32[3,1,128], index: 14, kind: input, shape index: {}]   ;;  %s12490_s15 = inlined_call_operand.vmem [shape: f32[3,1,128], index: 15, kind: input, shape index: {}]   ;;  %s12491_s16 = inlined_call_operand.vmem [shape: f32[1,128], index: 16, kind: input, shape index: {}]   ;;  %s12492_s17 = inlined_call_operand.<no memory space> [shape: f32[1,1], index: 17, kind: input, shape index: {}]   ;;  %s12493_s18 = inlined_call_operand.hbm [shape: f32[1,16], index: 18, kind: output, shape index: {}]  }
   0x1   :  { %12497 = sst [smem:[#allocation24_spill]] %s12475_s0  ;;  %v23_v0 = vstv %s12492_s17 }
   0x2   :  { %12498 = sst [smem:[#allocation25_spill]] %s12476_s1  ;;  %24 = vst [vmem:[#allocation2] sm:$0x1] %v23_v0 }
   0x3   :  { %12499 = sst [smem:[#allocation26_spill]] %s12477_s2 }
   0x4   :  { %25 = vsyncpa [#allocation4], 0 }
   0x5   :  { %26 = vsyncpa [#allocation7], 0 }
   0x6   :  { %27 = vsyncpa [#allocation10], 0 }
   0x7   :  { %28 = vsyncpa [#allocation13], 0 }
   0x8   :  { %29 = vsyncpa [#allocation16], 0 }
   0x9   :  { %30 = vsyncpa [#allocation5], 0  ;;  %s10997_s29 = smov [#allocation6]   ;;  %s10998_s0 = smov [#allocation9]  }
   0xa   :  { %s48_s30 = sshll.u32 %s10997_s29, 4  ;;  %s73_s19 = sshll.u32 %s10998_s0, 4  ;;  %s49_s30 = int_to_ptr.vmem [resolvable:$true] %s48_s30  ;;  %s11118_s19 = int_to_ptr.vmem [resolvable:$true] %s73_s19 }
   0xb   :  { %s12500_s21 = sld [smem:[#allocation25_spill]] }
  0x11   :  { %s10787_s22 = scalar_lea.hbm %s12500_s21, 256 }
  0x12   :  { %p10788_p0 = scmp.ne.s32.totalorder %s12500_s21, %s10787_s22  ;;  %p10791_p1 = scmp.lt.u32.totalorder %s10787_s22, %s12500_s21 }
  0x14   :  { %p10793_p2 = pnand %p10791_p1, %p10788_p0 }
  0x16   :  { %10796 = shalt.err (!%p10793_p2)
}
  0x17   :  { %s10797_s25 = scalar_lea.vmem %s49_s30, 256  ;;  %p10802_p4 = scmp.lt.s32.totalorder %s49_s30, %s49_s30 }
  0x18   :  { %p10798_p3 = scmp.ne.s32.totalorder %s49_s30, %s10797_s25  ;;  %p10803_p5 = scmp.lt.s32.totalorder %s10797_s25, %s10797_s25 }
  0x1a   :  { %p10804_p6 = por %p10803_p5, %p10802_p4 }
  0x1c   :  { %p10805_p7 = pnand %p10804_p6, %p10798_p3 }
  0x1e   :  { %10808 = shalt.err (!%p10805_p7)
}
  0x1f   :  { %s10999_s26 = smov 128   ;;  %s11000_s27 = smov 8  }
  0x20   :  { %54 = dma.hbm_to_vmem [thread:$0]  %s12500_s21, 256, %s49_s30, [#allocation7], %s10999_s26, %s10999_s26, %s11000_s27  }
  0x21   :  { %s10809_s20 = scalar_lea.hbm %s12478_s3, 16 }
  0x22   :  { %p10810_p8 = scmp.ne.s32.totalorder %s12478_s3, %s10809_s20  ;;  %p10813_p9 = scmp.lt.u32.totalorder %s10809_s20, %s12478_s3 }
  0x24   :  { %p10815_p10 = pnand %p10813_p9, %p10810_p8 }
  0x26   :  { %10818 = shalt.err (!%p10815_p10)
}
  0x27   :  { %s10819_s24 = scalar_lea.vmem %s11118_s19, 16  ;;  %s10823_s30 = scalar_lea.vmem %s11118_s19, 32 }
  0x28   :  { %p10820_p11 = scmp.ne.s32.totalorder %s11118_s19, %s10819_s24  ;;  %p10824_p12 = scmp.lt.s32.totalorder %s11118_s19, %s11118_s19 }
  0x29   :  { %p10825_p13 = scmp.lt.s32.totalorder %s10823_s30, %s10819_s24 }
  0x2b   :  { %p10826_p0 = por %p10825_p13, %p10824_p12 }
  0x2d   :  { %p10827_p1 = pnand %p10826_p0, %p10820_p11 }
  0x2f   :  { %10830 = shalt.err (!%p10827_p1)
}
  0x30   :  { %76 = dma.hbm_to_vmem [thread:$0]  %s12478_s3, 16, %s11118_s19, [#allocation10]  }
  0x31   :  { %s11001_s28 = smov [#allocation12]   ;;  %s11002_s0 = smov [#allocation3]  }
  0x32   :  { %s96_s29 = sshll.u32 %s11001_s28, 4  ;;  %s36_s1 = sshll.u32 %s11002_s0, 4  ;;  %s97_s29 = int_to_ptr.vmem [resolvable:$true] %s96_s29  ;;  %s11153_s1 = int_to_ptr.vmem [resolvable:$true] %s36_s1 }
  0x33   :  { %s10831_s2 = scalar_lea.hbm %s12481_s6, 6144 }
  0x34   :  { %p10832_p2 = scmp.ne.s32.totalorder %s12481_s6, %s10831_s2  ;;  %p10835_p3 = scmp.lt.u32.totalorder %s10831_s2, %s12481_s6 }
  0x36   :  { %p10837_p4 = pnand %p10835_p3, %p10832_p2 }
  0x38   :  { %10840 = shalt.err (!%p10837_p4)
}
  0x39   :  { %s10841_s3 = scalar_lea.vmem %s97_s29, 6144  ;;  %p10846_p6 = scmp.lt.s32.totalorder %s97_s29, %s97_s29 }
  0x3a   :  { %p10842_p5 = scmp.ne.s32.totalorder %s97_s29, %s10841_s3  ;;  %p10847_p7 = scmp.lt.s32.totalorder %s10841_s3, %s10841_s3 }
  0x3c   :  { %p10848_p8 = por %p10847_p7, %p10846_p6 }
  0x3e   :  { %p10849_p9 = pnand %p10848_p8, %p10842_p5 }
  0x40   :  { %10852 = shalt.err (!%p10849_p9)
}
  0x41   :  { %102 = dma.hbm_to_vmem [thread:$0]  %s12481_s6, 6144, %s97_s29, [#allocation13], %s10999_s26, %s10999_s26, %s11000_s27  }
  0x42   :  { %s12501_s0 = sld [smem:[#allocation24_spill]] }
  0x48   :  { %s10853_s20 = scalar_lea.hbm %s12501_s0, 256 }
  0x49   :  { %p10854_p10 = scmp.ne.s32.totalorder %s12501_s0, %s10853_s20  ;;  %p10857_p11 = scmp.lt.u32.totalorder %s10853_s20, %s12501_s0 }
  0x4b   :  { %p10859_p12 = pnand %p10857_p11, %p10854_p10 }
  0x4d   :  { %10862 = shalt.err (!%p10859_p12)
}
  0x4e   :  { %s10863_s24 = scalar_lea.vmem %s11153_s1, 256  ;;  %p10868_p0 = scmp.lt.s32.totalorder %s11153_s1, %s11153_s1 }
  0x4f   :  { %p10864_p13 = scmp.ne.s32.totalorder %s11153_s1, %s10863_s24  ;;  %p10869_p1 = scmp.lt.s32.totalorder %s10863_s24, %s10863_s24 }
  0x51   :  { %p10870_p2 = por %p10869_p1, %p10868_p0 }
  0x53   :  { %p10871_p3 = pnand %p10870_p2, %p10864_p13 }
  0x55   :  { %10874 = shalt.err (!%p10871_p3)
}
  0x56   :  { %42 = dma.hbm_to_vmem [thread:$0]  %s12501_s0, 256, %s11153_s1, [#allocation4], %s10999_s26, %s10999_s26, %s11000_s27  }
  0x57   :  { %s11003_s30 = smov [#allocation8]   ;;  %s11004_s19 = smov [#allocation11]  }
  0x58   :  { %s60_s3 = sshll.u32 %s11003_s30, 4  ;;  %s82_s21 = sshll.u32 %s11004_s19, 4  ;;  %s61_s3 = int_to_ptr.vmem [resolvable:$true] %s60_s3  ;;  %s11190_s21 = int_to_ptr.vmem [resolvable:$true] %s82_s21 }
  0x59   :  { %s12502_s20 = sld [smem:[#allocation26_spill]] }
  0x5f   :  { %s10875_s22 = scalar_lea.hbm %s12502_s20, 256 }
  0x60   :  { %p10876_p4 = scmp.ne.s32.totalorder %s12502_s20, %s10875_s22  ;;  %p10879_p5 = scmp.lt.u32.totalorder %s10875_s22, %s12502_s20 }
  0x62   :  { %p10881_p6 = pnand %p10879_p5, %p10876_p4 }
  0x64   :  { %10884 = shalt.err (!%p10881_p6)
}
  0x65   :  { %s10885_s1 = scalar_lea.vmem %s61_s3, 256  ;;  %p10890_p8 = scmp.lt.s32.totalorder %s61_s3, %s61_s3 }
  0x66   :  { %p10886_p7 = scmp.ne.s32.totalorder %s61_s3, %s10885_s1  ;;  %p10891_p9 = scmp.lt.s32.totalorder %s10885_s1, %s10885_s1 }
  0x68   :  { %p10892_p10 = por %p10891_p9, %p10890_p8 }
  0x6a   :  { %p10893_p11 = pnand %p10892_p10, %p10886_p7 }
  0x6c   :  { %10896 = shalt.err (!%p10893_p11)
}
  0x6d   :  { %66 = dma.hbm_to_vmem [thread:$0]  %s12502_s20, 256, %s61_s3, [#allocation7], %s10999_s26, %s10999_s26, %s11000_s27  }
  0x6e   :  { %s10897_s19 = scalar_lea.hbm %s12479_s4, 18432 }
  0x6f   :  { %p10898_p12 = scmp.ne.s32.totalorder %s12479_s4, %s10897_s19  ;;  %p10901_p13 = scmp.lt.u32.totalorder %s10897_s19, %s12479_s4 }
  0x71   :  { %p10903_p0 = pnand %p10901_p13, %p10898_p12 }
  0x73   :  { %10906 = shalt.err (!%p10903_p0)
}
  0x74   :  { %s10907_s17 = scalar_lea.vmem %s11190_s21, 18432  ;;  %p10912_p2 = scmp.lt.s32.totalorder %s11190_s21, %s11190_s21 }
  0x75   :  { %p10908_p1 = scmp.ne.s32.totalorder %s11190_s21, %s10907_s17  ;;  %p10913_p3 = scmp.lt.s32.totalorder %s10907_s17, %s10907_s17 }
  0x77   :  { %p10914_p4 = por %p10913_p3, %p10912_p2 }
  0x79   :  { %p10915_p5 = pnand %p10914_p4, %p10908_p1 }
  0x7b   :  { %10918 = shalt.err (!%p10915_p5)
}
  0x7c   :  { %s11005_s3 = smov 384   ;;  %s11006_s20 = smov 24  }
  0x7d   :  { %88 = dma.hbm_to_vmem [thread:$0]  %s12479_s4, 18432, %s11190_s21, [#allocation10], %s11005_s3, %s11005_s3, %s11006_s20  }
  0x7e   :  { %s11007_s1 = smov [#allocation14]   ;;  %s10919_s30 = scalar_lea.hbm %s12483_s8, 24576 }
  0x7f   :  { %s110_s0 = sshll.u32 %s11007_s1, 4  ;;  %p10920_p6 = scmp.ne.s32.totalorder %s12483_s8, %s10919_s30  ;;  %s111_s0 = int_to_ptr.vmem [resolvable:$true] %s110_s0 }
  0x80   :  { %p10923_p7 = scmp.lt.u32.totalorder %s10919_s30, %s12483_s8 }
  0x82   :  { %p10925_p8 = pnand %p10923_p7, %p10920_p6 }
  0x84   :  { %10928 = shalt.err (!%p10925_p8)
}
  0x85   :  { %s10929_s2 = scalar_lea.vmem %s111_s0, 24576  ;;  %p10934_p10 = scmp.lt.s32.totalorder %s111_s0, %s111_s0 }
  0x86   :  { %p10930_p9 = scmp.ne.s32.totalorder %s111_s0, %s10929_s2  ;;  %p10935_p11 = scmp.lt.s32.totalorder %s10929_s2, %s10929_s2 }
  0x88   :  { %p10936_p12 = por %p10935_p11, %p10934_p10 }
  0x8a   :  { %p10937_p13 = pnand %p10936_p12, %p10930_p9 }
  0x8c   :  { %10940 = shalt.err (!%p10937_p13)
}
  0x8d   :  { %s11008_s4 = smov 512   ;;  %s11009_s21 = smov 32  }
  0x8e   :  { %116 = dma.hbm_to_vmem [thread:$0]  %s12483_s8, 24576, %s111_s0, [#allocation13], %s11008_s4, %s11008_s4, %s11009_s21  }
  0x8f   :  { %s11010_s20 = smov [#allocation15]   ;;  %s10941_s6 = scalar_lea.hbm %s12485_s10, 24576 }
  0x90   :  { %s124_s23 = sshll.u32 %s11010_s20, 4  ;;  %p10942_p0 = scmp.ne.s32.totalorder %s12485_s10, %s10941_s6  ;;  %s125_s23 = int_to_ptr.vmem [resolvable:$true] %s124_s23 }
  0x91   :  { %p10945_p1 = scmp.lt.u32.totalorder %s10941_s6, %s12485_s10 }
  0x93   :  { %p10947_p2 = pnand %p10945_p1, %p10942_p0 }
  0x95   :  { %10950 = shalt.err (!%p10947_p2)
}
  0x96   :  { %s10951_s28 = scalar_lea.vmem %s125_s23, 24576  ;;  %p10956_p4 = scmp.lt.s32.totalorder %s125_s23, %s125_s23 }
  0x97   :  { %p10952_p3 = scmp.ne.s32.totalorder %s125_s23, %s10951_s28  ;;  %p10957_p5 = scmp.lt.s32.totalorder %s10951_s28, %s10951_s28 }
  0x99   :  { %p10958_p6 = por %p10957_p5, %p10956_p4 }
  0x9b   :  { %p10959_p7 = pnand %p10958_p6, %p10952_p3 }
  0x9d   :  { %10962 = shalt.err (!%p10959_p7)
}
  0x9e   :  { %130 = dma.hbm_to_vmem [thread:$0]  %s12485_s10, 24576, %s125_s23, [#allocation16], %s10999_s26, %s10999_s26, %s11000_s27  }
  0x9f   :  { %10985 = dma.done.wait [#allocation4], 256  }
  0xa0   :  { %10986 = vsyncadd [#allocation4], 4294967040 }
  0xa1   :  { %10987 = dma.done.wait [#allocation7], 512  }
  0xa2   :  { %10988 = vsyncadd [#allocation7], 4294966784 }
  0xa3   :  { %10989 = dma.done.wait [#allocation10], 18448  }
  0xa4   :  { %10990 = vsyncadd [#allocation10], 4294948848 }
  0xa5   :  { %10991 = dma.done.wait [#allocation13], 30720  }
  0xa6   :  { %10992 = vsyncadd [#allocation13], 4294936576 }
  0xa7   :  { %10993 = dma.done.wait [#allocation16], 24576  }
  0xa8   :  { %10994 = vsyncadd [#allocation16], 4294942720  ;;  %vm180_vm0 = vcmask 130048   ;;  %v171_v1 = vld [vmem:[#allocation8] sm:$0xff]  ;;  %v172_v2 = vld [vmem:[#allocation8 + $0x8] sm:$0xff]  ;;  %s11012_s27 = smov 112  }
  0xa9   :  { %v169_v3 = vld [vmem:[#allocation3] sm:$0xff]  ;;  %v9312_v4 = vpack.c.bf16 %v172_v2, %v171_v1  ;;  %v270_v6 = vld [vmem:[#allocation11 + $0x20] sm:$0xff]  ;;  %v170_v7 = vld [vmem:[#allocation3 + $0x8] sm:$0xff]  ;;  %s11013_s22 = smov 96   ;;  %s11014_s2 = smov 80   ;;  %vm2165_vm2 = vcmask 261120  }
  0xaa   :  { %8763 = vmatprep.mubr.msk.f32.mxu0 %vm180_vm0, %v169_v3  ;;  %v267_v5 = vld [vmem:[#allocation11 + $0x8] sm:$0xff]  ;;  %v266_v9 = vld [vmem:[#allocation11] sm:$0xff]  ;;  %v269_v10 = vld [vmem:[#allocation11 + $0x18] sm:$0xff]  ;;  %s11015_s4 = smov 64   ;;  %s11016_s17 = smov 48   ;;  %vm2168_vm3 = vcmask 392192  }
  0xab   :  { %v9316_v8 = vpack.c.bf16 %v270_v6, %v267_v5  ;;  %v268_v11 = vld [vmem:[#allocation11 + $0x10] sm:$0xff]  ;;  %9313 = vmatprep.subr.bf16.mxu0 %v9312_v4  ;;  %v9318_v12 = vpack.c.bf16 %v269_v10, %v266_v9  ;;  %v271_v13 = vld [vmem:[#allocation11 + $0x28] sm:$0xff]  ;;  %v273_v14 = vld [vmem:[#allocation11 + $0x38] sm:$0xff]  ;;  %s11017_s3 = smov 16   ;;  %vm2171_vm4 = vcmask 523264   ;;  %vm2174_vm5 = vcmask 654336  }
  0xac   :  { %v276_v15 = vld [vmem:[#allocation11 + $0x50] sm:$0xff]  ;;  %9315 = vmatpush3.bf16.msra.mxu0 %v9312_v4  ;;  %v9348_v16 = vpack.c.bf16 %v271_v13, %v268_v11  ;;  %v275_v19 = vld [vmem:[#allocation11 + $0x48] sm:$0xff]  ;;  %v274_v20 = vld [vmem:[#allocation11 + $0x40] sm:$0xff]  ;;  %vm2177_vm6 = vcmask 785408   ;;  %vm2180_vm7 = vcmask 916480   ;;  %vm8021_vm8 = vcmask 130112  }
  0xad   :  { %9317 = vmatprep.subr.bf16.mxu1 %v9316_v8  ;;  %v9320_v17 = vpack.c.bf16 %v276_v15, %v273_v14  ;;  %v272_v18 = vld [vmem:[#allocation11 + $0x30] sm:$0xff]  ;;  %v277_v22 = vld [vmem:[#allocation11 + $0x58] sm:$0xff]  ;;  %v279_v23 = vld [vmem:[#allocation11 + $0x68] sm:$0xff]  ;;  %v11011_v14 = vmov 0.0   ;;  %vm8024_vm9 = vcmask 122880  }
  0xae   :  { %9319 = vmatpush1.bf16.msra.mxu1 %v9318_v12  ;;  %v9322_v21 = vpack.c.bf16 %v275_v19, %v272_v18  ;;  %v282_v24 = vld [vmem:[#allocation11 + $0x80] sm:$0xff]  ;;  %9349 = vmatprep.subr.bf16.mxu0 %v9348_v16  ;;  %v9352_v25 = vpack.c.bf16 %v277_v22, %v274_v20  ;;  %v281_v28 = vld [vmem:[#allocation11 + $0x78] sm:$0xff]  ;;  %v280_v29 = vld [vmem:[#allocation11 + $0x70] sm:$0xff]  ;;  %v316_v22 = vlaneseq }
  0xaf   :  { %9321 = vmatprep.subr.bf16.mxu1 %v9320_v17  ;;  %v9324_v26 = vpack.c.bf16 %v282_v24, %v279_v23  ;;  %v278_v27 = vld [vmem:[#allocation11 + $0x60] sm:$0xff]  ;;  %8764 = vmatmul.mubr.msk.f32.vlgmr.msra.gmra.mrb[0].mxu0 %vm180_vm0, %v170_v7  ;;  %v283_v30 = vld [vmem:[#allocation11 + $0x88] sm:$0xff]  ;;  %v285_v31 = vld [vmem:[#allocation11 + $0x98] sm:$0xff] }
  0xb0   :  { %v288_v32 = vld [vmem:[#allocation11 + $0xb0] sm:$0xff]  ;;  %9351 = vmatpush3.bf16.msra.mxu0 %v9348_v16  ;;  %v9326_v33 = vpack.c.bf16 %v281_v28, %v278_v27  ;;  %v9356_v34 = vpack.c.bf16 %v283_v30, %v280_v29  ;;  %v287_v37 = vld [vmem:[#allocation11 + $0xa8] sm:$0xff]  ;;  %v286_v38 = vld [vmem:[#allocation11 + $0xa0] sm:$0xff]  ;;  %395 = vmatprep.mubr.f32.mxu1 %v11011_v14  ;;  %v11265_v23 = vshrl.u32 %v316_v22, 7 }
  0xb1   :  { %9353 = vmatprep.subr.bf16.mxu0 %v9352_v25  ;;  %v284_v35 = vld [vmem:[#allocation11 + $0x90] sm:$0xff]  ;;  %v9328_v36 = vpack.c.bf16 %v288_v32, %v285_v31  ;;  %v289_v39 = vld [vmem:[#allocation11 + $0xb8] sm:$0xff]  ;;  %v291_v40 = vld [vmem:[#allocation11 + $0xc8] sm:$0xff] }
  0xb2   :  { %9323 = vmatpush1.bf16.msra.mxu1 %v9322_v21  ;;  %v294_v41 = vld [vmem:[#allocation11 + $0xe0] sm:$0xff]  ;;  %v9330_v42 = vpack.c.bf16 %v287_v37, %v284_v35  ;;  %v9360_v43 = vpack.c.bf16 %v289_v39, %v286_v38  ;;  %v293_v46 = vld [vmem:[#allocation11 + $0xd8] sm:$0xff]  ;;  %v292_v47 = vld [vmem:[#allocation11 + $0xd0] sm:$0xff]  ;;  %v11268_v24 = vsub.s32 0, %v11265_v23  ;;  %v11277_v27 = vsub.s32 1, %v11265_v23 }
  0xb3   :  { %9325 = vmatprep.subr.bf16.mxu1 %v9324_v26  ;;  %v290_v44 = vld [vmem:[#allocation11 + $0xc0] sm:$0xff]  ;;  %v9332_v45 = vpack.c.bf16 %v294_v41, %v291_v40  ;;  %v295_v48 = vld [vmem:[#allocation11 + $0xe8] sm:$0xff]  ;;  %v297_v49 = vld [vmem:[#allocation11 + $0xf8] sm:$0xff]  ;;  %v11274_v26 = vsub.s32 2, %v11265_v23 }
  0xb4   :  { %9355 = vmatpush3.bf16.msra.mxu0 %v9352_v25  ;;  %v300_v50 = vld [vmem:[#allocation11 + $0x110] sm:$0xff]  ;;  %v9334_v51 = vpack.c.bf16 %v293_v46, %v290_v44  ;;  %v9364_v52 = vpack.c.bf16 %v295_v48, %v292_v47  ;;  %v299_v55 = vld [vmem:[#allocation11 + $0x108] sm:$0xff]  ;;  %v298_v56 = vld [vmem:[#allocation11 + $0x100] sm:$0xff] }
  0xb5   :  { %9357 = vmatprep.subr.bf16.mxu0 %v9356_v34  ;;  %v296_v53 = vld [vmem:[#allocation11 + $0xf0] sm:$0xff]  ;;  %v9336_v54 = vpack.c.bf16 %v300_v50, %v297_v49  ;;  %v301_v57 = vld [vmem:[#allocation11 + $0x118] sm:$0xff]  ;;  %v303_v58 = vld [vmem:[#allocation11 + $0x128] sm:$0xff] }
  0xb6   :  { %9327 = vmatpush1.bf16.msra.mxu1 %v9326_v33  ;;  %v306_v59 = vld [vmem:[#allocation11 + $0x140] sm:$0xff]  ;;  %v9338_v60 = vpack.c.bf16 %v299_v55, %v296_v53  ;;  %v9368_v61 = vpack.c.bf16 %v301_v57, %v298_v56  ;;  %v305_v0 = vld [vmem:[#allocation11 + $0x138] sm:$0xff]  ;;  %v304_v1 = vld [vmem:[#allocation11 + $0x130] sm:$0xff] }
  0xb7   :  { %9329 = vmatprep.subr.bf16.mxu1 %v9328_v36  ;;  %v302_v62 = vld [vmem:[#allocation11 + $0x120] sm:$0xff]  ;;  %v9340_v63 = vpack.c.bf16 %v306_v59, %v303_v58  ;;  %v307_v2 = vld [vmem:[#allocation11 + $0x148] sm:$0xff]  ;;  %v309_v5 = vld [vmem:[#allocation11 + $0x158] sm:$0xff] }
  0xb8   :  { %9359 = vmatpush3.bf16.msra.mxu0 %v9356_v34  ;;  %v9342_v3 = vpack.c.bf16 %v305_v0, %v302_v62  ;;  %v9372_v4 = vpack.c.bf16 %v307_v2, %v304_v1  ;;  %v312_v6 = vld [vmem:[#allocation11 + $0x170] sm:$0xff]  ;;  %v311_v9 = vld [vmem:[#allocation11 + $0x168] sm:$0xff]  ;;  %v310_v11 = vld [vmem:[#allocation11 + $0x160] sm:$0xff] }
  0xb9   :  { %9361 = vmatprep.subr.bf16.mxu0 %v9360_v43  ;;  %v9344_v7 = vpack.c.bf16 %v312_v6, %v309_v5  ;;  %v308_v8 = vld [vmem:[#allocation11 + $0x150] sm:$0xff]  ;;  %v313_v12 = vld [vmem:[#allocation11 + $0x178] sm:$0xff]  ;;  %v314_v25 = vld [vmem:[%s12480_s5] sm:$0x7] }
  0xba   :  { %9331 = vmatpush1.bf16.msra.mxu1 %v9330_v42  ;;  %v9346_v10 = vpack.c.bf16 %v311_v9, %v308_v8  ;;  %v9376_v13 = vpack.c.bf16 %v313_v12, %v310_v11  ;;  %v8045_v15 = vld [vmem:[#allocation9] ss:$0 sm:$0xff]  ;;  %v319_v28 = vrot.slane %v314_v25, %v11268_v24  ;;  %v327_v29 = vrot.slane %v314_v25, %v11274_v26  ;;  %vm11291_vm1 = vmpackc.low %vm180_vm0, %vm180_vm0 }
  0xbb   :  { %9333 = vmatprep.subr.bf16.mxu1 %v9332_v45  ;;  %v323_v31 = vrot.slane %v314_v25, %v11277_v27 }
  0xbc   :  { %9363 = vmatpush3.bf16.msra.mxu0 %v9360_v43 }
  0xbd   :  { %9365 = vmatprep.subr.bf16.mxu0 %v9364_v52 }
  0xbe   :  { %9335 = vmatpush1.bf16.msra.mxu1 %v9334_v51 }
  0xbf   :  { %9337 = vmatprep.subr.bf16.mxu1 %v9336_v54 }
  0xc0   :  { %9367 = vmatpush3.bf16.msra.mxu0 %v9364_v52 }
  0xc1   :  { %9369 = vmatprep.subr.bf16.mxu0 %v9368_v61 }
  0xc2   :  { %9339 = vmatpush1.bf16.msra.mxu1 %v9338_v60 }
  0xc3   :  { %9341 = vmatprep.subr.bf16.mxu1 %v9340_v63 }
  0xc4   :  { %9371 = vmatpush3.bf16.msra.mxu0 %v9368_v61 }
  0xc5   :  { %9373 = vmatprep.subr.bf16.mxu0 %v9372_v4 }
  0xc6   :  { %9343 = vmatpush1.bf16.msra.mxu1 %v9342_v3 }
  0xc7   :  { %9345 = vmatprep.subr.bf16.mxu1 %v9344_v7 }
  0xc8   :  { %9375 = vmatpush3.bf16.msra.mxu0 %v9372_v4 }
  0xc9   :  { %9377 = vmatprep.subr.bf16.mxu0 %v9376_v13 }
  0xca   :  { %9347 = vmatpush1.bf16.msra.mxu1 %v9346_v10 }
  0xcc   :  { %9379 = vmatpush3.bf16.msra.mxu0 %v9376_v13 }
 0x182   :  { %v8765_v16 = vpop.f32.mrb[0].mxu0 }
 0x183   :  { %v259_v17 = vadd.f32 %v8765_v16, %v8045_v15  ;;  %v253_v18 = vpop.f32.mrb[1].mxu0 }
 0x184   :  { %v254_v19 = vadd.f32 %v8045_v15, %v253_v18 }
 0x185   :  { %v11257_v21 = vmax.f32 %v259_v17, 0.0 }
 0x186   :  { %v11255_v20 = vmax.f32 %v254_v19, 0.0 }
 0x188   :  { %396 = vmatmul.mubr.f32.vlgmr.msra.gmra.mrb[0].mxu1 %v11255_v20  ;;  %8798 = vmatprep.mubr.f32.mxu0 %v11255_v20 }
 0x189   :  { %8799 = vmatmul.mubr.f32.vlgmr.msra.gmra.mrb[2].mxu0 %v11257_v21  ;;  %401 = vmatprep.mubr.f32.mxu1 %v11011_v14 }
 0x18c   :  { %402 = vmatmul.mubr.f32.gmra.mrb[2].mxu1 %v11257_v21 }
 0x25b   :  { %v397_v30 = vpop.f32.mrb[0].mxu1 }
 0x25c   :  { %v398_v32 = vadd.f32 %v397_v30, %v319_v28  ;;  %v399_v33 = vpop.f32.mrb[1].mxu1  ;;  %v8800_v34 = vpop.f32.mrb[2].mxu0 }
 0x25d   :  { %v480_v35 = vadd.f32 %v8800_v34, %v327_v29  ;;  %v474_v36 = vpop.f32.mrb[3].mxu0  ;;  %v400_v38 = vadd.f32 %v399_v33, %v323_v31 }
 0x25e   :  { %v475_v37 = vadd.f32 %v474_v36, %v327_v29  ;;  %485 = vrot.lane.b32.xlu1 %v398_v32, %s11012_s27  ;;  %8805 = vmatprep.mubr.msk.f32.mxu0 %vm180_vm0, %v398_v32 }
 0x25f   :  { %v403_v39 = vpop.f32.mrb[2].mxu1 }
 0x260   :  { %v404_v40 = vadd.f32 %v403_v39, %v319_v28  ;;  %v405_v41 = vpop.f32.mrb[3].mxu1  ;;  %v11284_v42 = vpack.i.bf16 %v480_v35, %v475_v37  ;;  %v11286_v44 = vpack.c.bf16 %v480_v35, %v475_v37 }
 0x261   :  { %v406_v43 = vadd.f32 %v405_v41, %v323_v31 }
 0x262   :  { %487 = vrot.lane.b32.xlu1 %v404_v40, %s11012_s27 }
 0x263   :  { %v10251_v46 = vpack.i.bf16 %v406_v43, %v400_v38  ;;  %v9380_v47 = vpack.c.bf16 %v406_v43, %v400_v38 }
 0x265   :  { %10252 = vrot.lane.b32.xlu0 %v10251_v46, %s11012_s27  ;;  %9382 = vmatprep.subr.msk.bf16.mxu0 %vm11291_vm1, %v9380_v47 }
 0x266   :  { %9385 = vmatpush3.bf16.xpose.msk.msra.mxu0 %vm11291_vm1, %v9380_v47  ;;  %489 = vrot.lane.b32.xlu1 %v398_v32, %s11013_s22 }
 0x269   :  { %10257 = vrot.lane.b32.xlu0 %v10251_v46, %s11013_s22 }
 0x26a   :  { %493 = vrot.lane.b32.xlu1 %v398_v32, %s11014_s2 }
 0x26d   :  { %491 = vrot.lane.b32.xlu0 %v404_v40, %s11013_s22  ;;  %8806 = vmatmul.mubr.msk.f32.vlgmr.msra.gmra.mrb[4].mxu0 %vm180_vm0, %v404_v40 }
 0x26e   :  { %10267 = vrot.lane.b32.xlu1 %v10251_v46, %s11015_s4 }
 0x271   :  { %10262 = vrot.lane.b32.xlu0 %v10251_v46, %s11014_s2 }
 0x272   :  { %497 = vrot.lane.b32.xlu1 %v398_v32, %s11015_s4 }
 0x275   :  { %495 = vrot.lane.b32.xlu0 %v404_v40, %s11014_s2 }
 0x276   :  { %10277 = vrot.lane.b32.xlu1 %v10251_v46, %s11009_s21 }
 0x279   :  { %10272 = vrot.lane.b32.xlu0 %v10251_v46, %s11016_s17 }
 0x27a   :  { %501 = vrot.lane.b32.xlu1 %v398_v32, %s11016_s17 }
 0x27d   :  { %499 = vrot.lane.b32.xlu0 %v404_v40, %s11015_s4 }
 0x27e   :  { %505 = vrot.lane.b32.xlu1 %v398_v32, %s11009_s21 }
 0x281   :  { %10282 = vrot.lane.b32.xlu0 %v10251_v46, %s11017_s3 }
 0x282   :  { %509 = vrot.lane.b32.xlu1 %v398_v32, %s11017_s3 }
 0x285   :  { %503 = vrot.lane.b32.xlu0 %v404_v40, %s11016_s17 }
 0x286   :  { %10292 = vrot.lane.b32.xlu1 %v11284_v42, %s11013_s22 }
 0x289   :  { %507 = vrot.lane.b32.xlu0 %v404_v40, %s11009_s21 }
 0x28a   :  { %10297 = vrot.lane.b32.xlu1 %v11284_v42, %s11014_s2 }
 0x28d   :  { %511 = vrot.lane.b32.xlu0 %v404_v40, %s11017_s3 }
 0x291   :  { %10287 = vrot.lane.b32.xlu0 %v11284_v42, %s11012_s27 }
 0x2d0   :  { %v486_v48 = vpop.permute.xlu1 %485 }
 0x2d1   :  { %8812 = vmatprep.mubr.msk.f32.mxu0 %vm180_vm0, %v486_v48 }
 0x2d4   :  { %v488_v49 = vpop.permute.xlu1 %487 }
 0x2d7   :  { %v10253_v50 = vpop.permute.xlu0 %10252 }
 0x2d8   :  { %v10255_v51 = vunpack.i.h.bf16 %v10253_v50  ;;  %v10254_v52 = vunpack.i.l.bf16 %v10253_v50  ;;  %v490_v53 = vpop.permute.xlu1 %489 }
 0x2da   :  { %v9386_v54 = vpack.c.bf16 %v10255_v51, %v10254_v52  ;;  %v11377_v52 = vld [vmem:[#allocation6] sm:$0xff] }
 0x2db   :  { %v10258_v55 = vpop.permute.xlu0 %10257 }
 0x2dc   :  { %v10260_v56 = vunpack.i.h.bf16 %v10258_v55  ;;  %v10259_v57 = vunpack.i.l.bf16 %v10258_v55  ;;  %9388 = vmatprep.subr.msk.bf16.mxu0 %vm11291_vm1, %v9386_v54  ;;  %v494_v58 = vpop.permute.xlu1 %493 }
 0x2dd   :  { %9391 = vmatpush3.bf16.xpose.msk.msra.mxu0 %vm11291_vm1, %v9386_v54 }
 0x2de   :  { %v9392_v59 = vpack.c.bf16 %v10260_v56, %v10259_v57 }
 0x2df   :  { %v492_v60 = vpop.permute.xlu0 %491 }
 0x2e0   :  { %v10268_v61 = vpop.permute.xlu1 %10267  ;;  %9394 = vmatprep.subr.msk.bf16.mxu0 %vm11291_vm1, %v9392_v59 }
 0x2e1   :  { %v10270_v62 = vunpack.i.h.bf16 %v10268_v61  ;;  %v10269_v63 = vunpack.i.l.bf16 %v10268_v61 }
 0x2e3   :  { %v9404_v0 = vpack.c.bf16 %v10270_v62, %v10269_v63  ;;  %v10263_v1 = vpop.permute.xlu0 %10262 }
 0x2e4   :  { %v10265_v2 = vunpack.i.h.bf16 %v10263_v1  ;;  %v10264_v3 = vunpack.i.l.bf16 %v10263_v1  ;;  %v498_v4 = vpop.permute.xlu1 %497  ;;  %8813 = vmatmul.mubr.msk.f32.vlgmr.msra.gmra.mrb[6].mxu0 %vm180_vm0, %v488_v49  ;;  %v11375_v49 = vld [vmem:[#allocation6 + $0x8] sm:$0xff] }
 0x2e5   :  { %9397 = vmatpush3.bf16.xpose.msk.msra.mxu0 %vm11291_vm1, %v9392_v59  ;;  %8819 = vmatprep.mubr.msk.f32.mxu0 %vm180_vm0, %v490_v53 }
 0x2e6   :  { %v9398_v5 = vpack.c.bf16 %v10265_v2, %v10264_v3  ;;  %9406 = vmatprep.subr.msk.bf16.mxu1 %vm11291_vm1, %v9404_v0  ;;  %8833 = vmatprep.mubr.msk.f32.mxu1 %vm180_vm0, %v498_v4 }
 0x2e7   :  { %9409 = vmatpush3.bf16.xpose.msk.msra.mxu1 %vm11291_vm1, %v9404_v0  ;;  %v496_v6 = vpop.permute.xlu0 %495 }
 0x2e8   :  { %v10278_v7 = vpop.permute.xlu1 %10277  ;;  %9400 = vmatprep.subr.msk.bf16.mxu0 %vm11291_vm1, %v9398_v5 }
 0x2e9   :  { %v10280_v8 = vunpack.i.h.bf16 %v10278_v7  ;;  %v10279_v9 = vunpack.i.l.bf16 %v10278_v7 }
 0x2eb   :  { %v9416_v10 = vpack.c.bf16 %v10280_v8, %v10279_v9  ;;  %v10273_v11 = vpop.permute.xlu0 %10272 }
 0x2ec   :  { %v10275_v12 = vunpack.i.h.bf16 %v10273_v11  ;;  %v10274_v13 = vunpack.i.l.bf16 %v10273_v11  ;;  %v502_v15 = vpop.permute.xlu1 %501  ;;  %8820 = vmatmul.mubr.msk.f32.vlgmr.msra.gmra.mrb[8].mxu0 %vm180_vm0, %v492_v60 }
 0x2ed   :  { %9403 = vmatpush3.bf16.xpose.msk.msra.mxu0 %vm11291_vm1, %v9398_v5  ;;  %8826 = vmatprep.mubr.msk.f32.mxu0 %vm180_vm0, %v494_v58 }
 0x2ee   :  { %v9410_v16 = vpack.c.bf16 %v10275_v12, %v10274_v13  ;;  %9418 = vmatprep.subr.msk.bf16.mxu1 %vm11291_vm1, %v9416_v10 }
 0x2ef   :  { %v500_v17 = vpop.permute.xlu0 %499 }
 0x2f0   :  { %v506_v18 = vpop.permute.xlu1 %505  ;;  %8834 = vmatmul.mubr.msk.f32.vlgmr.msra.gmra.mrb[4].mxu1 %vm180_vm0, %v500_v17  ;;  %9412 = vmatprep.subr.msk.bf16.mxu0 %vm11291_vm1, %v9410_v16 }
 0x2f1   :  { %9421 = vmatpush3.bf16.xpose.msk.msra.mxu1 %vm11291_vm1, %v9416_v10  ;;  %8847 = vmatprep.mubr.msk.f32.mxu1 %vm180_vm0, %v506_v18 }
 0x2f2   :  { %9429 = vmatprep.subr.bf16.mxu1 %v11286_v44 }
 0x2f3   :  { %v10283_v19 = vpop.permute.xlu0 %10282 }
 0x2f4   :  { %v10285_v25 = vunpack.i.h.bf16 %v10283_v19  ;;  %v10284_v28 = vunpack.i.l.bf16 %v10283_v19  ;;  %v510_v29 = vpop.permute.xlu1 %509  ;;  %8827 = vmatmul.mubr.msk.f32.vlgmr.msra.gmra.mrb[10].mxu0 %vm180_vm0, %v496_v6 }
 0x2f5   :  { %9415 = vmatpush3.bf16.xpose.msk.msra.mxu0 %vm11291_vm1, %v9410_v16  ;;  %8840 = vmatprep.mubr.msk.f32.mxu0 %vm180_vm0, %v502_v15 }
 0x2f6   :  { %v9422_v30 = vpack.c.bf16 %v10285_v25, %v10284_v28 }
 0x2f7   :  { %v504_v31 = vpop.permute.xlu0 %503 }
 0x2f8   :  { %v10293_v32 = vpop.permute.xlu1 %10292  ;;  %9424 = vmatprep.subr.msk.bf16.mxu0 %vm11291_vm1, %v9422_v30 }
 0x2f9   :  { %v10295_v33 = vunpack.i.h.bf16 %v10293_v32  ;;  %v10294_v34 = vunpack.i.l.bf16 %v10293_v32 }
 0x2fb   :  { %v508_v35 = vpop.permute.xlu0 %507  ;;  %v11362_v36 = vpack.c.bf16 %v10295_v33, %v10294_v34 }
 0x2fc   :  { %8841 = vmatmul.mubr.msk.f32.vlgmr.msra.gmra.mrb[12].mxu0 %vm180_vm0, %v504_v31  ;;  %8848 = vmatmul.mubr.msk.f32.vlgmr.msra.gmra.mrb[6].mxu1 %vm180_vm0, %v508_v35  ;;  %v10298_v38 = vpop.permute.xlu1 %10297 }
 0x2fd   :  { %9431 = vmatpush3.bf16.msra.mxu1 %v11286_v44  ;;  %9427 = vmatpush3.bf16.xpose.msk.msra.mxu0 %vm11291_vm1, %v9422_v30  ;;  %v10300_v40 = vunpack.i.h.bf16 %v10298_v38  ;;  %v10299_v41 = vunpack.i.l.bf16 %v10298_v38 }
 0x2fe   :  { %8854 = vmatprep.mubr.msk.f32.mxu0 %vm180_vm0, %v510_v29  ;;  %9437 = vmatprep.subr.bf16.mxu1 %v11362_v36 }
 0x2ff   :  { %v512_v37 = vpop.permute.xlu0 %511  ;;  %v11372_v48 = vpack.c.bf16 %v10300_v40, %v10299_v41 }
 0x303   :  { %v10288_v39 = vpop.permute.xlu0 %10287 }
 0x304   :  { %v10290_v43 = vunpack.i.h.bf16 %v10288_v39  ;;  %v10289_v46 = vunpack.i.l.bf16 %v10288_v39  ;;  %8855 = vmatmul.mubr.msk.f32.vlgmr.msra.gmra.mrb[14].mxu0 %vm180_vm0, %v512_v37 }
 0x306   :  { %v9432_v47 = vpack.c.bf16 %v10290_v43, %v10289_v46 }
 0x308   :  { %9433 = vmatprep.subr.bf16.mxu0 %v9432_v47 }
 0x309   :  { %9435 = vmatpush3.bf16.msra.mxu0 %v9432_v47 }
 0x30a   :  { %9441 = vmatprep.subr.bf16.mxu0 %v11372_v48 }
 0x340   :  { %v8807_v44 = vpop.f32.mrb[4].mxu0 }
 0x341   :  { %v1252_v50 = vmul.f32 0.25, %v8807_v44  ;;  %v661_v51 = vpop.f32.mrb[5].mxu0 }
 0x342   :  { %v1251_v53 = vmul.f32 0.25, %v661_v51 }
 0x343   :  { %v11380_v54 = vadd.f32 %v1252_v50, %v11375_v49 }
 0x344   :  { %v11383_v55 = vadd.f32 %v1251_v53, %v11377_v52 }
 0x345   :  { %v1286_v56 = vsel %vm180_vm0, %v11380_v54, -inf }
 0x346   :  { %1287 = vmax.xlane.f32.xlu0 %v1286_v56  ;;  %v1283_v57 = vsel %vm180_vm0, %v11383_v55, -inf }
 0x347   :  { %1284 = vmax.xlane.f32.xlu1 %v1283_v57 }
 0x3b7   :  { %v8814_v58 = vpop.f32.mrb[6].mxu0 }
 0x3b8   :  { %v1254_v59 = vmul.f32 0.25, %v8814_v58  ;;  %v744_v60 = vpop.f32.mrb[7].mxu0 }
 0x3b9   :  { %v1253_v61 = vmul.f32 0.25, %v744_v60 }
 0x3ba   :  { %v11390_v62 = vadd.f32 %v1254_v59, %v11375_v49 }
 0x3bb   :  { %v11393_v63 = vadd.f32 %v1253_v61, %v11377_v52 }
 0x3bc   :  { %v1292_v0 = vsel %vm180_vm0, %v11390_v62, -inf }
 0x3bd   :  { %1293 = vmax.xlane.f32.xlu1 %v1292_v0  ;;  %v1289_v1 = vsel %vm180_vm0, %v11393_v63, -inf }
 0x3be   :  { %1290 = vmax.xlane.f32.xlu0 %v1289_v1 }
 0x3bf   :  { %v8821_v2 = vpop.f32.mrb[8].mxu0 }
 0x3c0   :  { %v827_v3 = vpop.f32.mrb[9].mxu0  ;;  %v1256_v5 = vmul.f32 0.25, %v8821_v2 }
 0x3c1   :  { %v1255_v8 = vmul.f32 0.25, %v827_v3 }
 0x3c2   :  { %v11408_v16 = vadd.f32 %v1256_v5, %v11375_v49 }
 0x3c3   :  { %v8835_v4 = vpop.f32.mrb[4].mxu1  ;;  %v11413_v18 = vadd.f32 %v1255_v8, %v11377_v52 }
 0x3c4   :  { %v1260_v6 = vmul.f32 0.25, %v8835_v4  ;;  %v993_v7 = vpop.f32.mrb[5].mxu1  ;;  %v1298_v19 = vsel %vm180_vm0, %v11408_v16, -inf }
 0x3c5   :  { %v1259_v9 = vmul.f32 0.25, %v993_v7  ;;  %v1295_v25 = vsel %vm180_vm0, %v11413_v18, -inf }
 0x3c6   :  { %v11400_v10 = vadd.f32 %v1260_v6, %v11375_v49 }
 0x3c7   :  { %v8828_v11 = vpop.f32.mrb[10].mxu0  ;;  %v11403_v12 = vadd.f32 %v1259_v9, %v11377_v52 }
 0x3c8   :  { %v910_v13 = vpop.f32.mrb[11].mxu0  ;;  %v1310_v15 = vsel %vm180_vm0, %v11400_v10, -inf  ;;  %v1258_v30 = vmul.f32 0.25, %v8828_v11 }
 0x3c9   :  { %1311 = vmax.xlane.f32.xlu1 %v1310_v15  ;;  %v1307_v17 = vsel %vm180_vm0, %v11403_v12, -inf  ;;  %v1257_v34 = vmul.f32 0.25, %v910_v13 }
 0x3ca   :  { %1308 = vmax.xlane.f32.xlu0 %v1307_v17  ;;  %v11428_v41 = vadd.f32 %v1258_v30, %v11375_v49 }
 0x3cb   :  { %v11433_v47 = vadd.f32 %v1257_v34, %v11377_v52 }
 0x3cc   :  { %v1304_v53 = vsel %vm180_vm0, %v11428_v41, -inf }
 0x3cd   :  { %1299 = vmax.xlane.f32.xlu1 %v1298_v19  ;;  %v1301_v58 = vsel %vm180_vm0, %v11433_v47, -inf }
 0x3ce   :  { %1296 = vmax.xlane.f32.xlu0 %v1295_v25 }
 0x3cf   :  { %v8842_v28 = vpop.f32.mrb[12].mxu0  ;;  %v8849_v29 = vpop.f32.mrb[6].mxu1 }
 0x3d0   :  { %v1264_v31 = vmul.f32 0.25, %v8849_v29  ;;  %v1076_v32 = vpop.f32.mrb[13].mxu0  ;;  %v1159_v33 = vpop.f32.mrb[7].mxu1  ;;  %v1262_v39 = vmul.f32 0.25, %v8842_v28 }
 0x3d1   :  { %v1263_v35 = vmul.f32 0.25, %v1159_v33  ;;  %v1261_v43 = vmul.f32 0.25, %v1076_v32 }
 0x3d2   :  { %v11420_v37 = vadd.f32 %v1264_v31, %v11375_v49  ;;  %v11438_v56 = vadd.f32 %v1262_v39, %v11375_v49 }
 0x3d3   :  { %v11423_v38 = vadd.f32 %v1263_v35, %v11377_v52  ;;  %v11443_v59 = vadd.f32 %v1261_v43, %v11377_v52 }
 0x3d4   :  { %v1322_v40 = vsel %vm180_vm0, %v11420_v37, -inf  ;;  %v1316_v60 = vsel %vm180_vm0, %v11438_v56, -inf  ;;  %v1285_v4 = vpop.xlane.xlu1 %1284 }
 0x3d5   :  { %1323 = vmax.xlane.f32.xlu1 %v1322_v40  ;;  %v1319_v46 = vsel %vm180_vm0, %v11423_v38, -inf  ;;  %v1313_v0 = vsel %vm180_vm0, %v11443_v59, -inf  ;;  %v1331_v5 = vsub.f32 %v11383_v55, %v1285_v4 }
 0x3d6   :  { %1320 = vmax.xlane.f32.xlu0 %v1319_v46 }
 0x3d7   :  { %v8856_v44 = vpop.f32.mrb[14].mxu0  ;;  %v1347_v7 = vmul.f32 1.442695, %v1331_v5 }
 0x3d8   :  { %v1266_v50 = vmul.f32 0.25, %v8856_v44  ;;  %v1242_v51 = vpop.f32.mrb[15].mxu0 }
 0x3d9   :  { %v1265_v57 = vmul.f32 0.25, %v1242_v51  ;;  %1305 = vmax.xlane.f32.xlu1 %v1304_v53 }
 0x3da   :  { %1302 = vmax.xlane.f32.xlu0 %v1301_v58  ;;  %v11448_v61 = vadd.f32 %v1266_v50, %v11375_v49  ;;  %v1288_v49 = vpop.xlane.xlu0 %1287 }
 0x3db   :  { %v11453_v1 = vadd.f32 %v1265_v57, %v11377_v52  ;;  %v1332_v52 = vsub.f32 %v11380_v54, %v1288_v49 }
 0x3dc   :  { %v1328_v2 = vsel %vm180_vm0, %v11448_v61, -inf }
 0x3dd   :  { %1317 = vmax.xlane.f32.xlu1 %v1316_v60  ;;  %v1325_v3 = vsel %vm180_vm0, %v11453_v1, -inf  ;;  %v1349_v6 = vmul.f32 1.442695, %v1332_v52 }
 0x3de   :  { %1314 = vmax.xlane.f32.xlu0 %v1313_v0 }
 0x3df   :  { %10567 = vpow2.f32 %v1349_v6 }
 0x3e0   :  { %10569 = vpow2.f32 %v1347_v7 }
 0x3e1   :  { %1329 = vmax.xlane.f32.xlu1 %v1328_v2 }
 0x3e2   :  { %1326 = vmax.xlane.f32.xlu0 %v1325_v3 }
 0x3e9   :  { %v11465_v8 = vpop.eup %10567 }
 0x3ea   :  { %v11467_v9 = vpop.eup %10569  ;;  %v1382_v11 = vsel %vm180_vm0, %v11465_v8, 0.0 }
 0x3eb   :  { %v1379_v13 = vsel %vm180_vm0, %v11467_v9, 0.0 }
 0x3f2   :  { %10307 = vrot.lane.b32.xlu1 %v11284_v42, %s11016_s17 }
 0x3f8   :  { %10302 = vrot.lane.b32.xlu0 %v11284_v42, %s11015_s4 }
 0x416   :  { %1383 = vadd.xlane.f32.xlu1 %v1382_v11 }
 0x417   :  { %1380 = vadd.xlane.f32.xlu0 %v1379_v13 }
 0x44a   :  { %v1294_v15 = vpop.xlane.xlu1 %1293 }
 0x44b   :  { %v1334_v54 = vsub.f32 %v11390_v62, %v1294_v15  ;;  %v1291_v55 = vpop.xlane.xlu0 %1290 }
 0x44c   :  { %v1333_v17 = vsub.f32 %v11393_v63, %v1291_v55 }
 0x44d   :  { %v1353_v19 = vmul.f32 1.442695, %v1334_v54 }
 0x44e   :  { %v1351_v25 = vmul.f32 1.442695, %v1333_v17 }
 0x44f   :  { %10571 = vpow2.f32 %v1353_v19 }
 0x450   :  { %10573 = vpow2.f32 %v1351_v25 }
 0x456   :  { %v1312_v28 = vpop.xlane.xlu1 %1311 }
 0x457   :  { %v1340_v29 = vsub.f32 %v11400_v10, %v1312_v28  ;;  %v1309_v30 = vpop.xlane.xlu0 %1308 }
 0x458   :  { %v1339_v31 = vsub.f32 %v11403_v12, %v1309_v30 }
 0x459   :  { %v11477_v32 = vpop.eup %10571  ;;  %v1365_v33 = vmul.f32 1.442695, %v1340_v29 }
 0x45a   :  { %v11479_v34 = vpop.eup %10573  ;;  %v1363_v35 = vmul.f32 1.442695, %v1339_v31  ;;  %v1300_v62 = vpop.xlane.xlu1 %1299  ;;  %v1388_v63 = vsel %vm180_vm0, %v11477_v32, 0.0 }
 0x45b   :  { %10575 = vpow2.f32 %v1365_v33  ;;  %v1336_v39 = vsub.f32 %v11408_v16, %v1300_v62  ;;  %v1297_v40 = vpop.xlane.xlu0 %1296  ;;  %1389 = vadd.xlane.f32.xlu1 %v1388_v63  ;;  %v1385_v10 = vsel %vm180_vm0, %v11479_v34, 0.0 }
 0x45c   :  { %10577 = vpow2.f32 %v1363_v35  ;;  %v1335_v12 = vsub.f32 %v11413_v18, %v1297_v40  ;;  %1386 = vadd.xlane.f32.xlu0 %v1385_v10 }
 0x45d   :  { %v1357_v43 = vmul.f32 1.442695, %v1336_v39 }
 0x45e   :  { %v1355_v46 = vmul.f32 1.442695, %v1335_v12 }
 0x45f   :  { %10579 = vpow2.f32 %v1357_v43 }
 0x460   :  { %10581 = vpow2.f32 %v1355_v46 }
 0x462   :  { %v1324_v44 = vpop.xlane.xlu1 %1323 }
 0x463   :  { %v1344_v50 = vsub.f32 %v11420_v37, %v1324_v44  ;;  %v1321_v51 = vpop.xlane.xlu0 %1320 }
 0x464   :  { %v1343_v53 = vsub.f32 %v11423_v38, %v1321_v51 }
 0x465   :  { %v11489_v16 = vpop.eup %10575  ;;  %v1373_v57 = vmul.f32 1.442695, %v1344_v50 }
 0x466   :  { %v11491_v58 = vpop.eup %10577  ;;  %v1371_v60 = vmul.f32 1.442695, %v1343_v53  ;;  %v1306_v0 = vpop.xlane.xlu1 %1305  ;;  %v1406_v18 = vsel %vm180_vm0, %v11489_v16, 0.0 }
 0x467   :  { %10583 = vpow2.f32 %v1373_v57  ;;  %v1338_v2 = vsub.f32 %v11428_v41, %v1306_v0  ;;  %v1303_v3 = vpop.xlane.xlu0 %1302  ;;  %1407 = vadd.xlane.f32.xlu1 %v1406_v18  ;;  %v1403_v37 = vsel %vm180_vm0, %v11491_v58, 0.0 }
 0x468   :  { %10585 = vpow2.f32 %v1371_v60  ;;  %v1337_v38 = vsub.f32 %v11433_v47, %v1303_v3  ;;  %1404 = vadd.xlane.f32.xlu0 %v1403_v37 }
 0x469   :  { %v11499_v49 = vpop.eup %10579  ;;  %v1361_v4 = vmul.f32 1.442695, %v1338_v2 }
 0x46a   :  { %v11501_v52 = vpop.eup %10581  ;;  %v1359_v5 = vmul.f32 1.442695, %v1337_v38  ;;  %v1318_v6 = vpop.xlane.xlu1 %1317  ;;  %v1394_v7 = vsel %vm180_vm0, %v11499_v49, 0.0 }
 0x46b   :  { %10587 = vpow2.f32 %v1361_v4  ;;  %v1342_v41 = vsub.f32 %v11438_v56, %v1318_v6  ;;  %v1315_v11 = vpop.xlane.xlu0 %1314  ;;  %1395 = vadd.xlane.f32.xlu1 %v1394_v7  ;;  %v1391_v13 = vsel %vm180_vm0, %v11501_v52, 0.0 }
 0x46c   :  { %10589 = vpow2.f32 %v1359_v5  ;;  %v1341_v47 = vsub.f32 %v11443_v59, %v1315_v11  ;;  %1392 = vadd.xlane.f32.xlu0 %v1391_v13 }
 0x46d   :  { %v1369_v15 = vmul.f32 1.442695, %v1342_v41 }
 0x46e   :  { %v1367_v54 = vmul.f32 1.442695, %v1341_v47  ;;  %v1330_v55 = vpop.xlane.xlu1 %1329 }
 0x46f   :  { %10591 = vpow2.f32 %v1369_v15  ;;  %v1346_v17 = vsub.f32 %v11448_v61, %v1330_v55  ;;  %v1327_v19 = vpop.xlane.xlu0 %1326 }
 0x470   :  { %10593 = vpow2.f32 %v1367_v54  ;;  %v1345_v25 = vsub.f32 %v11453_v1, %v1327_v19 }
 0x471   :  { %v11511_v56 = vpop.eup %10583  ;;  %v1377_v28 = vmul.f32 1.442695, %v1346_v17 }
 0x472   :  { %v11513_v29 = vpop.eup %10585  ;;  %v1375_v30 = vmul.f32 1.442695, %v1345_v25  ;;  %v1418_v59 = vsel %vm180_vm0, %v11511_v56, 0.0  ;;  %v10308_v44 = vpop.permute.xlu1 %10307 }
 0x473   :  { %10595 = vpow2.f32 %v1377_v28  ;;  %1419 = vadd.xlane.f32.xlu1 %v1418_v59  ;;  %v1415_v31 = vsel %vm180_vm0, %v11513_v29, 0.0  ;;  %v10303_v50 = vpop.permute.xlu0 %10302  ;;  %v10310_v6 = vunpack.i.h.bf16 %v10308_v44  ;;  %v10309_v7 = vunpack.i.l.bf16 %v10308_v44 }
 0x474   :  { %10597 = vpow2.f32 %v1375_v30  ;;  %1416 = vadd.xlane.f32.xlu0 %v1415_v31  ;;  %v10305_v0 = vunpack.i.h.bf16 %v10303_v50  ;;  %v10304_v18 = vunpack.i.l.bf16 %v10303_v50 }
 0x475   :  { %v11519_v61 = vpop.eup %10587 }
 0x476   :  { %v11521_v33 = vpop.eup %10589  ;;  %v1400_v1 = vsel %vm180_vm0, %v11519_v61, 0.0  ;;  %v9444_v37 = vpack.c.bf16 %v10305_v0, %v10304_v18 }
 0x477   :  { %1401 = vadd.xlane.f32.xlu1 %v1400_v1  ;;  %v1397_v35 = vsel %vm180_vm0, %v11521_v33, 0.0 }
 0x478   :  { %1398 = vadd.xlane.f32.xlu0 %v1397_v35 }
 0x479   :  { %v11527_v62 = vpop.eup %10591 }
 0x47a   :  { %v11529_v63 = vpop.eup %10593  ;;  %v1412_v39 = vsel %vm180_vm0, %v11527_v62, 0.0 }
 0x47b   :  { %1413 = vadd.xlane.f32.xlu1 %v1412_v39  ;;  %v1409_v40 = vsel %vm180_vm0, %v11529_v63, 0.0 }
 0x47c   :  { %1410 = vadd.xlane.f32.xlu0 %v1409_v40 }
 0x47d   :  { %v11535_v10 = vpop.eup %10595 }
 0x47e   :  { %v11537_v12 = vpop.eup %10597  ;;  %v1424_v43 = vsel %vm180_vm0, %v11535_v10, 0.0 }
 0x47f   :  { %1425 = vadd.xlane.f32.xlu1 %v1424_v43  ;;  %v1421_v46 = vsel %vm180_vm0, %v11537_v12, 0.0 }
 0x480   :  { %1422 = vadd.xlane.f32.xlu0 %v1421_v46 }
 0x490   :  { %10317 = vrot.lane.b32.xlu1 %v11284_v42, %s11017_s3 }
 0x496   :  { %10312 = vrot.lane.b32.xlu0 %v11284_v42, %s11009_s21 }
 0x4a3   :  { %v1384_v51 = vpop.xlane.xlu1 %1383 }
 0x4a4   :  { %10599 = vrcp.f32 %v1384_v51  ;;  %v1381_v53 = vpop.xlane.xlu0 %1380 }
 0x4a5   :  { %10601 = vrcp.f32 %v1381_v53 }
 0x4ae   :  { %v10600_v57 = vpop.eup %10599 }
 0x4af   :  { %v10602_v60 = vpop.eup %10601  ;;  %v1430_v3 = vmul.f32 %v10600_v57, %v11465_v8 }
 0x4b0   :  { %v1428_v2 = vmul.f32 %v10602_v60, %v11467_v9 }
 0x4b2   :  { %8861 = vmatprep.mubr.msk.f32.mxu1 %vm180_vm0, %v1428_v2 }
 0x4b3   :  { %8862 = vmatmul.mubr.msk.f32.vlgmr.msra.gmra.mrb[8].mxu1 %vm180_vm0, %v1430_v3 }
 0x4b4   :  { %9439 = vmatpush3.bf16.msra.mxu1 %v11362_v36  ;;  %v9448_v36 = vpack.c.bf16 %v10310_v6, %v10309_v7  ;;  %v2184_v6 = vld [vmem:[#allocation12 + $0x8] sm:$0xff] }
 0x4b5   :  { %9445 = vmatprep.subr.bf16.mxu1 %v9444_v37 }
 0x4e8   :  { %v1390_v42 = vpop.xlane.xlu1 %1389 }
 0x4e9   :  { %10603 = vrcp.f32 %v1390_v42  ;;  %v1387_v38 = vpop.xlane.xlu0 %1386 }
 0x4ea   :  { %10605 = vrcp.f32 %v1387_v38 }
 0x4f3   :  { %v10604_v4 = vpop.eup %10603 }
 0x4f4   :  { %v10606_v5 = vpop.eup %10605  ;;  %v1408_v41 = vpop.xlane.xlu1 %1407  ;;  %v1434_v11 = vmul.f32 %v10604_v4, %v11477_v32 }
 0x4f5   :  { %v1405_v9 = vpop.xlane.xlu0 %1404  ;;  %v1432_v8 = vmul.f32 %v10606_v5, %v11479_v34  ;;  %v2183_v5 = vld [vmem:[#allocation12] sm:$0xff] }
 0x4f6   :  { %10607 = vrcp.f32 %v1405_v9  ;;  %v9460_v7 = vpack.c.bf16 %v2184_v6, %v2183_v5 }
 0x4f7   :  { %8868 = vmatprep.mubr.msk.f32.mxu0 %vm180_vm0, %v1432_v8 }
 0x4f8   :  { %v1396_v13 = vpop.xlane.xlu1 %1395  ;;  %8869 = vmatmul.mubr.msk.f32.vlgmr.msra.gmra.mrb[16].mxu0 %vm180_vm0, %v1434_v11  ;;  %v2187_v11 = vld [vmem:[#allocation12 + $0x20] sm:$0xff] }
 0x4f9   :  { %10609 = vrcp.f32 %v1396_v13  ;;  %9443 = vmatpush3.bf16.msra.mxu0 %v11372_v48  ;;  %v1393_v47 = vpop.xlane.xlu0 %1392  ;;  %v2188_v13 = vld [vmem:[#allocation12 + $0x28] sm:$0xff] }
 0x4fa   :  { %9449 = vmatprep.subr.bf16.mxu0 %v9448_v36  ;;  %10611 = vrcp.f32 %v1393_v47  ;;  %v2189_v47 = vld [vmem:[#allocation12 + $0x30] sm:$0xff] }
 0x4fb   :  { %10613 = vrcp.f32 %v1408_v41  ;;  %v2186_v41 = vld [vmem:[#allocation12 + $0x18] sm:$0xff] }
 0x500   :  { %v1420_v15 = vpop.xlane.xlu1 %1419  ;;  %v10608_v55 = vpop.eup %10607 }
 0x501   :  { %v1417_v54 = vpop.xlane.xlu0 %1416  ;;  %v1444_v48 = vmul.f32 %v10608_v55, %v11491_v58  ;;  %v2191_v55 = vld [vmem:[#allocation12 + $0x40] sm:$0xff] }
 0x502   :  { %10615 = vrcp.f32 %v1417_v54 }
 0x503   :  { %v10610_v34 = vpop.eup %10609 }
 0x504   :  { %v10612_v32 = vpop.eup %10611  ;;  %v1402_v17 = vpop.xlane.xlu1 %1401  ;;  %v1438_v28 = vmul.f32 %v10610_v34, %v11499_v49  ;;  %v2192_v34 = vld [vmem:[#allocation12 + $0x48] sm:$0xff] }
 0x505   :  { %10617 = vrcp.f32 %v1402_v17  ;;  %v1399_v19 = vpop.xlane.xlu0 %1398  ;;  %v1436_v25 = vmul.f32 %v10612_v32, %v11501_v52  ;;  %v10614_v30 = vpop.eup %10613  ;;  %v9476_v32 = vpack.c.bf16 %v2192_v34, %v2191_v55 }
 0x506   :  { %10619 = vrcp.f32 %v1399_v19  ;;  %v1446_v1 = vmul.f32 %v10614_v30, %v11489_v16  ;;  %v2194_v30 = vld [vmem:[#allocation12 + $0x58] sm:$0xff] }
 0x507   :  { %8875 = vmatprep.mubr.msk.f32.mxu1 %vm180_vm0, %v1436_v25 }
 0x508   :  { %v1414_v59 = vpop.xlane.xlu1 %1413  ;;  %8876 = vmatmul.mubr.msk.f32.vlgmr.msra.gmra.mrb[10].mxu1 %vm180_vm0, %v1438_v28  ;;  %v2193_v28 = vld [vmem:[#allocation12 + $0x50] sm:$0xff] }
 0x509   :  { %10621 = vrcp.f32 %v1414_v59  ;;  %9447 = vmatpush3.bf16.msra.mxu1 %v9444_v37  ;;  %8889 = vmatprep.mubr.msk.f32.mxu1 %vm180_vm0, %v1444_v48  ;;  %v1411_v31 = vpop.xlane.xlu0 %1410  ;;  %v9480_v48 = vpack.c.bf16 %v2194_v30, %v2193_v28 }
 0x50a   :  { %10623 = vrcp.f32 %v1411_v31 }
 0x50b   :  { %10625 = vrcp.f32 %v1420_v15  ;;  %v2190_v15 = vld [vmem:[#allocation12 + $0x38] sm:$0xff] }
 0x50c   :  { %v10616_v52 = vpop.eup %10615  ;;  %v1426_v35 = vpop.xlane.xlu1 %1425  ;;  %8890 = vmatmul.mubr.msk.f32.vlgmr.msra.gmra.mrb[12].mxu1 %vm180_vm0, %v1446_v1  ;;  %v9472_v54 = vpack.c.bf16 %v2190_v15, %v2189_v47 }
 0x50d   :  { %10627 = vrcp.f32 %v1426_v35  ;;  %v1423_v49 = vpop.xlane.xlu0 %1422  ;;  %v1452_v58 = vmul.f32 %v10616_v52, %v11513_v29  ;;  %v2195_v52 = vld [vmem:[#allocation12 + $0x60] sm:$0xff]  ;;  %v2196_v35 = vld [vmem:[#allocation12 + $0x68] sm:$0xff] }
 0x50e   :  { %10629 = vrcp.f32 %v1423_v49  ;;  %v9484_v49 = vpack.c.bf16 %v2196_v35, %v2195_v52 }
 0x50f   :  { %v10618_v39 = vpop.eup %10617  ;;  %8903 = vmatprep.mubr.msk.f32.mxu1 %vm180_vm0, %v1452_v58  ;;  %v2197_v58 = vld [vmem:[#allocation12 + $0x70] sm:$0xff] }
 0x510   :  { %v10620_v40 = vpop.eup %10619  ;;  %v10318_v43 = vpop.permute.xlu1 %10317  ;;  %v1442_v57 = vmul.f32 %v10618_v39, %v11519_v61  ;;  %v2198_v39 = vld [vmem:[#allocation12 + $0x78] sm:$0xff] }
 0x511   :  { %v10320_v46 = vunpack.i.h.bf16 %v10318_v43  ;;  %v10319_v44 = vunpack.i.l.bf16 %v10318_v43  ;;  %v10313_v50 = vpop.permute.xlu0 %10312  ;;  %v1440_v16 = vmul.f32 %v10620_v40, %v11521_v33  ;;  %v9488_v40 = vpack.c.bf16 %v2198_v39, %v2197_v58 }
 0x512   :  { %v10315_v51 = vunpack.i.h.bf16 %v10313_v50  ;;  %v10314_v53 = vunpack.i.l.bf16 %v10313_v50 }
 0x513   :  { %v10622_v60 = vpop.eup %10621  ;;  %8882 = vmatprep.mubr.msk.f32.mxu0 %vm180_vm0, %v1440_v16  ;;  %v9456_v0 = vpack.c.bf16 %v10320_v46, %v10319_v44 }
 0x514   :  { %v10624_v29 = vpop.eup %10623  ;;  %8883 = vmatmul.mubr.msk.f32.vlgmr.msra.gmra.mrb[18].mxu0 %vm180_vm0, %v1442_v57  ;;  %v9452_v18 = vpack.c.bf16 %v10315_v51, %v10314_v53  ;;  %v1450_v33 = vmul.f32 %v10622_v60, %v11527_v62 }
 0x515   :  { %v10626_v2 = vpop.eup %10625  ;;  %9451 = vmatpush3.bf16.msra.mxu0 %v9448_v36  ;;  %v1448_v3 = vmul.f32 %v10624_v29, %v11529_v63  ;;  %v9468_v36 = vpack.c.bf16 %v2188_v13, %v2187_v11 }
 0x516   :  { %9457 = vmatprep.subr.bf16.mxu0 %v9456_v0  ;;  %9453 = vmatprep.subr.bf16.mxu1 %v9452_v18  ;;  %v1454_v42 = vmul.f32 %v10626_v2, %v11511_v56  ;;  %v2185_v56 = vld [vmem:[#allocation12 + $0x10] sm:$0xff] }
 0x517   :  { %v10628_v37 = vpop.eup %10627  ;;  %8896 = vmatprep.mubr.msk.f32.mxu0 %vm180_vm0, %v1448_v3  ;;  %9455 = vmatpush3.bf16.msra.mxu1 %v9452_v18 }
 0x518   :  { %v10630_v61 = vpop.eup %10629  ;;  %8897 = vmatmul.mubr.msk.f32.vlgmr.msra.gmra.mrb[20].mxu0 %vm180_vm0, %v1450_v33  ;;  %v1458_v63 = vmul.f32 %v10628_v37, %v11535_v10  ;;  %9461 = vmatprep.subr.bf16.mxu1 %v9460_v7 }
 0x519   :  { %9459 = vmatpush3.bf16.msra.mxu0 %v9456_v0  ;;  %v1456_v38 = vmul.f32 %v10630_v61, %v11537_v12  ;;  %v9464_v12 = vpack.c.bf16 %v2186_v41, %v2185_v56 }
 0x51a   :  { %8904 = vmatmul.mubr.msk.f32.vlgmr.msra.gmra.mrb[14].mxu1 %vm180_vm0, %v1454_v42 }
 0x51b   :  { %8910 = vmatprep.mubr.msk.f32.mxu0 %vm180_vm0, %v1456_v38  ;;  %9463 = vmatpush3.bf16.msra.mxu1 %v9460_v7 }
 0x51c   :  { %8911 = vmatmul.mubr.msk.f32.vlgmr.msra.gmra.mrb[22].mxu0 %vm180_vm0, %v1458_v63  ;;  %9465 = vmatprep.subr.bf16.mxu1 %v9464_v12 }
 0x51d   :  { %2474 = vmatprep.mubr.f32.mxu0 %v11011_v14 }
 0x51f   :  { %9467 = vmatpush3.bf16.msra.mxu1 %v9464_v12 }
 0x520   :  { %9469 = vmatprep.subr.bf16.mxu1 %v9468_v36 }
 0x523   :  { %9471 = vmatpush3.bf16.msra.mxu1 %v9468_v36 }
 0x524   :  { %9473 = vmatprep.subr.bf16.mxu1 %v9472_v54 }
 0x527   :  { %9475 = vmatpush3.bf16.msra.mxu1 %v9472_v54 }
 0x528   :  { %9477 = vmatprep.subr.bf16.mxu1 %v9476_v32 }
 0x52b   :  { %9479 = vmatpush3.bf16.msra.mxu1 %v9476_v32 }
 0x52c   :  { %9481 = vmatprep.subr.bf16.mxu1 %v9480_v48 }
 0x52f   :  { %9483 = vmatpush3.bf16.msra.mxu1 %v9480_v48 }
 0x530   :  { %9485 = vmatprep.subr.bf16.mxu1 %v9484_v49 }
 0x533   :  { %9487 = vmatpush3.bf16.msra.mxu1 %v9484_v49 }
 0x534   :  { %9489 = vmatprep.subr.bf16.mxu1 %v9488_v40 }
 0x537   :  { %9491 = vmatpush3.bf16.msra.mxu1 %v9488_v40  ;;  %v2325_v40 = vld [vmem:[#allocation14 + $0x8] sm:$0xff] }
 0x586   :  { %v11582_v62 = vpop.f32.mrb[8].mxu1 }
 0x587   :  { %v11584_v4 = vpop.f32.mrb[9].mxu1 }
 0x5cb   :  { %v8870_v10 = vpop.f32.mrb[16].mxu0 }
 0x5cc   :  { %v1612_v9 = vpop.f32.mrb[17].mxu0 }
 0x5cd   :  { %v10321_v8 = vpack.i.bf16 %v8870_v10, %v1612_v9 }
 0x5cf   :  { %10322 = vrot.lane.b32.xlu0 %v10321_v8, %s11017_s3 }
 0x5db   :  { %v8877_v17 = vpop.f32.mrb[10].mxu1 }
 0x5dc   :  { %v1693_v19 = vpop.f32.mrb[11].mxu1 }
 0x5dd   :  { %v10326_v25 = vpack.i.bf16 %v8877_v17, %v1693_v19 }
 0x5df   :  { %10327 = vrot.lane.b32.xlu1 %v10326_v25, %s11009_s21  ;;  %v8891_v59 = vpop.f32.mrb[12].mxu1 }
 0x5e0   :  { %v1855_v31 = vpop.f32.mrb[13].mxu1 }
 0x5e1   :  { %v10331_v1 = vpack.i.bf16 %v8891_v59, %v1855_v31  ;;  %v8096_v31 = vld [vmem:[%s12482_s7] ss:$0 sm:$0xff] }
 0x5e3   :  { %10332 = vrot.lane.b32.xlu1 %v10331_v1, %s11015_s4 }
 0x5e7   :  { %v8884_v43 = vpop.f32.mrb[18].mxu0 }
 0x5e8   :  { %v1774_v46 = vpop.f32.mrb[19].mxu0 }
 0x5e9   :  { %v10336_v44 = vpack.i.bf16 %v8884_v43, %v1774_v46  ;;  %v2329_v43 = vld [vmem:[#allocation14 + $0x28] sm:$0xff]  ;;  %v2327_v46 = vld [vmem:[#allocation14 + $0x18] sm:$0xff] }
 0x5eb   :  { %10337 = vrot.lane.b32.xlu0 %v10336_v44, %s11016_s17  ;;  %v8898_v50 = vpop.f32.mrb[20].mxu0  ;;  %v9492_v44 = vpack.c.bf16 %v2329_v43, %v2325_v40  ;;  %v2361_v40 = vld [vmem:[#allocation14 + $0x128] sm:$0xff]  ;;  %v2359_v43 = vld [vmem:[#allocation14 + $0x118] sm:$0xff] }
 0x5ec   :  { %v1936_v16 = vpop.f32.mrb[21].mxu0 }
 0x5ed   :  { %v10346_v51 = vpack.i.bf16 %v8898_v50, %v1936_v16  ;;  %v8905_v53 = vpop.f32.mrb[14].mxu1  ;;  %v2331_v50 = vld [vmem:[#allocation14 + $0x38] sm:$0xff]  ;;  %v2324_v16 = vld [vmem:[#allocation14] sm:$0xff]  ;;  %9493 = vmatprep.subr.bf16.mxu0 %v9492_v44 }
 0x5ee   :  { %v2017_v57 = vpop.f32.mrb[15].mxu1  ;;  %v2363_v44 = vld [vmem:[#allocation14 + $0x138] sm:$0xff] }
 0x5ef   :  { %v10341_v60 = vpack.i.bf16 %v8905_v53, %v2017_v57  ;;  %10347 = vrot.lane.b32.xlu0 %v10346_v51, %s11014_s2  ;;  %v8912_v0 = vpop.f32.mrb[22].mxu0  ;;  %v2328_v51 = vld [vmem:[#allocation14 + $0x20] sm:$0xff]  ;;  %v9524_v53 = vpack.c.bf16 %v2331_v50, %v2327_v46 }
 0x5f0   :  { %v2098_v29 = vpop.f32.mrb[23].mxu0  ;;  %v9494_v57 = vpack.c.bf16 %v2328_v51, %v2324_v16  ;;  %v2356_v50 = vld [vmem:[#allocation14 + $0x100] sm:$0xff]  ;;  %v9540_v51 = vpack.c.bf16 %v2363_v44, %v2359_v43 }
 0x5f1   :  { %v10351_v18 = vpack.i.bf16 %v8912_v0, %v2098_v29  ;;  %10342 = vrot.lane.b32.xlu1 %v10341_v60, %s11013_s22  ;;  %v2326_v60 = vld [vmem:[#allocation14 + $0x10] sm:$0xff]  ;;  %v2333_v29 = vld [vmem:[#allocation14 + $0x48] sm:$0xff]  ;;  %9525 = vmatprep.subr.bf16.mxu1 %v9524_v53  ;;  %v2360_v16 = vld [vmem:[#allocation14 + $0x120] sm:$0xff] }
 0x5f2   :  { %v2330_v0 = vld [vmem:[#allocation14 + $0x30] sm:$0xff]  ;;  %9495 = vmatpush1.bf16.msra.mxu0 %v9494_v57  ;;  %v9510_v53 = vpack.c.bf16 %v2360_v16, %v2356_v50 }
 0x5f3   :  { %10352 = vrot.lane.b32.xlu0 %v10351_v18, %s11012_s27  ;;  %v9526_v18 = vpack.c.bf16 %v2330_v0, %v2326_v60  ;;  %v2358_v57 = vld [vmem:[#allocation14 + $0x110] sm:$0xff]  ;;  %v2365_v0 = vld [vmem:[#allocation14 + $0x148] sm:$0xff] }
 0x5f4   :  { %v2362_v60 = vld [vmem:[#allocation14 + $0x130] sm:$0xff] }
 0x641   :  { %v10323_v2 = vpop.permute.xlu0 %10322 }
 0x642   :  { %v10325_v33 = vunpack.i.h.bf16 %v10323_v2  ;;  %v10324_v37 = vunpack.i.l.bf16 %v10323_v2  ;;  %v2337_v2 = vld [vmem:[#allocation14 + $0x68] sm:$0xff] }
 0x644   :  { %v2164_v63 = vsel %vm180_vm0, %v11582_v62, %v10325_v33  ;;  %v2163_v5 = vsel %vm180_vm0, %v11584_v4, %v10324_v37  ;;  %v2332_v37 = vld [vmem:[#allocation14 + $0x40] sm:$0xff] }
 0x651   :  { %v10328_v3 = vpop.permute.xlu1 %10327 }
 0x652   :  { %v10330_v61 = vunpack.i.h.bf16 %v10328_v3  ;;  %v10329_v42 = vunpack.i.l.bf16 %v10328_v3  ;;  %v2339_v3 = vld [vmem:[#allocation14 + $0x78] sm:$0xff] }
 0x654   :  { %v2166_v41 = vsel %vm2165_vm2, %v2163_v5, %v10329_v42  ;;  %v2167_v12 = vsel %vm2165_vm2, %v2164_v63, %v10330_v61  ;;  %v2336_v61 = vld [vmem:[#allocation14 + $0x60] sm:$0xff]  ;;  %v2334_v42 = vld [vmem:[#allocation14 + $0x50] sm:$0xff]  ;;  %v2341_v5 = vld [vmem:[#allocation14 + $0x88] sm:$0xff] }
 0x655   :  { %v10333_v6 = vpop.permute.xlu1 %10332  ;;  %v2338_v63 = vld [vmem:[#allocation14 + $0x70] sm:$0xff] }
 0x656   :  { %v10335_v8 = vunpack.i.h.bf16 %v10333_v6  ;;  %v10334_v11 = vunpack.i.l.bf16 %v10333_v6  ;;  %v2345_v6 = vld [vmem:[#allocation14 + $0xa8] sm:$0xff] }
 0x65d   :  { %v10338_v38 = vpop.permute.xlu0 %10337 }
 0x65e   :  { %v10340_v56 = vunpack.i.h.bf16 %v10338_v38  ;;  %v10339_v7 = vunpack.i.l.bf16 %v10338_v38  ;;  %v9498_v38 = vpack.c.bf16 %v2336_v61, %v2332_v37  ;;  %v2368_v37 = vld [vmem:[#allocation14 + $0x160] sm:$0xff]  ;;  %v2366_v61 = vld [vmem:[#allocation14 + $0x150] sm:$0xff] }
 0x660   :  { %v2169_v10 = vsel %vm2168_vm3, %v2166_v41, %v10339_v7  ;;  %v2170_v9 = vsel %vm2168_vm3, %v2167_v12, %v10340_v56  ;;  %v9530_v56 = vpack.c.bf16 %v2338_v63, %v2334_v42  ;;  %v9500_v7 = vpack.c.bf16 %v2345_v6, %v2341_v5  ;;  %v2343_v41 = vld [vmem:[#allocation14 + $0x98] sm:$0xff]  ;;  %v2373_v63 = vld [vmem:[#allocation14 + $0x188] sm:$0xff] }
 0x661   :  { %v10348_v13 = vpop.permute.xlu0 %10347  ;;  %v2172_v4 = vsel %vm2171_vm4, %v2169_v10, %v10334_v11  ;;  %v2173_v15 = vsel %vm2171_vm4, %v2170_v9, %v10335_v8  ;;  %v2347_v12 = vld [vmem:[#allocation14 + $0xb8] sm:$0xff]  ;;  %v2340_v10 = vld [vmem:[#allocation14 + $0x80] sm:$0xff]  ;;  %v2342_v11 = vld [vmem:[#allocation14 + $0x90] sm:$0xff] }
 0x662   :  { %v10350_v62 = vunpack.i.h.bf16 %v10348_v13  ;;  %v10349_v36 = vunpack.i.l.bf16 %v10348_v13  ;;  %v9532_v9 = vpack.c.bf16 %v2347_v12, %v2343_v41  ;;  %v2344_v8 = vld [vmem:[#allocation14 + $0xa0] sm:$0xff]  ;;  %v2346_v13 = vld [vmem:[#allocation14 + $0xb0] sm:$0xff]  ;;  %v2377_v5 = vld [vmem:[#allocation14 + $0x1a8] sm:$0xff] }
 0x663   :  { %v10343_v47 = vpop.permute.xlu1 %10342  ;;  %v2379_v41 = vld [vmem:[#allocation14 + $0x1b8] sm:$0xff]  ;;  %v2372_v12 = vld [vmem:[#allocation14 + $0x180] sm:$0xff] }
 0x664   :  { %v10345_v54 = vunpack.i.h.bf16 %v10343_v47  ;;  %v10344_v55 = vunpack.i.l.bf16 %v10343_v47  ;;  %v2175_v34 = vsel %vm2174_vm5, %v2172_v4, %v10349_v36  ;;  %v2176_v32 = vsel %vm2174_vm5, %v2173_v15, %v10350_v62 }
 0x665   :  { %v10353_v17 = vpop.permute.xlu0 %10352  ;;  %v9502_v62 = vpack.c.bf16 %v2344_v8, %v2340_v10  ;;  %v9534_v36 = vpack.c.bf16 %v2346_v13, %v2342_v11  ;;  %v2374_v8 = vld [vmem:[#allocation14 + $0x190] sm:$0xff] }
 0x666   :  { %v10355_v19 = vunpack.i.h.bf16 %v10353_v17  ;;  %v10354_v25 = vunpack.i.l.bf16 %v10353_v17  ;;  %v2178_v28 = vsel %vm2177_vm6, %v2175_v34, %v10344_v55  ;;  %v2179_v30 = vsel %vm2177_vm6, %v2176_v32, %v10345_v54  ;;  %v2378_v11 = vld [vmem:[#allocation14 + $0x1b0] sm:$0xff] }
 0x668   :  { %v2181_v48 = vsel %vm2180_vm7, %v2178_v28, %v10354_v25  ;;  %v2182_v59 = vsel %vm2180_vm7, %v2179_v30, %v10355_v19  ;;  %v2349_v19 = vld [vmem:[#allocation14 + $0xc8] sm:$0xff]  ;;  %v2351_v28 = vld [vmem:[#allocation14 + $0xd8] sm:$0xff] }
 0x669   :  { %8945 = vmatprep.mubr.f32.mxu1 %v2181_v48  ;;  %v2353_v25 = vld [vmem:[#allocation14 + $0xe8] sm:$0xff]  ;;  %v2355_v48 = vld [vmem:[#allocation14 + $0xf8] sm:$0xff] }
 0x66a   :  { %8946 = vmatmul.mubr.f32.vlgmr.msra.gmra.mrb[16].mxu1 %v2182_v59  ;;  %v9504_v30 = vpack.c.bf16 %v2353_v25, %v2349_v19  ;;  %v2348_v59 = vld [vmem:[#allocation14 + $0xc0] sm:$0xff]  ;;  %v2382_v25 = vld [vmem:[#allocation14 + $0x1d0] sm:$0xff] }
 0x66b   :  { %2551 = vmatprep.mubr.f32.mxu1 %v11011_v14  ;;  %9527 = vmatpush1.bf16.msra.mxu1 %v9526_v18  ;;  %v2369_v18 = vld [vmem:[#allocation14 + $0x168] sm:$0xff] }
 0x73d   :  { %v8947_v1 = vpop.f32.mrb[16].mxu1 }
 0x73e   :  { %v2278_v52 = vadd.f32 %v8947_v1, %v8096_v31  ;;  %v2272_v35 = vpop.f32.mrb[17].mxu1  ;;  %v9536_v1 = vpack.c.bf16 %v2355_v48, %v2351_v28  ;;  %v2386_v28 = vld [vmem:[#allocation14 + $0x1f0] sm:$0xff] }
 0x73f   :  { %v2273_v49 = vadd.f32 %v8096_v31, %v2272_v35  ;;  %v2352_v31 = vld [vmem:[#allocation14 + $0xe0] sm:$0xff]  ;;  %v2350_v35 = vld [vmem:[#allocation14 + $0xd0] sm:$0xff]  ;;  %v9554_v48 = vpack.c.bf16 %v2386_v28, %v2382_v25  ;;  %v2627_v25 = vld [vmem:[#allocation15 + $0x1b8] sm:$0xff] }
 0x740   :  { %v2282_v58 = vadd.f32 %v2278_v52, %v11257_v21  ;;  %v2335_v21 = vld [vmem:[#allocation14 + $0x58] sm:$0xff]  ;;  %v9506_v52 = vpack.c.bf16 %v2352_v31, %v2348_v59  ;;  %v2588_v59 = vld [vmem:[#allocation15 + $0x80] sm:$0xff]  ;;  %v2589_v31 = vld [vmem:[#allocation15 + $0x88] sm:$0xff] }
 0x741   :  { %v2281_v39 = vadd.f32 %v2273_v49, %v11255_v20  ;;  %v9496_v20 = vpack.c.bf16 %v2337_v2, %v2333_v29  ;;  %v9528_v33 = vpack.c.bf16 %v2339_v3, %v2335_v21  ;;  %v2354_v49 = vld [vmem:[#allocation14 + $0xf0] sm:$0xff]  ;;  %v9542_v29 = vpack.c.bf16 %v2362_v60, %v2358_v57  ;;  %v2367_v2 = vld [vmem:[#allocation14 + $0x158] sm:$0xff] }
 0x742   :  { %2287 = vadd.xlane.f32.xlu0 %v2282_v58  ;;  %v2371_v21 = vld [vmem:[#allocation14 + $0x178] sm:$0xff]  ;;  %v9512_v3 = vpack.c.bf16 %v2369_v18, %v2365_v0  ;;  %v2572_v0 = vld [vmem:[#allocation15] sm:$0xff] }
 0x743   :  { %2285 = vadd.xlane.f32.xlu1 %v2281_v39  ;;  %9497 = vmatprep.subr.bf16.mxu0 %v9496_v20  ;;  %v9544_v20 = vpack.c.bf16 %v2371_v21, %v2367_v2  ;;  %v2604_v18 = vld [vmem:[#allocation15 + $0x100] sm:$0xff]  ;;  %v2605_v2 = vld [vmem:[#allocation15 + $0x108] sm:$0xff]  ;;  %v2590_v21 = vld [vmem:[#allocation15 + $0x90] sm:$0xff] }
 0x744   :  { %9529 = vmatprep.subr.bf16.mxu1 %v9528_v33  ;;  %9499 = vmatpush1.bf16.msra.mxu0 %v9498_v38  ;;  %v2364_v33 = vld [vmem:[#allocation14 + $0x140] sm:$0xff]  ;;  %v2370_v38 = vld [vmem:[#allocation14 + $0x170] sm:$0xff] }
 0x745   :  { %9531 = vmatpush1.bf16.msra.mxu1 %v9530_v56  ;;  %9501 = vmatprep.subr.bf16.mxu0 %v9500_v7  ;;  %v9514_v42 = vpack.c.bf16 %v2368_v37, %v2364_v33  ;;  %v9546_v6 = vpack.c.bf16 %v2370_v38, %v2366_v61  ;;  %v9516_v56 = vpack.c.bf16 %v2377_v5, %v2373_v63  ;;  %v2375_v7 = vld [vmem:[#allocation14 + $0x198] sm:$0xff]  ;;  %v2622_v33 = vld [vmem:[#allocation15 + $0x190] sm:$0xff] }
 0x746   :  { %9533 = vmatprep.subr.bf16.mxu1 %v9532_v9  ;;  %v9548_v10 = vpack.c.bf16 %v2379_v41, %v2375_v7  ;;  %v2376_v9 = vld [vmem:[#allocation14 + $0x1a0] sm:$0xff]  ;;  %v2623_v37 = vld [vmem:[#allocation15 + $0x198] sm:$0xff]  ;;  %v9590_v63 = vpack.c.bf16 %v2605_v2, %v2604_v18  ;;  %v2574_v5 = vld [vmem:[#allocation15 + $0x10] sm:$0xff] }
 0x747   :  { %v9518_v13 = vpack.c.bf16 %v2376_v9, %v2372_v12  ;;  %v2606_v7 = vld [vmem:[#allocation15 + $0x110] sm:$0xff]  ;;  %v2592_v41 = vld [vmem:[#allocation15 + $0xa0] sm:$0xff]  ;;  %v2593_v12 = vld [vmem:[#allocation15 + $0xa8] sm:$0xff] }
 0x748   :  { %9503 = vmatpush1.bf16.msra.mxu0 %v9502_v62  ;;  %v2381_v62 = vld [vmem:[#allocation14 + $0x1c8] sm:$0xff]  ;;  %v2631_v18 = vld [vmem:[#allocation15 + $0x1d8] sm:$0xff] }
 0x749   :  { %9535 = vmatpush1.bf16.msra.mxu1 %v9534_v36  ;;  %9505 = vmatprep.subr.bf16.mxu0 %v9504_v30  ;;  %v2385_v36 = vld [vmem:[#allocation14 + $0x1e8] sm:$0xff] }
 0x74a   :  { %9537 = vmatprep.subr.bf16.mxu1 %v9536_v1  ;;  %v2620_v1 = vld [vmem:[#allocation15 + $0x180] sm:$0xff]  ;;  %v2625_v9 = vld [vmem:[#allocation15 + $0x1a8] sm:$0xff] }
 0x74c   :  { %9507 = vmatpush1.bf16.msra.mxu0 %v9506_v52  ;;  %v9556_v52 = vpack.c.bf16 %v2589_v31, %v2588_v59  ;;  %v2579_v59 = vld [vmem:[#allocation15 + $0x38] sm:$0xff] }
 0x7cf   :  { %v2288_v47 = vpop.xlane.xlu0 %2287 }
 0x7d0   :  { %v2291_v4 = vmul.f32 0.0078125, %v2288_v47  ;;  %v2286_v15 = vpop.xlane.xlu1 %2285  ;;  %v2383_v47 = vld [vmem:[#allocation14 + $0x1d8] sm:$0xff] }
 0x7d1   :  { %v2290_v54 = vmul.f32 0.0078125, %v2286_v15  ;;  %v9520_v15 = vpack.c.bf16 %v2385_v36, %v2381_v62  ;;  %v2576_v62 = vld [vmem:[#allocation15 + $0x20] sm:$0xff]  ;;  %v2577_v36 = vld [vmem:[#allocation15 + $0x28] sm:$0xff] }
 0x7d2   :  { %v11615_v55 = vsub.f32 %v2282_v58, %v2291_v4  ;;  %v9538_v58 = vpack.c.bf16 %v2354_v49, %v2350_v35  ;;  %v9550_v4 = vpack.c.bf16 %v2378_v11, %v2374_v8  ;;  %v2621_v35 = vld [vmem:[#allocation15 + $0x188] sm:$0xff]  ;;  %v9566_v28 = vpack.c.bf16 %v2577_v36, %v2576_v62  ;;  %v2602_v36 = vld [vmem:[#allocation15 + $0xf0] sm:$0xff] }
 0x7d3   :  { %v11617_v34 = vsub.f32 %v2281_v39, %v2290_v54  ;;  %v2357_v39 = vld [vmem:[#allocation14 + $0x108] sm:$0xff]  ;;  %v2387_v54 = vld [vmem:[#allocation14 + $0x1f8] sm:$0xff]  ;;  %v9588_v49 = vpack.c.bf16 %v2621_v35, %v2620_v1 }
 0x7d4   :  { %v2295_v32 = vmul.f32 %v11615_v55, %v11615_v55  ;;  %9539 = vmatpush1.bf16.msra.mxu1 %v9538_v58  ;;  %v9508_v46 = vpack.c.bf16 %v2361_v40, %v2357_v39  ;;  %v9552_v19 = vpack.c.bf16 %v2387_v54, %v2383_v47  ;;  %v9564_v47 = vpack.c.bf16 %v2593_v12, %v2592_v41  ;;  %v2609_v54 = vld [vmem:[#allocation15 + $0x128] sm:$0xff]  ;;  %v2611_v35 = vld [vmem:[#allocation15 + $0x138] sm:$0xff]  ;;  %v2584_v12 = vld [vmem:[#allocation15 + $0x60] sm:$0xff] }
 0x7d5   :  { %v2294_v17 = vmul.f32 %v11617_v34, %v11617_v34  ;;  %9541 = vmatprep.subr.bf16.mxu1 %v9540_v51  ;;  %v8097_v51 = vld [vmem:[%s12487_s12] ss:$0 sm:$0xff] }
 0x7d6   :  { %2298 = vadd.xlane.f32.xlu1 %v2295_v32  ;;  %9509 = vmatprep.subr.bf16.mxu0 %v9508_v46  ;;  %v2380_v32 = vld [vmem:[#allocation14 + $0x1c0] sm:$0xff] }
 0x7d7   :  { %2296 = vadd.xlane.f32.xlu0 %v2294_v17  ;;  %9511 = vmatpush1.bf16.msra.mxu0 %v9510_v53  ;;  %v2384_v17 = vld [vmem:[#allocation14 + $0x1e0] sm:$0xff]  ;;  %v8098_v53 = vld [vmem:[%s12488_s13] ss:$0 sm:$0xff] }
 0x7d8   :  { %9543 = vmatpush1.bf16.msra.mxu1 %v9542_v29  ;;  %9513 = vmatprep.subr.bf16.mxu0 %v9512_v3  ;;  %v9522_v30 = vpack.c.bf16 %v2384_v17, %v2380_v32  ;;  %v2573_v29 = vld [vmem:[#allocation15 + $0x8] sm:$0xff]  ;;  %v2594_v32 = vld [vmem:[#allocation15 + $0xb0] sm:$0xff]  ;;  %v2595_v17 = vld [vmem:[#allocation15 + $0xb8] sm:$0xff] }
 0x7d9   :  { %9545 = vmatprep.subr.bf16.mxu1 %v9544_v20  ;;  %v2591_v20 = vld [vmem:[#allocation15 + $0x98] sm:$0xff]  ;;  %v9558_v38 = vpack.c.bf16 %v2573_v29, %v2572_v0  ;;  %v9568_v31 = vpack.c.bf16 %v2595_v17, %v2594_v32  ;;  %v2630_v29 = vld [vmem:[#allocation15 + $0x1d0] sm:$0xff] }
 0x7da   :  { %v2599_v0 = vld [vmem:[#allocation15 + $0xd8] sm:$0xff]  ;;  %v2586_v32 = vld [vmem:[#allocation15 + $0x70] sm:$0xff] }
 0x7db   :  { %9515 = vmatpush1.bf16.msra.mxu0 %v9514_v42  ;;  %v2587_v17 = vld [vmem:[#allocation15 + $0x78] sm:$0xff] }
 0x7dc   :  { %9547 = vmatpush1.bf16.msra.mxu1 %v9546_v6  ;;  %9517 = vmatprep.subr.bf16.mxu0 %v9516_v56  ;;  %v2575_v6 = vld [vmem:[#allocation15 + $0x18] sm:$0xff]  ;;  %v9560_v56 = vpack.c.bf16 %v2591_v20, %v2590_v21 }
 0x7dd   :  { %9549 = vmatprep.subr.bf16.mxu1 %v9548_v10  ;;  %v2624_v10 = vld [vmem:[#allocation15 + $0x1a0] sm:$0xff]  ;;  %v9562_v11 = vpack.c.bf16 %v2575_v6, %v2574_v5  ;;  %v2583_v20 = vld [vmem:[#allocation15 + $0x58] sm:$0xff]  ;;  %v2601_v5 = vld [vmem:[#allocation15 + $0xe8] sm:$0xff] }
 0x7de   :  { %v2632_v6 = vld [vmem:[#allocation15 + $0x1e0] sm:$0xff] }
 0x7df   :  { %9519 = vmatpush1.bf16.msra.mxu0 %v9518_v13 }
 0x7e0   :  { %9551 = vmatpush1.bf16.msra.mxu1 %v9550_v4  ;;  %9521 = vmatprep.subr.bf16.mxu0 %v9520_v15  ;;  %v9596_v4 = vpack.c.bf16 %v2625_v9, %v2624_v10  ;;  %v2608_v15 = vld [vmem:[#allocation15 + $0x120] sm:$0xff]  ;;  %v2585_v10 = vld [vmem:[#allocation15 + $0x68] sm:$0xff] }
 0x7e1   :  { %9553 = vmatprep.subr.bf16.mxu1 %v9552_v19  ;;  %v2626_v19 = vld [vmem:[#allocation15 + $0x1b0] sm:$0xff]  ;;  %v2616_v9 = vld [vmem:[#allocation15 + $0x160] sm:$0xff] }
 0x7e2   :  { %v9600_v1 = vpack.c.bf16 %v2627_v25, %v2626_v19  ;;  %v9586_v25 = vpack.c.bf16 %v2587_v17, %v2586_v32  ;;  %v2837_v17 = vld [vmem:[#allocation11 + $0x188] sm:$0xff] }
 0x7e3   :  { %9523 = vmatpush1.bf16.msra.mxu0 %v9522_v30  ;;  %v9598_v30 = vpack.c.bf16 %v2609_v54, %v2608_v15  ;;  %v2635_v54 = vld [vmem:[#allocation15 + $0x1f8] sm:$0xff] }
 0x7e4   :  { %9555 = vmatpush1.bf16.msra.mxu1 %v9554_v48  ;;  %9557 = vmatprep.subr.bf16.mxu0 %v9556_v52  ;;  %v2578_v48 = vld [vmem:[#allocation15 + $0x30] sm:$0xff] }
 0x7e5   :  { %9589 = vmatprep.subr.bf16.mxu1 %v9588_v49  ;;  %v2610_v52 = vld [vmem:[#allocation15 + $0x130] sm:$0xff]  ;;  %v2596_v49 = vld [vmem:[#allocation15 + $0xc0] sm:$0xff] }
 0x863   :  { %v2299_v58 = vpop.xlane.xlu1 %2298 }
 0x864   :  { %v2301_v39 = vmul.f32 0.0078125, %v2299_v58  ;;  %v2297_v40 = vpop.xlane.xlu0 %2296  ;;  %v2597_v58 = vld [vmem:[#allocation15 + $0xc8] sm:$0xff] }
 0x865   :  { %v2300_v43 = vmul.f32 0.0078125, %v2297_v40  ;;  %v2629_v40 = vld [vmem:[#allocation15 + $0x1c8] sm:$0xff] }
 0x866   :  { %v2303_v46 = vadd.f32 1e-05, %v2301_v39  ;;  %v2628_v39 = vld [vmem:[#allocation15 + $0x1c0] sm:$0xff] }
 0x867   :  { %v2302_v44 = vadd.f32 1e-05, %v2300_v43  ;;  %v9570_v43 = vpack.c.bf16 %v2579_v59, %v2578_v48  ;;  %v2388_v59 = vld [vmem:[%s12484_s9] sm:$0xf] }
 0x868   :  { %10631 = vrsqrt.f32 %v2303_v46  ;;  %v9602_v46 = vpack.c.bf16 %v2611_v35, %v2610_v52  ;;  %v2401_v52 = vrot.slane %v2388_v59, %v11274_v26  ;;  %v2397_v35 = vrot.slane %v2388_v59, %v11277_v27 }
 0x869   :  { %10633 = vrsqrt.f32 %v2302_v44  ;;  %v2580_v44 = vld [vmem:[#allocation15 + $0x40] sm:$0xff] }
 0x872   :  { %v10632_v50 = vpop.eup %10631 }
 0x873   :  { %v10634_v16 = vpop.eup %10633  ;;  %v2307_v60 = vmul.f32 %v10632_v50, %v11615_v55  ;;  %v2607_v55 = vld [vmem:[#allocation15 + $0x118] sm:$0xff]  ;;  %v2581_v50 = vld [vmem:[#allocation15 + $0x48] sm:$0xff] }
 0x874   :  { %v2306_v57 = vmul.f32 %v10634_v16, %v11617_v34  ;;  %v9592_v34 = vpack.c.bf16 %v2623_v37, %v2622_v33  ;;  %v9594_v13 = vpack.c.bf16 %v2607_v55, %v2606_v7  ;;  %v9572_v16 = vpack.c.bf16 %v2597_v58, %v2596_v49 }
 0x875   :  { %v2315_v42 = vmul.f32 %v8097_v51, %v2307_v60  ;;  %v2598_v60 = vld [vmem:[#allocation15 + $0xd0] sm:$0xff]  ;;  %v9574_v2 = vpack.c.bf16 %v2581_v50, %v2580_v44  ;;  %v9608_v37 = vpack.c.bf16 %v2631_v18, %v2630_v29 }
 0x876   :  { %v2314_v3 = vmul.f32 %v8097_v51, %v2306_v57  ;;  %v9604_v51 = vpack.c.bf16 %v2629_v40, %v2628_v39  ;;  %v2613_v57 = vld [vmem:[#allocation15 + $0x148] sm:$0xff]  ;;  %v9576_v33 = vpack.c.bf16 %v2599_v0, %v2598_v60 }
 0x877   :  { %v11637_v8 = vadd.f32 %v8098_v53, %v2315_v42  ;;  %v2614_v42 = vld [vmem:[#allocation15 + $0x150] sm:$0xff] }
 0x878   :  { %v11631_v61 = vadd.f32 %v8098_v53, %v2314_v3  ;;  %v2612_v53 = vld [vmem:[#allocation15 + $0x140] sm:$0xff]  ;;  %v2582_v3 = vld [vmem:[#allocation15 + $0x50] sm:$0xff] }
 0x879   :  { %v9606_v21 = vpack.c.bf16 %v2613_v57, %v2612_v53 }
 0x87a   :  { %2475 = vmatmul.mubr.f32.vlgmr.msra.gmra.mrb[24].mxu0 %v11631_v61  ;;  %2552 = vmatmul.mubr.f32.vlgmr.msra.gmra.mrb[18].mxu1 %v11631_v61 }
 0x87b   :  { %2480 = vmatprep.mubr.f32.mxu0 %v11011_v14  ;;  %2557 = vmatprep.mubr.f32.mxu1 %v11011_v14 }
 0x87c   :  { %9559 = vmatpush3.bf16.msra.mxu0 %v9558_v38  ;;  %9591 = vmatpush3.bf16.msra.mxu1 %v9590_v63  ;;  %v2615_v38 = vld [vmem:[#allocation15 + $0x158] sm:$0xff]  ;;  %v2600_v63 = vld [vmem:[#allocation15 + $0xe0] sm:$0xff] }
 0x87d   :  { %9561 = vmatprep.subr.bf16.mxu0 %v9560_v56  ;;  %9593 = vmatprep.subr.bf16.mxu1 %v9592_v34  ;;  %v2633_v56 = vld [vmem:[#allocation15 + $0x1e8] sm:$0xff]  ;;  %v9578_v34 = vpack.c.bf16 %v2583_v20, %v2582_v3  ;;  %v9610_v7 = vpack.c.bf16 %v2615_v38, %v2614_v42  ;;  %v9580_v55 = vpack.c.bf16 %v2601_v5, %v2600_v63 }
 0x87e   :  { %2481 = vmatmul.mubr.f32.gmra.mrb[26].mxu0 %v11637_v8  ;;  %2558 = vmatmul.mubr.f32.gmra.mrb[20].mxu1 %v11637_v8  ;;  %v9612_v41 = vpack.c.bf16 %v2633_v56, %v2632_v6  ;;  %v8099_v56 = vld [vmem:[%s12486_s11] ss:$0 sm:$0xff] }
 0x880   :  { %9563 = vmatpush3.bf16.msra.mxu0 %v9562_v11  ;;  %9595 = vmatpush3.bf16.msra.mxu1 %v9594_v13  ;;  %v9582_v11 = vpack.c.bf16 %v2585_v10, %v2584_v12  ;;  %v2617_v13 = vld [vmem:[#allocation15 + $0x168] sm:$0xff] }
 0x881   :  { %9565 = vmatprep.subr.bf16.mxu0 %v9564_v47  ;;  %9597 = vmatprep.subr.bf16.mxu1 %v9596_v4  ;;  %v9614_v62 = vpack.c.bf16 %v2617_v13, %v2616_v9  ;;  %v2603_v47 = vld [vmem:[#allocation15 + $0xf8] sm:$0xff]  ;;  %v2634_v4 = vld [vmem:[#allocation15 + $0x1f0] sm:$0xff] }
 0x882   :  { %v9584_v15 = vpack.c.bf16 %v2603_v47, %v2602_v36  ;;  %v9616_v19 = vpack.c.bf16 %v2635_v54, %v2634_v4 }
 0x884   :  { %9567 = vmatpush3.bf16.msra.mxu0 %v9566_v28  ;;  %9599 = vmatpush3.bf16.msra.mxu1 %v9598_v30  ;;  %v2618_v28 = vld [vmem:[#allocation15 + $0x170] sm:$0xff]  ;;  %v2619_v30 = vld [vmem:[#allocation15 + $0x178] sm:$0xff] }
 0x885   :  { %9569 = vmatprep.subr.bf16.mxu0 %v9568_v31  ;;  %9601 = vmatprep.subr.bf16.mxu1 %v9600_v1  ;;  %v9618_v48 = vpack.c.bf16 %v2619_v30, %v2618_v28  ;;  %v11645_v31 = vsub.s32 3, %v11265_v23  ;;  %v2393_v1 = vrot.slane %v2388_v59, %v11268_v24  ;;  %v2839_v30 = vld [vmem:[#allocation11 + $0x198] sm:$0xff] }
 0x887   :  { %v2405_v49 = vrot.slane %v2388_v59, %v11645_v31  ;;  %v2846_v59 = vld [vmem:[#allocation11 + $0x1d0] sm:$0xff] }
 0x888   :  { %9571 = vmatpush3.bf16.msra.mxu0 %v9570_v43  ;;  %9603 = vmatpush3.bf16.msra.mxu1 %v9602_v46 }
 0x889   :  { %9573 = vmatprep.subr.bf16.mxu0 %v9572_v16  ;;  %9605 = vmatprep.subr.bf16.mxu1 %v9604_v51 }
 0x88c   :  { %9575 = vmatpush3.bf16.msra.mxu0 %v9574_v2  ;;  %9607 = vmatpush3.bf16.msra.mxu1 %v9606_v21 }
 0x88d   :  { %9577 = vmatprep.subr.bf16.mxu0 %v9576_v33  ;;  %9609 = vmatprep.subr.bf16.mxu1 %v9608_v37 }
 0x890   :  { %9579 = vmatpush3.bf16.msra.mxu0 %v9578_v34  ;;  %9611 = vmatpush3.bf16.msra.mxu1 %v9610_v7 }
 0x891   :  { %9581 = vmatprep.subr.bf16.mxu0 %v9580_v55  ;;  %9613 = vmatprep.subr.bf16.mxu1 %v9612_v41 }
 0x894   :  { %9583 = vmatpush3.bf16.msra.mxu0 %v9582_v11  ;;  %9615 = vmatpush3.bf16.msra.mxu1 %v9614_v62 }
 0x895   :  { %9585 = vmatprep.subr.bf16.mxu0 %v9584_v15  ;;  %9617 = vmatprep.subr.bf16.mxu1 %v9616_v19  ;;  %v2840_v19 = vld [vmem:[#allocation11 + $0x1a0] sm:$0xff] }
 0x896   :  { %v9620_v28 = vpack.c.bf16 %v2840_v19, %v2837_v17  ;;  %v2869_v17 = vld [vmem:[#allocation11 + $0x288] sm:$0xff] }
 0x898   :  { %9587 = vmatpush3.bf16.msra.mxu0 %v9586_v25  ;;  %9619 = vmatpush3.bf16.msra.mxu1 %v9618_v48  ;;  %v2836_v25 = vld [vmem:[#allocation11 + $0x180] sm:$0xff]  ;;  %v2843_v48 = vld [vmem:[#allocation11 + $0x1b8] sm:$0xff] }
 0x899   :  { %9621 = vmatprep.subr.bf16.mxu0 %v9620_v28  ;;  %v2873_v28 = vld [vmem:[#allocation11 + $0x2a8] sm:$0xff] }
 0x94d   :  { %v2476_v58 = vpop.f32.mrb[24].mxu0  ;;  %v2553_v39 = vpop.f32.mrb[18].mxu1 }
 0x94e   :  { %v2477_v40 = vadd.f32 %v2476_v58, %v2393_v1  ;;  %v2554_v43 = vadd.f32 %v2553_v39, %v2401_v52  ;;  %v2478_v46 = vpop.f32.mrb[25].mxu0  ;;  %v2555_v44 = vpop.f32.mrb[19].mxu1  ;;  %v2842_v58 = vld [vmem:[#allocation11 + $0x1b0] sm:$0xff] }
 0x94f   :  { %v2479_v50 = vadd.f32 %v2478_v46, %v2397_v35  ;;  %v2556_v16 = vadd.f32 %v2555_v44, %v2405_v49  ;;  %v2844_v46 = vld [vmem:[#allocation11 + $0x1c0] sm:$0xff]  ;;  %v2847_v44 = vld [vmem:[#allocation11 + $0x1d8] sm:$0xff] }
 0x950   :  { %v2564_v0 = vmax.f32 %v2477_v40, 0.0  ;;  %v2566_v29 = vmax.f32 %v2554_v43, 0.0  ;;  %v2849_v40 = vld [vmem:[#allocation11 + $0x1e8] sm:$0xff]  ;;  %v2852_v43 = vld [vmem:[#allocation11 + $0x200] sm:$0xff] }
 0x951   :  { %v2565_v51 = vmax.f32 %v2479_v50, 0.0  ;;  %v2567_v53 = vmax.f32 %v2556_v16, 0.0  ;;  %v2482_v57 = vpop.f32.mrb[26].mxu0  ;;  %v2559_v60 = vpop.f32.mrb[20].mxu1  ;;  %v9628_v50 = vpack.c.bf16 %v2852_v43, %v2849_v40  ;;  %v9656_v16 = vpack.c.bf16 %v2847_v44, %v2844_v46  ;;  %v2874_v40 = vld [vmem:[#allocation11 + $0x2b0] sm:$0xff]  ;;  %v2881_v44 = vld [vmem:[#allocation11 + $0x2e8] sm:$0xff] }
 0x952   :  { %v2483_v18 = vadd.f32 %v2482_v57, %v2393_v1  ;;  %v2560_v2 = vadd.f32 %v2559_v60, %v2401_v52  ;;  %v2484_v21 = vpop.f32.mrb[27].mxu0  ;;  %v2561_v3 = vpop.f32.mrb[21].mxu1  ;;  %v9622_v1 = vpack.c.bf16 %v2839_v30, %v2836_v25  ;;  %v9624_v52 = vpack.c.bf16 %v2846_v59, %v2843_v48  ;;  %v2876_v30 = vld [vmem:[#allocation11 + $0x2c0] sm:$0xff]  ;;  %v2878_v46 = vld [vmem:[#allocation11 + $0x2d0] sm:$0xff] }
 0x953   :  { %v2485_v20 = vadd.f32 %v2484_v21, %v2397_v35  ;;  %v2562_v33 = vadd.f32 %v2561_v3, %v2405_v49  ;;  %2707 = vmatprep.mubr.f32.mxu0 %v2565_v51  ;;  %2782 = vmatprep.mubr.f32.mxu1 %v2567_v53  ;;  %v2838_v35 = vld [vmem:[#allocation11 + $0x190] sm:$0xff]  ;;  %v2841_v49 = vld [vmem:[#allocation11 + $0x1a8] sm:$0xff]  ;;  %v2848_v51 = vld [vmem:[#allocation11 + $0x1e0] sm:$0xff]  ;;  %v9644_v59 = vpack.c.bf16 %v2876_v30, %v2873_v28 }
 0x954   :  { %2708 = vmatmul.mubr.f32.vlgmr.msra.gmra.mrb[28].mxu0 %v2564_v0  ;;  %2783 = vmatmul.mubr.f32.vlgmr.msra.gmra.mrb[22].mxu1 %v2566_v29  ;;  %v2568_v38 = vmax.f32 %v2483_v18, 0.0  ;;  %v2570_v63 = vmax.f32 %v2560_v2, 0.0  ;;  %v9652_v39 = vpack.c.bf16 %v2841_v49, %v2838_v35  ;;  %v2851_v53 = vld [vmem:[#allocation11 + $0x1f8] sm:$0xff]  ;;  %v2868_v48 = vld [vmem:[#allocation11 + $0x280] sm:$0xff] }
 0x955   :  { %v2569_v37 = vmax.f32 %v2485_v20, 0.0  ;;  %v2571_v42 = vmax.f32 %v2562_v33, 0.0  ;;  %9623 = vmatpush1.bf16.msra.mxu0 %v9622_v1  ;;  %v9630_v57 = vpack.c.bf16 %v2851_v53, %v2848_v51  ;;  %v2855_v33 = vld [vmem:[#allocation11 + $0x218] sm:$0xff]  ;;  %v2880_v51 = vld [vmem:[#allocation11 + $0x2e0] sm:$0xff] }
 0x956   :  { %9625 = vmatprep.subr.bf16.mxu0 %v9624_v52  ;;  %9653 = vmatprep.subr.bf16.mxu1 %v9652_v39  ;;  %v2871_v1 = vld [vmem:[#allocation11 + $0x298] sm:$0xff]  ;;  %v2872_v52 = vld [vmem:[#allocation11 + $0x2a0] sm:$0xff] }
 0x957   :  { %2712 = vmatprep.mubr.f32.mxu0 %v2569_v37  ;;  %2787 = vmatprep.mubr.f32.mxu1 %v2571_v42  ;;  %v2858_v37 = vld [vmem:[#allocation11 + $0x230] sm:$0xff]  ;;  %v2875_v35 = vld [vmem:[#allocation11 + $0x2b8] sm:$0xff]  ;;  %v9672_v49 = vpack.c.bf16 %v2871_v1, %v2868_v48 }
 0x958   :  { %2713 = vmatmul.mubr.f32.gmra.mrb[30].mxu0 %v2568_v38  ;;  %2788 = vmatmul.mubr.f32.gmra.mrb[24].mxu1 %v2570_v63  ;;  %v2850_v42 = vld [vmem:[#allocation11 + $0x1f0] sm:$0xff]  ;;  %v9632_v38 = vpack.c.bf16 %v2858_v37, %v2855_v33  ;;  %v2853_v63 = vld [vmem:[#allocation11 + $0x208] sm:$0xff]  ;;  %v2883_v53 = vld [vmem:[#allocation11 + $0x2f8] sm:$0xff] }
 0x959   :  { %2966 = vmatprep.mubr.f32.mxu0 %v11011_v14  ;;  %9655 = vmatpush3.bf16.msra.mxu1 %v9652_v39  ;;  %v2879_v39 = vld [vmem:[#allocation11 + $0x2d8] sm:$0xff]  ;;  %v8100_v37 = vld [vmem:[%s12489_s14] ss:$0 sm:$0xff] }
 0x95a   :  { %9657 = vmatprep.subr.bf16.mxu1 %v9656_v16 }
 0x95d   :  { %9659 = vmatpush3.bf16.msra.mxu1 %v9656_v16  ;;  %v9650_v16 = vpack.c.bf16 %v2881_v44, %v2878_v46 }
 0xa27   :  { %v8363_v5 = vpop.f32.mrb[28].mxu0  ;;  %v8401_v6 = vpop.f32.mrb[22].mxu1 }
 0xa28   :  { %v8364_v34 = vpop.f32.mrb[29].mxu0  ;;  %v8402_v7 = vpop.f32.mrb[23].mxu1 }
 0xa29   :  { %v8365_v55 = vadd.f32 %v8364_v34, %v8363_v5  ;;  %v8403_v41 = vadd.f32 %v8402_v7, %v8401_v6  ;;  %v2854_v5 = vld [vmem:[#allocation11 + $0x210] sm:$0xff]  ;;  %v2857_v6 = vld [vmem:[#allocation11 + $0x228] sm:$0xff] }
 0xa2a   :  { %v9634_v34 = vpack.c.bf16 %v2857_v6, %v2854_v5  ;;  %v2861_v7 = vld [vmem:[#allocation11 + $0x248] sm:$0xff] }
 0xa2b   :  { %v2710_v12 = vadd.f32 %v8365_v55, %v8099_v56  ;;  %v8366_v10 = vpop.f32.mrb[30].mxu0  ;;  %v8404_v9 = vpop.f32.mrb[24].mxu1  ;;  %v2864_v55 = vld [vmem:[#allocation11 + $0x260] sm:$0xff] }
 0xa2c   :  { %v8367_v11 = vpop.f32.mrb[31].mxu0  ;;  %v8405_v13 = vpop.f32.mrb[25].mxu1 }
 0xa2d   :  { %v2785_v62 = vadd.f32 %v8403_v41, %v2710_v12  ;;  %v8368_v36 = vadd.f32 %v8367_v11, %v8366_v10  ;;  %v8406_v47 = vadd.f32 %v8405_v13, %v8404_v9  ;;  %v2856_v41 = vld [vmem:[#allocation11 + $0x220] sm:$0xff]  ;;  %v9636_v12 = vpack.c.bf16 %v2864_v55, %v2861_v7  ;;  %v2859_v10 = vld [vmem:[#allocation11 + $0x238] sm:$0xff] }
 0xa2e   :  { %v2860_v9 = vld [vmem:[#allocation11 + $0x240] sm:$0xff]  ;;  %v2863_v11 = vld [vmem:[#allocation11 + $0x258] sm:$0xff]  ;;  %v9664_v13 = vpack.c.bf16 %v2859_v10, %v2856_v41 }
 0xa2f   :  { %v2715_v4 = vadd.f32 %v8368_v36, %v8099_v56  ;;  %v2793_v15 = vadd.f32 %v2785_v62, %v11631_v61  ;;  %v2845_v61 = vld [vmem:[#allocation11 + $0x1c8] sm:$0xff]  ;;  %v9660_v56 = vpack.c.bf16 %v2853_v63, %v2850_v42  ;;  %v9638_v62 = vpack.c.bf16 %v2863_v11, %v2860_v9  ;;  %v2867_v36 = vld [vmem:[#allocation11 + $0x278] sm:$0xff] }
 0xa31   :  { %v2790_v54 = vadd.f32 %v8406_v47, %v2715_v4  ;;  %2797 = vadd.xlane.f32.xlu0 %v2793_v15  ;;  %9661 = vmatprep.subr.bf16.mxu1 %v9660_v56  ;;  %v2870_v47 = vld [vmem:[#allocation11 + $0x290] sm:$0xff] }
 0xa32   :  { %9663 = vmatpush3.bf16.msra.mxu1 %v9660_v56  ;;  %v2862_v4 = vld [vmem:[#allocation11 + $0x250] sm:$0xff] }
 0xa33   :  { %v2794_v32 = vadd.f32 %v2790_v54, %v11637_v8  ;;  %v9626_v8 = vpack.c.bf16 %v2845_v61, %v2842_v58  ;;  %9665 = vmatprep.subr.bf16.mxu1 %v9664_v13  ;;  %v2865_v54 = vld [vmem:[#allocation11 + $0x268] sm:$0xff]  ;;  %v9646_v58 = vpack.c.bf16 %v2875_v35, %v2872_v52  ;;  %v2882_v61 = vld [vmem:[#allocation11 + $0x2f0] sm:$0xff] }
 0xa34   :  { %v9668_v19 = vpack.c.bf16 %v2865_v54, %v2862_v4  ;;  %v9648_v43 = vpack.c.bf16 %v2882_v61, %v2879_v39 }
 0xa35   :  { %2799 = vadd.xlane.f32.xlu1 %v2794_v32  ;;  %9627 = vmatpush1.bf16.msra.mxu0 %v9626_v8  ;;  %v2877_v8 = vld [vmem:[#allocation11 + $0x2c8] sm:$0xff] }
 0xa36   :  { %9629 = vmatprep.subr.bf16.mxu0 %v9628_v50  ;;  %9667 = vmatpush3.bf16.msra.mxu1 %v9664_v13  ;;  %v9676_v50 = vpack.c.bf16 %v2877_v8, %v2874_v40 }
 0xa37   :  { %9669 = vmatprep.subr.bf16.mxu1 %v9668_v19 }
 0xa39   :  { %9631 = vmatpush1.bf16.msra.mxu0 %v9630_v57  ;;  %v9680_v57 = vpack.c.bf16 %v2883_v53, %v2880_v51 }
 0xa3a   :  { %9633 = vmatprep.subr.bf16.mxu0 %v9632_v38  ;;  %9671 = vmatpush3.bf16.msra.mxu1 %v9668_v19  ;;  %v8101_v38 = vld [vmem:[%s12490_s15] ss:$0 sm:$0xff] }
 0xa3b   :  { %9673 = vmatprep.subr.bf16.mxu1 %v9672_v49 }
 0xa3d   :  { %9635 = vmatpush1.bf16.msra.mxu0 %v9634_v34 }
 0xa3e   :  { %9637 = vmatprep.subr.bf16.mxu0 %v9636_v12  ;;  %9675 = vmatpush3.bf16.msra.mxu1 %v9672_v49 }
 0xa3f   :  { %9677 = vmatprep.subr.bf16.mxu1 %v9676_v50 }
 0xa41   :  { %9639 = vmatpush1.bf16.msra.mxu0 %v9638_v62 }
 0xa42   :  { %9679 = vmatpush3.bf16.msra.mxu1 %v9676_v50 }
 0xa43   :  { %9681 = vmatprep.subr.bf16.mxu1 %v9680_v57 }
 0xa46   :  { %9683 = vmatpush3.bf16.msra.mxu1 %v9680_v57 }
 0xabe   :  { %v2798_v60 = vpop.xlane.xlu0 %2797 }
 0xabf   :  { %v2801_v0 = vmul.f32 0.0078125, %v2798_v60 }
 0xac1   :  { %v11657_v29 = vsub.f32 %v2793_v15, %v2801_v0  ;;  %v9640_v15 = vpack.c.bf16 %v2870_v47, %v2867_v36 }
 0xac2   :  { %v2800_v18 = vpop.xlane.xlu1 %2799 }
 0xac3   :  { %v2802_v2 = vmul.f32 0.0078125, %v2800_v18  ;;  %v2805_v21 = vmul.f32 %v11657_v29, %v11657_v29  ;;  %9641 = vmatprep.subr.bf16.mxu0 %v9640_v15 }
 0xac5   :  { %2807 = vadd.xlane.f32.xlu0 %v2805_v21  ;;  %v11661_v3 = vsub.f32 %v2794_v32, %v2802_v2  ;;  %v2866_v32 = vld [vmem:[#allocation11 + $0x270] sm:$0xff] }
 0xac6   :  { %v9642_v25 = vpack.c.bf16 %v2869_v17, %v2866_v32 }
 0xac7   :  { %v2806_v20 = vmul.f32 %v11661_v3, %v11661_v3 }
 0xac8   :  { %9643 = vmatpush1.bf16.msra.mxu0 %v9642_v25 }
 0xac9   :  { %2809 = vadd.xlane.f32.xlu1 %v2806_v20  ;;  %9645 = vmatprep.subr.bf16.mxu0 %v9644_v59 }
 0xacc   :  { %9647 = vmatpush1.bf16.msra.mxu0 %v9646_v58 }
 0xacd   :  { %9649 = vmatprep.subr.bf16.mxu0 %v9648_v43 }
 0xad0   :  { %9651 = vmatpush1.bf16.msra.mxu0 %v9650_v16 }
 0xb52   :  { %v2808_v60 = vpop.xlane.xlu0 %2807 }
 0xb53   :  { %v2811_v0 = vmul.f32 0.0078125, %v2808_v60 }
 0xb55   :  { %v2813_v18 = vadd.f32 1e-05, %v2811_v0 }
 0xb56   :  { %v2810_v2 = vpop.xlane.xlu1 %2809 }
 0xb57   :  { %10635 = vrsqrt.f32 %v2813_v18  ;;  %v2812_v21 = vmul.f32 0.0078125, %v2810_v2 }
 0xb59   :  { %v2814_v20 = vadd.f32 1e-05, %v2812_v21 }
 0xb5b   :  { %10637 = vrsqrt.f32 %v2814_v20 }
 0xb61   :  { %v10636_v33 = vpop.eup %10635 }
 0xb62   :  { %v2817_v42 = vmul.f32 %v10636_v33, %v11657_v29  ;;  %v8102_v29 = vld [vmem:[%s12480_s5 + $0x3] sm:$0x7] }
 0xb63   :  { %v2890_v55 = vrot.slane %v8102_v29, %v11268_v24  ;;  %v2894_v10 = vrot.slane %v8102_v29, %v11277_v27  ;;  %v2898_v9 = vrot.slane %v8102_v29, %v11274_v26 }
 0xb64   :  { %v2825_v63 = vmul.f32 %v8100_v37, %v2817_v42 }
 0xb65   :  { %v10638_v5 = vpop.eup %10637 }
 0xb66   :  { %v11672_v6 = vadd.f32 %v8101_v38, %v2825_v63  ;;  %v2818_v56 = vmul.f32 %v10638_v5, %v11661_v3 }
 0xb68   :  { %2967 = vmatmul.mubr.f32.vlgmr.msra.gmra.mrb[32].mxu0 %v11672_v6  ;;  %8980 = vmatprep.mubr.f32.mxu1 %v11672_v6  ;;  %v2826_v34 = vmul.f32 %v8100_v37, %v2818_v56 }
 0xb69   :  { %2972 = vmatprep.mubr.f32.mxu0 %v11011_v14 }
 0xb6a   :  { %v11678_v7 = vadd.f32 %v8101_v38, %v2826_v34 }
 0xb6c   :  { %2973 = vmatmul.mubr.f32.gmra.mrb[34].mxu0 %v11678_v7  ;;  %8981 = vmatmul.mubr.f32.vlgmr.msra.gmra.mrb[26].mxu1 %v11678_v7 }
 0xc3b   :  { %v2968_v3 = vpop.f32.mrb[32].mxu0 }
 0xc3c   :  { %v2969_v41 = vadd.f32 %v2968_v3, %v2890_v55  ;;  %v2970_v12 = vpop.f32.mrb[33].mxu0 }
 0xc3d   :  { %v2971_v47 = vadd.f32 %v2970_v12, %v2894_v10 }
 0xc3e   :  { %3056 = vrot.lane.b32.xlu1 %v2969_v41, %s11012_s27  ;;  %8987 = vmatprep.mubr.msk.f32.mxu0 %vm180_vm0, %v2969_v41 }
 0xc3f   :  { %v2974_v11 = vpop.f32.mrb[34].mxu0  ;;  %v8982_v13 = vpop.f32.mrb[26].mxu1 }
 0xc40   :  { %v2976_v62 = vpop.f32.mrb[35].mxu0  ;;  %v3045_v36 = vpop.f32.mrb[27].mxu1  ;;  %v3051_v4 = vadd.f32 %v8982_v13, %v2898_v9  ;;  %v2975_v28 = vadd.f32 %v2974_v11, %v2890_v55 }
 0xc41   :  { %v2977_v15 = vadd.f32 %v2976_v62, %v2894_v10  ;;  %v3046_v54 = vadd.f32 %v3045_v36, %v2898_v9 }
 0xc43   :  { %v10361_v32 = vpack.i.bf16 %v2977_v15, %v2971_v47  ;;  %v9684_v17 = vpack.c.bf16 %v2977_v15, %v2971_v47  ;;  %v11692_v19 = vpack.i.bf16 %v3051_v4, %v3046_v54  ;;  %v11696_v25 = vpack.c.bf16 %v3051_v4, %v3046_v54 }
 0xc45   :  { %10362 = vrot.lane.b32.xlu1 %v10361_v32, %s11013_s22  ;;  %10357 = vrot.lane.b32.xlu0 %v10361_v32, %s11012_s27 }
 0xc46   :  { %9686 = vmatprep.subr.msk.bf16.mxu0 %vm11291_vm1, %v9684_v17 }
 0xc47   :  { %9689 = vmatpush3.bf16.xpose.msk.msra.mxu0 %vm11291_vm1, %v9684_v17 }
 0xc49   :  { %3062 = vrot.lane.b32.xlu1 %v2975_v28, %s11013_s22  ;;  %3058 = vrot.lane.b32.xlu0 %v2975_v28, %s11012_s27 }
 0xc4d   :  { %10367 = vrot.lane.b32.xlu1 %v10361_v32, %s11014_s2  ;;  %3060 = vrot.lane.b32.xlu0 %v2969_v41, %s11013_s22 }
 0xc4e   :  { %8988 = vmatmul.mubr.msk.f32.vlgmr.msra.gmra.mrb[36].mxu0 %vm180_vm0, %v2975_v28 }
 0xc51   :  { %3066 = vrot.lane.b32.xlu1 %v2975_v28, %s11014_s2  ;;  %3064 = vrot.lane.b32.xlu0 %v2969_v41, %s11014_s2 }
 0xc55   :  { %10377 = vrot.lane.b32.xlu1 %v10361_v32, %s11016_s17  ;;  %10372 = vrot.lane.b32.xlu0 %v10361_v32, %s11015_s4 }
 0xc59   :  { %3070 = vrot.lane.b32.xlu1 %v2975_v28, %s11015_s4  ;;  %3068 = vrot.lane.b32.xlu0 %v2969_v41, %s11015_s4 }
 0xc5d   :  { %10387 = vrot.lane.b32.xlu1 %v10361_v32, %s11017_s3  ;;  %10382 = vrot.lane.b32.xlu0 %v10361_v32, %s11009_s21 }
 0xc61   :  { %3074 = vrot.lane.b32.xlu1 %v2975_v28, %s11016_s17  ;;  %3072 = vrot.lane.b32.xlu0 %v2969_v41, %s11016_s17 }
 0xc65   :  { %3078 = vrot.lane.b32.xlu1 %v2975_v28, %s11009_s21  ;;  %3076 = vrot.lane.b32.xlu0 %v2969_v41, %s11009_s21 }
 0xc69   :  { %3082 = vrot.lane.b32.xlu1 %v2975_v28, %s11017_s3  ;;  %3080 = vrot.lane.b32.xlu0 %v2969_v41, %s11017_s3 }
 0xc6d   :  { %10392 = vrot.lane.b32.xlu1 %v11692_v19, %s11012_s27  ;;  %10397 = vrot.lane.b32.xlu0 %v11692_v19, %s11013_s22 }
 0xc71   :  { %10402 = vrot.lane.b32.xlu1 %v11692_v19, %s11014_s2 }
 0xcb0   :  { %v3057_v30 = vpop.permute.xlu1 %3056 }
 0xcb1   :  { %8994 = vmatprep.mubr.msk.f32.mxu0 %vm180_vm0, %v3057_v30 }
 0xcb7   :  { %v10358_v48 = vpop.permute.xlu0 %10357  ;;  %v10363_v59 = vpop.permute.xlu1 %10362 }
 0xcb8   :  { %v10360_v1 = vunpack.i.h.bf16 %v10358_v48  ;;  %v10359_v52 = vunpack.i.l.bf16 %v10358_v48  ;;  %v10365_v35 = vunpack.i.h.bf16 %v10363_v59  ;;  %v10364_v49 = vunpack.i.l.bf16 %v10363_v59 }
 0xcba   :  { %v9690_v58 = vpack.c.bf16 %v10360_v1, %v10359_v52  ;;  %v9696_v40 = vpack.c.bf16 %v10365_v35, %v10364_v49  ;;  %v11775_v35 = vld [vmem:[#allocation6 + $0x8] sm:$0xff] }
 0xcbb   :  { %v3059_v39 = vpop.permute.xlu0 %3058  ;;  %v3063_v61 = vpop.permute.xlu1 %3062 }
 0xcbc   :  { %9692 = vmatprep.subr.msk.bf16.mxu0 %vm11291_vm1, %v9690_v58 }
 0xcbd   :  { %9695 = vmatpush3.bf16.xpose.msk.msra.mxu0 %vm11291_vm1, %v9690_v58  ;;  %v11780_v58 = vld [vmem:[#allocation6] sm:$0xff] }
 0xcbe   :  { %9698 = vmatprep.subr.msk.bf16.mxu0 %vm11291_vm1, %v9696_v40 }
 0xcbf   :  { %v3061_v43 = vpop.permute.xlu0 %3060  ;;  %v10368_v8 = vpop.permute.xlu1 %10367 }
 0xcc0   :  { %v10370_v46 = vunpack.i.h.bf16 %v10368_v8  ;;  %v10369_v44 = vunpack.i.l.bf16 %v10368_v8 }
 0xcc2   :  { %v9702_v51 = vpack.c.bf16 %v10370_v46, %v10369_v44 }
 0xcc3   :  { %v3065_v50 = vpop.permute.xlu0 %3064  ;;  %v3067_v16 = vpop.permute.xlu1 %3066 }
 0xcc4   :  { %8995 = vmatmul.mubr.msk.f32.vlgmr.msra.gmra.mrb[38].mxu0 %vm180_vm0, %v3059_v39 }
 0xcc5   :  { %9701 = vmatpush3.bf16.xpose.msk.msra.mxu0 %vm11291_vm1, %v9696_v40  ;;  %9001 = vmatprep.mubr.msk.f32.mxu0 %vm180_vm0, %v3061_v43 }
 0xcc6   :  { %9704 = vmatprep.subr.msk.bf16.mxu0 %vm11291_vm1, %v9702_v51 }
 0xcc7   :  { %v10373_v53 = vpop.permute.xlu0 %10372  ;;  %v10378_v57 = vpop.permute.xlu1 %10377 }
 0xcc8   :  { %v10375_v60 = vunpack.i.h.bf16 %v10373_v53  ;;  %v10374_v0 = vunpack.i.l.bf16 %v10373_v53  ;;  %v10380_v18 = vunpack.i.h.bf16 %v10378_v57  ;;  %v10379_v2 = vunpack.i.l.bf16 %v10378_v57 }
 0xcca   :  { %v9708_v21 = vpack.c.bf16 %v10375_v60, %v10374_v0  ;;  %v9714_v37 = vpack.c.bf16 %v10380_v18, %v10379_v2 }
 0xccb   :  { %v3069_v20 = vpop.permute.xlu0 %3068  ;;  %v3071_v33 = vpop.permute.xlu1 %3070 }
 0xccc   :  { %9002 = vmatmul.mubr.msk.f32.vlgmr.msra.gmra.mrb[40].mxu0 %vm180_vm0, %v3063_v61  ;;  %9710 = vmatprep.subr.msk.bf16.mxu1 %vm11291_vm1, %v9708_v21 }
 0xccd   :  { %9015 = vmatprep.mubr.msk.f32.mxu1 %vm180_vm0, %v3069_v20  ;;  %9707 = vmatpush3.bf16.xpose.msk.msra.mxu0 %vm11291_vm1, %v9702_v51 }
 0xcce   :  { %9008 = vmatprep.mubr.msk.f32.mxu0 %vm180_vm0, %v3065_v50  ;;  %9713 = vmatpush3.bf16.xpose.msk.msra.mxu1 %vm11291_vm1, %v9708_v21 }
 0xccf   :  { %9716 = vmatprep.subr.msk.bf16.mxu0 %vm11291_vm1, %v9714_v37  ;;  %v10383_v42 = vpop.permute.xlu0 %10382  ;;  %v10388_v38 = vpop.permute.xlu1 %10387 }
 0xcd0   :  { %v10385_v63 = vunpack.i.h.bf16 %v10383_v42  ;;  %v10384_v5 = vunpack.i.l.bf16 %v10383_v42  ;;  %v10390_v56 = vunpack.i.h.bf16 %v10388_v38  ;;  %v10389_v34 = vunpack.i.l.bf16 %v10388_v38 }
 0xcd2   :  { %v9720_v29 = vpack.c.bf16 %v10385_v63, %v10384_v5  ;;  %v9726_v41 = vpack.c.bf16 %v10390_v56, %v10389_v34 }
 0xcd3   :  { %v3073_v55 = vpop.permute.xlu0 %3072  ;;  %v3075_v3 = vpop.permute.xlu1 %3074 }
 0xcd4   :  { %9009 = vmatmul.mubr.msk.f32.vlgmr.msra.gmra.mrb[42].mxu0 %vm180_vm0, %v3067_v16  ;;  %9722 = vmatprep.subr.msk.bf16.mxu1 %vm11291_vm1, %v9720_v29 }
 0xcd5   :  { %9016 = vmatmul.mubr.msk.f32.vlgmr.msra.gmra.mrb[28].mxu1 %vm180_vm0, %v3071_v33  ;;  %9719 = vmatpush3.bf16.xpose.msk.msra.mxu0 %vm11291_vm1, %v9714_v37 }
 0xcd6   :  { %9022 = vmatprep.mubr.msk.f32.mxu0 %vm180_vm0, %v3073_v55  ;;  %9725 = vmatpush3.bf16.xpose.msk.msra.mxu1 %vm11291_vm1, %v9720_v29 }
 0xcd7   :  { %9728 = vmatprep.subr.msk.bf16.mxu0 %vm11291_vm1, %v9726_v41  ;;  %9733 = vmatprep.subr.bf16.mxu1 %v11696_v25  ;;  %v3077_v12 = vpop.permute.xlu0 %3076  ;;  %v3079_v10 = vpop.permute.xlu1 %3078 }
 0xcd8   :  { %9029 = vmatprep.mubr.msk.f32.mxu1 %vm180_vm0, %v3077_v12 }
 0xcdb   :  { %v3081_v9 = vpop.permute.xlu0 %3080  ;;  %v3083_v11 = vpop.permute.xlu1 %3082 }
 0xcdc   :  { %9023 = vmatmul.mubr.msk.f32.vlgmr.msra.gmra.mrb[44].mxu0 %vm180_vm0, %v3075_v3 }
 0xcdd   :  { %9030 = vmatmul.mubr.msk.f32.vlgmr.msra.gmra.mrb[30].mxu1 %vm180_vm0, %v3079_v10  ;;  %9731 = vmatpush3.bf16.xpose.msk.msra.mxu0 %vm11291_vm1, %v9726_v41 }
 0xcde   :  { %9036 = vmatprep.mubr.msk.f32.mxu0 %vm180_vm0, %v3081_v9  ;;  %9735 = vmatpush3.bf16.msra.mxu1 %v11696_v25 }
 0xcdf   :  { %v10398_v13 = vpop.permute.xlu0 %10397  ;;  %v10393_v62 = vpop.permute.xlu1 %10392 }
 0xce0   :  { %v10400_v36 = vunpack.i.h.bf16 %v10398_v13  ;;  %v10399_v47 = vunpack.i.l.bf16 %v10398_v13  ;;  %v10395_v4 = vunpack.i.h.bf16 %v10393_v62  ;;  %v10394_v15 = vunpack.i.l.bf16 %v10393_v62 }
 0xce2   :  { %v9736_v54 = vpack.c.bf16 %v10395_v4, %v10394_v15  ;;  %v11768_v32 = vpack.c.bf16 %v10400_v36, %v10399_v47 }
 0xce3   :  { %v10403_v17 = vpop.permute.xlu1 %10402 }
 0xce4   :  { %v10405_v28 = vunpack.i.h.bf16 %v10403_v17  ;;  %v10404_v30 = vunpack.i.l.bf16 %v10403_v17  ;;  %9037 = vmatmul.mubr.msk.f32.vlgmr.msra.gmra.mrb[46].mxu0 %vm180_vm0, %v3083_v11  ;;  %9737 = vmatprep.subr.bf16.mxu0 %v9736_v54 }
 0xce5   :  { %9741 = vmatprep.subr.bf16.mxu1 %v11768_v32  ;;  %9739 = vmatpush3.bf16.msra.mxu0 %v9736_v54 }
 0xce6   :  { %v11772_v48 = vpack.c.bf16 %v10405_v28, %v10404_v30 }
 0xce8   :  { %9745 = vmatprep.subr.bf16.mxu0 %v11772_v48 }
 0xd21   :  { %v8989_v25 = vpop.f32.mrb[36].mxu0 }
 0xd22   :  { %v3823_v59 = vmul.f32 0.25, %v8989_v25  ;;  %v3232_v1 = vpop.f32.mrb[37].mxu0 }
 0xd23   :  { %v3822_v52 = vmul.f32 0.25, %v3232_v1 }
 0xd24   :  { %v11778_v49 = vadd.f32 %v11775_v35, %v3823_v59 }
 0xd25   :  { %v11783_v39 = vadd.f32 %v11780_v58, %v3822_v52 }
 0xd26   :  { %v3857_v61 = vsel %vm180_vm0, %v11778_v49, -inf }
 0xd27   :  { %3858 = vmax.xlane.f32.xlu1 %v3857_v61  ;;  %v3854_v40 = vsel %vm180_vm0, %v11783_v39, -inf }
 0xd28   :  { %3855 = vmax.xlane.f32.xlu0 %v3854_v40 }
 0xd97   :  { %v8996_v43 = vpop.f32.mrb[38].mxu0 }
 0xd98   :  { %v3825_v8 = vmul.f32 0.25, %v8996_v43  ;;  %v3315_v46 = vpop.f32.mrb[39].mxu0 }
 0xd99   :  { %v3824_v0 = vmul.f32 0.25, %v3315_v46 }
 0xd9a   :  { %v11790_v44 = vadd.f32 %v11775_v35, %v3825_v8 }
 0xd9b   :  { %v11801_v42 = vadd.f32 %v11780_v58, %v3824_v0 }
 0xd9c   :  { %v3863_v50 = vsel %vm180_vm0, %v11790_v44, -inf }
 0xd9d   :  { %3864 = vmax.xlane.f32.xlu0 %v3863_v50  ;;  %v3860_v10 = vsel %vm180_vm0, %v11801_v42, -inf }
 0xd9f   :  { %v9003_v16 = vpop.f32.mrb[40].mxu0 }
 0xda0   :  { %v3398_v51 = vpop.f32.mrb[41].mxu0  ;;  %v3827_v38 = vmul.f32 0.25, %v9003_v16 }
 0xda1   :  { %v3826_v21 = vmul.f32 0.25, %v3398_v51 }
 0xda2   :  { %v11811_v3 = vadd.f32 %v11775_v35, %v3827_v38 }
 0xda3   :  { %v11806_v5 = vadd.f32 %v11780_v58, %v3826_v21 }
 0xda4   :  { %v3869_v4 = vsel %vm180_vm0, %v11811_v3, -inf }
 0xda5   :  { %v3866_v13 = vsel %vm180_vm0, %v11806_v5, -inf }
 0xda7   :  { %v9010_v53 = vpop.f32.mrb[42].mxu0 }
 0xda8   :  { %v9017_v57 = vpop.f32.mrb[28].mxu1  ;;  %v3481_v60 = vpop.f32.mrb[43].mxu0  ;;  %v3829_v36 = vmul.f32 0.25, %v9010_v53 }
 0xda9   :  { %v3831_v18 = vmul.f32 0.25, %v9017_v57  ;;  %v3564_v2 = vpop.f32.mrb[29].mxu1  ;;  %v3828_v9 = vmul.f32 0.25, %v3481_v60 }
 0xdaa   :  { %v3830_v20 = vmul.f32 0.25, %v3564_v2  ;;  %v11831_v25 = vadd.f32 %v11775_v35, %v3829_v36 }
 0xdab   :  { %v11795_v33 = vadd.f32 %v11775_v35, %v3831_v18  ;;  %v11826_v15 = vadd.f32 %v11780_v58, %v3828_v9 }
 0xdac   :  { %v11798_v37 = vadd.f32 %v11780_v58, %v3830_v20  ;;  %v3875_v46 = vsel %vm180_vm0, %v11831_v25, -inf }
 0xdad   :  { %v3881_v63 = vsel %vm180_vm0, %v11795_v33, -inf  ;;  %v3872_v40 = vsel %vm180_vm0, %v11826_v15, -inf }
 0xdae   :  { %3882 = vmax.xlane.f32.xlu0 %v3881_v63  ;;  %v3878_v56 = vsel %vm180_vm0, %v11798_v37, -inf }
 0xdaf   :  { %3879 = vmax.xlane.f32.xlu1 %v3878_v56  ;;  %v9024_v34 = vpop.f32.mrb[44].mxu0 }
 0xdb0   :  { %v9031_v29 = vpop.f32.mrb[30].mxu1  ;;  %v3647_v55 = vpop.f32.mrb[45].mxu0  ;;  %v3833_v59 = vmul.f32 0.25, %v9024_v34 }
 0xdb1   :  { %v3835_v41 = vmul.f32 0.25, %v9031_v29  ;;  %v3730_v12 = vpop.f32.mrb[31].mxu1  ;;  %v3832_v54 = vmul.f32 0.25, %v3647_v55 }
 0xdb2   :  { %v3834_v11 = vmul.f32 0.25, %v3730_v12  ;;  %3861 = vmax.xlane.f32.xlu0 %v3860_v10  ;;  %v11841_v43 = vadd.f32 %v11775_v35, %v3833_v59 }
 0xdb3   :  { %3867 = vmax.xlane.f32.xlu1 %v3866_v13  ;;  %v11821_v47 = vadd.f32 %v11775_v35, %v3835_v41  ;;  %v11836_v52 = vadd.f32 %v11780_v58, %v3832_v54 }
 0xdb4   :  { %v11818_v62 = vadd.f32 %v11780_v58, %v3834_v11  ;;  %v3887_v53 = vsel %vm180_vm0, %v11841_v43, -inf  ;;  %v3859_v60 = vpop.xlane.xlu1 %3858 }
 0xdb5   :  { %v3893_v1 = vsel %vm180_vm0, %v11821_v47, -inf  ;;  %v3884_v16 = vsel %vm180_vm0, %v11836_v52, -inf  ;;  %v3903_v18 = vsub.f32 %v11778_v49, %v3859_v60 }
 0xdb6   :  { %3870 = vmax.xlane.f32.xlu0 %v3869_v4  ;;  %v3890_v17 = vsel %vm180_vm0, %v11818_v62, -inf }
 0xdb7   :  { %3891 = vmax.xlane.f32.xlu1 %v3890_v17  ;;  %v9038_v28 = vpop.f32.mrb[46].mxu0  ;;  %v3920_v21 = vmul.f32 1.442695, %v3903_v18 }
 0xdb8   :  { %v3813_v30 = vpop.f32.mrb[47].mxu0  ;;  %v3837_v8 = vmul.f32 0.25, %v9038_v28 }
 0xdb9   :  { %v3836_v61 = vmul.f32 0.25, %v3813_v30 }
 0xdba   :  { %3894 = vmax.xlane.f32.xlu0 %v3893_v1  ;;  %v11851_v51 = vadd.f32 %v11775_v35, %v3837_v8  ;;  %v3856_v35 = vpop.xlane.xlu0 %3855 }
 0xdbb   :  { %3873 = vmax.xlane.f32.xlu1 %v3872_v40  ;;  %v11846_v50 = vadd.f32 %v11780_v58, %v3836_v61  ;;  %v3902_v0 = vsub.f32 %v11783_v39, %v3856_v35 }
 0xdbc   :  { %v3899_v58 = vsel %vm180_vm0, %v11851_v51, -inf }
 0xdbd   :  { %v3896_v57 = vsel %vm180_vm0, %v11846_v50, -inf  ;;  %v3918_v2 = vmul.f32 1.442695, %v3902_v0 }
 0xdbe   :  { %3876 = vmax.xlane.f32.xlu0 %v3875_v46 }
 0xdbf   :  { %3885 = vmax.xlane.f32.xlu1 %v3884_v16  ;;  %10639 = vpow2.f32 %v3918_v2 }
 0xdc0   :  { %10641 = vpow2.f32 %v3920_v21 }
 0xdc2   :  { %3888 = vmax.xlane.f32.xlu0 %v3887_v53 }
 0xdc3   :  { %3897 = vmax.xlane.f32.xlu1 %v3896_v57 }
 0xdc6   :  { %3900 = vmax.xlane.f32.xlu0 %v3899_v58 }
 0xdc9   :  { %v11865_v20 = vpop.eup %10639 }
 0xdca   :  { %v11867_v38 = vpop.eup %10641  ;;  %v3950_v63 = vsel %vm180_vm0, %v11865_v20, 0.0 }
 0xdcb   :  { %v3953_v56 = vsel %vm180_vm0, %v11867_v38, 0.0 }
 0xdd4   :  { %10407 = vrot.lane.b32.xlu1 %v11692_v19, %s11015_s4 }
 0xddc   :  { %10412 = vrot.lane.b32.xlu0 %v11692_v19, %s11016_s17 }
 0xdf8   :  { %3951 = vadd.xlane.f32.xlu1 %v3950_v63 }
 0xdfb   :  { %3954 = vadd.xlane.f32.xlu0 %v3953_v56 }
 0xe2a   :  { %v3865_v34 = vpop.xlane.xlu0 %3864 }
 0xe2b   :  { %v3905_v39 = vsub.f32 %v11790_v44, %v3865_v34 }
 0xe2d   :  { %v3924_v49 = vmul.f32 1.442695, %v3905_v39 }
 0xe2f   :  { %10643 = vpow2.f32 %v3924_v49 }
 0xe39   :  { %v11874_v29 = vpop.eup %10643 }
 0xe3a   :  { %v3959_v55 = vsel %vm180_vm0, %v11874_v29, 0.0 }
 0xe3b   :  { %v3883_v41 = vpop.xlane.xlu0 %3882  ;;  %3960 = vadd.xlane.f32.xlu0 %v3959_v55 }
 0xe3c   :  { %v3911_v12 = vsub.f32 %v11795_v33, %v3883_v41  ;;  %v3880_v10 = vpop.xlane.xlu1 %3879 }
 0xe3d   :  { %v3910_v11 = vsub.f32 %v11798_v37, %v3880_v10 }
 0xe3e   :  { %v3936_v9 = vmul.f32 1.442695, %v3911_v12 }
 0xe3f   :  { %v3862_v13 = vpop.xlane.xlu0 %3861  ;;  %v3934_v4 = vmul.f32 1.442695, %v3910_v11 }
 0xe40   :  { %10645 = vpow2.f32 %v3936_v9  ;;  %v3904_v36 = vsub.f32 %v11801_v42, %v3862_v13  ;;  %v3868_v44 = vpop.xlane.xlu1 %3867 }
 0xe41   :  { %v3906_v17 = vsub.f32 %v11806_v5, %v3868_v44 }
 0xe42   :  { %v3922_v54 = vmul.f32 1.442695, %v3904_v36 }
 0xe43   :  { %v3871_v28 = vpop.xlane.xlu0 %3870  ;;  %v3926_v33 = vmul.f32 1.442695, %v3906_v17 }
 0xe44   :  { %10647 = vpow2.f32 %v3922_v54  ;;  %v3907_v30 = vsub.f32 %v11811_v3, %v3871_v28  ;;  %v3892_v59 = vpop.xlane.xlu1 %3891 }
 0xe45   :  { %10649 = vpow2.f32 %v3934_v4  ;;  %v3914_v61 = vsub.f32 %v11818_v62, %v3892_v59 }
 0xe46   :  { %v3928_v1 = vmul.f32 1.442695, %v3907_v30 }
 0xe47   :  { %v3895_v37 = vpop.xlane.xlu0 %3894  ;;  %v3942_v46 = vmul.f32 1.442695, %v3914_v61 }
 0xe48   :  { %10651 = vpow2.f32 %v3928_v1  ;;  %v3915_v40 = vsub.f32 %v11821_v47, %v3895_v37  ;;  %v3874_v42 = vpop.xlane.xlu1 %3873 }
 0xe49   :  { %10653 = vpow2.f32 %v3926_v33  ;;  %v3908_v16 = vsub.f32 %v11826_v15, %v3874_v42 }
 0xe4a   :  { %v11885_v8 = vpop.eup %10645  ;;  %v3944_v5 = vmul.f32 1.442695, %v3915_v40 }
 0xe4b   :  { %v3877_v53 = vpop.xlane.xlu0 %3876  ;;  %v3977_v3 = vsel %vm180_vm0, %v11885_v8, 0.0  ;;  %v3930_v47 = vmul.f32 1.442695, %v3908_v16 }
 0xe4c   :  { %10655 = vpow2.f32 %v3944_v5  ;;  %v3909_v57 = vsub.f32 %v11831_v25, %v3877_v53  ;;  %v3886_v62 = vpop.xlane.xlu1 %3885  ;;  %3978 = vadd.xlane.f32.xlu0 %v3977_v3 }
 0xe4d   :  { %10657 = vpow2.f32 %v3942_v46  ;;  %v3912_v60 = vsub.f32 %v11836_v52, %v3886_v62 }
 0xe4e   :  { %v11891_v58 = vpop.eup %10647  ;;  %v3932_v35 = vmul.f32 1.442695, %v3909_v57 }
 0xe4f   :  { %v3889_v0 = vpop.xlane.xlu0 %3888  ;;  %v3956_v15 = vsel %vm180_vm0, %v11891_v58, 0.0  ;;  %v11896_v18 = vpop.eup %10649  ;;  %v3938_v63 = vmul.f32 1.442695, %v3912_v60 }
 0xe50   :  { %10659 = vpow2.f32 %v3932_v35  ;;  %v3913_v2 = vsub.f32 %v11841_v43, %v3889_v0  ;;  %3957 = vadd.xlane.f32.xlu1 %v3956_v15  ;;  %v3898_v25 = vpop.xlane.xlu1 %3897  ;;  %v3974_v49 = vsel %vm180_vm0, %v11896_v18, 0.0 }
 0xe51   :  { %10661 = vpow2.f32 %v3930_v47  ;;  %v3916_v34 = vsub.f32 %v11846_v50, %v3898_v25 }
 0xe52   :  { %v11899_v21 = vpop.eup %10651  ;;  %v3940_v56 = vmul.f32 1.442695, %v3913_v2 }
 0xe53   :  { %v3901_v39 = vpop.xlane.xlu0 %3900  ;;  %v3965_v52 = vsel %vm180_vm0, %v11899_v21, 0.0  ;;  %v11906_v55 = vpop.eup %10653  ;;  %v3946_v12 = vmul.f32 1.442695, %v3916_v34 }
 0xe54   :  { %10663 = vpow2.f32 %v3940_v56  ;;  %v3917_v43 = vsub.f32 %v11851_v51, %v3901_v39  ;;  %3966 = vadd.xlane.f32.xlu0 %v3965_v52  ;;  %3975 = vadd.xlane.f32.xlu1 %v3974_v49  ;;  %v3962_v9 = vsel %vm180_vm0, %v11906_v55, 0.0  ;;  %v10408_v37 = vpop.permute.xlu1 %10407 }
 0xe55   :  { %10665 = vpow2.f32 %v3938_v63  ;;  %v10410_v53 = vunpack.i.h.bf16 %v10408_v37  ;;  %v10409_v3 = vunpack.i.l.bf16 %v10408_v37 }
 0xe56   :  { %v11909_v41 = vpop.eup %10655  ;;  %v3948_v10 = vmul.f32 1.442695, %v3917_v43 }
 0xe57   :  { %v3989_v50 = vsel %vm180_vm0, %v11909_v41, 0.0  ;;  %v11915_v11 = vpop.eup %10657  ;;  %v10413_v40 = vpop.permute.xlu0 %10412  ;;  %v9748_v47 = vpack.c.bf16 %v10410_v53, %v10409_v3 }
 0xe58   :  { %10667 = vpow2.f32 %v3948_v10  ;;  %3990 = vadd.xlane.f32.xlu0 %v3989_v50  ;;  %3963 = vadd.xlane.f32.xlu1 %v3962_v9  ;;  %v3986_v36 = vsel %vm180_vm0, %v11915_v11, 0.0  ;;  %v10415_v63 = vunpack.i.h.bf16 %v10413_v40  ;;  %v10414_v56 = vunpack.i.l.bf16 %v10413_v40 }
 0xe59   :  { %10669 = vpow2.f32 %v3946_v12 }
 0xe5a   :  { %v11917_v13 = vpop.eup %10659  ;;  %v9752_v49 = vpack.c.bf16 %v10415_v63, %v10414_v56  ;;  %v4755_v56 = vld [vmem:[#allocation12 + $0xb0] sm:$0xff] }
 0xe5b   :  { %v3971_v51 = vsel %vm180_vm0, %v11917_v13, 0.0  ;;  %v11923_v44 = vpop.eup %10661 }
 0xe5c   :  { %3972 = vadd.xlane.f32.xlu0 %v3971_v51  ;;  %3987 = vadd.xlane.f32.xlu1 %v3986_v36  ;;  %v3968_v17 = vsel %vm180_vm0, %v11923_v44, 0.0 }
 0xe5e   :  { %v11925_v4 = vpop.eup %10663 }
 0xe5f   :  { %v3983_v54 = vsel %vm180_vm0, %v11925_v4, 0.0  ;;  %v11931_v28 = vpop.eup %10665 }
 0xe60   :  { %3984 = vadd.xlane.f32.xlu0 %v3983_v54  ;;  %3969 = vadd.xlane.f32.xlu1 %v3968_v17  ;;  %v3980_v33 = vsel %vm180_vm0, %v11931_v28, 0.0 }
 0xe62   :  { %v11933_v30 = vpop.eup %10667 }
 0xe63   :  { %v3995_v59 = vsel %vm180_vm0, %v11933_v30, 0.0  ;;  %v11939_v1 = vpop.eup %10669 }
 0xe64   :  { %3996 = vadd.xlane.f32.xlu0 %v3995_v59  ;;  %3981 = vadd.xlane.f32.xlu1 %v3980_v33  ;;  %v3992_v61 = vsel %vm180_vm0, %v11939_v1, 0.0 }
 0xe68   :  { %3993 = vadd.xlane.f32.xlu1 %v3992_v61 }
 0xe79   :  { %10417 = vrot.lane.b32.xlu1 %v11692_v19, %s11009_s21 }
 0xe7a   :  { %10422 = vrot.lane.b32.xlu0 %v11692_v19, %s11017_s3 }
 0xe85   :  { %v3952_v42 = vpop.xlane.xlu1 %3951 }
 0xe86   :  { %10671 = vrcp.f32 %v3952_v42 }
 0xe88   :  { %v3955_v46 = vpop.xlane.xlu0 %3954 }
 0xe89   :  { %10673 = vrcp.f32 %v3955_v46 }
 0xe90   :  { %v10672_v5 = vpop.eup %10671 }
 0xe91   :  { %v3999_v16 = vmul.f32 %v10672_v5, %v11865_v20 }
 0xe93   :  { %v10674_v57 = vpop.eup %10673  ;;  %9043 = vmatprep.mubr.msk.f32.mxu1 %vm180_vm0, %v3999_v16 }
 0xe94   :  { %v4001_v62 = vmul.f32 %v10674_v57, %v11867_v38 }
 0xe96   :  { %9044 = vmatmul.mubr.msk.f32.vlgmr.msra.gmra.mrb[32].mxu1 %vm180_vm0, %v4001_v62 }
 0xe97   :  { %9743 = vmatpush3.bf16.msra.mxu1 %v11768_v32 }
 0xe98   :  { %9749 = vmatprep.subr.bf16.mxu1 %v9748_v47 }
 0xec8   :  { %v3961_v19 = vpop.xlane.xlu0 %3960 }
 0xec9   :  { %10675 = vrcp.f32 %v3961_v19 }
 0xed3   :  { %v10676_v25 = vpop.eup %10675 }
 0xed4   :  { %v4005_v52 = vmul.f32 %v10676_v25, %v11874_v29 }
 0xed9   :  { %v3979_v35 = vpop.xlane.xlu0 %3978 }
 0xedd   :  { %v3958_v60 = vpop.xlane.xlu1 %3957 }
 0xede   :  { %10677 = vrcp.f32 %v3958_v60 }
 0xee1   :  { %v3967_v0 = vpop.xlane.xlu0 %3966  ;;  %v3976_v20 = vpop.xlane.xlu1 %3975 }
 0xee2   :  { %10679 = vrcp.f32 %v3967_v0 }
 0xee3   :  { %10681 = vrcp.f32 %v3976_v20 }
 0xee5   :  { %v3991_v15 = vpop.xlane.xlu0 %3990  ;;  %v3964_v2 = vpop.xlane.xlu1 %3963 }
 0xee6   :  { %10683 = vrcp.f32 %v3964_v2  ;;  %v4752_v2 = vld [vmem:[#allocation12 + $0x98] sm:$0xff] }
 0xee7   :  { %10685 = vrcp.f32 %v3979_v35 }
 0xee8   :  { %v10678_v38 = vpop.eup %10677 }
 0xee9   :  { %v3973_v34 = vpop.xlane.xlu0 %3972  ;;  %v3988_v39 = vpop.xlane.xlu1 %3987  ;;  %v4003_v32 = vmul.f32 %v10678_v38, %v11891_v58  ;;  %v4753_v38 = vld [vmem:[#allocation12 + $0xa0] sm:$0xff] }
 0xeea   :  { %10687 = vrcp.f32 %v3988_v39 }
 0xeeb   :  { %9050 = vmatprep.mubr.msk.f32.mxu0 %vm180_vm0, %v4003_v32  ;;  %10689 = vrcp.f32 %v3973_v34  ;;  %v4756_v34 = vld [vmem:[#allocation12 + $0xb8] sm:$0xff] }
 0xeec   :  { %9051 = vmatmul.mubr.msk.f32.vlgmr.msra.gmra.mrb[48].mxu0 %vm180_vm0, %v4005_v52  ;;  %v10680_v10 = vpop.eup %10679  ;;  %v9776_v32 = vpack.c.bf16 %v4756_v34, %v4755_v56 }
 0xeed   :  { %9747 = vmatpush3.bf16.msra.mxu0 %v11772_v48  ;;  %v3985_v43 = vpop.xlane.xlu0 %3984  ;;  %v3970_v12 = vpop.xlane.xlu1 %3969  ;;  %v4009_v36 = vmul.f32 %v10680_v10, %v11899_v21 }
 0xeee   :  { %9753 = vmatprep.subr.bf16.mxu0 %v9752_v49  ;;  %10691 = vrcp.f32 %v3970_v12  ;;  %v10682_v50 = vpop.eup %10681  ;;  %v4758_v12 = vld [vmem:[#allocation12 + $0xc8] sm:$0xff] }
 0xeef   :  { %10693 = vrcp.f32 %v3991_v15  ;;  %v4015_v48 = vmul.f32 %v10682_v50, %v11896_v18  ;;  %v4759_v50 = vld [vmem:[#allocation12 + $0xd0] sm:$0xff] }
 0xef0   :  { %v10684_v9 = vpop.eup %10683  ;;  %10695 = vrcp.f32 %v3985_v43  ;;  %v4757_v43 = vld [vmem:[#allocation12 + $0xc0] sm:$0xff] }
 0xef1   :  { %v3997_v58 = vpop.xlane.xlu0 %3996  ;;  %v3982_v51 = vpop.xlane.xlu1 %3981  ;;  %v4007_v29 = vmul.f32 %v10684_v9, %v11906_v55  ;;  %v9780_v10 = vpack.c.bf16 %v4758_v12, %v4757_v43  ;;  %v4760_v9 = vld [vmem:[#allocation12 + $0xd8] sm:$0xff] }
 0xef2   :  { %10697 = vrcp.f32 %v3982_v51  ;;  %v10686_v54 = vpop.eup %10685 }
 0xef3   :  { %9057 = vmatprep.mubr.msk.f32.mxu1 %vm180_vm0, %v4007_v29  ;;  %10699 = vrcp.f32 %v3997_v58  ;;  %v4017_v55 = vmul.f32 %v10686_v54, %v11885_v8  ;;  %v9784_v58 = vpack.c.bf16 %v4760_v9, %v4759_v50  ;;  %v4761_v54 = vld [vmem:[#allocation12 + $0xe0] sm:$0xff] }
 0xef4   :  { %v10688_v17 = vpop.eup %10687  ;;  %9058 = vmatmul.mubr.msk.f32.vlgmr.msra.gmra.mrb[34].mxu1 %vm180_vm0, %v4009_v36 }
 0xef5   :  { %v3994_v59 = vpop.xlane.xlu1 %3993  ;;  %9751 = vmatpush3.bf16.msra.mxu1 %v9748_v47  ;;  %v10423_v33 = vpop.permute.xlu0 %10422  ;;  %9071 = vmatprep.mubr.msk.f32.mxu1 %vm180_vm0, %v4015_v48  ;;  %v4023_v21 = vmul.f32 %v10688_v17, %v11915_v11  ;;  %v4762_v48 = vld [vmem:[#allocation12 + $0xe8] sm:$0xff] }
 0xef6   :  { %10701 = vrcp.f32 %v3994_v59  ;;  %v10690_v61 = vpop.eup %10689  ;;  %v10425_v40 = vunpack.i.h.bf16 %v10423_v33  ;;  %v10424_v42 = vunpack.i.l.bf16 %v10423_v33  ;;  %v9788_v17 = vpack.c.bf16 %v4762_v48, %v4761_v54 }
 0xef7   :  { %v4013_v3 = vmul.f32 %v10690_v61, %v11917_v13  ;;  %v4763_v61 = vld [vmem:[#allocation12 + $0xf0] sm:$0xff] }
 0xef8   :  { %v10692_v37 = vpop.eup %10691  ;;  %9072 = vmatmul.mubr.msk.f32.vlgmr.msra.gmra.mrb[36].mxu1 %vm180_vm0, %v4017_v55  ;;  %v9760_v62 = vpack.c.bf16 %v10425_v40, %v10424_v42 }
 0xef9   :  { %v10418_v18 = vpop.permute.xlu1 %10417  ;;  %9085 = vmatprep.mubr.msk.f32.mxu1 %vm180_vm0, %v4023_v21  ;;  %v4011_v16 = vmul.f32 %v10692_v37, %v11923_v44  ;;  %v10694_v53 = vpop.eup %10693  ;;  %v4764_v21 = vld [vmem:[#allocation12 + $0xf8] sm:$0xff] }
 0xefa   :  { %v10420_v46 = vunpack.i.h.bf16 %v10418_v18  ;;  %v10419_v5 = vunpack.i.l.bf16 %v10418_v18  ;;  %v10696_v57 = vpop.eup %10695  ;;  %v4025_v13 = vmul.f32 %v10694_v53, %v11909_v41  ;;  %v9792_v37 = vpack.c.bf16 %v4764_v21, %v4763_v61 }
 0xefb   :  { %9064 = vmatprep.mubr.msk.f32.mxu0 %vm180_vm0, %v4011_v16  ;;  %v4021_v44 = vmul.f32 %v10696_v57, %v11925_v4  ;;  %v4749_v4 = vld [vmem:[#allocation12 + $0x80] sm:$0xff] }
 0xefc   :  { %v9756_v8 = vpack.c.bf16 %v10420_v46, %v10419_v5  ;;  %v10698_v11 = vpop.eup %10697  ;;  %9065 = vmatmul.mubr.msk.f32.vlgmr.msra.gmra.mrb[50].mxu0 %vm180_vm0, %v4013_v3 }
 0xefd   :  { %9755 = vmatpush3.bf16.msra.mxu0 %v9752_v49  ;;  %v4019_v47 = vmul.f32 %v10698_v11, %v11931_v28  ;;  %v10700_v19 = vpop.eup %10699  ;;  %v4750_v28 = vld [vmem:[#allocation12 + $0x88] sm:$0xff] }
 0xefe   :  { %9757 = vmatprep.subr.bf16.mxu1 %v9756_v8  ;;  %9761 = vmatprep.subr.bf16.mxu0 %v9760_v62  ;;  %v4029_v0 = vmul.f32 %v10700_v19, %v11933_v30  ;;  %v9764_v20 = vpack.c.bf16 %v4750_v28, %v4749_v4  ;;  %v4754_v30 = vld [vmem:[#allocation12 + $0xa8] sm:$0xff] }
 0xeff   :  { %9759 = vmatpush3.bf16.msra.mxu1 %v9756_v8  ;;  %9078 = vmatprep.mubr.msk.f32.mxu0 %vm180_vm0, %v4019_v47  ;;  %v9772_v63 = vpack.c.bf16 %v4754_v30, %v4753_v38 }
 0xf00   :  { %v10702_v35 = vpop.eup %10701  ;;  %9079 = vmatmul.mubr.msk.f32.vlgmr.msra.gmra.mrb[52].mxu0 %vm180_vm0, %v4021_v44  ;;  %9765 = vmatprep.subr.bf16.mxu1 %v9764_v20 }
 0xf01   :  { %v4027_v60 = vmul.f32 %v10702_v35, %v11939_v1  ;;  %9763 = vmatpush3.bf16.msra.mxu0 %v9760_v62  ;;  %v4751_v1 = vld [vmem:[#allocation12 + $0x90] sm:$0xff] }
 0xf02   :  { %9086 = vmatmul.mubr.msk.f32.vlgmr.msra.gmra.mrb[38].mxu1 %vm180_vm0, %v4025_v13  ;;  %v9768_v25 = vpack.c.bf16 %v4752_v2, %v4751_v1 }
 0xf03   :  { %9092 = vmatprep.mubr.msk.f32.mxu0 %vm180_vm0, %v4027_v60  ;;  %9767 = vmatpush3.bf16.msra.mxu1 %v9764_v20 }
 0xf04   :  { %9093 = vmatmul.mubr.msk.f32.vlgmr.msra.gmra.mrb[54].mxu0 %vm180_vm0, %v4029_v0  ;;  %9769 = vmatprep.subr.bf16.mxu1 %v9768_v25 }
 0xf05   :  { %5044 = vmatprep.mubr.f32.mxu0 %v11011_v14 }
 0xf07   :  { %9771 = vmatpush3.bf16.msra.mxu1 %v9768_v25 }
 0xf08   :  { %9773 = vmatprep.subr.bf16.mxu1 %v9772_v63 }
 0xf0b   :  { %9775 = vmatpush3.bf16.msra.mxu1 %v9772_v63 }
 0xf0c   :  { %9777 = vmatprep.subr.bf16.mxu1 %v9776_v32 }
 0xf0f   :  { %9779 = vmatpush3.bf16.msra.mxu1 %v9776_v32 }
 0xf10   :  { %9781 = vmatprep.subr.bf16.mxu1 %v9780_v10 }
 0xf13   :  { %9783 = vmatpush3.bf16.msra.mxu1 %v9780_v10 }
 0xf14   :  { %9785 = vmatprep.subr.bf16.mxu1 %v9784_v58 }
 0xf17   :  { %9787 = vmatpush3.bf16.msra.mxu1 %v9784_v58 }
 0xf18   :  { %9789 = vmatprep.subr.bf16.mxu1 %v9788_v17 }
 0xf1b   :  { %9791 = vmatpush3.bf16.msra.mxu1 %v9788_v17  ;;  %v8152_v17 = vld [vmem:[%s12482_s7 + $0x1] ss:$0 sm:$0xff] }
 0xf1c   :  { %9793 = vmatprep.subr.bf16.mxu1 %v9792_v37 }
 0xf1f   :  { %9795 = vmatpush3.bf16.msra.mxu1 %v9792_v37 }
 0xf69   :  { %v11982_v41 = vpop.f32.mrb[32].mxu1 }
 0xf6a   :  { %v11984_v15 = vpop.f32.mrb[33].mxu1 }
 0xfbf   :  { %v9052_v39 = vpop.f32.mrb[48].mxu0 }
 0xfc0   :  { %v4183_v52 = vpop.f32.mrb[49].mxu0 }
 0xfc1   :  { %v10426_v49 = vpack.i.bf16 %v9052_v39, %v4183_v52 }
 0xfc3   :  { %10427 = vrot.lane.b32.xlu1 %v10426_v49, %s11017_s3 }
 0xfc7   :  { %v9059_v51 = vpop.f32.mrb[34].mxu1 }
 0xfc8   :  { %v4264_v29 = vpop.f32.mrb[35].mxu1 }
 0xfc9   :  { %v10431_v36 = vpack.i.bf16 %v9059_v51, %v4264_v29 }
 0xfcb   :  { %10432 = vrot.lane.b32.xlu0 %v10431_v36, %s11009_s21  ;;  %v9073_v59 = vpop.f32.mrb[36].mxu1 }
 0xfcc   :  { %v4426_v33 = vpop.f32.mrb[37].mxu1 }
 0xfcd   :  { %v10436_v55 = vpack.i.bf16 %v9073_v59, %v4426_v33 }
 0xfcf   :  { %v9066_v40 = vpop.f32.mrb[50].mxu0  ;;  %10437 = vrot.lane.b32.xlu0 %v10436_v55, %s11015_s4 }
 0xfd0   :  { %v4345_v42 = vpop.f32.mrb[51].mxu0 }
 0xfd1   :  { %v10441_v18 = vpack.i.bf16 %v9066_v40, %v4345_v42  ;;  %v4894_v40 = vld [vmem:[#allocation14 + $0x208] sm:$0xff] }
 0xfd2   :  { %v4898_v42 = vld [vmem:[#allocation14 + $0x228] sm:$0xff] }
 0xfd3   :  { %10442 = vrot.lane.b32.xlu1 %v10441_v18, %s11016_s17  ;;  %v9080_v46 = vpop.f32.mrb[52].mxu0  ;;  %v4896_v18 = vld [vmem:[#allocation14 + $0x218] sm:$0xff] }
 0xfd4   :  { %v4507_v5 = vpop.f32.mrb[53].mxu0 }
 0xfd5   :  { %v9087_v16 = vpop.f32.mrb[38].mxu1  ;;  %v10451_v53 = vpack.i.bf16 %v9080_v46, %v4507_v5  ;;  %v9796_v46 = vpack.c.bf16 %v4898_v42, %v4894_v40  ;;  %v4900_v5 = vld [vmem:[#allocation14 + $0x238] sm:$0xff]  ;;  %v4926_v40 = vld [vmem:[#allocation14 + $0x308] sm:$0xff] }
 0xfd6   :  { %v4588_v3 = vpop.f32.mrb[39].mxu1  ;;  %v4930_v42 = vld [vmem:[#allocation14 + $0x328] sm:$0xff] }
 0xfd7   :  { %v10446_v57 = vpack.i.bf16 %v9087_v16, %v4588_v3  ;;  %10452 = vrot.lane.b32.xlu1 %v10451_v53, %s11014_s2  ;;  %v9094_v8 = vpop.f32.mrb[54].mxu0  ;;  %v4893_v16 = vld [vmem:[#allocation14 + $0x200] sm:$0xff]  ;;  %v9828_v3 = vpack.c.bf16 %v4900_v5, %v4896_v18  ;;  %9797 = vmatprep.subr.bf16.mxu0 %v9796_v46  ;;  %v4928_v18 = vld [vmem:[#allocation14 + $0x318] sm:$0xff]  ;;  %v9812_v46 = vpack.c.bf16 %v4930_v42, %v4926_v40 }
 0xfd8   :  { %v4669_v11 = vpop.f32.mrb[55].mxu0  ;;  %v4897_v53 = vld [vmem:[#allocation14 + $0x220] sm:$0xff]  ;;  %v4932_v5 = vld [vmem:[#allocation14 + $0x338] sm:$0xff] }
 0xfd9   :  { %10447 = vrot.lane.b32.xlu0 %v10446_v57, %s11013_s22  ;;  %v10456_v62 = vpack.i.bf16 %v9094_v8, %v4669_v11  ;;  %v9798_v57 = vpack.c.bf16 %v4897_v53, %v4893_v16  ;;  %v4895_v8 = vld [vmem:[#allocation14 + $0x210] sm:$0xff]  ;;  %9829 = vmatprep.subr.bf16.mxu1 %v9828_v3  ;;  %v4925_v16 = vld [vmem:[#allocation14 + $0x300] sm:$0xff]  ;;  %v9844_v3 = vpack.c.bf16 %v4932_v5, %v4928_v18 }
 0xfda   :  { %v4899_v11 = vld [vmem:[#allocation14 + $0x230] sm:$0xff]  ;;  %v4929_v53 = vld [vmem:[#allocation14 + $0x320] sm:$0xff] }
 0xfdb   :  { %10457 = vrot.lane.b32.xlu1 %v10456_v62, %s11012_s27  ;;  %v4902_v62 = vld [vmem:[#allocation14 + $0x248] sm:$0xff]  ;;  %9799 = vmatpush1.bf16.msra.mxu0 %v9798_v57  ;;  %v9814_v57 = vpack.c.bf16 %v4929_v53, %v4925_v16 }
0x1035   :  { %v10428_v47 = vpop.permute.xlu1 %10427 }
0x1036   :  { %v10430_v44 = vunpack.i.h.bf16 %v10428_v47  ;;  %v10429_v35 = vunpack.i.l.bf16 %v10428_v47  ;;  %v9830_v47 = vpack.c.bf16 %v4899_v11, %v4895_v8  ;;  %v4927_v8 = vld [vmem:[#allocation14 + $0x310] sm:$0xff] }
0x1037   :  { %v4931_v11 = vld [vmem:[#allocation14 + $0x330] sm:$0xff] }
0x1038   :  { %v4735_v4 = vsel %vm180_vm0, %v11982_v41, %v10430_v44  ;;  %v4734_v28 = vsel %vm180_vm0, %v11984_v15, %v10429_v35  ;;  %v4908_v44 = vld [vmem:[#allocation14 + $0x278] sm:$0xff] }
0x103d   :  { %v10433_v19 = vpop.permute.xlu0 %10432 }
0x103e   :  { %v10435_v13 = vunpack.i.h.bf16 %v10433_v19  ;;  %v10434_v60 = vunpack.i.l.bf16 %v10433_v19  ;;  %v4906_v19 = vld [vmem:[#allocation14 + $0x268] sm:$0xff] }
0x1040   :  { %v4736_v25 = vsel %vm2165_vm2, %v4734_v28, %v10434_v60  ;;  %v4737_v38 = vsel %vm2165_vm2, %v4735_v4, %v10435_v13  ;;  %v4901_v13 = vld [vmem:[#allocation14 + $0x240] sm:$0xff]  ;;  %v4907_v28 = vld [vmem:[#allocation14 + $0x270] sm:$0xff] }
0x1041   :  { %v10438_v20 = vpop.permute.xlu0 %10437  ;;  %v4905_v60 = vld [vmem:[#allocation14 + $0x260] sm:$0xff] }
0x1042   :  { %v10440_v56 = vunpack.i.h.bf16 %v10438_v20  ;;  %v10439_v34 = vunpack.i.l.bf16 %v10438_v20  ;;  %v9802_v4 = vpack.c.bf16 %v4905_v60, %v4901_v13  ;;  %v4910_v20 = vld [vmem:[#allocation14 + $0x288] sm:$0xff]  ;;  %v4937_v13 = vld [vmem:[#allocation14 + $0x360] sm:$0xff] }
0x1045   :  { %v10443_v0 = vpop.permute.xlu1 %10442 }
0x1046   :  { %v10445_v1 = vunpack.i.h.bf16 %v10443_v0  ;;  %v10444_v2 = vunpack.i.l.bf16 %v10443_v0  ;;  %v4903_v0 = vld [vmem:[#allocation14 + $0x250] sm:$0xff] }
0x1048   :  { %v4738_v30 = vsel %vm2168_vm3, %v4736_v25, %v10444_v2  ;;  %v4739_v63 = vsel %vm2168_vm3, %v4737_v38, %v10445_v1  ;;  %v4914_v1 = vld [vmem:[#allocation14 + $0x2a8] sm:$0xff]  ;;  %v9834_v2 = vpack.c.bf16 %v4907_v28, %v4903_v0  ;;  %v4912_v38 = vld [vmem:[#allocation14 + $0x298] sm:$0xff]  ;;  %v4939_v28 = vld [vmem:[#allocation14 + $0x370] sm:$0xff] }
0x1049   :  { %v10453_v39 = vpop.permute.xlu1 %10452  ;;  %v4741_v49 = vsel %vm2171_vm4, %v4739_v63, %v10440_v56  ;;  %v4740_v12 = vsel %vm2171_vm4, %v4738_v30, %v10439_v34  ;;  %v9804_v25 = vpack.c.bf16 %v4914_v1, %v4910_v20  ;;  %v4916_v30 = vld [vmem:[#allocation14 + $0x2b8] sm:$0xff]  ;;  %v4909_v63 = vld [vmem:[#allocation14 + $0x280] sm:$0xff]  ;;  %v4942_v20 = vld [vmem:[#allocation14 + $0x388] sm:$0xff] }
0x104a   :  { %v10455_v32 = vunpack.i.h.bf16 %v10453_v39  ;;  %v10454_v52 = vunpack.i.l.bf16 %v10453_v39  ;;  %v9836_v56 = vpack.c.bf16 %v4916_v30, %v4912_v38  ;;  %v4913_v34 = vld [vmem:[#allocation14 + $0x2a0] sm:$0xff]  ;;  %v4911_v39 = vld [vmem:[#allocation14 + $0x290] sm:$0xff]  ;;  %v4948_v38 = vld [vmem:[#allocation14 + $0x3b8] sm:$0xff] }
0x104b   :  { %v10448_v41 = vpop.permute.xlu0 %10447 }
0x104c   :  { %v10450_v15 = vunpack.i.h.bf16 %v10448_v41  ;;  %v10449_v43 = vunpack.i.l.bf16 %v10448_v41  ;;  %v4743_v10 = vsel %vm2174_vm5, %v4741_v49, %v10455_v32  ;;  %v4742_v50 = vsel %vm2174_vm5, %v4740_v12, %v10454_v52  ;;  %v4915_v32 = vld [vmem:[#allocation14 + $0x2b0] sm:$0xff] }
0x104d   :  { %v10458_v9 = vpop.permute.xlu1 %10457  ;;  %v9806_v52 = vpack.c.bf16 %v4913_v34, %v4909_v63  ;;  %v9838_v41 = vpack.c.bf16 %v4915_v32, %v4911_v39  ;;  %v4945_v34 = vld [vmem:[#allocation14 + $0x3a0] sm:$0xff]  ;;  %v4943_v39 = vld [vmem:[#allocation14 + $0x390] sm:$0xff] }
0x104e   :  { %v4744_v58 = vsel %vm2177_vm6, %v4742_v50, %v10449_v43  ;;  %v4745_v51 = vsel %vm2177_vm6, %v4743_v10, %v10450_v15  ;;  %v10460_v29 = vunpack.i.h.bf16 %v10458_v9  ;;  %v10459_v36 = vunpack.i.l.bf16 %v10458_v9 }
0x1050   :  { %v4746_v54 = vsel %vm2180_vm7, %v4744_v58, %v10459_v36  ;;  %v4747_v48 = vsel %vm2180_vm7, %v4745_v51, %v10460_v29  ;;  %v4918_v51 = vld [vmem:[#allocation14 + $0x2c8] sm:$0xff]  ;;  %v4920_v36 = vld [vmem:[#allocation14 + $0x2d8] sm:$0xff] }
0x1051   :  { %9127 = vmatprep.mubr.f32.mxu1 %v4746_v54  ;;  %v4922_v29 = vld [vmem:[#allocation14 + $0x2e8] sm:$0xff] }
0x1052   :  { %9128 = vmatmul.mubr.f32.vlgmr.msra.gmra.mrb[40].mxu1 %v4747_v48  ;;  %v9808_v54 = vpack.c.bf16 %v4922_v29, %v4918_v51  ;;  %v4924_v48 = vld [vmem:[#allocation14 + $0x2f8] sm:$0xff]  ;;  %v4953_v29 = vld [vmem:[#allocation14 + $0x3e0] sm:$0xff] }
0x1053   :  { %5121 = vmatprep.mubr.f32.mxu1 %v11011_v14  ;;  %9831 = vmatpush1.bf16.msra.mxu1 %v9830_v47  ;;  %v4934_v47 = vld [vmem:[#allocation14 + $0x348] sm:$0xff] }
0x1125   :  { %v9129_v59 = vpop.f32.mrb[40].mxu1 }
0x1126   :  { %v4845_v33 = vadd.f32 %v9129_v59, %v8152_v17  ;;  %v4839_v55 = vpop.f32.mrb[41].mxu1  ;;  %v4921_v59 = vld [vmem:[#allocation14 + $0x2e0] sm:$0xff] }
0x1127   :  { %v4840_v61 = vadd.f32 %v8152_v17, %v4839_v55  ;;  %v4917_v17 = vld [vmem:[#allocation14 + $0x2c0] sm:$0xff] }
0x1128   :  { %v4849_v21 = vadd.f32 %v4845_v33, %v11678_v7  ;;  %v4904_v7 = vld [vmem:[#allocation14 + $0x258] sm:$0xff]  ;;  %v9840_v33 = vpack.c.bf16 %v4924_v48, %v4920_v36  ;;  %v9810_v55 = vpack.c.bf16 %v4921_v59, %v4917_v17  ;;  %v4951_v36 = vld [vmem:[#allocation14 + $0x3d0] sm:$0xff]  ;;  %v5159_v59 = vld [vmem:[#allocation15 + $0x280] sm:$0xff] }
0x1129   :  { %v4848_v37 = vadd.f32 %v4840_v61, %v11672_v6  ;;  %v9800_v6 = vpack.c.bf16 %v4906_v19, %v4902_v62  ;;  %v9832_v35 = vpack.c.bf16 %v4908_v44, %v4904_v7  ;;  %v4919_v61 = vld [vmem:[#allocation14 + $0x2d0] sm:$0xff]  ;;  %v9846_v62 = vpack.c.bf16 %v4931_v11, %v4927_v8  ;;  %v4938_v19 = vld [vmem:[#allocation14 + $0x368] sm:$0xff]  ;;  %v4936_v7 = vld [vmem:[#allocation14 + $0x358] sm:$0xff] }
0x112a   :  { %4856 = vadd.xlane.f32.xlu1 %v4849_v21  ;;  %v9816_v44 = vpack.c.bf16 %v4938_v19, %v4934_v47  ;;  %v5143_v11 = vld [vmem:[#allocation15 + $0x200] sm:$0xff]  ;;  %v5176_v19 = vld [vmem:[#allocation15 + $0x308] sm:$0xff] }
0x112b   :  { %4854 = vadd.xlane.f32.xlu0 %v4848_v37  ;;  %9801 = vmatprep.subr.bf16.mxu0 %v9800_v6  ;;  %v4940_v6 = vld [vmem:[#allocation14 + $0x378] sm:$0xff]  ;;  %v5175_v47 = vld [vmem:[#allocation15 + $0x300] sm:$0xff] }
0x112c   :  { %9833 = vmatprep.subr.bf16.mxu1 %v9832_v35  ;;  %9803 = vmatpush1.bf16.msra.mxu0 %v9802_v4  ;;  %v4933_v35 = vld [vmem:[#allocation14 + $0x340] sm:$0xff]  ;;  %v9848_v60 = vpack.c.bf16 %v4940_v6, %v4936_v7  ;;  %v4935_v4 = vld [vmem:[#allocation14 + $0x350] sm:$0xff]  ;;  %v5162_v6 = vld [vmem:[#allocation15 + $0x298] sm:$0xff] }
0x112d   :  { %9835 = vmatpush1.bf16.msra.mxu1 %v9834_v2  ;;  %9805 = vmatprep.subr.bf16.mxu0 %v9804_v25  ;;  %v9818_v0 = vpack.c.bf16 %v4937_v13, %v4933_v35  ;;  %v9850_v1 = vpack.c.bf16 %v4939_v28, %v4935_v4  ;;  %v4946_v2 = vld [vmem:[#allocation14 + $0x3a8] sm:$0xff]  ;;  %v4944_v25 = vld [vmem:[#allocation14 + $0x398] sm:$0xff]  ;;  %v5161_v7 = vld [vmem:[#allocation15 + $0x290] sm:$0xff] }
0x112e   :  { %9837 = vmatprep.subr.bf16.mxu1 %v9836_v56  ;;  %v9820_v30 = vpack.c.bf16 %v4946_v2, %v4942_v20  ;;  %v9852_v63 = vpack.c.bf16 %v4948_v38, %v4944_v25  ;;  %v4941_v56 = vld [vmem:[#allocation14 + $0x380] sm:$0xff]  ;;  %v5193_v35 = vld [vmem:[#allocation15 + $0x390] sm:$0xff]  ;;  %v5194_v13 = vld [vmem:[#allocation15 + $0x398] sm:$0xff]  ;;  %v9894_v20 = vpack.c.bf16 %v5176_v19, %v5175_v47  ;;  %v9864_v25 = vpack.c.bf16 %v5162_v6, %v5161_v7 }
0x112f   :  { %v9822_v32 = vpack.c.bf16 %v4945_v34, %v4941_v56  ;;  %v5146_v2 = vld [vmem:[#allocation15 + $0x218] sm:$0xff]  ;;  %v5177_v38 = vld [vmem:[#allocation15 + $0x310] sm:$0xff]  ;;  %v5164_v34 = vld [vmem:[#allocation15 + $0x2a8] sm:$0xff] }
0x1130   :  { %9807 = vmatpush1.bf16.msra.mxu0 %v9806_v52  ;;  %v4947_v52 = vld [vmem:[#allocation14 + $0x3b0] sm:$0xff]  ;;  %v5170_v19 = vld [vmem:[#allocation15 + $0x2d8] sm:$0xff] }
0x1131   :  { %9839 = vmatpush1.bf16.msra.mxu1 %v9838_v41  ;;  %9809 = vmatprep.subr.bf16.mxu0 %v9808_v54  ;;  %v4950_v41 = vld [vmem:[#allocation14 + $0x3c8] sm:$0xff]  ;;  %v4955_v54 = vld [vmem:[#allocation14 + $0x3f0] sm:$0xff] }
0x1132   :  { %9841 = vmatprep.subr.bf16.mxu1 %v9840_v33  ;;  %v9858_v17 = vpack.c.bf16 %v4955_v54, %v4951_v36  ;;  %v5160_v33 = vld [vmem:[#allocation15 + $0x288] sm:$0xff]  ;;  %v5197_v36 = vld [vmem:[#allocation15 + $0x3b0] sm:$0xff]  ;;  %v5198_v54 = vld [vmem:[#allocation15 + $0x3b8] sm:$0xff] }
0x1133   :  { %v5169_v47 = vld [vmem:[#allocation15 + $0x2d0] sm:$0xff] }
0x1134   :  { %9811 = vmatpush1.bf16.msra.mxu0 %v9810_v55  ;;  %v5191_v55 = vld [vmem:[#allocation15 + $0x380] sm:$0xff]  ;;  %v5201_v7 = vld [vmem:[#allocation15 + $0x3d0] sm:$0xff] }
0x1135   :  { %9813 = vmatprep.subr.bf16.mxu0 %v9812_v46 }
0x1138   :  { %9815 = vmatpush1.bf16.msra.mxu0 %v9814_v57  ;;  %v8156_v57 = vld [vmem:[%s12488_s13 + $0x1] ss:$0 sm:$0xff] }
0x1139   :  { %9817 = vmatprep.subr.bf16.mxu0 %v9816_v44 }
0x113c   :  { %9819 = vmatpush1.bf16.msra.mxu0 %v9818_v0 }
0x113d   :  { %9821 = vmatprep.subr.bf16.mxu0 %v9820_v30  ;;  %v5178_v30 = vld [vmem:[#allocation15 + $0x318] sm:$0xff] }
0x1140   :  { %9823 = vmatpush1.bf16.msra.mxu0 %v9822_v32  ;;  %v5196_v32 = vld [vmem:[#allocation15 + $0x3a8] sm:$0xff] }
0x11b7   :  { %v4857_v49 = vpop.xlane.xlu1 %4856 }
0x11b8   :  { %v4855_v15 = vpop.xlane.xlu0 %4854  ;;  %v4859_v43 = vmul.f32 0.0078125, %v4857_v49  ;;  %v4954_v49 = vld [vmem:[#allocation14 + $0x3e8] sm:$0xff] }
0x11b9   :  { %v4858_v12 = vmul.f32 0.0078125, %v4855_v15  ;;  %v9854_v15 = vpack.c.bf16 %v4947_v52, %v4943_v39  ;;  %v5195_v39 = vld [vmem:[#allocation15 + $0x3a0] sm:$0xff] }
0x11ba   :  { %v12017_v50 = vsub.f32 %v4849_v21, %v4859_v43  ;;  %v4923_v21 = vld [vmem:[#allocation14 + $0x2f0] sm:$0xff]  ;;  %v9824_v43 = vpack.c.bf16 %v4954_v49, %v4950_v41  ;;  %v9898_v41 = vpack.c.bf16 %v5178_v30, %v5177_v38  ;;  %v5147_v49 = vld [vmem:[#allocation15 + $0x220] sm:$0xff]  ;;  %v5204_v38 = vld [vmem:[#allocation15 + $0x3e8] sm:$0xff] }
0x11bb   :  { %v12015_v10 = vsub.f32 %v4848_v37, %v4858_v12  ;;  %v9842_v37 = vpack.c.bf16 %v4923_v21, %v4919_v61  ;;  %v4952_v12 = vld [vmem:[#allocation14 + $0x3d8] sm:$0xff]  ;;  %v9860_v61 = vpack.c.bf16 %v5160_v33, %v5159_v59  ;;  %v5192_v21 = vld [vmem:[#allocation15 + $0x388] sm:$0xff]  ;;  %v5149_v59 = vld [vmem:[#allocation15 + $0x230] sm:$0xff] }
0x11bc   :  { %v4863_v58 = vmul.f32 %v12017_v50, %v12017_v50  ;;  %9825 = vmatprep.subr.bf16.mxu0 %v9824_v43  ;;  %v5150_v33 = vld [vmem:[#allocation15 + $0x238] sm:$0xff] }
0x11bd   :  { %v4862_v9 = vmul.f32 %v12015_v10, %v12015_v10  ;;  %9843 = vmatpush1.bf16.msra.mxu1 %v9842_v37  ;;  %v9892_v37 = vpack.c.bf16 %v5192_v21, %v5191_v55  ;;  %v5181_v21 = vld [vmem:[#allocation15 + $0x330] sm:$0xff] }
0x11be   :  { %9845 = vmatprep.subr.bf16.mxu1 %v9844_v3  ;;  %v8155_v3 = vld [vmem:[%s12487_s12 + $0x1] ss:$0 sm:$0xff] }
0x11bf   :  { %4864 = vadd.xlane.f32.xlu0 %v4862_v9  ;;  %v4956_v9 = vld [vmem:[#allocation14 + $0x3f8] sm:$0xff] }
0x11c0   :  { %v9856_v51 = vpack.c.bf16 %v4956_v9, %v4952_v12  ;;  %v9900_v12 = vpack.c.bf16 %v5196_v32, %v5195_v39  ;;  %v5179_v9 = vld [vmem:[#allocation15 + $0x320] sm:$0xff]  ;;  %v5156_v32 = vld [vmem:[#allocation15 + $0x268] sm:$0xff] }
0x11c1   :  { %9847 = vmatpush1.bf16.msra.mxu1 %v9846_v62  ;;  %v5144_v62 = vld [vmem:[#allocation15 + $0x208] sm:$0xff]  ;;  %v5155_v39 = vld [vmem:[#allocation15 + $0x260] sm:$0xff] }
0x11c2   :  { %9849 = vmatprep.subr.bf16.mxu1 %v9848_v60  ;;  %v9862_v28 = vpack.c.bf16 %v5144_v62, %v5143_v11  ;;  %v5183_v11 = vld [vmem:[#allocation15 + $0x340] sm:$0xff]  ;;  %v5184_v62 = vld [vmem:[#allocation15 + $0x348] sm:$0xff] }
0x11c3   :  { %4866 = vadd.xlane.f32.xlu0 %v4863_v58  ;;  %v4949_v58 = vld [vmem:[#allocation14 + $0x3c0] sm:$0xff] }
0x11c4   :  { %v9826_v48 = vpack.c.bf16 %v4953_v29, %v4949_v58  ;;  %v5180_v58 = vld [vmem:[#allocation15 + $0x328] sm:$0xff]  ;;  %v5166_v29 = vld [vmem:[#allocation15 + $0x2b8] sm:$0xff] }
0x11c5   :  { %9851 = vmatpush1.bf16.msra.mxu1 %v9850_v1  ;;  %v5145_v1 = vld [vmem:[#allocation15 + $0x210] sm:$0xff] }
0x11c6   :  { %9853 = vmatprep.subr.bf16.mxu1 %v9852_v63  ;;  %9827 = vmatpush1.bf16.msra.mxu0 %v9826_v48  ;;  %v5163_v63 = vld [vmem:[#allocation15 + $0x2a0] sm:$0xff]  ;;  %v9866_v52 = vpack.c.bf16 %v5146_v2, %v5145_v1  ;;  %v5186_v1 = vld [vmem:[#allocation15 + $0x358] sm:$0xff] }
0x11c7   :  { %9861 = vmatprep.subr.bf16.mxu0 %v9860_v61  ;;  %v9868_v43 = vpack.c.bf16 %v5164_v34, %v5163_v63  ;;  %v9904_v61 = vpack.c.bf16 %v5198_v54, %v5197_v36  ;;  %v5171_v2 = vld [vmem:[#allocation15 + $0x2e0] sm:$0xff]  ;;  %v5158_v36 = vld [vmem:[#allocation15 + $0x278] sm:$0xff] }
0x11c9   :  { %9855 = vmatpush1.bf16.msra.mxu1 %v9854_v15  ;;  %v5148_v15 = vld [vmem:[#allocation15 + $0x228] sm:$0xff] }
0x11ca   :  { %9857 = vmatprep.subr.bf16.mxu1 %v9856_v51  ;;  %v5165_v51 = vld [vmem:[#allocation15 + $0x2b0] sm:$0xff]  ;;  %v9870_v48 = vpack.c.bf16 %v5148_v15, %v5147_v49  ;;  %v5188_v49 = vld [vmem:[#allocation15 + $0x368] sm:$0xff] }
0x11cb   :  { %v9872_v55 = vpack.c.bf16 %v5166_v29, %v5165_v51  ;;  %v5206_v51 = vld [vmem:[#allocation15 + $0x3f8] sm:$0xff]  ;;  %v5157_v29 = vld [vmem:[#allocation15 + $0x270] sm:$0xff] }
0x11cd   :  { %9859 = vmatpush1.bf16.msra.mxu1 %v9858_v17  ;;  %v9902_v17 = vpack.c.bf16 %v5180_v58, %v5179_v9  ;;  %v5205_v9 = vld [vmem:[#allocation15 + $0x3f0] sm:$0xff] }
0x11ce   :  { %9893 = vmatprep.subr.bf16.mxu1 %v9892_v37  ;;  %v5182_v37 = vld [vmem:[#allocation15 + $0x338] sm:$0xff]  ;;  %v9920_v54 = vpack.c.bf16 %v5206_v51, %v5205_v9 }
0x124c   :  { %v4865_v40 = vpop.xlane.xlu0 %4864 }
0x124d   :  { %v4868_v42 = vmul.f32 0.0078125, %v4865_v40  ;;  %v5167_v40 = vld [vmem:[#allocation15 + $0x2c0] sm:$0xff] }
0x124f   :  { %v4870_v18 = vadd.f32 1e-05, %v4868_v42  ;;  %v5168_v42 = vld [vmem:[#allocation15 + $0x2c8] sm:$0xff] }
0x1250   :  { %v4867_v46 = vpop.xlane.xlu0 %4866 }
0x1251   :  { %10703 = vrsqrt.f32 %v4870_v18  ;;  %v4869_v5 = vmul.f32 0.0078125, %v4867_v46  ;;  %v5199_v18 = vld [vmem:[#allocation15 + $0x3c0] sm:$0xff]  ;;  %v5200_v46 = vld [vmem:[#allocation15 + $0x3c8] sm:$0xff] }
0x1253   :  { %v4871_v16 = vadd.f32 1e-05, %v4869_v5  ;;  %v9874_v5 = vpack.c.bf16 %v5150_v33, %v5149_v59  ;;  %v5190_v59 = vld [vmem:[#allocation15 + $0x378] sm:$0xff] }
0x1255   :  { %10705 = vrsqrt.f32 %v4871_v16  ;;  %v9906_v16 = vpack.c.bf16 %v5182_v37, %v5181_v21 }
0x125b   :  { %v10704_v53 = vpop.eup %10703 }
0x125c   :  { %v4874_v8 = vmul.f32 %v10704_v53, %v12015_v10  ;;  %v9896_v10 = vpack.c.bf16 %v5194_v13, %v5193_v35  ;;  %v5151_v53 = vld [vmem:[#allocation15 + $0x240] sm:$0xff]  ;;  %v9910_v35 = vpack.c.bf16 %v5184_v62, %v5183_v11  ;;  %v5153_v13 = vld [vmem:[#allocation15 + $0x250] sm:$0xff] }
0x125e   :  { %v4882_v44 = vmul.f32 %v8155_v3, %v4874_v8  ;;  %v9908_v8 = vpack.c.bf16 %v5200_v46, %v5199_v18 }
0x125f   :  { %v10706_v60 = vpop.eup %10705 }
0x1260   :  { %v12030_v0 = vadd.f32 %v8156_v57, %v4882_v44  ;;  %v4875_v4 = vmul.f32 %v10706_v60, %v12017_v50  ;;  %v5202_v44 = vld [vmem:[#allocation15 + $0x3d8] sm:$0xff] }
0x1261   :  { %v5154_v60 = vld [vmem:[#allocation15 + $0x258] sm:$0xff] }
0x1262   :  { %5045 = vmatmul.mubr.f32.vlgmr.msra.gmra.mrb[56].mxu0 %v12030_v0  ;;  %5122 = vmatmul.mubr.f32.vlgmr.msra.gmra.mrb[42].mxu1 %v12030_v0  ;;  %v4883_v56 = vmul.f32 %v8155_v3, %v4875_v4  ;;  %v5152_v3 = vld [vmem:[#allocation15 + $0x248] sm:$0xff]  ;;  %v9880_v4 = vpack.c.bf16 %v5170_v19, %v5169_v47  ;;  %v9882_v30 = vpack.c.bf16 %v5154_v60, %v5153_v13 }
0x1263   :  { %5050 = vmatprep.mubr.f32.mxu0 %v11011_v14  ;;  %5127 = vmatprep.mubr.f32.mxu1 %v11011_v14  ;;  %v9878_v6 = vpack.c.bf16 %v5152_v3, %v5151_v53 }
0x1264   :  { %v12037_v50 = vadd.f32 %v8156_v57, %v4883_v56  ;;  %9863 = vmatpush3.bf16.msra.mxu0 %v9862_v28  ;;  %9895 = vmatpush3.bf16.msra.mxu1 %v9894_v20  ;;  %v9876_v57 = vpack.c.bf16 %v5168_v42, %v5167_v40  ;;  %v9912_v28 = vpack.c.bf16 %v5202_v44, %v5201_v7  ;;  %v5185_v20 = vld [vmem:[#allocation15 + $0x350] sm:$0xff] }
0x1265   :  { %9865 = vmatprep.subr.bf16.mxu0 %v9864_v25  ;;  %9897 = vmatprep.subr.bf16.mxu1 %v9896_v10  ;;  %v5172_v25 = vld [vmem:[#allocation15 + $0x2e8] sm:$0xff]  ;;  %v5203_v10 = vld [vmem:[#allocation15 + $0x3e0] sm:$0xff]  ;;  %v9914_v63 = vpack.c.bf16 %v5186_v1, %v5185_v20 }
0x1266   :  { %5051 = vmatmul.mubr.f32.gmra.mrb[58].mxu0 %v12037_v50  ;;  %5128 = vmatmul.mubr.f32.gmra.mrb[44].mxu1 %v12037_v50  ;;  %v9884_v56 = vpack.c.bf16 %v5172_v25, %v5171_v2  ;;  %v9916_v34 = vpack.c.bf16 %v5204_v38, %v5203_v10  ;;  %v8159_v38 = vld [vmem:[%s12486_s11 + $0x1] ss:$0 sm:$0xff] }
0x1268   :  { %9867 = vmatpush3.bf16.msra.mxu0 %v9866_v52  ;;  %9899 = vmatpush3.bf16.msra.mxu1 %v9898_v41  ;;  %v5187_v52 = vld [vmem:[#allocation15 + $0x360] sm:$0xff]  ;;  %v9886_v41 = vpack.c.bf16 %v5156_v32, %v5155_v39 }
0x1269   :  { %9869 = vmatprep.subr.bf16.mxu0 %v9868_v43  ;;  %9901 = vmatprep.subr.bf16.mxu1 %v9900_v12  ;;  %v9918_v15 = vpack.c.bf16 %v5188_v49, %v5187_v52  ;;  %v5173_v43 = vld [vmem:[#allocation15 + $0x2f0] sm:$0xff]  ;;  %v5174_v12 = vld [vmem:[#allocation15 + $0x2f8] sm:$0xff] }
0x126a   :  { %v9888_v58 = vpack.c.bf16 %v5174_v12, %v5173_v43 }
0x126c   :  { %9871 = vmatpush3.bf16.msra.mxu0 %v9870_v48  ;;  %9903 = vmatpush3.bf16.msra.mxu1 %v9902_v17  ;;  %v9890_v48 = vpack.c.bf16 %v5158_v36, %v5157_v29  ;;  %v5189_v17 = vld [vmem:[#allocation15 + $0x370] sm:$0xff]  ;;  %v5411_v36 = vld [vmem:[#allocation11 + $0x308] sm:$0xff] }
0x126d   :  { %9873 = vmatprep.subr.bf16.mxu0 %v9872_v55  ;;  %9905 = vmatprep.subr.bf16.mxu1 %v9904_v61  ;;  %v9922_v33 = vpack.c.bf16 %v5190_v59, %v5189_v17  ;;  %v8157_v55 = vld [vmem:[%s12484_s9 + $0x4] sm:$0xf]  ;;  %v5413_v59 = vld [vmem:[#allocation11 + $0x318] sm:$0xff] }
0x126e   :  { %v4963_v61 = vrot.slane %v8157_v55, %v11268_v24  ;;  %v4971_v21 = vrot.slane %v8157_v55, %v11274_v26  ;;  %v4967_v37 = vrot.slane %v8157_v55, %v11277_v27  ;;  %v4975_v40 = vrot.slane %v8157_v55, %v11645_v31  ;;  %v5420_v55 = vld [vmem:[#allocation11 + $0x350] sm:$0xff] }
0x1270   :  { %9875 = vmatpush3.bf16.msra.mxu0 %v9874_v5  ;;  %9907 = vmatpush3.bf16.msra.mxu1 %v9906_v16 }
0x1271   :  { %9877 = vmatprep.subr.bf16.mxu0 %v9876_v57  ;;  %9909 = vmatprep.subr.bf16.mxu1 %v9908_v8 }
0x1274   :  { %9879 = vmatpush3.bf16.msra.mxu0 %v9878_v6  ;;  %9911 = vmatpush3.bf16.msra.mxu1 %v9910_v35 }
0x1275   :  { %9881 = vmatprep.subr.bf16.mxu0 %v9880_v4  ;;  %9913 = vmatprep.subr.bf16.mxu1 %v9912_v28 }
0x1278   :  { %9883 = vmatpush3.bf16.msra.mxu0 %v9882_v30  ;;  %9915 = vmatpush3.bf16.msra.mxu1 %v9914_v63 }
0x1279   :  { %9885 = vmatprep.subr.bf16.mxu0 %v9884_v56  ;;  %9917 = vmatprep.subr.bf16.mxu1 %v9916_v34 }
0x127c   :  { %9887 = vmatpush3.bf16.msra.mxu0 %v9886_v41  ;;  %9919 = vmatpush3.bf16.msra.mxu1 %v9918_v15 }
0x127d   :  { %9889 = vmatprep.subr.bf16.mxu0 %v9888_v58  ;;  %9921 = vmatprep.subr.bf16.mxu1 %v9920_v54  ;;  %v5414_v54 = vld [vmem:[#allocation11 + $0x320] sm:$0xff] }
0x127e   :  { %v9924_v17 = vpack.c.bf16 %v5414_v54, %v5411_v36  ;;  %v5443_v36 = vld [vmem:[#allocation11 + $0x408] sm:$0xff] }
0x1280   :  { %9891 = vmatpush3.bf16.msra.mxu0 %v9890_v48  ;;  %9923 = vmatpush3.bf16.msra.mxu1 %v9922_v33  ;;  %v5410_v48 = vld [vmem:[#allocation11 + $0x300] sm:$0xff]  ;;  %v5417_v33 = vld [vmem:[#allocation11 + $0x338] sm:$0xff] }
0x1281   :  { %9925 = vmatprep.subr.bf16.mxu0 %v9924_v17  ;;  %v5447_v17 = vld [vmem:[#allocation11 + $0x428] sm:$0xff] }
0x1335   :  { %v5046_v42 = vpop.f32.mrb[56].mxu0  ;;  %v5123_v18 = vpop.f32.mrb[42].mxu1 }
0x1336   :  { %v5047_v46 = vadd.f32 %v5046_v42, %v4963_v61  ;;  %v5124_v5 = vadd.f32 %v5123_v18, %v4971_v21  ;;  %v5048_v16 = vpop.f32.mrb[57].mxu0  ;;  %v5125_v53 = vpop.f32.mrb[43].mxu1  ;;  %v5416_v42 = vld [vmem:[#allocation11 + $0x330] sm:$0xff] }
0x1337   :  { %v5049_v3 = vadd.f32 %v5048_v16, %v4967_v37  ;;  %v5126_v57 = vadd.f32 %v5125_v53, %v4975_v40  ;;  %v5418_v16 = vld [vmem:[#allocation11 + $0x340] sm:$0xff]  ;;  %v5421_v53 = vld [vmem:[#allocation11 + $0x358] sm:$0xff] }
0x1338   :  { %v5134_v19 = vmax.f32 %v5047_v46, 0.0  ;;  %v5136_v7 = vmax.f32 %v5124_v5, 0.0  ;;  %v5423_v46 = vld [vmem:[#allocation11 + $0x368] sm:$0xff]  ;;  %v5426_v5 = vld [vmem:[#allocation11 + $0x380] sm:$0xff] }
0x1339   :  { %v5135_v8 = vmax.f32 %v5049_v3, 0.0  ;;  %v5137_v11 = vmax.f32 %v5126_v57, 0.0  ;;  %v5052_v62 = vpop.f32.mrb[58].mxu0  ;;  %v5129_v47 = vpop.f32.mrb[44].mxu1  ;;  %v9932_v3 = vpack.c.bf16 %v5426_v5, %v5423_v46  ;;  %v9960_v57 = vpack.c.bf16 %v5421_v53, %v5418_v16  ;;  %v5448_v46 = vld [vmem:[#allocation11 + $0x430] sm:$0xff]  ;;  %v5455_v53 = vld [vmem:[#allocation11 + $0x468] sm:$0xff] }
0x133a   :  { %v5053_v44 = vadd.f32 %v5052_v62, %v4963_v61  ;;  %v5130_v6 = vadd.f32 %v5129_v47, %v4971_v21  ;;  %v5054_v35 = vpop.f32.mrb[59].mxu0  ;;  %v5131_v13 = vpop.f32.mrb[45].mxu1  ;;  %v9926_v61 = vpack.c.bf16 %v5413_v59, %v5410_v48  ;;  %v9928_v21 = vpack.c.bf16 %v5420_v55, %v5417_v33  ;;  %v5450_v59 = vld [vmem:[#allocation11 + $0x440] sm:$0xff]  ;;  %v5452_v16 = vld [vmem:[#allocation11 + $0x450] sm:$0xff] }
0x133b   :  { %v5055_v60 = vadd.f32 %v5054_v35, %v4967_v37  ;;  %v5132_v4 = vadd.f32 %v5131_v13, %v4975_v40  ;;  %5279 = vmatprep.mubr.f32.mxu0 %v5135_v8  ;;  %5354 = vmatprep.mubr.f32.mxu1 %v5137_v11  ;;  %v5412_v37 = vld [vmem:[#allocation11 + $0x310] sm:$0xff]  ;;  %v5415_v40 = vld [vmem:[#allocation11 + $0x328] sm:$0xff]  ;;  %v5422_v8 = vld [vmem:[#allocation11 + $0x360] sm:$0xff]  ;;  %v9948_v55 = vpack.c.bf16 %v5450_v59, %v5447_v17 }
0x133c   :  { %5280 = vmatmul.mubr.f32.vlgmr.msra.gmra.mrb[60].mxu0 %v5134_v19  ;;  %5355 = vmatmul.mubr.f32.vlgmr.msra.gmra.mrb[46].mxu1 %v5136_v7  ;;  %v5138_v1 = vmax.f32 %v5053_v44, 0.0  ;;  %v5140_v2 = vmax.f32 %v5130_v6, 0.0  ;;  %v9956_v18 = vpack.c.bf16 %v5415_v40, %v5412_v37  ;;  %v5425_v11 = vld [vmem:[#allocation11 + $0x378] sm:$0xff]  ;;  %v5442_v33 = vld [vmem:[#allocation11 + $0x400] sm:$0xff] }
0x133d   :  { %v5139_v28 = vmax.f32 %v5055_v60, 0.0  ;;  %v5141_v20 = vmax.f32 %v5132_v4, 0.0  ;;  %9927 = vmatpush1.bf16.msra.mxu0 %v9926_v61  ;;  %v9934_v62 = vpack.c.bf16 %v5425_v11, %v5422_v8  ;;  %v5429_v4 = vld [vmem:[#allocation11 + $0x398] sm:$0xff]  ;;  %v5454_v8 = vld [vmem:[#allocation11 + $0x460] sm:$0xff] }
0x133e   :  { %9929 = vmatprep.subr.bf16.mxu0 %v9928_v21  ;;  %9957 = vmatprep.subr.bf16.mxu1 %v9956_v18  ;;  %v5445_v61 = vld [vmem:[#allocation11 + $0x418] sm:$0xff]  ;;  %v5446_v21 = vld [vmem:[#allocation11 + $0x420] sm:$0xff] }
0x133f   :  { %5284 = vmatprep.mubr.f32.mxu0 %v5139_v28  ;;  %5359 = vmatprep.mubr.f32.mxu1 %v5141_v20  ;;  %v5432_v28 = vld [vmem:[#allocation11 + $0x3b0] sm:$0xff]  ;;  %v5449_v37 = vld [vmem:[#allocation11 + $0x438] sm:$0xff]  ;;  %v9976_v40 = vpack.c.bf16 %v5445_v61, %v5442_v33 }
0x1340   :  { %5285 = vmatmul.mubr.f32.gmra.mrb[62].mxu0 %v5138_v1  ;;  %5360 = vmatmul.mubr.f32.gmra.mrb[48].mxu1 %v5140_v2  ;;  %v5424_v20 = vld [vmem:[#allocation11 + $0x370] sm:$0xff]  ;;  %v9936_v1 = vpack.c.bf16 %v5432_v28, %v5429_v4  ;;  %v5427_v2 = vld [vmem:[#allocation11 + $0x388] sm:$0xff]  ;;  %v5457_v11 = vld [vmem:[#allocation11 + $0x478] sm:$0xff] }
0x1341   :  { %5540 = vmatprep.mubr.f32.mxu0 %v11011_v14  ;;  %9959 = vmatpush3.bf16.msra.mxu1 %v9956_v18  ;;  %v5453_v18 = vld [vmem:[#allocation11 + $0x458] sm:$0xff]  ;;  %v8162_v28 = vld [vmem:[%s12489_s14 + $0x1] ss:$0 sm:$0xff] }
0x1342   :  { %9961 = vmatprep.subr.bf16.mxu1 %v9960_v57 }
0x1345   :  { %9963 = vmatpush3.bf16.msra.mxu1 %v9960_v57  ;;  %v9954_v57 = vpack.c.bf16 %v5455_v53, %v5452_v16 }
0x140f   :  { %v8539_v25 = vpop.f32.mrb[60].mxu0  ;;  %v8577_v10 = vpop.f32.mrb[46].mxu1 }
0x1410   :  { %v8540_v30 = vpop.f32.mrb[61].mxu0  ;;  %v8578_v63 = vpop.f32.mrb[47].mxu1 }
0x1411   :  { %v8541_v56 = vadd.f32 %v8540_v30, %v8539_v25  ;;  %v8579_v34 = vadd.f32 %v8578_v63, %v8577_v10  ;;  %v5428_v25 = vld [vmem:[#allocation11 + $0x390] sm:$0xff]  ;;  %v5431_v10 = vld [vmem:[#allocation11 + $0x3a8] sm:$0xff] }
0x1412   :  { %v9938_v30 = vpack.c.bf16 %v5431_v10, %v5428_v25  ;;  %v5435_v63 = vld [vmem:[#allocation11 + $0x3c8] sm:$0xff] }
0x1413   :  { %v5282_v39 = vadd.f32 %v8541_v56, %v8159_v38  ;;  %v8542_v32 = vpop.f32.mrb[62].mxu0  ;;  %v8580_v52 = vpop.f32.mrb[48].mxu1  ;;  %v5438_v56 = vld [vmem:[#allocation11 + $0x3e0] sm:$0xff] }
0x1414   :  { %v8543_v41 = vpop.f32.mrb[63].mxu0  ;;  %v8581_v49 = vpop.f32.mrb[49].mxu1 }
0x1415   :  { %v5357_v15 = vadd.f32 %v8579_v34, %v5282_v39  ;;  %v8544_v43 = vadd.f32 %v8543_v41, %v8542_v32  ;;  %v8582_v12 = vadd.f32 %v8581_v49, %v8580_v52  ;;  %v5430_v34 = vld [vmem:[#allocation11 + $0x3a0] sm:$0xff]  ;;  %v9940_v39 = vpack.c.bf16 %v5438_v56, %v5435_v63  ;;  %v5433_v32 = vld [vmem:[#allocation11 + $0x3b8] sm:$0xff] }
0x1416   :  { %v5434_v52 = vld [vmem:[#allocation11 + $0x3c0] sm:$0xff]  ;;  %v5437_v41 = vld [vmem:[#allocation11 + $0x3d8] sm:$0xff]  ;;  %v9968_v49 = vpack.c.bf16 %v5433_v32, %v5430_v34 }
0x1417   :  { %v5287_v9 = vadd.f32 %v8544_v43, %v8159_v38  ;;  %v5365_v58 = vadd.f32 %v5357_v15, %v12030_v0  ;;  %v5419_v0 = vld [vmem:[#allocation11 + $0x348] sm:$0xff]  ;;  %v9964_v38 = vpack.c.bf16 %v5427_v2, %v5424_v20  ;;  %v9942_v15 = vpack.c.bf16 %v5437_v41, %v5434_v52  ;;  %v5441_v43 = vld [vmem:[#allocation11 + $0x3f8] sm:$0xff] }
0x1419   :  { %v5362_v51 = vadd.f32 %v8582_v12, %v5287_v9  ;;  %5371 = vadd.xlane.f32.xlu1 %v5365_v58  ;;  %9965 = vmatprep.subr.bf16.mxu1 %v9964_v38  ;;  %v5444_v12 = vld [vmem:[#allocation11 + $0x410] sm:$0xff] }
0x141a   :  { %9967 = vmatpush3.bf16.msra.mxu1 %v9964_v38  ;;  %v5436_v9 = vld [vmem:[#allocation11 + $0x3d0] sm:$0xff] }
0x141b   :  { %v5366_v29 = vadd.f32 %v5362_v51, %v12037_v50  ;;  %v9930_v50 = vpack.c.bf16 %v5419_v0, %v5416_v42  ;;  %9969 = vmatprep.subr.bf16.mxu1 %v9968_v49  ;;  %v5439_v51 = vld [vmem:[#allocation11 + $0x3e8] sm:$0xff]  ;;  %v9950_v42 = vpack.c.bf16 %v5449_v37, %v5446_v21  ;;  %v5456_v0 = vld [vmem:[#allocation11 + $0x470] sm:$0xff] }
0x141c   :  { %v9972_v54 = vpack.c.bf16 %v5439_v51, %v5436_v9  ;;  %v9952_v5 = vpack.c.bf16 %v5456_v0, %v5453_v18 }
0x141d   :  { %5373 = vadd.xlane.f32.xlu0 %v5366_v29  ;;  %9931 = vmatpush1.bf16.msra.mxu0 %v9930_v50  ;;  %v5451_v50 = vld [vmem:[#allocation11 + $0x448] sm:$0xff] }
0x141e   :  { %9933 = vmatprep.subr.bf16.mxu0 %v9932_v3  ;;  %9971 = vmatpush3.bf16.msra.mxu1 %v9968_v49  ;;  %v9980_v3 = vpack.c.bf16 %v5451_v50, %v5448_v46 }
0x141f   :  { %9973 = vmatprep.subr.bf16.mxu1 %v9972_v54 }
0x1421   :  { %9935 = vmatpush1.bf16.msra.mxu0 %v9934_v62  ;;  %v9984_v62 = vpack.c.bf16 %v5457_v11, %v5454_v8 }
0x1422   :  { %9937 = vmatprep.subr.bf16.mxu0 %v9936_v1  ;;  %9975 = vmatpush3.bf16.msra.mxu1 %v9972_v54  ;;  %v8163_v1 = vld [vmem:[%s12490_s15 + $0x1] ss:$0 sm:$0xff] }
0x1423   :  { %9977 = vmatprep.subr.bf16.mxu1 %v9976_v40 }
0x1425   :  { %9939 = vmatpush1.bf16.msra.mxu0 %v9938_v30 }
0x1426   :  { %9941 = vmatprep.subr.bf16.mxu0 %v9940_v39  ;;  %9979 = vmatpush3.bf16.msra.mxu1 %v9976_v40 }
0x1427   :  { %9981 = vmatprep.subr.bf16.mxu1 %v9980_v3 }
0x1429   :  { %9943 = vmatpush1.bf16.msra.mxu0 %v9942_v15 }
0x142a   :  { %9983 = vmatpush3.bf16.msra.mxu1 %v9980_v3 }
0x142b   :  { %9985 = vmatprep.subr.bf16.mxu1 %v9984_v62 }
0x142e   :  { %9987 = vmatpush3.bf16.msra.mxu1 %v9984_v62 }
0x14a6   :  { %v5372_v47 = vpop.xlane.xlu1 %5371 }
0x14a7   :  { %v5375_v19 = vmul.f32 0.0078125, %v5372_v47 }
0x14a9   :  { %v12054_v7 = vsub.f32 %v5365_v58, %v5375_v19  ;;  %v9944_v58 = vpack.c.bf16 %v5444_v12, %v5441_v43 }
0x14aa   :  { %v5374_v44 = vpop.xlane.xlu0 %5373 }
0x14ab   :  { %v5376_v6 = vmul.f32 0.0078125, %v5374_v44  ;;  %v5379_v35 = vmul.f32 %v12054_v7, %v12054_v7  ;;  %9945 = vmatprep.subr.bf16.mxu0 %v9944_v58 }
0x14ad   :  { %v12058_v13 = vsub.f32 %v5366_v29, %v5376_v6  ;;  %5381 = vadd.xlane.f32.xlu1 %v5379_v35  ;;  %v5440_v29 = vld [vmem:[#allocation11 + $0x3f0] sm:$0xff] }
0x14ae   :  { %v9946_v48 = vpack.c.bf16 %v5443_v36, %v5440_v29 }
0x14af   :  { %v5380_v60 = vmul.f32 %v12058_v13, %v12058_v13 }
0x14b0   :  { %9947 = vmatpush1.bf16.msra.mxu0 %v9946_v48 }
0x14b1   :  { %5383 = vadd.xlane.f32.xlu0 %v5380_v60  ;;  %9949 = vmatprep.subr.bf16.mxu0 %v9948_v55 }
0x14b4   :  { %9951 = vmatpush1.bf16.msra.mxu0 %v9950_v42 }
0x14b5   :  { %9953 = vmatprep.subr.bf16.mxu0 %v9952_v5 }
0x14b8   :  { %9955 = vmatpush1.bf16.msra.mxu0 %v9954_v57 }
0x153a   :  { %v5382_v47 = vpop.xlane.xlu1 %5381 }
0x153b   :  { %v5385_v19 = vmul.f32 0.0078125, %v5382_v47 }
0x153d   :  { %v5387_v44 = vadd.f32 1e-05, %v5385_v19 }
0x153e   :  { %v5384_v6 = vpop.xlane.xlu0 %5383 }
0x153f   :  { %10707 = vrsqrt.f32 %v5387_v44  ;;  %v5386_v35 = vmul.f32 0.0078125, %v5384_v6 }
0x1541   :  { %v5388_v60 = vadd.f32 1e-05, %v5386_v35 }
0x1543   :  { %10709 = vrsqrt.f32 %v5388_v60 }
0x1549   :  { %v10708_v4 = vpop.eup %10707 }
0x154a   :  { %v5391_v20 = vmul.f32 %v10708_v4, %v12054_v7  ;;  %v8164_v7 = vld [vmem:[%s12480_s5 + $0x6] sm:$0x7] }
0x154b   :  { %v5464_v56 = vrot.slane %v8164_v7, %v11268_v24  ;;  %v5468_v32 = vrot.slane %v8164_v7, %v11277_v27  ;;  %v5472_v52 = vrot.slane %v8164_v7, %v11274_v26 }
0x154c   :  { %v5399_v2 = vmul.f32 %v8162_v28, %v5391_v20 }
0x154d   :  { %v10710_v25 = vpop.eup %10709 }
0x154e   :  { %v12069_v10 = vadd.f32 %v8163_v1, %v5399_v2  ;;  %v5392_v38 = vmul.f32 %v10710_v25, %v12058_v13 }
0x1550   :  { %5541 = vmatmul.mubr.f32.vlgmr.msra.gmra.mrb[64].mxu0 %v12069_v10  ;;  %9162 = vmatprep.mubr.f32.mxu1 %v12069_v10  ;;  %v5400_v30 = vmul.f32 %v8162_v28, %v5392_v38 }
0x1551   :  { %5546 = vmatprep.mubr.f32.mxu0 %v11011_v14 }
0x1552   :  { %v12075_v63 = vadd.f32 %v8163_v1, %v5400_v30 }
0x1554   :  { %5547 = vmatmul.mubr.f32.gmra.mrb[66].mxu0 %v12075_v63  ;;  %9163 = vmatmul.mubr.f32.vlgmr.msra.gmra.mrb[50].mxu1 %v12075_v63 }
0x1623   :  { %v5542_v13 = vpop.f32.mrb[64].mxu0 }
0x1624   :  { %v5543_v34 = vadd.f32 %v5542_v13, %v5464_v56  ;;  %v5544_v39 = vpop.f32.mrb[65].mxu0 }
0x1625   :  { %v5545_v12 = vadd.f32 %v5544_v39, %v5468_v32 }
0x1626   :  { %9169 = vmatprep.mubr.msk.f32.mxu0 %vm180_vm0, %v5543_v34 }
0x1627   :  { %v5548_v41 = vpop.f32.mrb[66].mxu0  ;;  %v9164_v49 = vpop.f32.mrb[50].mxu1 }
0x1628   :  { %v5550_v15 = vpop.f32.mrb[67].mxu0  ;;  %v5619_v43 = vpop.f32.mrb[51].mxu1  ;;  %v5625_v9 = vadd.f32 %v9164_v49, %v5472_v52  ;;  %v5549_v17 = vadd.f32 %v5548_v41, %v5464_v56 }
0x1629   :  { %v5551_v58 = vadd.f32 %v5550_v15, %v5468_v32  ;;  %v5620_v51 = vadd.f32 %v5619_v43, %v5472_v52 }
0x162b   :  { %v10466_v29 = vpack.i.bf16 %v5551_v58, %v5545_v12  ;;  %v9988_v36 = vpack.c.bf16 %v5551_v58, %v5545_v12  ;;  %v12088_v54 = vpack.i.bf16 %v5625_v9, %v5620_v51  ;;  %v12092_v48 = vpack.c.bf16 %v5625_v9, %v5620_v51 }
0x162d   :  { %10467 = vrot.lane.b32.xlu0 %v10466_v29, %s11013_s22  ;;  %10462 = vrot.lane.b32.xlu1 %v10466_v29, %s11012_s27 }
0x162e   :  { %9990 = vmatprep.subr.msk.bf16.mxu0 %vm11291_vm1, %v9988_v36 }
0x162f   :  { %9993 = vmatpush3.bf16.xpose.msk.msra.mxu0 %vm11291_vm1, %v9988_v36 }
0x1631   :  { %5630 = vrot.lane.b32.xlu1 %v5543_v34, %s11012_s27  ;;  %5636 = vrot.lane.b32.xlu0 %v5549_v17, %s11013_s22 }
0x1635   :  { %10472 = vrot.lane.b32.xlu0 %v10466_v29, %s11014_s2  ;;  %5632 = vrot.lane.b32.xlu1 %v5549_v17, %s11012_s27 }
0x1636   :  { %9170 = vmatmul.mubr.msk.f32.vlgmr.msra.gmra.mrb[68].mxu0 %vm180_vm0, %v5549_v17 }
0x1639   :  { %5640 = vrot.lane.b32.xlu0 %v5549_v17, %s11014_s2  ;;  %5634 = vrot.lane.b32.xlu1 %v5543_v34, %s11013_s22 }
0x163d   :  { %10482 = vrot.lane.b32.xlu0 %v10466_v29, %s11016_s17  ;;  %5638 = vrot.lane.b32.xlu1 %v5543_v34, %s11014_s2 }
0x1641   :  { %5644 = vrot.lane.b32.xlu0 %v5549_v17, %s11015_s4  ;;  %10477 = vrot.lane.b32.xlu1 %v10466_v29, %s11015_s4 }
0x1645   :  { %10492 = vrot.lane.b32.xlu0 %v10466_v29, %s11017_s3  ;;  %5642 = vrot.lane.b32.xlu1 %v5543_v34, %s11015_s4 }
0x1649   :  { %5648 = vrot.lane.b32.xlu0 %v5549_v17, %s11016_s17  ;;  %10487 = vrot.lane.b32.xlu1 %v10466_v29, %s11009_s21 }
0x164d   :  { %5652 = vrot.lane.b32.xlu0 %v5549_v17, %s11009_s21  ;;  %5646 = vrot.lane.b32.xlu1 %v5543_v34, %s11016_s17 }
0x1651   :  { %5656 = vrot.lane.b32.xlu0 %v5549_v17, %s11017_s3  ;;  %5650 = vrot.lane.b32.xlu1 %v5543_v34, %s11009_s21 }
0x1655   :  { %10497 = vrot.lane.b32.xlu0 %v12088_v54, %s11012_s27  ;;  %5654 = vrot.lane.b32.xlu1 %v5543_v34, %s11017_s3 }
0x1659   :  { %10502 = vrot.lane.b32.xlu1 %v12088_v54, %s11013_s22 }
0x165d   :  { %10507 = vrot.lane.b32.xlu1 %v12088_v54, %s11014_s2 }
0x169f   :  { %v10468_v59 = vpop.permute.xlu0 %10467  ;;  %v10463_v33 = vpop.permute.xlu1 %10462 }
0x16a0   :  { %v10470_v55 = vunpack.i.h.bf16 %v10468_v59  ;;  %v10469_v61 = vunpack.i.l.bf16 %v10468_v59  ;;  %v10465_v21 = vunpack.i.h.bf16 %v10463_v33  ;;  %v10464_v37 = vunpack.i.l.bf16 %v10463_v33 }
0x16a2   :  { %v9994_v40 = vpack.c.bf16 %v10465_v21, %v10464_v37  ;;  %v10000_v0 = vpack.c.bf16 %v10470_v55, %v10469_v61  ;;  %v12172_v21 = vld [vmem:[#allocation6 + $0x8] sm:$0xff] }
0x16a3   :  { %v5631_v42 = vpop.permute.xlu1 %5630  ;;  %v5637_v18 = vpop.permute.xlu0 %5636 }
0x16a4   :  { %9996 = vmatprep.subr.msk.bf16.mxu0 %vm11291_vm1, %v9994_v40  ;;  %9176 = vmatprep.mubr.msk.f32.mxu0 %vm180_vm0, %v5631_v42 }
0x16a5   :  { %9999 = vmatpush3.bf16.xpose.msk.msra.mxu0 %vm11291_vm1, %v9994_v40  ;;  %v12177_v40 = vld [vmem:[#allocation6] sm:$0xff] }
0x16a6   :  { %10002 = vmatprep.subr.msk.bf16.mxu0 %vm11291_vm1, %v10000_v0 }
0x16a7   :  { %v10473_v46 = vpop.permute.xlu0 %10472  ;;  %v5633_v5 = vpop.permute.xlu1 %5632 }
0x16a8   :  { %v10475_v50 = vunpack.i.h.bf16 %v10473_v46  ;;  %v10474_v16 = vunpack.i.l.bf16 %v10473_v46 }
0x16aa   :  { %v10006_v57 = vpack.c.bf16 %v10475_v50, %v10474_v16 }
0x16ab   :  { %v5641_v53 = vpop.permute.xlu0 %5640  ;;  %v5635_v3 = vpop.permute.xlu1 %5634 }
0x16ac   :  { %9177 = vmatmul.mubr.msk.f32.vlgmr.msra.gmra.mrb[70].mxu0 %vm180_vm0, %v5633_v5 }
0x16ad   :  { %10005 = vmatpush3.bf16.xpose.msk.msra.mxu0 %vm11291_vm1, %v10000_v0  ;;  %9183 = vmatprep.mubr.msk.f32.mxu0 %vm180_vm0, %v5635_v3 }
0x16ae   :  { %10008 = vmatprep.subr.msk.bf16.mxu0 %vm11291_vm1, %v10006_v57 }
0x16af   :  { %v10483_v8 = vpop.permute.xlu0 %10482  ;;  %v5639_v11 = vpop.permute.xlu1 %5638 }
0x16b0   :  { %v10485_v62 = vunpack.i.h.bf16 %v10483_v8  ;;  %v10484_v47 = vunpack.i.l.bf16 %v10483_v8 }
0x16b2   :  { %v10018_v6 = vpack.c.bf16 %v10485_v62, %v10484_v47 }
0x16b3   :  { %v5645_v19 = vpop.permute.xlu0 %5644  ;;  %v10478_v44 = vpop.permute.xlu1 %10477 }
0x16b4   :  { %v10480_v35 = vunpack.i.h.bf16 %v10478_v44  ;;  %v10479_v60 = vunpack.i.l.bf16 %v10478_v44  ;;  %9184 = vmatmul.mubr.msk.f32.vlgmr.msra.gmra.mrb[72].mxu0 %vm180_vm0, %v5637_v18 }
0x16b5   :  { %10011 = vmatpush3.bf16.xpose.msk.msra.mxu0 %vm11291_vm1, %v10006_v57  ;;  %9190 = vmatprep.mubr.msk.f32.mxu0 %vm180_vm0, %v5639_v11 }
0x16b6   :  { %v10012_v4 = vpack.c.bf16 %v10480_v35, %v10479_v60  ;;  %10020 = vmatprep.subr.msk.bf16.mxu0 %vm11291_vm1, %v10018_v6 }
0x16b7   :  { %v10493_v28 = vpop.permute.xlu0 %10492  ;;  %v5643_v20 = vpop.permute.xlu1 %5642 }
0x16b8   :  { %v10495_v1 = vunpack.i.h.bf16 %v10493_v28  ;;  %v10494_v2 = vunpack.i.l.bf16 %v10493_v28  ;;  %10014 = vmatprep.subr.msk.bf16.mxu1 %vm11291_vm1, %v10012_v4  ;;  %9197 = vmatprep.mubr.msk.f32.mxu1 %vm180_vm0, %v5643_v20 }
0x16b9   :  { %10017 = vmatpush3.bf16.xpose.msk.msra.mxu1 %vm11291_vm1, %v10012_v4 }
0x16ba   :  { %v10030_v30 = vpack.c.bf16 %v10495_v1, %v10494_v2 }
0x16bb   :  { %v5649_v25 = vpop.permute.xlu0 %5648  ;;  %v10488_v38 = vpop.permute.xlu1 %10487 }
0x16bc   :  { %v10490_v7 = vunpack.i.h.bf16 %v10488_v38  ;;  %v10489_v56 = vunpack.i.l.bf16 %v10488_v38  ;;  %9191 = vmatmul.mubr.msk.f32.vlgmr.msra.gmra.mrb[74].mxu0 %vm180_vm0, %v5641_v53 }
0x16bd   :  { %10023 = vmatpush3.bf16.xpose.msk.msra.mxu0 %vm11291_vm1, %v10018_v6 }
0x16be   :  { %v10024_v13 = vpack.c.bf16 %v10490_v7, %v10489_v56  ;;  %10032 = vmatprep.subr.msk.bf16.mxu0 %vm11291_vm1, %v10030_v30 }
0x16bf   :  { %v5653_v34 = vpop.permute.xlu0 %5652  ;;  %v5647_v39 = vpop.permute.xlu1 %5646 }
0x16c0   :  { %9198 = vmatmul.mubr.msk.f32.vlgmr.msra.gmra.mrb[52].mxu1 %vm180_vm0, %v5645_v19  ;;  %9204 = vmatprep.mubr.msk.f32.mxu0 %vm180_vm0, %v5647_v39 }
0x16c1   :  { %10026 = vmatprep.subr.msk.bf16.mxu1 %vm11291_vm1, %v10024_v13 }
0x16c2   :  { %10029 = vmatpush3.bf16.xpose.msk.msra.mxu1 %vm11291_vm1, %v10024_v13 }
0x16c3   :  { %10037 = vmatprep.subr.bf16.mxu1 %v12092_v48  ;;  %v5657_v32 = vpop.permute.xlu0 %5656  ;;  %v5651_v52 = vpop.permute.xlu1 %5650 }
0x16c4   :  { %9205 = vmatmul.mubr.msk.f32.vlgmr.msra.gmra.mrb[76].mxu0 %vm180_vm0, %v5649_v25  ;;  %9211 = vmatprep.mubr.msk.f32.mxu1 %vm180_vm0, %v5651_v52 }
0x16c5   :  { %10035 = vmatpush3.bf16.xpose.msk.msra.mxu0 %vm11291_vm1, %v10030_v30 }
0x16c7   :  { %v10498_v41 = vpop.permute.xlu0 %10497  ;;  %v5655_v49 = vpop.permute.xlu1 %5654 }
0x16c8   :  { %v10500_v15 = vunpack.i.h.bf16 %v10498_v41  ;;  %v10499_v43 = vunpack.i.l.bf16 %v10498_v41  ;;  %9218 = vmatprep.mubr.msk.f32.mxu0 %vm180_vm0, %v5655_v49 }
0x16c9   :  { %9212 = vmatmul.mubr.msk.f32.vlgmr.msra.gmra.mrb[54].mxu1 %vm180_vm0, %v5653_v34 }
0x16ca   :  { %v10040_v12 = vpack.c.bf16 %v10500_v15, %v10499_v43  ;;  %10039 = vmatpush3.bf16.msra.mxu1 %v12092_v48 }
0x16cb   :  { %v10503_v9 = vpop.permute.xlu1 %10502 }
0x16cc   :  { %v10505_v58 = vunpack.i.h.bf16 %v10503_v9  ;;  %v10504_v51 = vunpack.i.l.bf16 %v10503_v9  ;;  %9219 = vmatmul.mubr.msk.f32.vlgmr.msra.gmra.mrb[78].mxu0 %vm180_vm0, %v5657_v32  ;;  %10041 = vmatprep.subr.bf16.mxu0 %v10040_v12 }
0x16cd   :  { %10043 = vmatpush3.bf16.msra.mxu0 %v10040_v12 }
0x16ce   :  { %v12166_v45 = vpack.c.bf16 %v10505_v58, %v10504_v51 }
0x16cf   :  { %v10508_v29 = vpop.permute.xlu1 %10507 }
0x16d0   :  { %v10510_v36 = vunpack.i.h.bf16 %v10508_v29  ;;  %v10509_v17 = vunpack.i.l.bf16 %v10508_v29  ;;  %10045 = vmatprep.subr.bf16.mxu1 %v12166_v45 }
0x16d2   :  { %v12169_v59 = vpack.c.bf16 %v10510_v36, %v10509_v17 }
0x16d4   :  { %10049 = vmatprep.subr.bf16.mxu0 %v12169_v59 }
0x1709   :  { %v9171_v33 = vpop.f32.mrb[68].mxu0 }
0x170a   :  { %v6397_v48 = vmul.f32 0.25, %v9171_v33  ;;  %v5806_v55 = vpop.f32.mrb[69].mxu0 }
0x170b   :  { %v6396_v61 = vmul.f32 0.25, %v5806_v55 }
0x170c   :  { %v12175_v37 = vadd.f32 %v12172_v21, %v6397_v48 }
0x170d   :  { %v12180_v42 = vadd.f32 %v12177_v40, %v6396_v61 }
0x170e   :  { %v6431_v18 = vsel %vm180_vm0, %v12175_v37, -inf }
0x170f   :  { %6432 = vmax.xlane.f32.xlu0 %v6431_v18  ;;  %v6428_v0 = vsel %vm180_vm0, %v12180_v42, -inf }
0x1710   :  { %6429 = vmax.xlane.f32.xlu1 %v6428_v0 }
0x177f   :  { %v9178_v46 = vpop.f32.mrb[70].mxu0 }
0x1780   :  { %v6399_v5 = vmul.f32 0.25, %v9178_v46  ;;  %v5889_v50 = vpop.f32.mrb[71].mxu0 }
0x1781   :  { %v6398_v16 = vmul.f32 0.25, %v5889_v50 }
0x1782   :  { %v12187_v53 = vadd.f32 %v12172_v21, %v6399_v5 }
0x1783   :  { %v12190_v3 = vadd.f32 %v12177_v40, %v6398_v16 }
0x1784   :  { %v6437_v57 = vsel %vm180_vm0, %v12187_v53, -inf }
0x1785   :  { %6438 = vmax.xlane.f32.xlu1 %v6437_v57  ;;  %v6434_v8 = vsel %vm180_vm0, %v12190_v3, -inf }
0x1786   :  { %6435 = vmax.xlane.f32.xlu0 %v6434_v8 }
0x1787   :  { %v9185_v11 = vpop.f32.mrb[72].mxu0 }
0x1788   :  { %v5972_v62 = vpop.f32.mrb[73].mxu0  ;;  %v6401_v6 = vmul.f32 0.25, %v9185_v11 }
0x1789   :  { %v6400_v4 = vmul.f32 0.25, %v5972_v62 }
0x178a   :  { %v12203_v25 = vadd.f32 %v12172_v21, %v6401_v6 }
0x178b   :  { %v12208_v7 = vadd.f32 %v12177_v40, %v6400_v4 }
0x178c   :  { %v6443_v34 = vsel %vm180_vm0, %v12203_v25, -inf }
0x178d   :  { %v6440_v41 = vsel %vm180_vm0, %v12208_v7, -inf }
0x178f   :  { %v9192_v47 = vpop.f32.mrb[74].mxu0 }
0x1790   :  { %v6055_v19 = vpop.f32.mrb[75].mxu0  ;;  %v6403_v39 = vmul.f32 0.25, %v9192_v47 }
0x1791   :  { %v6402_v49 = vmul.f32 0.25, %v6055_v19 }
0x1792   :  { %v12223_v51 = vadd.f32 %v12172_v21, %v6403_v39 }
0x1793   :  { %v9199_v44 = vpop.f32.mrb[52].mxu1  ;;  %v12228_v17 = vadd.f32 %v12177_v40, %v6402_v49 }
0x1794   :  { %v6405_v35 = vmul.f32 0.25, %v9199_v44  ;;  %v6138_v60 = vpop.f32.mrb[53].mxu1  ;;  %v6449_v18 = vsel %vm180_vm0, %v12223_v51, -inf }
0x1795   :  { %v6404_v28 = vmul.f32 0.25, %v6138_v60  ;;  %v6446_v5 = vsel %vm180_vm0, %v12228_v17, -inf }
0x1796   :  { %v12197_v20 = vadd.f32 %v12172_v21, %v6405_v35 }
0x1797   :  { %v12200_v1 = vadd.f32 %v12177_v40, %v6404_v28  ;;  %v9206_v2 = vpop.f32.mrb[76].mxu0 }
0x1798   :  { %v6221_v38 = vpop.f32.mrb[77].mxu0  ;;  %v6455_v30 = vsel %vm180_vm0, %v12197_v20, -inf  ;;  %v6407_v29 = vmul.f32 0.25, %v9206_v2 }
0x1799   :  { %6456 = vmax.xlane.f32.xlu1 %v6455_v30  ;;  %v6452_v56 = vsel %vm180_vm0, %v12200_v1, -inf  ;;  %v6406_v33 = vmul.f32 0.25, %v6221_v38 }
0x179a   :  { %6453 = vmax.xlane.f32.xlu0 %v6452_v56  ;;  %v12233_v55 = vadd.f32 %v12172_v21, %v6407_v29 }
0x179b   :  { %v12238_v0 = vadd.f32 %v12177_v40, %v6406_v33 }
0x179c   :  { %v9213_v13 = vpop.f32.mrb[54].mxu1  ;;  %v6461_v16 = vsel %vm180_vm0, %v12233_v55, -inf }
0x179d   :  { %v6409_v32 = vmul.f32 0.25, %v9213_v13  ;;  %v6304_v52 = vpop.f32.mrb[55].mxu1  ;;  %6444 = vmax.xlane.f32.xlu1 %v6443_v34  ;;  %v6458_v8 = vsel %vm180_vm0, %v12238_v0, -inf }
0x179e   :  { %v6408_v15 = vmul.f32 0.25, %v6304_v52  ;;  %6441 = vmax.xlane.f32.xlu0 %v6440_v41 }
0x179f   :  { %v12217_v43 = vadd.f32 %v12172_v21, %v6409_v32  ;;  %v9220_v12 = vpop.f32.mrb[78].mxu0 }
0x17a0   :  { %v12220_v9 = vadd.f32 %v12177_v40, %v6408_v15  ;;  %v6387_v58 = vpop.f32.mrb[79].mxu0  ;;  %v6411_v61 = vmul.f32 0.25, %v9220_v12 }
0x17a1   :  { %v6467_v36 = vsel %vm180_vm0, %v12217_v43, -inf  ;;  %v6410_v46 = vmul.f32 0.25, %v6387_v58 }
0x17a2   :  { %6468 = vmax.xlane.f32.xlu1 %v6467_v36  ;;  %v6464_v48 = vsel %vm180_vm0, %v12220_v9, -inf  ;;  %v12243_v50 = vadd.f32 %v12172_v21, %v6411_v61  ;;  %v6433_v21 = vpop.xlane.xlu0 %6432 }
0x17a3   :  { %6465 = vmax.xlane.f32.xlu0 %v6464_v48  ;;  %v12248_v57 = vadd.f32 %v12177_v40, %v6410_v46  ;;  %v6430_v40 = vpop.xlane.xlu1 %6429  ;;  %v6477_v47 = vsub.f32 %v12175_v37, %v6433_v21 }
0x17a4   :  { %v6473_v11 = vsel %vm180_vm0, %v12243_v50, -inf  ;;  %v6476_v19 = vsub.f32 %v12180_v42, %v6430_v40 }
0x17a5   :  { %v6470_v62 = vsel %vm180_vm0, %v12248_v57, -inf  ;;  %v6494_v44 = vmul.f32 1.442695, %v6477_v47 }
0x17a6   :  { %6450 = vmax.xlane.f32.xlu1 %v6449_v18  ;;  %v6492_v6 = vmul.f32 1.442695, %v6476_v19 }
0x17a7   :  { %6447 = vmax.xlane.f32.xlu0 %v6446_v5  ;;  %10711 = vpow2.f32 %v6494_v44 }
0x17a8   :  { %10713 = vpow2.f32 %v6492_v6 }
0x17aa   :  { %6462 = vmax.xlane.f32.xlu1 %v6461_v16 }
0x17ab   :  { %6459 = vmax.xlane.f32.xlu0 %v6458_v8 }
0x17ae   :  { %6474 = vmax.xlane.f32.xlu1 %v6473_v11 }
0x17af   :  { %6471 = vmax.xlane.f32.xlu0 %v6470_v62 }
0x17b1   :  { %v12262_v35 = vpop.eup %10711 }
0x17b2   :  { %v12264_v60 = vpop.eup %10713  ;;  %v6527_v4 = vsel %vm180_vm0, %v12262_v35, 0.0 }
0x17b3   :  { %v6524_v28 = vsel %vm180_vm0, %v12264_v60, 0.0 }
0x17bf   :  { %10517 = vrot.lane.b32.xlu1 %v12088_v54, %s11016_s17 }
0x17c5   :  { %10512 = vrot.lane.b32.xlu0 %v12088_v54, %s11015_s4 }
0x17e3   :  { %6528 = vadd.xlane.f32.xlu1 %v6527_v4 }
0x17e4   :  { %6525 = vadd.xlane.f32.xlu0 %v6524_v28 }
0x1812   :  { %v6439_v2 = vpop.xlane.xlu1 %6438 }
0x1813   :  { %v6479_v37 = vsub.f32 %v12187_v53, %v6439_v2  ;;  %v6436_v42 = vpop.xlane.xlu0 %6435 }
0x1814   :  { %v6478_v38 = vsub.f32 %v12190_v3, %v6436_v42 }
0x1815   :  { %v6498_v30 = vmul.f32 1.442695, %v6479_v37 }
0x1816   :  { %v6496_v56 = vmul.f32 1.442695, %v6478_v38 }
0x1817   :  { %10715 = vpow2.f32 %v6498_v30 }
0x1818   :  { %10717 = vpow2.f32 %v6496_v56 }
0x1821   :  { %v12272_v13 = vpop.eup %10715 }
0x1822   :  { %v12274_v34 = vpop.eup %10717  ;;  %v6533_v39 = vsel %vm180_vm0, %v12272_v13, 0.0 }
0x1823   :  { %6534 = vadd.xlane.f32.xlu1 %v6533_v39  ;;  %v6530_v32 = vsel %vm180_vm0, %v12274_v34, 0.0 }
0x1824   :  { %6531 = vadd.xlane.f32.xlu0 %v6530_v32 }
0x1826   :  { %v6457_v53 = vpop.xlane.xlu1 %6456 }
0x1827   :  { %v6485_v52 = vsub.f32 %v12197_v20, %v6457_v53  ;;  %v6454_v3 = vpop.xlane.xlu0 %6453 }
0x1828   :  { %v6484_v41 = vsub.f32 %v12200_v1, %v6454_v3 }
0x1829   :  { %v6510_v49 = vmul.f32 1.442695, %v6485_v52 }
0x182a   :  { %v6508_v15 = vmul.f32 1.442695, %v6484_v41  ;;  %v6445_v12 = vpop.xlane.xlu1 %6444 }
0x182b   :  { %10719 = vpow2.f32 %v6510_v49  ;;  %v6481_v58 = vsub.f32 %v12203_v25, %v6445_v12  ;;  %v6442_v29 = vpop.xlane.xlu0 %6441 }
0x182c   :  { %10721 = vpow2.f32 %v6508_v15  ;;  %v6480_v36 = vsub.f32 %v12208_v7, %v6442_v29 }
0x182d   :  { %v6502_v33 = vmul.f32 1.442695, %v6481_v58 }
0x182e   :  { %v6500_v48 = vmul.f32 1.442695, %v6480_v36 }
0x182f   :  { %10723 = vpow2.f32 %v6502_v33  ;;  %v6469_v61 = vpop.xlane.xlu1 %6468 }
0x1830   :  { %10725 = vpow2.f32 %v6500_v48  ;;  %v6489_v20 = vsub.f32 %v12217_v43, %v6469_v61  ;;  %v6466_v18 = vpop.xlane.xlu0 %6465 }
0x1831   :  { %v6488_v1 = vsub.f32 %v12220_v9, %v6466_v18 }
0x1832   :  { %v6518_v46 = vmul.f32 1.442695, %v6489_v20 }
0x1833   :  { %v6516_v5 = vmul.f32 1.442695, %v6488_v1  ;;  %v6451_v16 = vpop.xlane.xlu1 %6450 }
0x1834   :  { %10727 = vpow2.f32 %v6518_v46  ;;  %v6483_v25 = vsub.f32 %v12223_v51, %v6451_v16  ;;  %v6448_v8 = vpop.xlane.xlu0 %6447 }
0x1835   :  { %v12287_v11 = vpop.eup %10719  ;;  %10729 = vpow2.f32 %v6516_v5  ;;  %v6482_v7 = vsub.f32 %v12228_v17, %v6448_v8 }
0x1836   :  { %v12290_v62 = vpop.eup %10721  ;;  %v6506_v21 = vmul.f32 1.442695, %v6483_v25  ;;  %v6551_v43 = vsel %vm180_vm0, %v12287_v11, 0.0 }
0x1837   :  { %v6504_v40 = vmul.f32 1.442695, %v6482_v7  ;;  %v6463_v9 = vpop.xlane.xlu1 %6462  ;;  %6552 = vadd.xlane.f32.xlu1 %v6551_v43  ;;  %v6548_v47 = vsel %vm180_vm0, %v12290_v62, 0.0 }
0x1838   :  { %10731 = vpow2.f32 %v6506_v21  ;;  %v6487_v51 = vsub.f32 %v12233_v55, %v6463_v9  ;;  %v6460_v19 = vpop.xlane.xlu0 %6459  ;;  %6549 = vadd.xlane.f32.xlu0 %v6548_v47 }
0x1839   :  { %v12297_v44 = vpop.eup %10723  ;;  %10733 = vpow2.f32 %v6504_v40  ;;  %v6486_v17 = vsub.f32 %v12238_v0, %v6460_v19 }
0x183a   :  { %v12300_v6 = vpop.eup %10725  ;;  %v6514_v4 = vmul.f32 1.442695, %v6487_v51  ;;  %v6539_v28 = vsel %vm180_vm0, %v12297_v44, 0.0 }
0x183b   :  { %v6512_v2 = vmul.f32 1.442695, %v6486_v17  ;;  %v6475_v37 = vpop.xlane.xlu1 %6474  ;;  %6540 = vadd.xlane.f32.xlu1 %v6539_v28  ;;  %v6536_v42 = vsel %vm180_vm0, %v12300_v6, 0.0 }
0x183c   :  { %10735 = vpow2.f32 %v6514_v4  ;;  %v6491_v55 = vsub.f32 %v12243_v50, %v6475_v37  ;;  %v6472_v38 = vpop.xlane.xlu0 %6471  ;;  %6537 = vadd.xlane.f32.xlu0 %v6536_v42 }
0x183d   :  { %10737 = vpow2.f32 %v6512_v2  ;;  %v6490_v0 = vsub.f32 %v12248_v57, %v6472_v38 }
0x183e   :  { %v12308_v30 = vpop.eup %10727  ;;  %v6522_v56 = vmul.f32 1.442695, %v6491_v55 }
0x183f   :  { %v12310_v39 = vpop.eup %10729  ;;  %v6520_v32 = vmul.f32 1.442695, %v6490_v0  ;;  %v6563_v53 = vsel %vm180_vm0, %v12308_v30, 0.0  ;;  %v10518_v61 = vpop.permute.xlu1 %10517 }
0x1840   :  { %10739 = vpow2.f32 %v6522_v56  ;;  %6564 = vadd.xlane.f32.xlu1 %v6563_v53  ;;  %v6560_v52 = vsel %vm180_vm0, %v12310_v39, 0.0  ;;  %v10513_v20 = vpop.permute.xlu0 %10512  ;;  %v10520_v47 = vunpack.i.h.bf16 %v10518_v61  ;;  %v10519_v51 = vunpack.i.l.bf16 %v10518_v61 }
0x1841   :  { %10741 = vpow2.f32 %v6520_v32  ;;  %6561 = vadd.xlane.f32.xlu0 %v6560_v52  ;;  %v10515_v16 = vunpack.i.h.bf16 %v10513_v20  ;;  %v10514_v25 = vunpack.i.l.bf16 %v10513_v20 }
0x1842   :  { %v12316_v50 = vpop.eup %10731  ;;  %v10056_v19 = vpack.c.bf16 %v10520_v47, %v10519_v51  ;;  %v7325_v47 = vld [vmem:[#allocation12 + $0x110] sm:$0xff] }
0x1843   :  { %v12318_v3 = vpop.eup %10733  ;;  %v6545_v57 = vsel %vm180_vm0, %v12316_v50, 0.0  ;;  %v10052_v21 = vpack.c.bf16 %v10515_v16, %v10514_v25 }
0x1844   :  { %6546 = vadd.xlane.f32.xlu1 %v6545_v57  ;;  %v6542_v41 = vsel %vm180_vm0, %v12318_v3, 0.0 }
0x1845   :  { %6543 = vadd.xlane.f32.xlu0 %v6542_v41 }
0x1846   :  { %v12324_v49 = vpop.eup %10735 }
0x1847   :  { %v12326_v15 = vpop.eup %10737  ;;  %v6557_v12 = vsel %vm180_vm0, %v12324_v49, 0.0 }
0x1848   :  { %6558 = vadd.xlane.f32.xlu1 %v6557_v12  ;;  %v6554_v58 = vsel %vm180_vm0, %v12326_v15, 0.0 }
0x1849   :  { %6555 = vadd.xlane.f32.xlu0 %v6554_v58 }
0x184a   :  { %v12332_v29 = vpop.eup %10739 }
0x184b   :  { %v12334_v36 = vpop.eup %10741  ;;  %v6569_v33 = vsel %vm180_vm0, %v12332_v29, 0.0 }
0x184c   :  { %6570 = vadd.xlane.f32.xlu1 %v6569_v33  ;;  %v6566_v48 = vsel %vm180_vm0, %v12334_v36, 0.0 }
0x184d   :  { %6567 = vadd.xlane.f32.xlu0 %v6566_v48 }
0x185d   :  { %10527 = vrot.lane.b32.xlu1 %v12088_v54, %s11017_s3 }
0x1863   :  { %10522 = vrot.lane.b32.xlu0 %v12088_v54, %s11009_s21 }
0x1870   :  { %v6529_v18 = vpop.xlane.xlu1 %6528 }
0x1871   :  { %10743 = vrcp.f32 %v6529_v18  ;;  %v6526_v1 = vpop.xlane.xlu0 %6525 }
0x1872   :  { %10745 = vrcp.f32 %v6526_v1 }
0x187b   :  { %v10744_v46 = vpop.eup %10743 }
0x187c   :  { %v10746_v5 = vpop.eup %10745  ;;  %v6575_v7 = vmul.f32 %v10744_v46, %v12262_v35 }
0x187d   :  { %v6573_v8 = vmul.f32 %v10746_v5, %v12264_v60 }
0x187f   :  { %9225 = vmatprep.mubr.msk.f32.mxu1 %vm180_vm0, %v6573_v8 }
0x1880   :  { %9226 = vmatmul.mubr.msk.f32.vlgmr.msra.gmra.mrb[56].mxu1 %vm180_vm0, %v6575_v7 }
0x1881   :  { %10047 = vmatpush3.bf16.msra.mxu1 %v12166_v45 }
0x1882   :  { %10053 = vmatprep.subr.bf16.mxu1 %v10052_v21 }
0x18b0   :  { %v6535_v54 = vpop.xlane.xlu1 %6534 }
0x18b1   :  { %10747 = vrcp.f32 %v6535_v54  ;;  %v6532_v43 = vpop.xlane.xlu0 %6531 }
0x18b2   :  { %10749 = vrcp.f32 %v6532_v43 }
0x18bb   :  { %v10748_v40 = vpop.eup %10747 }
0x18bc   :  { %v10750_v9 = vpop.eup %10749  ;;  %v6579_v35 = vmul.f32 %v10748_v40, %v12272_v13 }
0x18bd   :  { %v6577_v60 = vmul.f32 %v10750_v9, %v12274_v34  ;;  %v7324_v9 = vld [vmem:[#allocation12 + $0x108] sm:$0xff] }
0x18bf   :  { %9232 = vmatprep.mubr.msk.f32.mxu0 %vm180_vm0, %v6577_v60  ;;  %v7326_v60 = vld [vmem:[#allocation12 + $0x118] sm:$0xff] }
0x18c0   :  { %9233 = vmatmul.mubr.msk.f32.vlgmr.msra.gmra.mrb[80].mxu0 %vm180_vm0, %v6579_v35  ;;  %v7327_v35 = vld [vmem:[#allocation12 + $0x120] sm:$0xff] }
0x18c1   :  { %10051 = vmatpush3.bf16.msra.mxu0 %v12169_v59 }
0x18c2   :  { %10057 = vmatprep.subr.bf16.mxu0 %v10056_v19 }
0x18c4   :  { %v6553_v45 = vpop.xlane.xlu1 %6552 }
0x18c5   :  { %v6550_v17 = vpop.xlane.xlu0 %6549 }
0x18c6   :  { %10751 = vrcp.f32 %v6550_v17 }
0x18c8   :  { %v6541_v4 = vpop.xlane.xlu1 %6540 }
0x18c9   :  { %10753 = vrcp.f32 %v6541_v4  ;;  %v6538_v28 = vpop.xlane.xlu0 %6537 }
0x18ca   :  { %10755 = vrcp.f32 %v6538_v28  ;;  %v7329_v28 = vld [vmem:[#allocation12 + $0x130] sm:$0xff] }
0x18cb   :  { %10757 = vrcp.f32 %v6553_v45 }
0x18cd   :  { %v6565_v2 = vpop.xlane.xlu1 %6564 }
0x18ce   :  { %v6562_v34 = vpop.xlane.xlu0 %6561 }
0x18cf   :  { %10759 = vrcp.f32 %v6562_v34 }
0x18d0   :  { %v10752_v37 = vpop.eup %10751 }
0x18d1   :  { %v6547_v13 = vpop.xlane.xlu1 %6546  ;;  %v6589_v52 = vmul.f32 %v10752_v37, %v12290_v62  ;;  %v7332_v37 = vld [vmem:[#allocation12 + $0x148] sm:$0xff] }
0x18d2   :  { %10761 = vrcp.f32 %v6547_v13  ;;  %v6544_v42 = vpop.xlane.xlu0 %6543  ;;  %v7331_v13 = vld [vmem:[#allocation12 + $0x140] sm:$0xff] }
0x18d3   :  { %v10754_v55 = vpop.eup %10753  ;;  %10763 = vrcp.f32 %v6544_v42  ;;  %v10084_v42 = vpack.c.bf16 %v7332_v37, %v7331_v13 }
0x18d4   :  { %v10756_v38 = vpop.eup %10755  ;;  %v6583_v56 = vmul.f32 %v10754_v55, %v12297_v44 }
0x18d5   :  { %v6559_v59 = vpop.xlane.xlu1 %6558  ;;  %v6581_v0 = vmul.f32 %v10756_v38, %v12300_v6  ;;  %v10758_v53 = vpop.eup %10757  ;;  %v7333_v38 = vld [vmem:[#allocation12 + $0x150] sm:$0xff] }
0x18d6   :  { %10765 = vrcp.f32 %v6559_v59  ;;  %v6556_v32 = vpop.xlane.xlu0 %6555  ;;  %v6591_v6 = vmul.f32 %v10758_v53, %v12287_v11  ;;  %v7334_v59 = vld [vmem:[#allocation12 + $0x158] sm:$0xff] }
0x18d7   :  { %10767 = vrcp.f32 %v6556_v32  ;;  %9239 = vmatprep.mubr.msk.f32.mxu1 %vm180_vm0, %v6581_v0 }
0x18d8   :  { %10769 = vrcp.f32 %v6565_v2  ;;  %9240 = vmatmul.mubr.msk.f32.vlgmr.msra.gmra.mrb[58].mxu1 %vm180_vm0, %v6583_v56  ;;  %v7330_v2 = vld [vmem:[#allocation12 + $0x138] sm:$0xff]  ;;  %v10088_v56 = vpack.c.bf16 %v7334_v59, %v7333_v38 }
0x18d9   :  { %v10760_v57 = vpop.eup %10759  ;;  %v6571_v41 = vpop.xlane.xlu1 %6570  ;;  %10055 = vmatpush3.bf16.msra.mxu1 %v10052_v21  ;;  %9253 = vmatprep.mubr.msk.f32.mxu1 %vm180_vm0, %v6589_v52  ;;  %v10080_v34 = vpack.c.bf16 %v7330_v2, %v7329_v28  ;;  %v7335_v52 = vld [vmem:[#allocation12 + $0x160] sm:$0xff] }
0x18da   :  { %10771 = vrcp.f32 %v6571_v41  ;;  %v6568_v44 = vpop.xlane.xlu0 %6567  ;;  %v6597_v12 = vmul.f32 %v10760_v57, %v12310_v39  ;;  %v7336_v57 = vld [vmem:[#allocation12 + $0x168] sm:$0xff] }
0x18db   :  { %10773 = vrcp.f32 %v6568_v44 }
0x18dc   :  { %v10762_v58 = vpop.eup %10761  ;;  %9254 = vmatmul.mubr.msk.f32.vlgmr.msra.gmra.mrb[60].mxu1 %vm180_vm0, %v6591_v6  ;;  %v10092_v6 = vpack.c.bf16 %v7336_v57, %v7335_v52  ;;  %v8214_v52 = vld [vmem:[%s12482_s7 + $0x2] ss:$0 sm:$0xff] }
0x18dd   :  { %v10764_v33 = vpop.eup %10763  ;;  %v10528_v62 = vpop.permute.xlu1 %10527  ;;  %9267 = vmatprep.mubr.msk.f32.mxu1 %vm180_vm0, %v6597_v12  ;;  %v6587_v1 = vmul.f32 %v10762_v58, %v12316_v50  ;;  %v7337_v12 = vld [vmem:[#allocation12 + $0x170] sm:$0xff]  ;;  %v7338_v58 = vld [vmem:[#allocation12 + $0x178] sm:$0xff] }
0x18de   :  { %v10530_v48 = vunpack.i.h.bf16 %v10528_v62  ;;  %v10529_v61 = vunpack.i.l.bf16 %v10528_v62  ;;  %v10523_v20 = vpop.permute.xlu0 %10522  ;;  %v6585_v18 = vmul.f32 %v10764_v33, %v12318_v3  ;;  %v10096_v62 = vpack.c.bf16 %v7338_v58, %v7337_v12 }
0x18df   :  { %v10525_v11 = vunpack.i.h.bf16 %v10523_v20  ;;  %v10524_v46 = vunpack.i.l.bf16 %v10523_v20 }
0x18e0   :  { %v10766_v5 = vpop.eup %10765  ;;  %v10064_v16 = vpack.c.bf16 %v10530_v48, %v10529_v61  ;;  %9246 = vmatprep.mubr.msk.f32.mxu0 %vm180_vm0, %v6585_v18 }
0x18e1   :  { %v10768_v39 = vpop.eup %10767  ;;  %v10060_v25 = vpack.c.bf16 %v10525_v11, %v10524_v46  ;;  %9247 = vmatmul.mubr.msk.f32.vlgmr.msra.gmra.mrb[82].mxu0 %vm180_vm0, %v6587_v1  ;;  %v6595_v21 = vmul.f32 %v10766_v5, %v12324_v49 }
0x18e2   :  { %v10770_v8 = vpop.eup %10769  ;;  %10059 = vmatpush3.bf16.msra.mxu0 %v10056_v19  ;;  %v6593_v7 = vmul.f32 %v10768_v39, %v12326_v15 }
0x18e3   :  { %10065 = vmatprep.subr.bf16.mxu0 %v10064_v16  ;;  %10061 = vmatprep.subr.bf16.mxu1 %v10060_v25  ;;  %v6599_v54 = vmul.f32 %v10770_v8, %v12308_v30  ;;  %v7323_v30 = vld [vmem:[#allocation12 + $0x100] sm:$0xff] }
0x18e4   :  { %v10772_v3 = vpop.eup %10771  ;;  %9260 = vmatprep.mubr.msk.f32.mxu0 %vm180_vm0, %v6593_v7  ;;  %10063 = vmatpush3.bf16.msra.mxu1 %v10060_v25  ;;  %v10068_v51 = vpack.c.bf16 %v7324_v9, %v7323_v30 }
0x18e5   :  { %v10774_v50 = vpop.eup %10773  ;;  %9261 = vmatmul.mubr.msk.f32.vlgmr.msra.gmra.mrb[84].mxu0 %vm180_vm0, %v6595_v21  ;;  %v6603_v40 = vmul.f32 %v10772_v3, %v12332_v29  ;;  %v7328_v29 = vld [vmem:[#allocation12 + $0x128] sm:$0xff] }
0x18e6   :  { %10067 = vmatpush3.bf16.msra.mxu0 %v10064_v16  ;;  %v6601_v43 = vmul.f32 %v10774_v50, %v12334_v36  ;;  %v10072_v36 = vpack.c.bf16 %v7326_v60, %v7325_v47  ;;  %10069 = vmatprep.subr.bf16.mxu1 %v10068_v51  ;;  %v10076_v19 = vpack.c.bf16 %v7328_v29, %v7327_v35 }
0x18e7   :  { %9268 = vmatmul.mubr.msk.f32.vlgmr.msra.gmra.mrb[62].mxu1 %vm180_vm0, %v6599_v54 }
0x18e8   :  { %9274 = vmatprep.mubr.msk.f32.mxu0 %vm180_vm0, %v6601_v43  ;;  %10071 = vmatpush3.bf16.msra.mxu1 %v10068_v51 }
0x18e9   :  { %9275 = vmatmul.mubr.msk.f32.vlgmr.msra.gmra.mrb[86].mxu0 %vm180_vm0, %v6603_v40  ;;  %10073 = vmatprep.subr.bf16.mxu1 %v10072_v36 }
0x18ea   :  { %7618 = vmatprep.mubr.f32.mxu0 %v11011_v14 }
0x18ec   :  { %10075 = vmatpush3.bf16.msra.mxu1 %v10072_v36 }
0x18ed   :  { %10077 = vmatprep.subr.bf16.mxu1 %v10076_v19 }
0x18f0   :  { %10079 = vmatpush3.bf16.msra.mxu1 %v10076_v19 }
0x18f1   :  { %10081 = vmatprep.subr.bf16.mxu1 %v10080_v34 }
0x18f4   :  { %10083 = vmatpush3.bf16.msra.mxu1 %v10080_v34 }
0x18f5   :  { %10085 = vmatprep.subr.bf16.mxu1 %v10084_v42 }
0x18f8   :  { %10087 = vmatpush3.bf16.msra.mxu1 %v10084_v42 }
0x18f9   :  { %10089 = vmatprep.subr.bf16.mxu1 %v10088_v56 }
0x18fc   :  { %10091 = vmatpush3.bf16.msra.mxu1 %v10088_v56 }
0x18fd   :  { %10093 = vmatprep.subr.bf16.mxu1 %v10092_v6 }
0x1900   :  { %10095 = vmatpush3.bf16.msra.mxu1 %v10092_v6 }
0x1901   :  { %10097 = vmatprep.subr.bf16.mxu1 %v10096_v62 }
0x1904   :  { %10099 = vmatpush3.bf16.msra.mxu1 %v10096_v62  ;;  %v7472_v62 = vld [vmem:[#allocation14 + $0x428] sm:$0xff] }
0x1953   :  { %v12379_v49 = vpop.f32.mrb[56].mxu1 }
0x1954   :  { %v12381_v15 = vpop.f32.mrb[57].mxu1 }
0x1993   :  { %v9234_v45 = vpop.f32.mrb[80].mxu0 }
0x1994   :  { %v6757_v17 = vpop.f32.mrb[81].mxu0 }
0x1995   :  { %v10531_v4 = vpack.i.bf16 %v9234_v45, %v6757_v17 }
0x1997   :  { %10532 = vrot.lane.b32.xlu0 %v10531_v4, %s11017_s3 }
0x19ab   :  { %v9241_v55 = vpop.f32.mrb[58].mxu1 }
0x19ac   :  { %v6838_v0 = vpop.f32.mrb[59].mxu1 }
0x19ad   :  { %v10536_v32 = vpack.i.bf16 %v9241_v55, %v6838_v0 }
0x19af   :  { %10537 = vrot.lane.b32.xlu1 %v10536_v32, %s11009_s21  ;;  %v9255_v53 = vpop.f32.mrb[60].mxu1 }
0x19b0   :  { %v7000_v41 = vpop.f32.mrb[61].mxu1 }
0x19b1   :  { %v10541_v44 = vpack.i.bf16 %v9255_v53, %v7000_v41 }
0x19b3   :  { %10542 = vrot.lane.b32.xlu1 %v10541_v44, %s11015_s4 }
0x19b4   :  { %v9248_v33 = vpop.f32.mrb[82].mxu0 }
0x19b5   :  { %v6919_v48 = vpop.f32.mrb[83].mxu0 }
0x19b6   :  { %v10546_v61 = vpack.i.bf16 %v9248_v33, %v6919_v48  ;;  %v7468_v33 = vld [vmem:[#allocation14 + $0x408] sm:$0xff]  ;;  %v7470_v48 = vld [vmem:[#allocation14 + $0x418] sm:$0xff] }
0x19b8   :  { %10547 = vrot.lane.b32.xlu0 %v10546_v61, %s11016_s17  ;;  %v9262_v20 = vpop.f32.mrb[84].mxu0  ;;  %v10100_v61 = vpack.c.bf16 %v7472_v62, %v7468_v33  ;;  %v7504_v33 = vld [vmem:[#allocation14 + $0x528] sm:$0xff]  ;;  %v7502_v62 = vld [vmem:[#allocation14 + $0x518] sm:$0xff] }
0x19b9   :  { %v7081_v18 = vpop.f32.mrb[85].mxu0 }
0x19ba   :  { %v10556_v1 = vpack.i.bf16 %v9262_v20, %v7081_v18  ;;  %v9269_v11 = vpop.f32.mrb[62].mxu1  ;;  %v7474_v20 = vld [vmem:[#allocation14 + $0x438] sm:$0xff]  ;;  %v7467_v18 = vld [vmem:[#allocation14 + $0x400] sm:$0xff]  ;;  %10101 = vmatprep.subr.bf16.mxu0 %v10100_v61 }
0x19bb   :  { %v7162_v46 = vpop.f32.mrb[63].mxu1  ;;  %v7506_v61 = vld [vmem:[#allocation14 + $0x538] sm:$0xff] }
0x19bc   :  { %v10551_v5 = vpack.i.bf16 %v9269_v11, %v7162_v46  ;;  %10557 = vrot.lane.b32.xlu0 %v10556_v1, %s11014_s2  ;;  %v9276_v16 = vpop.f32.mrb[86].mxu0  ;;  %v7471_v1 = vld [vmem:[#allocation14 + $0x420] sm:$0xff]  ;;  %v10132_v11 = vpack.c.bf16 %v7474_v20, %v7470_v48 }
0x19bd   :  { %v7243_v39 = vpop.f32.mrb[87].mxu0  ;;  %v10102_v46 = vpack.c.bf16 %v7471_v1, %v7467_v18  ;;  %v7499_v20 = vld [vmem:[#allocation14 + $0x500] sm:$0xff]  ;;  %v10148_v1 = vpack.c.bf16 %v7506_v61, %v7502_v62 }
0x19be   :  { %v10561_v25 = vpack.i.bf16 %v9276_v16, %v7243_v39  ;;  %10552 = vrot.lane.b32.xlu1 %v10551_v5, %s11013_s22  ;;  %v7469_v5 = vld [vmem:[#allocation14 + $0x410] sm:$0xff]  ;;  %v7476_v39 = vld [vmem:[#allocation14 + $0x448] sm:$0xff]  ;;  %10133 = vmatprep.subr.bf16.mxu1 %v10132_v11  ;;  %v7503_v18 = vld [vmem:[#allocation14 + $0x520] sm:$0xff] }
0x19bf   :  { %v7473_v16 = vld [vmem:[#allocation14 + $0x430] sm:$0xff]  ;;  %10103 = vmatpush1.bf16.msra.mxu0 %v10102_v46  ;;  %v10118_v11 = vpack.c.bf16 %v7503_v18, %v7499_v20 }
0x19c0   :  { %10562 = vrot.lane.b32.xlu0 %v10561_v25, %s11012_s27  ;;  %v10134_v25 = vpack.c.bf16 %v7473_v16, %v7469_v5  ;;  %v7501_v46 = vld [vmem:[#allocation14 + $0x510] sm:$0xff]  ;;  %v7508_v16 = vld [vmem:[#allocation14 + $0x548] sm:$0xff] }
0x19c1   :  { %v7505_v5 = vld [vmem:[#allocation14 + $0x530] sm:$0xff] }
0x1a09   :  { %v10533_v8 = vpop.permute.xlu0 %10532 }
0x1a0a   :  { %v10535_v21 = vunpack.i.h.bf16 %v10533_v8  ;;  %v10534_v3 = vunpack.i.l.bf16 %v10533_v8  ;;  %v7480_v8 = vld [vmem:[#allocation14 + $0x468] sm:$0xff] }
0x1a0c   :  { %v7309_v40 = vsel %vm180_vm0, %v12379_v49, %v10535_v21  ;;  %v7308_v30 = vsel %vm180_vm0, %v12381_v15, %v10534_v3  ;;  %v7475_v3 = vld [vmem:[#allocation14 + $0x440] sm:$0xff] }
0x1a21   :  { %v10538_v7 = vpop.permute.xlu1 %10537 }
0x1a22   :  { %v10540_v50 = vunpack.i.h.bf16 %v10538_v7  ;;  %v10539_v54 = vunpack.i.l.bf16 %v10538_v7  ;;  %v7482_v7 = vld [vmem:[#allocation14 + $0x478] sm:$0xff] }
0x1a24   :  { %v7310_v60 = vsel %vm2165_vm2, %v7308_v30, %v10539_v54  ;;  %v7311_v36 = vsel %vm2165_vm2, %v7309_v40, %v10540_v50  ;;  %v7479_v50 = vld [vmem:[#allocation14 + $0x460] sm:$0xff]  ;;  %v7477_v54 = vld [vmem:[#allocation14 + $0x450] sm:$0xff]  ;;  %v7484_v30 = vld [vmem:[#allocation14 + $0x488] sm:$0xff] }
0x1a25   :  { %v10543_v9 = vpop.permute.xlu1 %10542  ;;  %v7481_v40 = vld [vmem:[#allocation14 + $0x470] sm:$0xff] }
0x1a26   :  { %v10545_v19 = vunpack.i.h.bf16 %v10543_v9  ;;  %v10544_v45 = vunpack.i.l.bf16 %v10543_v9  ;;  %v7488_v9 = vld [vmem:[#allocation14 + $0x4a8] sm:$0xff] }
0x1a2a   :  { %v10548_v43 = vpop.permute.xlu0 %10547 }
0x1a2b   :  { %v10550_v47 = vunpack.i.h.bf16 %v10548_v43  ;;  %v10549_v51 = vunpack.i.l.bf16 %v10548_v43  ;;  %v10106_v43 = vpack.c.bf16 %v7479_v50, %v7475_v3  ;;  %v7511_v3 = vld [vmem:[#allocation14 + $0x560] sm:$0xff]  ;;  %v7509_v50 = vld [vmem:[#allocation14 + $0x550] sm:$0xff] }
0x1a2d   :  { %v7312_v35 = vsel %vm2168_vm3, %v7310_v60, %v10549_v51  ;;  %v7313_v29 = vsel %vm2168_vm3, %v7311_v36, %v10550_v47  ;;  %v10138_v47 = vpack.c.bf16 %v7481_v40, %v7477_v54  ;;  %v10108_v51 = vpack.c.bf16 %v7488_v9, %v7484_v30  ;;  %v7486_v60 = vld [vmem:[#allocation14 + $0x498] sm:$0xff]  ;;  %v7516_v40 = vld [vmem:[#allocation14 + $0x588] sm:$0xff] }
0x1a2e   :  { %v10558_v17 = vpop.permute.xlu0 %10557  ;;  %v7315_v49 = vsel %vm2171_vm4, %v7313_v29, %v10545_v19  ;;  %v7314_v15 = vsel %vm2171_vm4, %v7312_v35, %v10544_v45  ;;  %v7490_v36 = vld [vmem:[#allocation14 + $0x4b8] sm:$0xff]  ;;  %v7483_v35 = vld [vmem:[#allocation14 + $0x480] sm:$0xff]  ;;  %v7485_v45 = vld [vmem:[#allocation14 + $0x490] sm:$0xff] }
0x1a2f   :  { %v10560_v4 = vunpack.i.h.bf16 %v10558_v17  ;;  %v10559_v28 = vunpack.i.l.bf16 %v10558_v17  ;;  %v10140_v29 = vpack.c.bf16 %v7490_v36, %v7486_v60  ;;  %v7487_v19 = vld [vmem:[#allocation14 + $0x4a0] sm:$0xff]  ;;  %v7489_v17 = vld [vmem:[#allocation14 + $0x4b0] sm:$0xff]  ;;  %v7520_v30 = vld [vmem:[#allocation14 + $0x5a8] sm:$0xff] }
0x1a30   :  { %v10553_v2 = vpop.permute.xlu1 %10552  ;;  %v7522_v60 = vld [vmem:[#allocation14 + $0x5b8] sm:$0xff]  ;;  %v7515_v36 = vld [vmem:[#allocation14 + $0x580] sm:$0xff] }
0x1a31   :  { %v7317_v34 = vsel %vm2174_vm5, %v7315_v49, %v10560_v4  ;;  %v10555_v13 = vunpack.i.h.bf16 %v10553_v2  ;;  %v10554_v37 = vunpack.i.l.bf16 %v10553_v2  ;;  %v7316_v42 = vsel %vm2174_vm5, %v7314_v15, %v10559_v28 }
0x1a32   :  { %v10563_v55 = vpop.permute.xlu0 %10562  ;;  %v10110_v4 = vpack.c.bf16 %v7487_v19, %v7483_v35  ;;  %v10142_v28 = vpack.c.bf16 %v7489_v17, %v7485_v45  ;;  %v7517_v19 = vld [vmem:[#allocation14 + $0x590] sm:$0xff]  ;;  %v7524_v17 = vld [vmem:[#allocation14 + $0x5c8] sm:$0xff] }
0x1a33   :  { %v10565_v38 = vunpack.i.h.bf16 %v10563_v55  ;;  %v10564_v59 = vunpack.i.l.bf16 %v10563_v55  ;;  %v7318_v0 = vsel %vm2177_vm6, %v7316_v42, %v10554_v37  ;;  %v7319_v56 = vsel %vm2177_vm6, %v7317_v34, %v10555_v13  ;;  %v7521_v45 = vld [vmem:[#allocation14 + $0x5b0] sm:$0xff] }
0x1a35   :  { %v7320_v32 = vsel %vm2180_vm7, %v7318_v0, %v10564_v59  ;;  %v7321_v53 = vsel %vm2180_vm7, %v7319_v56, %v10565_v38  ;;  %v7492_v38 = vld [vmem:[#allocation14 + $0x4c8] sm:$0xff]  ;;  %v7494_v0 = vld [vmem:[#allocation14 + $0x4d8] sm:$0xff] }
0x1a36   :  { %9309 = vmatprep.mubr.f32.mxu1 %v7320_v32  ;;  %v7496_v59 = vld [vmem:[#allocation14 + $0x4e8] sm:$0xff]  ;;  %v7498_v32 = vld [vmem:[#allocation14 + $0x4f8] sm:$0xff] }
0x1a37   :  { %9310 = vmatmul.mubr.f32.vlgmr.msra.gmra.mrb[64].mxu1 %v7321_v53  ;;  %v10112_v56 = vpack.c.bf16 %v7496_v59, %v7492_v38  ;;  %v7491_v53 = vld [vmem:[#allocation14 + $0x4c0] sm:$0xff]  ;;  %v7525_v59 = vld [vmem:[#allocation14 + $0x5d0] sm:$0xff] }
0x1a38   :  { %7695 = vmatprep.mubr.f32.mxu1 %v11011_v14  ;;  %10135 = vmatpush1.bf16.msra.mxu1 %v10134_v25  ;;  %v7512_v25 = vld [vmem:[#allocation14 + $0x568] sm:$0xff] }
0x1b0a   :  { %v9311_v57 = vpop.f32.mrb[64].mxu1 }
0x1b0b   :  { %v7419_v41 = vadd.f32 %v9311_v57, %v8214_v52  ;;  %v7413_v6 = vpop.f32.mrb[65].mxu1  ;;  %v10144_v57 = vpack.c.bf16 %v7498_v32, %v7494_v0  ;;  %v7529_v0 = vld [vmem:[#allocation14 + $0x5f0] sm:$0xff] }
0x1b0c   :  { %v7414_v44 = vadd.f32 %v8214_v52, %v7413_v6  ;;  %v7495_v52 = vld [vmem:[#allocation14 + $0x4e0] sm:$0xff]  ;;  %v7493_v6 = vld [vmem:[#allocation14 + $0x4d0] sm:$0xff]  ;;  %v10162_v32 = vpack.c.bf16 %v7529_v0, %v7525_v59 }
0x1b0d   :  { %v7423_v12 = vadd.f32 %v7419_v41, %v12075_v63  ;;  %v7478_v63 = vld [vmem:[#allocation14 + $0x458] sm:$0xff]  ;;  %v10114_v41 = vpack.c.bf16 %v7495_v52, %v7491_v53  ;;  %v7733_v53 = vld [vmem:[#allocation15 + $0x480] sm:$0xff]  ;;  %v7734_v52 = vld [vmem:[#allocation15 + $0x488] sm:$0xff] }
0x1b0e   :  { %v7422_v58 = vadd.f32 %v7414_v44, %v12069_v10  ;;  %v10104_v10 = vpack.c.bf16 %v7480_v8, %v7476_v39  ;;  %v10136_v21 = vpack.c.bf16 %v7482_v7, %v7478_v63  ;;  %v7497_v44 = vld [vmem:[#allocation14 + $0x4f0] sm:$0xff]  ;;  %v10150_v39 = vpack.c.bf16 %v7505_v5, %v7501_v46  ;;  %v7510_v8 = vld [vmem:[#allocation14 + $0x558] sm:$0xff] }
0x1b0f   :  { %7430 = vadd.xlane.f32.xlu0 %v7423_v12  ;;  %v7514_v63 = vld [vmem:[#allocation14 + $0x578] sm:$0xff]  ;;  %v10120_v7 = vpack.c.bf16 %v7512_v25, %v7508_v16  ;;  %v7717_v16 = vld [vmem:[#allocation15 + $0x400] sm:$0xff] }
0x1b10   :  { %7428 = vadd.xlane.f32.xlu1 %v7422_v58  ;;  %10105 = vmatprep.subr.bf16.mxu0 %v10104_v10  ;;  %v10152_v10 = vpack.c.bf16 %v7514_v63, %v7510_v8  ;;  %v7749_v25 = vld [vmem:[#allocation15 + $0x500] sm:$0xff]  ;;  %v7750_v8 = vld [vmem:[#allocation15 + $0x508] sm:$0xff]  ;;  %v7735_v63 = vld [vmem:[#allocation15 + $0x490] sm:$0xff] }
0x1b11   :  { %10137 = vmatprep.subr.bf16.mxu1 %v10136_v21  ;;  %10107 = vmatpush1.bf16.msra.mxu0 %v10106_v43  ;;  %v7507_v21 = vld [vmem:[#allocation14 + $0x540] sm:$0xff]  ;;  %v7513_v43 = vld [vmem:[#allocation14 + $0x570] sm:$0xff] }
0x1b12   :  { %10139 = vmatpush1.bf16.msra.mxu1 %v10138_v47  ;;  %10109 = vmatprep.subr.bf16.mxu0 %v10108_v51  ;;  %v10122_v54 = vpack.c.bf16 %v7511_v3, %v7507_v21  ;;  %v10154_v9 = vpack.c.bf16 %v7513_v43, %v7509_v50  ;;  %v10124_v47 = vpack.c.bf16 %v7520_v30, %v7516_v40  ;;  %v7518_v51 = vld [vmem:[#allocation14 + $0x598] sm:$0xff]  ;;  %v7767_v21 = vld [vmem:[#allocation15 + $0x590] sm:$0xff] }
0x1b13   :  { %10141 = vmatprep.subr.bf16.mxu1 %v10140_v29  ;;  %v10156_v35 = vpack.c.bf16 %v7522_v60, %v7518_v51  ;;  %v7519_v29 = vld [vmem:[#allocation14 + $0x5a0] sm:$0xff]  ;;  %v7768_v3 = vld [vmem:[#allocation15 + $0x598] sm:$0xff]  ;;  %v10198_v40 = vpack.c.bf16 %v7750_v8, %v7749_v25  ;;  %v7719_v30 = vld [vmem:[#allocation15 + $0x410] sm:$0xff] }
0x1b14   :  { %v7751_v51 = vld [vmem:[#allocation15 + $0x510] sm:$0xff]  ;;  %v7737_v60 = vld [vmem:[#allocation15 + $0x4a0] sm:$0xff] }
0x1b15   :  { %10111 = vmatpush1.bf16.msra.mxu0 %v10110_v4  ;;  %v7528_v4 = vld [vmem:[#allocation14 + $0x5e8] sm:$0xff] }
0x1b16   :  { %10143 = vmatpush1.bf16.msra.mxu1 %v10142_v28  ;;  %10113 = vmatprep.subr.bf16.mxu0 %v10112_v56  ;;  %v7526_v28 = vld [vmem:[#allocation14 + $0x5d8] sm:$0xff] }
0x1b17   :  { %10145 = vmatprep.subr.bf16.mxu1 %v10144_v57  ;;  %v7765_v57 = vld [vmem:[#allocation15 + $0x580] sm:$0xff] }
0x1b19   :  { %10115 = vmatpush1.bf16.msra.mxu0 %v10114_v41  ;;  %v10164_v41 = vpack.c.bf16 %v7734_v52, %v7733_v53 }
0x1b9c   :  { %v7431_v49 = vpop.xlane.xlu0 %7430 }
0x1b9d   :  { %v7433_v2 = vmul.f32 0.0078125, %v7431_v49  ;;  %v7429_v15 = vpop.xlane.xlu1 %7428  ;;  %v10126_v49 = vpack.c.bf16 %v7519_v29, %v7515_v36  ;;  %v7738_v36 = vld [vmem:[#allocation15 + $0x4a8] sm:$0xff] }
0x1b9e   :  { %v7432_v34 = vmul.f32 0.0078125, %v7429_v15  ;;  %v10158_v15 = vpack.c.bf16 %v7521_v45, %v7517_v19  ;;  %v7770_v29 = vld [vmem:[#allocation15 + $0x5a8] sm:$0xff] }
0x1b9f   :  { %v12412_v13 = vsub.f32 %v7423_v12, %v7433_v2  ;;  %v10146_v12 = vpack.c.bf16 %v7497_v44, %v7493_v6  ;;  %v7530_v2 = vld [vmem:[#allocation14 + $0x5f8] sm:$0xff]  ;;  %v7766_v6 = vld [vmem:[#allocation15 + $0x588] sm:$0xff] }
0x1ba0   :  { %v12414_v37 = vsub.f32 %v7422_v58, %v7432_v34  ;;  %v7500_v58 = vld [vmem:[#allocation14 + $0x508] sm:$0xff]  ;;  %v10128_v34 = vpack.c.bf16 %v7528_v4, %v7524_v17  ;;  %v10160_v38 = vpack.c.bf16 %v7530_v2, %v7526_v28  ;;  %v10196_v44 = vpack.c.bf16 %v7766_v6, %v7765_v57  ;;  %v7721_v4 = vld [vmem:[#allocation15 + $0x420] sm:$0xff]  ;;  %v7755_v57 = vld [vmem:[#allocation15 + $0x530] sm:$0xff] }
0x1ba1   :  { %v7437_v42 = vmul.f32 %v12412_v13, %v12412_v13  ;;  %v10116_v48 = vpack.c.bf16 %v7504_v33, %v7500_v58  ;;  %10147 = vmatpush1.bf16.msra.mxu1 %v10146_v12  ;;  %v7722_v28 = vld [vmem:[#allocation15 + $0x428] sm:$0xff]  ;;  %v7741_v6 = vld [vmem:[#allocation15 + $0x4c0] sm:$0xff] }
0x1ba2   :  { %v7436_v55 = vmul.f32 %v12414_v37, %v12414_v37  ;;  %10149 = vmatprep.subr.bf16.mxu1 %v10148_v1  ;;  %v8217_v1 = vld [vmem:[%s12487_s12 + $0x2] ss:$0 sm:$0xff]  ;;  %v10174_v59 = vpack.c.bf16 %v7722_v28, %v7721_v4  ;;  %v7747_v4 = vld [vmem:[#allocation15 + $0x4f0] sm:$0xff]  ;;  %v7748_v28 = vld [vmem:[#allocation15 + $0x4f8] sm:$0xff] }
0x1ba3   :  { %7440 = vadd.xlane.f32.xlu1 %v7437_v42  ;;  %10117 = vmatprep.subr.bf16.mxu0 %v10116_v48  ;;  %v7523_v42 = vld [vmem:[#allocation14 + $0x5c0] sm:$0xff] }
0x1ba4   :  { %7438 = vadd.xlane.f32.xlu0 %v7436_v55  ;;  %10119 = vmatpush1.bf16.msra.mxu0 %v10118_v11  ;;  %v7527_v55 = vld [vmem:[#allocation14 + $0x5e0] sm:$0xff]  ;;  %v8218_v11 = vld [vmem:[%s12488_s13 + $0x2] ss:$0 sm:$0xff] }
0x1ba5   :  { %10151 = vmatpush1.bf16.msra.mxu1 %v10150_v39  ;;  %10121 = vmatprep.subr.bf16.mxu0 %v10120_v7  ;;  %v10130_v56 = vpack.c.bf16 %v7527_v55, %v7523_v42  ;;  %v7718_v39 = vld [vmem:[#allocation15 + $0x408] sm:$0xff]  ;;  %v7739_v42 = vld [vmem:[#allocation15 + $0x4b0] sm:$0xff] }
0x1ba6   :  { %10153 = vmatprep.subr.bf16.mxu1 %v10152_v10  ;;  %v7736_v10 = vld [vmem:[#allocation15 + $0x498] sm:$0xff]  ;;  %v10166_v43 = vpack.c.bf16 %v7718_v39, %v7717_v16  ;;  %v7771_v55 = vld [vmem:[#allocation15 + $0x5b0] sm:$0xff] }
0x1ba7   :  { %v7775_v16 = vld [vmem:[#allocation15 + $0x5d0] sm:$0xff]  ;;  %v7776_v39 = vld [vmem:[#allocation15 + $0x5d8] sm:$0xff] }
0x1ba8   :  { %10123 = vmatpush1.bf16.msra.mxu0 %v10122_v54 }
0x1ba9   :  { %10155 = vmatpush1.bf16.msra.mxu1 %v10154_v9  ;;  %10125 = vmatprep.subr.bf16.mxu0 %v10124_v47  ;;  %v7720_v9 = vld [vmem:[#allocation15 + $0x418] sm:$0xff]  ;;  %v10168_v47 = vpack.c.bf16 %v7736_v10, %v7735_v63  ;;  %v7727_v63 = vld [vmem:[#allocation15 + $0x450] sm:$0xff] }
0x1baa   :  { %10157 = vmatprep.subr.bf16.mxu1 %v10156_v35  ;;  %v7769_v35 = vld [vmem:[#allocation15 + $0x5a0] sm:$0xff]  ;;  %v10170_v45 = vpack.c.bf16 %v7720_v9, %v7719_v30  ;;  %v7778_v9 = vld [vmem:[#allocation15 + $0x5e8] sm:$0xff] }
0x1bab   :  { %v10204_v2 = vpack.c.bf16 %v7770_v29, %v7769_v35  ;;  %v7777_v30 = vld [vmem:[#allocation15 + $0x5e0] sm:$0xff] }
0x1bac   :  { %10127 = vmatpush1.bf16.msra.mxu0 %v10126_v49  ;;  %v10172_v49 = vpack.c.bf16 %v7738_v36, %v7737_v60  ;;  %v7729_v60 = vld [vmem:[#allocation15 + $0x460] sm:$0xff]  ;;  %v7730_v36 = vld [vmem:[#allocation15 + $0x468] sm:$0xff] }
0x1bad   :  { %10159 = vmatpush1.bf16.msra.mxu1 %v10158_v15  ;;  %10129 = vmatprep.subr.bf16.mxu0 %v10128_v34  ;;  %v7753_v15 = vld [vmem:[#allocation15 + $0x520] sm:$0xff]  ;;  %v7754_v34 = vld [vmem:[#allocation15 + $0x528] sm:$0xff]  ;;  %v10190_v29 = vpack.c.bf16 %v7730_v36, %v7729_v60 }
0x1bae   :  { %10161 = vmatprep.subr.bf16.mxu1 %v10160_v38  ;;  %v7772_v38 = vld [vmem:[#allocation15 + $0x5b8] sm:$0xff]  ;;  %v10206_v0 = vpack.c.bf16 %v7754_v34, %v7753_v15  ;;  %v7761_v35 = vld [vmem:[#allocation15 + $0x560] sm:$0xff]  ;;  %v7731_v34 = vld [vmem:[#allocation15 + $0x470] sm:$0xff] }
0x1baf   :  { %v10208_v52 = vpack.c.bf16 %v7772_v38, %v7771_v55  ;;  %v7780_v15 = vld [vmem:[#allocation15 + $0x5f8] sm:$0xff]  ;;  %v7763_v38 = vld [vmem:[#allocation15 + $0x570] sm:$0xff] }
0x1bb0   :  { %10131 = vmatpush1.bf16.msra.mxu0 %v10130_v56  ;;  %v7723_v56 = vld [vmem:[#allocation15 + $0x430] sm:$0xff] }
0x1bb1   :  { %10163 = vmatpush1.bf16.msra.mxu1 %v10162_v32  ;;  %10165 = vmatprep.subr.bf16.mxu0 %v10164_v41  ;;  %v7724_v32 = vld [vmem:[#allocation15 + $0x438] sm:$0xff] }
0x1bb2   :  { %10197 = vmatprep.subr.bf16.mxu1 %v10196_v44  ;;  %v7756_v41 = vld [vmem:[#allocation15 + $0x538] sm:$0xff]  ;;  %v7742_v44 = vld [vmem:[#allocation15 + $0x4c8] sm:$0xff] }
0x1c30   :  { %v7441_v12 = vpop.xlane.xlu1 %7440 }
0x1c31   :  { %v7443_v58 = vmul.f32 0.0078125, %v7441_v12  ;;  %v7439_v33 = vpop.xlane.xlu0 %7438  ;;  %v7773_v12 = vld [vmem:[#allocation15 + $0x5c0] sm:$0xff] }
0x1c32   :  { %v7442_v62 = vmul.f32 0.0078125, %v7439_v33  ;;  %v10178_v33 = vpack.c.bf16 %v7724_v32, %v7723_v56  ;;  %v8219_v56 = vld [vmem:[%s12484_s9 + $0x8] sm:$0xf] }
0x1c33   :  { %v7445_v48 = vadd.f32 1e-05, %v7443_v58  ;;  %v7774_v58 = vld [vmem:[#allocation15 + $0x5c8] sm:$0xff]  ;;  %v7537_v32 = vrot.slane %v8219_v56, %v11268_v24 }
0x1c34   :  { %v7444_v61 = vadd.f32 1e-05, %v7442_v62  ;;  %v10210_v62 = vpack.c.bf16 %v7756_v41, %v7755_v57  ;;  %v7549_v57 = vrot.slane %v8219_v56, %v11645_v31 }
0x1c35   :  { %10775 = vrsqrt.f32 %v7445_v48  ;;  %v7725_v48 = vld [vmem:[#allocation15 + $0x440] sm:$0xff] }
0x1c36   :  { %10777 = vrsqrt.f32 %v7444_v61  ;;  %v7726_v61 = vld [vmem:[#allocation15 + $0x448] sm:$0xff] }
0x1c37   :  { %v10182_v25 = vpack.c.bf16 %v7726_v61, %v7725_v48 }
0x1c3f   :  { %v10776_v20 = vpop.eup %10775 }
0x1c40   :  { %v10778_v18 = vpop.eup %10777  ;;  %v7449_v5 = vmul.f32 %v10776_v20, %v12412_v13  ;;  %v7752_v13 = vld [vmem:[#allocation15 + $0x518] sm:$0xff]  ;;  %v10180_v20 = vpack.c.bf16 %v7742_v44, %v7741_v6 }
0x1c41   :  { %v7448_v46 = vmul.f32 %v10778_v18, %v12414_v37  ;;  %v10200_v37 = vpack.c.bf16 %v7768_v3, %v7767_v21  ;;  %v10202_v17 = vpack.c.bf16 %v7752_v13, %v7751_v51  ;;  %v10212_v18 = vpack.c.bf16 %v7774_v58, %v7773_v12  ;;  %v7759_v3 = vld [vmem:[#allocation15 + $0x550] sm:$0xff] }
0x1c42   :  { %v7457_v54 = vmul.f32 %v8217_v1, %v7449_v5  ;;  %v7744_v5 = vld [vmem:[#allocation15 + $0x4d8] sm:$0xff]  ;;  %v10216_v21 = vpack.c.bf16 %v7776_v39, %v7775_v16  ;;  %v10220_v13 = vpack.c.bf16 %v7778_v9, %v7777_v30 }
0x1c43   :  { %v7456_v7 = vmul.f32 %v8217_v1, %v7448_v46  ;;  %v7757_v1 = vld [vmem:[#allocation15 + $0x540] sm:$0xff]  ;;  %v7743_v46 = vld [vmem:[#allocation15 + $0x4d0] sm:$0xff] }
0x1c44   :  { %v12434_v19 = vadd.f32 %v8218_v11, %v7457_v54  ;;  %v10184_v10 = vpack.c.bf16 %v7744_v5, %v7743_v46  ;;  %v7760_v54 = vld [vmem:[#allocation15 + $0x558] sm:$0xff] }
0x1c45   :  { %v12428_v50 = vadd.f32 %v8218_v11, %v7456_v7  ;;  %v7758_v11 = vld [vmem:[#allocation15 + $0x548] sm:$0xff]  ;;  %v7728_v7 = vld [vmem:[#allocation15 + $0x458] sm:$0xff] }
0x1c46   :  { %v10214_v8 = vpack.c.bf16 %v7758_v11, %v7757_v1 }
0x1c47   :  { %7619 = vmatmul.mubr.f32.vlgmr.msra.gmra.mrb[88].mxu0 %v12428_v50  ;;  %7696 = vmatmul.mubr.f32.vlgmr.msra.gmra.mrb[66].mxu1 %v12428_v50 }
0x1c48   :  { %7624 = vmatprep.mubr.f32.mxu0 %v11011_v14  ;;  %7701 = vmatprep.mubr.f32.mxu1 %v11011_v14  ;;  %v7740_v14 = vld [vmem:[#allocation15 + $0x4b8] sm:$0xff] }
0x1c49   :  { %10167 = vmatpush3.bf16.msra.mxu0 %v10166_v43  ;;  %10199 = vmatpush3.bf16.msra.mxu1 %v10198_v40  ;;  %v10176_v53 = vpack.c.bf16 %v7740_v14, %v7739_v42  ;;  %v7745_v43 = vld [vmem:[#allocation15 + $0x4e0] sm:$0xff]  ;;  %v7746_v40 = vld [vmem:[#allocation15 + $0x4e8] sm:$0xff]  ;;  %v7732_v42 = vld [vmem:[#allocation15 + $0x478] sm:$0xff] }
0x1c4a   :  { %10169 = vmatprep.subr.bf16.mxu0 %v10168_v47  ;;  %10201 = vmatprep.subr.bf16.mxu1 %v10200_v37  ;;  %v10186_v47 = vpack.c.bf16 %v7728_v7, %v7727_v63  ;;  %v10218_v37 = vpack.c.bf16 %v7760_v54, %v7759_v3  ;;  %v10188_v51 = vpack.c.bf16 %v7746_v40, %v7745_v43  ;;  %v8221_v3 = vld [vmem:[%s12486_s11 + $0x2] ss:$0 sm:$0xff] }
0x1c4b   :  { %7625 = vmatmul.mubr.f32.gmra.mrb[90].mxu0 %v12434_v19  ;;  %7702 = vmatmul.mubr.f32.gmra.mrb[68].mxu1 %v12434_v19  ;;  %v10194_v55 = vpack.c.bf16 %v7732_v42, %v7731_v34 }
0x1c4d   :  { %10171 = vmatpush3.bf16.msra.mxu0 %v10170_v45  ;;  %10203 = vmatpush3.bf16.msra.mxu1 %v10202_v17  ;;  %v7762_v45 = vld [vmem:[#allocation15 + $0x568] sm:$0xff] }
0x1c4e   :  { %10173 = vmatprep.subr.bf16.mxu0 %v10172_v49  ;;  %10205 = vmatprep.subr.bf16.mxu1 %v10204_v2  ;;  %v10222_v17 = vpack.c.bf16 %v7762_v45, %v7761_v35  ;;  %v7779_v49 = vld [vmem:[#allocation15 + $0x5f0] sm:$0xff]  ;;  %v10192_v2 = vpack.c.bf16 %v7748_v28, %v7747_v4 }
0x1c4f   :  { %v10224_v14 = vpack.c.bf16 %v7780_v15, %v7779_v49 }
0x1c51   :  { %10175 = vmatpush3.bf16.msra.mxu0 %v10174_v59  ;;  %10207 = vmatpush3.bf16.msra.mxu1 %v10206_v0  ;;  %v7764_v59 = vld [vmem:[#allocation15 + $0x578] sm:$0xff] }
0x1c52   :  { %10177 = vmatprep.subr.bf16.mxu0 %v10176_v53  ;;  %10209 = vmatprep.subr.bf16.mxu1 %v10208_v52  ;;  %v10226_v0 = vpack.c.bf16 %v7764_v59, %v7763_v38  ;;  %v7545_v53 = vrot.slane %v8219_v56, %v11274_v26  ;;  %v7541_v52 = vrot.slane %v8219_v56, %v11277_v27  ;;  %v11018_v38 = vmov 0  }
0x1c53   :  { %10566 = vset.pattern.permute.xlu0 %v11018_v38 }
0x1c55   :  { %10179 = vmatpush3.bf16.msra.mxu0 %v10178_v33  ;;  %10211 = vmatpush3.bf16.msra.mxu1 %v10210_v62 }
0x1c56   :  { %10181 = vmatprep.subr.bf16.mxu0 %v10180_v20  ;;  %10213 = vmatprep.subr.bf16.mxu1 %v10212_v18 }
0x1c59   :  { %10183 = vmatpush3.bf16.msra.mxu0 %v10182_v25  ;;  %10215 = vmatpush3.bf16.msra.mxu1 %v10214_v8 }
0x1c5a   :  { %10185 = vmatprep.subr.bf16.mxu0 %v10184_v10  ;;  %10217 = vmatprep.subr.bf16.mxu1 %v10216_v21 }
0x1c5d   :  { %10187 = vmatpush3.bf16.msra.mxu0 %v10186_v47  ;;  %10219 = vmatpush3.bf16.msra.mxu1 %v10218_v37 }
0x1c5e   :  { %10189 = vmatprep.subr.bf16.mxu0 %v10188_v51  ;;  %10221 = vmatprep.subr.bf16.mxu1 %v10220_v13 }
0x1c61   :  { %10191 = vmatpush3.bf16.msra.mxu0 %v10190_v29  ;;  %10223 = vmatpush3.bf16.msra.mxu1 %v10222_v17 }
0x1c62   :  { %10193 = vmatprep.subr.bf16.mxu0 %v10192_v2  ;;  %10225 = vmatprep.subr.bf16.mxu1 %v10224_v14 }
0x1c65   :  { %10195 = vmatpush3.bf16.msra.mxu0 %v10194_v55  ;;  %10227 = vmatpush3.bf16.msra.mxu1 %v10226_v0 }
0x1d1a   :  { %v7620_v41 = vpop.f32.mrb[88].mxu0  ;;  %v7697_v6 = vpop.f32.mrb[66].mxu1 }
0x1d1b   :  { %v7621_v44 = vadd.f32 %v7620_v41, %v7537_v32  ;;  %v7698_v12 = vadd.f32 %v7697_v6, %v7545_v53  ;;  %v7622_v58 = vpop.f32.mrb[89].mxu0  ;;  %v7699_v33 = vpop.f32.mrb[67].mxu1  ;;  %v8225_v41 = vld [vmem:[%s12490_s15 + $0x2] ss:$0 sm:$0xff] }
0x1d1c   :  { %v7623_v62 = vadd.f32 %v7622_v58, %v7541_v52  ;;  %v7700_v48 = vadd.f32 %v7699_v33, %v7549_v57 }
0x1d1d   :  { %v7708_v11 = vmax.f32 %v7621_v44, 0.0  ;;  %v7710_v46 = vmax.f32 %v7698_v12, 0.0  ;;  %v8226_v12 = vld [vmem:[%s12491_s16] ss:$0 sm:$0xff] }
0x1d1e   :  { %v7709_v61 = vmax.f32 %v7623_v62, 0.0  ;;  %v7711_v20 = vmax.f32 %v7700_v48, 0.0  ;;  %v7626_v18 = vpop.f32.mrb[90].mxu0  ;;  %v7703_v1 = vpop.f32.mrb[68].mxu1 }
0x1d1f   :  { %v7627_v5 = vadd.f32 %v7626_v18, %v7537_v32  ;;  %v7704_v26 = vadd.f32 %v7703_v1, %v7545_v53  ;;  %v7628_v16 = vpop.f32.mrb[91].mxu0  ;;  %v7705_v27 = vpop.f32.mrb[69].mxu1  ;;  %v7996_v18 = vld [vmem:[#allocation2] sm:$0x1]  ;;  %v8011_v1 = vand.u32 127, %v316_v22 }
0x1d20   :  { %v7629_v39 = vadd.f32 %v7628_v16, %v7541_v52  ;;  %v7706_v31 = vadd.f32 %v7705_v27, %v7549_v57  ;;  %7853 = vmatprep.mubr.f32.mxu0 %v7709_v61  ;;  %7928 = vmatprep.mubr.f32.mxu1 %v7711_v20  ;;  %v8224_v52 = vld [vmem:[%s12489_s14 + $0x2] ss:$0 sm:$0xff]  ;;  %s11019_s14 = smov [#allocation17]  }
0x1d21   :  { %7854 = vmatmul.mubr.f32.vlgmr.msra.gmra.mrb[92].mxu0 %v7708_v11  ;;  %7929 = vmatmul.mubr.f32.vlgmr.msra.gmra.mrb[70].mxu1 %v7710_v46  ;;  %v7712_v63 = vmax.f32 %v7627_v5, 0.0  ;;  %v7714_v7 = vmax.f32 %v7704_v26, 0.0  ;;  %v8016_v46 = vadd.s32 4294967288, %v8011_v1  ;;  %v8014_v26 = vsub.s32 %v8011_v1, %v11265_v23  ;;  %s8032_s15 = sshll.u32 %s11019_s14, 4  ;;  %s8033_s15 = int_to_ptr.vmem [resolvable:$true] %s8032_s15 }
0x1d22   :  { %v7713_v25 = vmax.f32 %v7629_v39, 0.0  ;;  %v7715_v8 = vmax.f32 %v7706_v31, 0.0  ;;  %s10963_s16 = scalar_lea.vmem %s8033_s15, 16  ;;  %s10967_s19 = scalar_lea.vmem %s8033_s15, 32 }
0x1d23   :  { %v8019_v16 = vsub.s32 %v8016_v46, %v11265_v23  ;;  %p10964_p8 = scmp.ne.s32.totalorder %s8033_s15, %s10963_s16  ;;  %p10968_p9 = scmp.lt.s32.totalorder %s8033_s15, %s8033_s15 }
0x1d24   :  { %7858 = vmatprep.mubr.f32.mxu0 %v7713_v25  ;;  %7933 = vmatprep.mubr.f32.mxu1 %v7715_v8  ;;  %p10969_p10 = scmp.lt.s32.totalorder %s10967_s19, %s10963_s16 }
0x1d25   :  { %7859 = vmatmul.mubr.f32.gmra.mrb[94].mxu0 %v7712_v63  ;;  %7934 = vmatmul.mubr.f32.gmra.mrb[72].mxu1 %v7714_v7 }
0x1d26   :  { %p10970_p11 = por %p10969_p10, %p10968_p9 }
0x1d28   :  { %p10971_p12 = pnand %p10970_p11, %p10964_p8 }
0x1df4   :  { %v8715_v10 = vpop.f32.mrb[92].mxu0  ;;  %v8753_v21 = vpop.f32.mrb[70].mxu1 }
0x1df5   :  { %v8716_v54 = vpop.f32.mrb[93].mxu0  ;;  %v8754_v43 = vpop.f32.mrb[71].mxu1 }
0x1df6   :  { %v8717_v40 = vadd.f32 %v8716_v54, %v8715_v10  ;;  %v8755_v30 = vadd.f32 %v8754_v43, %v8753_v21 }
0x1df8   :  { %v7856_v9 = vadd.f32 %v8717_v40, %v8221_v3  ;;  %v8718_v47 = vpop.f32.mrb[94].mxu0  ;;  %v8756_v37 = vpop.f32.mrb[72].mxu1 }
0x1df9   :  { %v8719_v51 = vpop.f32.mrb[95].mxu0  ;;  %v8757_v13 = vpop.f32.mrb[73].mxu1 }
0x1dfa   :  { %v7931_v60 = vadd.f32 %v8755_v30, %v7856_v9  ;;  %v8720_v36 = vadd.f32 %v8719_v51, %v8718_v47  ;;  %v8758_v35 = vadd.f32 %v8757_v13, %v8756_v37 }
0x1dfc   :  { %v7861_v29 = vadd.f32 %v8720_v36, %v8221_v3  ;;  %v7939_v45 = vadd.f32 %v7931_v60, %v12428_v50 }
0x1dfe   :  { %v7936_v17 = vadd.f32 %v8758_v35, %v7861_v29  ;;  %7945 = vadd.xlane.f32.xlu0 %v7939_v45 }
0x1e00   :  { %v7940_v4 = vadd.f32 %v7936_v17, %v12434_v19 }
0x1e02   :  { %7947 = vadd.xlane.f32.xlu1 %v7940_v4 }
0x1e8b   :  { %v7946_v28 = vpop.xlane.xlu0 %7945 }
0x1e8c   :  { %v7949_v49 = vmul.f32 0.0078125, %v7946_v28 }
0x1e8e   :  { %v7951_v2 = vsub.f32 %v7939_v45, %v7949_v49 }
0x1e8f   :  { %v7948_v15 = vpop.xlane.xlu1 %7947 }
0x1e90   :  { %v7950_v34 = vmul.f32 0.0078125, %v7948_v15  ;;  %v7953_v42 = vmul.f32 %v7951_v2, %v7951_v2 }
0x1e92   :  { %v7952_v14 = vsub.f32 %v7940_v4, %v7950_v34  ;;  %7955 = vadd.xlane.f32.xlu0 %v7953_v42 }
0x1e94   :  { %v7954_v55 = vmul.f32 %v7952_v14, %v7952_v14 }
0x1e96   :  { %7957 = vadd.xlane.f32.xlu1 %v7954_v55 }
0x1f1f   :  { %v7956_v59 = vpop.xlane.xlu0 %7955 }
0x1f20   :  { %v7959_v0 = vmul.f32 0.0078125, %v7956_v59 }
0x1f22   :  { %v7961_v50 = vadd.f32 1e-05, %v7959_v0 }
0x1f23   :  { %v7958_v56 = vpop.xlane.xlu1 %7957 }
0x1f24   :  { %10779 = vrsqrt.f32 %v7961_v50  ;;  %v7960_v32 = vmul.f32 0.0078125, %v7958_v56 }
0x1f26   :  { %v7962_v19 = vadd.f32 1e-05, %v7960_v32 }
0x1f28   :  { %10781 = vrsqrt.f32 %v7962_v19 }
0x1f2e   :  { %v10780_v53 = vpop.eup %10779 }
0x1f2f   :  { %v7965_v57 = vmul.f32 %v10780_v53, %v7951_v2 }
0x1f31   :  { %v7973_v6 = vmul.f32 %v8224_v52, %v7965_v57 }
0x1f32   :  { %v10782_v44 = vpop.eup %10781 }
0x1f33   :  { %v7981_v58 = vadd.f32 %v8225_v41, %v7973_v6  ;;  %v7966_v33 = vmul.f32 %v10782_v44, %v7952_v14 }
0x1f35   :  { %v7990_v62 = vmul.f32 %v8226_v12, %v7981_v58  ;;  %v7974_v48 = vmul.f32 %v8224_v52, %v7966_v33 }
0x1f37   :  { %7992 = vadd.xlane.f32.xlu0 %v7990_v62  ;;  %v7982_v61 = vadd.f32 %v8225_v41, %v7974_v48 }
0x1f39   :  { %v7991_v20 = vmul.f32 %v8226_v12, %v7982_v61 }
0x1f3b   :  { %7994 = vadd.xlane.f32.xlu1 %v7991_v20 }
0x1f4d   :  { %7999 = vperm.xlu0 %10566, %v7996_v18  }
0x1fc4   :  { %v7993_v11 = vpop.xlane.xlu0 %7992 }
0x1fc8   :  { %v7995_v39 = vpop.xlane.xlu1 %7994 }
0x1fcc   :  { %v8000_v5 = vpop.permute.xlu0 %7999 }
0x1fcd   :  { %v8005_v27 = vrot.slane %v8000_v5, %v11268_v24 }
0x1fcf   :  { %v8006_v31 = vadd.f32 %v8005_v27, %v7993_v11  ;;  %v8007_v25 = vadd.f32 %v8005_v27, %v7995_v39 }
0x1fd1   :  { %v8015_v8 = vrot.slane %v8006_v31, %v8014_v26  ;;  %v8020_v63 = vrot.slane %v8007_v25, %v8019_v16 }
0x1fd3   :  { %v8022_v22 = vsel %vm8021_vm8, %v8020_v63, %v8015_v8 }
0x1fd4   :  { %8025 = vst.msk [vmem:[#allocation17] sm:$0x1] %vm8024_vm9, %v8022_v22 }
0x1fd5   :  { %10974 = shalt.err (!%p10971_p12)
}
0x1fd6   :  { %s10975_s8 = scalar_lea.hbm %s12493_s18, 16 }
0x1fd7   :  { %p10976_p13 = scmp.ne.s32.totalorder %s12493_s18, %s10975_s8  ;;  %p10979_p0 = scmp.lt.u32.totalorder %s10975_s8, %s12493_s18 }
0x1fd9   :  { %p10981_p1 = pnand %p10979_p0, %p10976_p13 }
0x1fdb   :  { %10984 = shalt.err (!%p10981_p1)
}
0x1fdc   :  { %8035 = dma.vmem_to_hbm [thread:$0]  %s8033_s15, 16, %s12493_s18, [#allocation5]  }
0x1fdd   :  { %10995 = dma.done.wait [#allocation5], 16  }
0x1fde   :  { %10996 = vsyncadd [#allocation5], 4294967280 }
0x1fdf   :  { %8039 = vsyncpa [#allocation4], 1 }
0x1fe0   :  { %8040 = vsyncpa [#allocation7], 1 }
0x1fe1   :  { %8041 = vsyncpa [#allocation10], 1 }
0x1fe2   :  { %8042 = vsyncpa [#allocation13], 1 }
0x1fe3   :  { %8043 = vsyncpa [#allocation16], 1 }
0x1fe4   :  { %8044 = vsyncpa [#allocation5], 1 }

</bundles_post_ra>
